<compile_context>
chip_gen: v7x
topology: tpu7x:2x2x1
jax: 0.10.0
libtpu: 0.0.40
codegen_flags: <defaults>
</compile_context>

<pallas_src>
import numpy as np
import jax
import jax.numpy as jnp
from jax.experimental import pallas as pl
from jax.experimental.pallas import tpu as pltpu

FIRST_SIZE = 64                       # "first_size" of the module (small example)
DIMS = 6
KSIZE = 9
CONV_LEN = FIRST_SIZE - (KSIZE - 1)   # 56  (valid conv output length)
FLAT = DIMS * CONV_LEN                # 336
ENC_SIZES = [FLAT, 500, 200, 80, 30, 10]
DEC_SIZES = [10, 30, 80, 200, 500, FLAT]

L = FIRST_SIZE
WPAD = 512                            # lane-dense padded feature width (multiple of 128)
NLIN = 10                             # 5 encoder + 5 decoder Linear layers


# ---------------------------------------------------------------------------
# Kernel: 12 MXU matmuls per batch tile, activations always (B_TILE, 512).
# ---------------------------------------------------------------------------
def autoencoder_kernel(x_ref, c_ref, w_ref, b_ref, t_ref, out_ref):
    bf16 = jnp.bfloat16

    # Conv1d(1,6,9) + ReLU + channel-major flatten, as one matmul with the
    # precomputed (64, 512) matrix C.  Padded cols (336..511) stay exactly 0.
    x = x_ref[...].astype(bf16)                                           # (BT, 64)
    h = jnp.dot(x, c_ref[...], preferred_element_type=jnp.float32)        # (BT, 512)
    h = jnp.maximum(h + b_ref[0:1, :], 0.0)                               # bias + ReLU (f32)

    # Encoder + decoder Linear chain (no activations between, like the module).
    for i in range(NLIN):
        h = jnp.dot(h.astype(bf16), w_ref[i],
                    preferred_element_type=jnp.float32) + b_ref[i + 1:i + 2, :]

    # ConvTranspose1d(6,1,9) as one matmul with the precomputed (512, 64) scatter T.
    y = jnp.dot(h.astype(bf16), t_ref[...], preferred_element_type=jnp.float32)  # (BT, 64)
    out_ref[...] = y + b_ref[NLIN + 1:NLIN + 2, 0:L]


# ---------------------------------------------------------------------------
# Host-side parameter packing (torch layout -> 4 padded, MXU-ready arrays).
# ---------------------------------------------------------------------------
def pack_params(params):
    conv_w = np.asarray(params["conv_w"], np.float32)        # (6, 9)
    conv_b = np.asarray(params["conv_b"], np.float32)        # (6,)
    deconv_w = np.asarray(params["deconv_w"], np.float32)    # (6, 9)
    deconv_b = float(np.asarray(params["deconv_b"], np.float32))

    # Conv-as-matmul: h[:, c*56+j] = sum_k x[:, j+k] * w[c, k]
    C = np.zeros((L, WPAD), np.float32)
    # Deconv-as-matmul: y[:, j+k] += d[:, c*56+j] * dw[c, k]
    T = np.zeros((WPAD, L), np.float32)
    for c in range(DIMS):
        for k in range(KSIZE):
            for j in range(CONV_LEN):
                C[j + k, c * CONV_LEN + j] += conv_w[c, k]
                T[c * CONV_LEN + j, j + k] += deconv_w[c, k]

    Wstack = np.zeros((NLIN, WPAD, WPAD), np.float32)
    Bstack = np.zeros((NLIN + 2, WPAD), np.float32)
    for c in range(DIMS):                                     # row 0: conv bias per position
        Bstack[0, c * CONV_LEN:(c + 1) * CONV_LEN] = conv_b[c]
    layers = list(params["enc"]) + list(params["dec"])        # torch layout: W (out,in), b (out,)
    for i, (W, b) in enumerate(layers):
        Wnp = np.asarray(W, np.float32)
        bnp = np.asarray(b, np.float32)
        out_f, in_f = Wnp.shape
        Wstack[i, :in_f, :out_f] = Wnp.T                      # kernel computes h @ W.T
        Bstack[i + 1, :out_f] = bnp
    Bstack[NLIN + 1, :L] = deconv_b                           # row 11: deconv bias (scalar)

    return (jnp.asarray(C, jnp.bfloat16),
            jnp.asarray(Wstack, jnp.bfloat16),
            jnp.asarray(Bstack, jnp.float32),
            jnp.asarray(T, jnp.bfloat16))


# ---------------------------------------------------------------------------
# pallas_call wrapper: grid over batch tiles, weights resident across steps.
# ---------------------------------------------------------------------------
def run_autoencoder(x, packed, *, b_tile=128):
    # b_tile=128 maps cleanly on v5e's 4x128x128 MXU; 256 is also a good choice
    # on v6e/v7x (all buffers stay far under the 32 MiB scoped VMEM budget).
    C, Wstack, Bstack, T = packed
    B = x.shape[0]
    n_tiles = (B + b_tile - 1) // b_tile
    Bp = n_tiles * b_tile
    xp = jnp.pad(x, ((0, Bp - B), (0, 0))) if Bp != B else x

    const2 = lambda i: (0, 0)
    out = pl.pallas_call(
        autoencoder_kernel,
        out_shape=jax.ShapeDtypeStruct((Bp, L), jnp.float32),
        grid=(n_tiles,),
        in_specs=[
            pl.BlockSpec((b_tile, L), lambda i: (i, 0)),           # x batch tile
            pl.BlockSpec((L, WPAD), const2),                       # conv matrix C (resident)
            pl.BlockSpec((NLIN, WPAD, WPAD), lambda i: (0, 0, 0)),  # Linear weight stack (resident)
            pl.BlockSpec((NLIN + 2, WPAD), const2),                # bias stack (resident)
            pl.BlockSpec((WPAD, L), const2),                       # deconv matrix T (resident)
        ],
        out_specs=pl.BlockSpec((b_tile, L), lambda i: (i, 0)),
        compiler_params=pltpu.CompilerParams(
            dimension_semantics=("parallel",),                     # shard batch tiles across TCs (v7x)
            vmem_limit_bytes=32 * 1024 * 1024,
        ),
    )(xp, C, Wstack, Bstack, T)
    return out[:B]


# ---------------------------------------------------------------------------
# Pure-JAX reference: direct (non-matmul-ified) conv / Linear / deconv math in
# torch layout, with the same bf16-operand / f32-accumulate dtype policy.
# ---------------------------------------------------------------------------
def reference(x, params):
    bf16 = jnp.bfloat16
    B = x.shape[0]

    conv_w = params["conv_w"].astype(bf16).astype(jnp.float32)    # (6, 9)
    conv_b = params["conv_b"]                                     # (6,)
    xb = x.astype(bf16).astype(jnp.float32)                       # (B, 64)
    acc = jnp.zeros((B, DIMS, CONV_LEN), jnp.float32)
    for k in range(KSIZE):
        acc = acc + xb[:, None, k:k + CONV_LEN] * conv_w[None, :, k:k + 1]
    h = jnp.maximum(acc + conv_b[None, :, None], 0.0).reshape(B, FLAT)

    for (W, b) in list(params["enc"]) + list(params["dec"]):      # W: (out, in)
        h = jnp.dot(h.astype(bf16), W.T.astype(bf16),
                    preferred_element_type=jnp.float32) + b[None, :]

    d = h.astype(bf16).astype(jnp.float32).reshape(B, DIMS, CONV_LEN)
    dw = params["deconv_w"].astype(bf16).astype(jnp.float32)      # (6, 9)
    y = jnp.zeros((B, L), jnp.float32)
    for k in range(KSIZE):
        contrib = jnp.sum(d * dw[None, :, k:k + 1], axis=1)        # (B, 56)
        y = y.at[:, k:k + CONV_LEN].add(contrib)
    return y + params["deconv_b"]


# ---------------------------------------------------------------------------
# Deterministic parameter init (torch layout).
# ---------------------------------------------------------------------------
def init_params(key):
    keys = iter(jax.random.split(key, 64))

    def mat(shape, scale):
        return scale * jax.random.normal(next(keys), shape, jnp.float32)

    params = {
        "conv_w": mat((DIMS, KSIZE), 1.0 / np.sqrt(KSIZE)),
        "conv_b": mat((DIMS,), 0.1),
        "deconv_w": mat((DIMS, KSIZE), 1.0 / np.sqrt(DIMS * KSIZE)),
        "deconv_b": mat((), 0.1),
        "enc": [],
        "dec": [],
    }
    for fin, fout in zip(ENC_SIZES[:-1], ENC_SIZES[1:]):
        params["enc"].append((mat((fout, fin), 1.0 / np.sqrt(fin)), mat((fout,), 0.1)))
    for fin, fout in zip(DEC_SIZES[:-1], DEC_SIZES[1:]):
        params["dec"].append((mat((fout, fin), 1.0 / np.sqrt(fin)), mat((fout,), 0.1)))
    return params


if __name__ == "__main__":
    key = jax.random.PRNGKey(0)
    kp, kx = jax.random.split(key)
    params = init_params(kp)
    packed = pack_params(params)

    B = 256                                            # 2 batch tiles of 128
    x = jax.random.normal(kx, (B, FIRST_SIZE), jnp.float32)

    out = run_autoencoder(x, packed, b_tile=128)
    jax.block_until_ready(out)

    ref = reference(x, params)
    assert out.shape == (B, FIRST_SIZE), (out.shape, (B, FIRST_SIZE))
    max_err = float(jnp.max(jnp.abs(out - ref)))
    assert jnp.allclose(out, ref, rtol=1e-2, atol=1e-3), f"mismatch vs reference (max abs err {max_err})"
    print("KERNEL_OK")
</pallas_src>

<mosaic_0001>
module attributes {stable_mosaic.version = 11 : i64} {
  func.func @autoencoder_kernel(%arg0: i32, %arg1: memref<128x64xf32, #tpu.memory_space<vmem>>, %arg2: memref<64x512xbf16, #tpu.memory_space<vmem>>, %arg3: memref<10x512x512xbf16, #tpu.memory_space<vmem>>, %arg4: memref<12x512xf32, #tpu.memory_space<vmem>>, %arg5: memref<512x64xbf16, #tpu.memory_space<vmem>>, %arg6: memref<128x64xf32, #tpu.memory_space<vmem>>) attributes {dimension_semantics = [#tpu.dimension_semantics<parallel>], iteration_bounds = array<i64: 2>, scalar_prefetch = 0 : i64, scratch_operands = 0 : i64, tpu.core_type = #tpu.core_type<tc>, window_params = [{transform_indices = @transform_0, window_bounds = array<i64: 128, 64>}, {pipeline_mode = #tpu.pipeline_mode<synchronous>, transform_indices = @transform_1, window_bounds = array<i64: 64, 512>}, {pipeline_mode = #tpu.pipeline_mode<synchronous>, transform_indices = @transform_2, window_bounds = array<i64: 10, 512, 512>}, {pipeline_mode = #tpu.pipeline_mode<synchronous>, transform_indices = @transform_3, window_bounds = array<i64: 12, 512>}, {pipeline_mode = #tpu.pipeline_mode<synchronous>, transform_indices = @transform_4, window_bounds = array<i64: 512, 64>}, {transform_indices = @transform_5, window_bounds = array<i64: 128, 64>}]} {
    %c0 = arith.constant 0 : index
    %c0_0 = arith.constant 0 : index
    %0 = vector.load %arg1[%c0, %c0_0] : memref<128x64xf32, #tpu.memory_space<vmem>>, vector<128x64xf32>
    %1 = arith.truncf %0 : vector<128x64xf32> to vector<128x64xbf16>
    %c0_1 = arith.constant 0 : index
    %c0_2 = arith.constant 0 : index
    %2 = vector.load %arg2[%c0_1, %c0_2] : memref<64x512xbf16, #tpu.memory_space<vmem>>, vector<64x512xbf16>
    %cst = arith.constant dense<0.000000e+00> : vector<128x512xf32>
    %3 = tpu.matmul %1, %2, %cst {dimension_numbers = #tpu.dot_dimension_numbers<[1], [0], [0], [1], [0, 0, 1, 1], [], []>} : vector<128x64xbf16>, vector<64x512xbf16>, vector<128x512xf32> -> vector<128x512xf32>
    %c0_3 = arith.constant 0 : index
    %c0_4 = arith.constant 0 : index
    %4 = vector.load %arg4[%c0_3, %c0_4] : memref<12x512xf32, #tpu.memory_space<vmem>>, vector<1x512xf32>
    %5 = vector.broadcast %4 : vector<1x512xf32> to vector<128x512xf32>
    %6 = arith.addf %3, %5 : vector<128x512xf32>
    %cst_5 = arith.constant 0.000000e+00 : f32
    %7 = vector.broadcast %cst_5 : f32 to vector<128x512xf32>
    %8 = arith.maximumf %6, %7 : vector<128x512xf32>
    %9 = arith.truncf %8 : vector<128x512xf32> to vector<128x512xbf16>
    %c0_6 = arith.constant 0 : index
    %c0_7 = arith.constant 0 : index
    %c0_8 = arith.constant 0 : index
    %10 = vector.load %arg3[%c0_6, %c0_7, %c0_8] : memref<10x512x512xbf16, #tpu.memory_space<vmem>>, vector<1x512x512xbf16>
    %11 = vector.shape_cast %10 : vector<1x512x512xbf16> to vector<512x512xbf16>
    %cst_9 = arith.constant dense<0.000000e+00> : vector<128x512xf32>
    %12 = tpu.matmul %9, %11, %cst_9 {dimension_numbers = #tpu.dot_dimension_numbers<[1], [0], [0], [1], [0, 0, 1, 1], [], []>} : vector<128x512xbf16>, vector<512x512xbf16>, vector<128x512xf32> -> vector<128x512xf32>
    %c1 = arith.constant 1 : index
    %c0_10 = arith.constant 0 : index
    %13 = vector.load %arg4[%c1, %c0_10] : memref<12x512xf32, #tpu.memory_space<vmem>>, vector<1x512xf32>
    %14 = vector.broadcast %13 : vector<1x512xf32> to vector<128x512xf32>
    %15 = arith.addf %12, %14 : vector<128x512xf32>
    %16 = arith.truncf %15 : vector<128x512xf32> to vector<128x512xbf16>
    %c1_11 = arith.constant 1 : index
    %c0_12 = arith.constant 0 : index
    %c0_13 = arith.constant 0 : index
    %17 = vector.load %arg3[%c1_11, %c0_12, %c0_13] : memref<10x512x512xbf16, #tpu.memory_space<vmem>>, vector<1x512x512xbf16>
    %18 = vector.shape_cast %17 : vector<1x512x512xbf16> to vector<512x512xbf16>
    %cst_14 = arith.constant dense<0.000000e+00> : vector<128x512xf32>
    %19 = tpu.matmul %16, %18, %cst_14 {dimension_numbers = #tpu.dot_dimension_numbers<[1], [0], [0], [1], [0, 0, 1, 1], [], []>} : vector<128x512xbf16>, vector<512x512xbf16>, vector<128x512xf32> -> vector<128x512xf32>
    %c2 = arith.constant 2 : index
    %c0_15 = arith.constant 0 : index
    %20 = vector.load %arg4[%c2, %c0_15] : memref<12x512xf32, #tpu.memory_space<vmem>>, vector<1x512xf32>
    %21 = vector.broadcast %20 : vector<1x512xf32> to vector<128x512xf32>
    %22 = arith.addf %19, %21 : vector<128x512xf32>
    %23 = arith.truncf %22 : vector<128x512xf32> to vector<128x512xbf16>
    %c2_16 = arith.constant 2 : index
    %c0_17 = arith.constant 0 : index
    %c0_18 = arith.constant 0 : index
    %24 = vector.load %arg3[%c2_16, %c0_17, %c0_18] : memref<10x512x512xbf16, #tpu.memory_space<vmem>>, vector<1x512x512xbf16>
    %25 = vector.shape_cast %24 : vector<1x512x512xbf16> to vector<512x512xbf16>
    %cst_19 = arith.constant dense<0.000000e+00> : vector<128x512xf32>
    %26 = tpu.matmul %23, %25, %cst_19 {dimension_numbers = #tpu.dot_dimension_numbers<[1], [0], [0], [1], [0, 0, 1, 1], [], []>} : vector<128x512xbf16>, vector<512x512xbf16>, vector<128x512xf32> -> vector<128x512xf32>
    %c3 = arith.constant 3 : index
    %c0_20 = arith.constant 0 : index
    %27 = vector.load %arg4[%c3, %c0_20] : memref<12x512xf32, #tpu.memory_space<vmem>>, vector<1x512xf32>
    %28 = vector.broadcast %27 : vector<1x512xf32> to vector<128x512xf32>
    %29 = arith.addf %26, %28 : vector<128x512xf32>
    %30 = arith.truncf %29 : vector<128x512xf32> to vector<128x512xbf16>
    %c3_21 = arith.constant 3 : index
    %c0_22 = arith.constant 0 : index
    %c0_23 = arith.constant 0 : index
    %31 = vector.load %arg3[%c3_21, %c0_22, %c0_23] : memref<10x512x512xbf16, #tpu.memory_space<vmem>>, vector<1x512x512xbf16>
    %32 = vector.shape_cast %31 : vector<1x512x512xbf16> to vector<512x512xbf16>
    %cst_24 = arith.constant dense<0.000000e+00> : vector<128x512xf32>
    %33 = tpu.matmul %30, %32, %cst_24 {dimension_numbers = #tpu.dot_dimension_numbers<[1], [0], [0], [1], [0, 0, 1, 1], [], []>} : vector<128x512xbf16>, vector<512x512xbf16>, vector<128x512xf32> -> vector<128x512xf32>
    %c4 = arith.constant 4 : index
    %c0_25 = arith.constant 0 : index
    %34 = vector.load %arg4[%c4, %c0_25] : memref<12x512xf32, #tpu.memory_space<vmem>>, vector<1x512xf32>
    %35 = vector.broadcast %34 : vector<1x512xf32> to vector<128x512xf32>
    %36 = arith.addf %33, %35 : vector<128x512xf32>
    %37 = arith.truncf %36 : vector<128x512xf32> to vector<128x512xbf16>
    %c4_26 = arith.constant 4 : index
    %c0_27 = arith.constant 0 : index
    %c0_28 = arith.constant 0 : index
    %38 = vector.load %arg3[%c4_26, %c0_27, %c0_28] : memref<10x512x512xbf16, #tpu.memory_space<vmem>>, vector<1x512x512xbf16>
    %39 = vector.shape_cast %38 : vector<1x512x512xbf16> to vector<512x512xbf16>
    %cst_29 = arith.constant dense<0.000000e+00> : vector<128x512xf32>
    %40 = tpu.matmul %37, %39, %cst_29 {dimension_numbers = #tpu.dot_dimension_numbers<[1], [0], [0], [1], [0, 0, 1, 1], [], []>} : vector<128x512xbf16>, vector<512x512xbf16>, vector<128x512xf32> -> vector<128x512xf32>
    %c5 = arith.constant 5 : index
    %c0_30 = arith.constant 0 : index
    %41 = vector.load %arg4[%c5, %c0_30] : memref<12x512xf32, #tpu.memory_space<vmem>>, vector<1x512xf32>
    %42 = vector.broadcast %41 : vector<1x512xf32> to vector<128x512xf32>
    %43 = arith.addf %40, %42 : vector<128x512xf32>
    %44 = arith.truncf %43 : vector<128x512xf32> to vector<128x512xbf16>
    %c5_31 = arith.constant 5 : index
    %c0_32 = arith.constant 0 : index
    %c0_33 = arith.constant 0 : index
    %45 = vector.load %arg3[%c5_31, %c0_32, %c0_33] : memref<10x512x512xbf16, #tpu.memory_space<vmem>>, vector<1x512x512xbf16>
    %46 = vector.shape_cast %45 : vector<1x512x512xbf16> to vector<512x512xbf16>
    %cst_34 = arith.constant dense<0.000000e+00> : vector<128x512xf32>
    %47 = tpu.matmul %44, %46, %cst_34 {dimension_numbers = #tpu.dot_dimension_numbers<[1], [0], [0], [1], [0, 0, 1, 1], [], []>} : vector<128x512xbf16>, vector<512x512xbf16>, vector<128x512xf32> -> vector<128x512xf32>
    %c6 = arith.constant 6 : index
    %c0_35 = arith.constant 0 : index
    %48 = vector.load %arg4[%c6, %c0_35] : memref<12x512xf32, #tpu.memory_space<vmem>>, vector<1x512xf32>
    %49 = vector.broadcast %48 : vector<1x512xf32> to vector<128x512xf32>
    %50 = arith.addf %47, %49 : vector<128x512xf32>
    %51 = arith.truncf %50 : vector<128x512xf32> to vector<128x512xbf16>
    %c6_36 = arith.constant 6 : index
    %c0_37 = arith.constant 0 : index
    %c0_38 = arith.constant 0 : index
    %52 = vector.load %arg3[%c6_36, %c0_37, %c0_38] : memref<10x512x512xbf16, #tpu.memory_space<vmem>>, vector<1x512x512xbf16>
    %53 = vector.shape_cast %52 : vector<1x512x512xbf16> to vector<512x512xbf16>
    %cst_39 = arith.constant dense<0.000000e+00> : vector<128x512xf32>
    %54 = tpu.matmul %51, %53, %cst_39 {dimension_numbers = #tpu.dot_dimension_numbers<[1], [0], [0], [1], [0, 0, 1, 1], [], []>} : vector<128x512xbf16>, vector<512x512xbf16>, vector<128x512xf32> -> vector<128x512xf32>
    %c7 = arith.constant 7 : index
    %c0_40 = arith.constant 0 : index
    %55 = vector.load %arg4[%c7, %c0_40] : memref<12x512xf32, #tpu.memory_space<vmem>>, vector<1x512xf32>
    %56 = vector.broadcast %55 : vector<1x512xf32> to vector<128x512xf32>
    %57 = arith.addf %54, %56 : vector<128x512xf32>
    %58 = arith.truncf %57 : vector<128x512xf32> to vector<128x512xbf16>
    %c7_41 = arith.constant 7 : index
    %c0_42 = arith.constant 0 : index
    %c0_43 = arith.constant 0 : index
    %59 = vector.load %arg3[%c7_41, %c0_42, %c0_43] : memref<10x512x512xbf16, #tpu.memory_space<vmem>>, vector<1x512x512xbf16>
    %60 = vector.shape_cast %59 : vector<1x512x512xbf16> to vector<512x512xbf16>
    %cst_44 = arith.constant dense<0.000000e+00> : vector<128x512xf32>
    %61 = tpu.matmul %58, %60, %cst_44 {dimension_numbers = #tpu.dot_dimension_numbers<[1], [0], [0], [1], [0, 0, 1, 1], [], []>} : vector<128x512xbf16>, vector<512x512xbf16>, vector<128x512xf32> -> vector<128x512xf32>
    %c8 = arith.constant 8 : index
    %c0_45 = arith.constant 0 : index
    %62 = vector.load %arg4[%c8, %c0_45] : memref<12x512xf32, #tpu.memory_space<vmem>>, vector<1x512xf32>
    %63 = vector.broadcast %62 : vector<1x512xf32> to vector<128x512xf32>
    %64 = arith.addf %61, %63 : vector<128x512xf32>
    %65 = arith.truncf %64 : vector<128x512xf32> to vector<128x512xbf16>
    %c8_46 = arith.constant 8 : index
    %c0_47 = arith.constant 0 : index
    %c0_48 = arith.constant 0 : index
    %66 = vector.load %arg3[%c8_46, %c0_47, %c0_48] : memref<10x512x512xbf16, #tpu.memory_space<vmem>>, vector<1x512x512xbf16>
    %67 = vector.shape_cast %66 : vector<1x512x512xbf16> to vector<512x512xbf16>
    %cst_49 = arith.constant dense<0.000000e+00> : vector<128x512xf32>
    %68 = tpu.matmul %65, %67, %cst_49 {dimension_numbers = #tpu.dot_dimension_numbers<[1], [0], [0], [1], [0, 0, 1, 1], [], []>} : vector<128x512xbf16>, vector<512x512xbf16>, vector<128x512xf32> -> vector<128x512xf32>
    %c9 = arith.constant 9 : index
    %c0_50 = arith.constant 0 : index
    %69 = vector.load %arg4[%c9, %c0_50] : memref<12x512xf32, #tpu.memory_space<vmem>>, vector<1x512xf32>
    %70 = vector.broadcast %69 : vector<1x512xf32> to vector<128x512xf32>
    %71 = arith.addf %68, %70 : vector<128x512xf32>
    %72 = arith.truncf %71 : vector<128x512xf32> to vector<128x512xbf16>
    %c9_51 = arith.constant 9 : index
    %c0_52 = arith.constant 0 : index
    %c0_53 = arith.constant 0 : index
    %73 = vector.load %arg3[%c9_51, %c0_52, %c0_53] : memref<10x512x512xbf16, #tpu.memory_space<vmem>>, vector<1x512x512xbf16>
    %74 = vector.shape_cast %73 : vector<1x512x512xbf16> to vector<512x512xbf16>
    %cst_54 = arith.constant dense<0.000000e+00> : vector<128x512xf32>
    %75 = tpu.matmul %72, %74, %cst_54 {dimension_numbers = #tpu.dot_dimension_numbers<[1], [0], [0], [1], [0, 0, 1, 1], [], []>} : vector<128x512xbf16>, vector<512x512xbf16>, vector<128x512xf32> -> vector<128x512xf32>
    %c10 = arith.constant 10 : index
    %c0_55 = arith.constant 0 : index
    %76 = vector.load %arg4[%c10, %c0_55] : memref<12x512xf32, #tpu.memory_space<vmem>>, vector<1x512xf32>
    %77 = vector.broadcast %76 : vector<1x512xf32> to vector<128x512xf32>
    %78 = arith.addf %75, %77 : vector<128x512xf32>
    %79 = arith.truncf %78 : vector<128x512xf32> to vector<128x512xbf16>
    %c0_56 = arith.constant 0 : index
    %c0_57 = arith.constant 0 : index
    %80 = vector.load %arg5[%c0_56, %c0_57] : memref<512x64xbf16, #tpu.memory_space<vmem>>, vector<512x64xbf16>
    %cst_58 = arith.constant dense<0.000000e+00> : vector<128x64xf32>
    %81 = tpu.matmul %79, %80, %cst_58 {dimension_numbers = #tpu.dot_dimension_numbers<[1], [0], [0], [1], [0, 0, 1, 1], [], []>} : vector<128x512xbf16>, vector<512x64xbf16>, vector<128x64xf32> -> vector<128x64xf32>
    %c11 = arith.constant 11 : index
    %c0_59 = arith.constant 0 : index
    %82 = vector.load %arg4[%c11, %c0_59] : memref<12x512xf32, #tpu.memory_space<vmem>>, vector<1x64xf32>
    %83 = vector.broadcast %82 : vector<1x64xf32> to vector<128x64xf32>
    %84 = arith.addf %81, %83 : vector<128x64xf32>
    %c0_60 = arith.constant 0 : index
    %c0_61 = arith.constant 0 : index
    %85 = vector.load %arg6[%c0_60, %c0_61] : memref<128x64xf32, #tpu.memory_space<vmem>>, vector<128x64xf32>
    tpu.vector_store %arg6[%c0_60, %c0_61], %84 {strides = array<i32>} : memref<128x64xf32, #tpu.memory_space<vmem>>, vector<128x64xf32>,
    return
  }
  func.func @transform_0(%arg0: i32) -> (i32, i32) {
    %c0_i32 = arith.constant 0 : i32
    %c0_i32_0 = arith.constant 0 : i32
    return %arg0, %c0_i32 : i32, i32
  }
  func.func @transform_1(%arg0: i32) -> (i32, i32) {
    %c0_i32 = arith.constant 0 : i32
    %c0_i32_0 = arith.constant 0 : i32
    %c0_i32_1 = arith.constant 0 : i32
    return %c0_i32, %c0_i32_0 : i32, i32
  }
  func.func @transform_2(%arg0: i32) -> (i32, i32, i32) {
    %c0_i32 = arith.constant 0 : i32
    %c0_i32_0 = arith.constant 0 : i32
    %c0_i32_1 = arith.constant 0 : i32
    %c0_i32_2 = arith.constant 0 : i32
    return %c0_i32, %c0_i32_0, %c0_i32_1 : i32, i32, i32
  }
  func.func @transform_3(%arg0: i32) -> (i32, i32) {
    %c0_i32 = arith.constant 0 : i32
    %c0_i32_0 = arith.constant 0 : i32
    %c0_i32_1 = arith.constant 0 : i32
    return %c0_i32, %c0_i32_0 : i32, i32
  }
  func.func @transform_4(%arg0: i32) -> (i32, i32) {
    %c0_i32 = arith.constant 0 : i32
    %c0_i32_0 = arith.constant 0 : i32
    %c0_i32_1 = arith.constant 0 : i32
    return %c0_i32, %c0_i32_0 : i32, i32
  }
  func.func @transform_5(%arg0: i32) -> (i32, i32) {
    %c0_i32 = arith.constant 0 : i32
    %c0_i32_0 = arith.constant 0 : i32
    return %arg0, %c0_i32 : i32, i32
  }
}

</mosaic_0001>

<bundles_post_ra>
// kernel: tpu_custom_call.1
= control target key start
LH: loop header
LB: loop body
LE: loop exit
PB: predicated region body
PF: predicated region fallthrough
CT: control target
= control target key end

     0   :  { %10 = vsyncpa [#allocation3], 0  ;;  %s20819_s0 = inlined_call_operand.vmem [shape: f32[256,64], index: 0, kind: input, shape index: {}]   ;;  %s20820_s1 = inlined_call_operand.hbm [shape: bf16[64,512], index: 1, kind: input, shape index: {}]   ;;  %s20821_s2 = inlined_call_operand.hbm [shape: bf16[10,512,512], index: 2, kind: input, shape index: {}]   ;;  %s20822_s3 = inlined_call_operand.hbm [shape: f32[12,512], index: 3, kind: input, shape index: {}]   ;;  %s20823_s4 = inlined_call_operand.vmem [shape: bf16[512,64], index: 4, kind: input, shape index: {}]   ;;  %s20824_s5 = inlined_call_operand.vmem [shape: f32[256,64], index: 5, kind: output, shape index: {}]  }
   0x1   :  { %11 = vsyncpa [#allocation5], 0  ;;  %s19002_s18 = smov 0  }
   0x2 LB: > { %s14075_s19 = sadd.s32 4294967295, %s18962_s18   ;;  %p14077_p0 = scmp.ge.s32.totalorder %s18962_s18, 1  ;;  %s18962_s18 = sphi %s19002_s18, %s17_s18  }
   0x3   : > { %p158_p1 = scmp.lt.s32.totalorder %s18962_s18, 3  ;;  %p19012_p2 = scmp.eq.s32.totalorder %s14075_s19, 0 }
   0x4   : > { %s18964_s22 = smov [#allocation4]   ;;  %s18965_s24 = smov [#allocation2]  }
   0x5   : > { %p19016_p3 = pnand %p14077_p0, %p158_p1  ;;  %s183_s23 = sshll.u32 %s18964_s22, 4  ;;  %s19020_s23 = int_to_ptr.vmem [resolvable:$true] %s183_s23 }
   0x6   : > { %s170_s25 = sshll.u32 %s18965_s24, 4  ;;  %s18966_s27 = smov [#allocation6]   ;;  %s19024_s25 = int_to_ptr.vmem [resolvable:$true] %s170_s25 }
   0x7   : > { %p16856_p4 = pneg %p19016_p3  ;;  %s196_s28 = sshll.u32 %s18966_s27, 4  ;;  %s19032_s28 = int_to_ptr.vmem [resolvable:$true] %s196_s28 }
   0x8   : > { %s18864_s6 = scalar_lea.hbm %s20821_s2, 163840 }
   0x9   : > { %p19028_p5 = pnand %p19012_p2, %p16856_p4  ;;  %p18865_p6 = scmp.ne.s32.totalorder %s20821_s2, %s18864_s6 }
   0xa   : > { %p18871_p10 = scmp.lt.u32.totalorder %s18864_s6, %s20821_s2 }
   0xb   : > { %p19042_p7 = pneg %p19028_p5 }
   0xd   : > { %p18867_p8 = pnand %p19042_p7, %p18865_p6 }
   0xf   : > { %p18868_p9 = pneg %p18867_p8 }
  0x11   : > { %p18873_p11 = pnand %p18871_p10, %p18868_p9 }
  0x13   : > { %18876 = shalt.err (!%p18873_p11)
}
  0x14   : > { %s18877_s12 = scalar_lea.vmem %s19020_s23, 163840  ;;  %p18885_p1 = scmp.lt.s32.totalorder %s19020_s23, %s19020_s23 }
  0x15   : > { %p18878_p12 = scmp.ne.s32.totalorder %s19020_s23, %s18877_s12  ;;  %p18886_p4 = scmp.lt.s32.totalorder %s18877_s12, %s18877_s12 }
  0x17   : > { %p18880_p13 = pnand %p18878_p12, %p19042_p7  ;;  %p18887_p6 = por %p18886_p4, %p18885_p1 }
  0x19   : > { %p18881_p0 = pneg %p18880_p13 }
  0x1b   : > { %p18888_p8 = pnand %p18887_p6, %p18881_p0 }
  0x1d   : > { %18891 = shalt.err (!%p18888_p8)
}
  0x1e   : > { %s18967_s13 = smov 256   ;;  %s18968_s14 = smov 16  }
  0x1f   : > { %16862 = dma.hbm_to_vmem [thread:$0]  (!%p19028_p5), %s20821_s2, 163840, %s19020_s23, [#allocation5], %s18967_s13, %s18967_s13, %s18968_s14  }
  0x20   : > { %s18892_s24 = scalar_lea.hbm %s20820_s1, 2048 }
  0x21   : > { %p18893_p9 = scmp.ne.s32.totalorder %s20820_s1, %s18892_s24  ;;  %p18899_p12 = scmp.lt.u32.totalorder %s18892_s24, %s20820_s1 }
  0x23   : > { %p18895_p10 = pnand %p18893_p9, %p19042_p7 }
  0x25   : > { %p18896_p11 = pneg %p18895_p10 }
  0x27   : > { %p18901_p13 = pnand %p18899_p12, %p18896_p11 }
  0x29   : > { %18904 = shalt.err (!%p18901_p13)
}
  0x2a   : > { %s18905_s23 = scalar_lea.vmem %s19024_s25, 2048  ;;  %p18913_p6 = scmp.lt.s32.totalorder %s19024_s25, %s19024_s25 }
  0x2b   : > { %p18906_p0 = scmp.ne.s32.totalorder %s19024_s25, %s18905_s23  ;;  %p18914_p8 = scmp.lt.s32.totalorder %s18905_s23, %s18905_s23 }
  0x2d   : > { %p18908_p1 = pnand %p18906_p0, %p19042_p7  ;;  %p18915_p9 = por %p18914_p8, %p18913_p6 }
  0x2f   : > { %p18909_p4 = pneg %p18908_p1 }
  0x31   : > { %p18916_p10 = pnand %p18915_p9, %p18909_p4 }
  0x33   : > { %18919 = shalt.err (!%p18916_p10)
}
  0x34   : > { %16859 = dma.hbm_to_vmem [thread:$0]  (!%p19028_p5), %s20820_s1, 2048, %s19024_s25, [#allocation3], %s18967_s13, %s18967_s13, %s18968_s14  }
  0x35   : > { %s18920_s12 = scalar_lea.hbm %s20822_s3, 1024 }
  0x36   : > { %p18921_p11 = scmp.ne.s32.totalorder %s20822_s3, %s18920_s12  ;;  %p18927_p0 = scmp.lt.u32.totalorder %s18920_s12, %s20822_s3 }
  0x38   : > { %p18923_p12 = pnand %p18921_p11, %p19042_p7 }
  0x3a   : > { %p18924_p13 = pneg %p18923_p12 }
  0x3c   : > { %p18929_p1 = pnand %p18927_p0, %p18924_p13 }
  0x3e   : > { %18932 = shalt.err (!%p18929_p1)
}
  0x3f   : > { %s18933_s25 = scalar_lea.vmem %s19032_s28, 1024  ;;  %p18941_p9 = scmp.lt.s32.totalorder %s19032_s28, %s19032_s28 }
  0x40   : > { %p18934_p4 = scmp.ne.s32.totalorder %s19032_s28, %s18933_s25  ;;  %p18942_p10 = scmp.lt.s32.totalorder %s18933_s25, %s18933_s25 }
  0x42   : > { %p18936_p6 = pnand %p18934_p4, %p19042_p7  ;;  %p18943_p11 = por %p18942_p10, %p18941_p9 }
  0x44   : > { %p18937_p8 = pneg %p18936_p6 }
  0x46   : > { %p18944_p12 = pnand %p18943_p11, %p18937_p8 }
  0x48   : > { %18947 = shalt.err (!%p18944_p12)
}
  0x49   : > { %s18969_s13 = smov 512   ;;  %s18970_s14 = smov 32  }
  0x4a   : > { %16865 = dma.hbm_to_vmem [thread:$0]  (!%p19028_p5), %s20822_s3, 1024, %s19032_s28, [#allocation5], %s18969_s13, %s18969_s13, %s18970_s14  }
  0x4b   : > { %224 = sbr.rel (%p19016_p3) target bundleno = 3443 (0xd73), region = 40 }
  0x52   : > { %18953 = dma.done.wait (%p19012_p2), [#allocation3], 2048  }
  0x53   : > { %18955 = vsyncadd (%p19012_p2), [#allocation3], 4294965248 }
  0x54   : > { %18957 = dma.done.wait (%p19012_p2), [#allocation5], 164864  }
  0x55   : > { %18959 = vsyncadd (%p19012_p2), [#allocation5], 4294802432  ;;  %s14086_s26 = sshll.u32 %s14075_s19, 4  ;;  %v18971_v0 = vmov 0   ;;  %v16888_v1 = vld [vmem:[#allocation2 + $0x4] ss:$16 sps:$4 sm:$0xff]  }
  0x56   : > { %472 = vmatprep.mubr.bf16.mxu0 %v18971_v0  ;;  %585 = vmatprep.mubr.bf16.mxu1 %v18971_v0  ;;  %p261_p3 = scmp.lt.s32.totalorder %s14086_s26, 31  ;;  %v16890_v2 = vld [vmem:[#allocation2] ss:$16 sps:$4 sm:$0xff]   ;;  %v16891_v3 = vld [vmem:[#allocation2 + $0x24] ss:$16 sps:$4 sm:$0xff]   ;;  %vm415_vm0 = vcmask 523264  }
  0x57   : > { %440 = vmatprep.subr.bf16.mxu0 %v16888_v1  ;;  %v16893_v4 = vld [vmem:[#allocation2 + $0x20] ss:$16 sps:$4 sm:$0xff]   ;;  %v16894_v5 = vld [vmem:[#allocation2 + $0x44] ss:$16 sps:$4 sm:$0xff]   ;;  %v16900_v10 = vld [vmem:[#allocation2 + $0xc] ss:$16 sps:$4 sm:$0xff]  }
  0x58   : > { %s20830_s26 = smov (!%p261_p3, %s14086_s26), 31  ;;  %441 = vmatpush1.bf16.msra.mxu0 %v16890_v2  ;;  %v16896_v6 = vld [vmem:[#allocation2 + $0x40] ss:$16 sps:$4 sm:$0xff]   ;;  %v16897_v7 = vld [vmem:[#allocation2 + $0x64] ss:$16 sps:$4 sm:$0xff]   ;;  %553 = vmatprep.subr.bf16.mxu1 %v16900_v10 }
  0x59   : > { %442 = vmatprep.subr.bf16.mxu0 %v16891_v3  ;;  %s14087_s20 = sshll.u32 %s20830_s26, 3  ;;  %v16899_v8 = vld [vmem:[#allocation2 + $0x60] ss:$16 sps:$4 sm:$0xff]   ;;  %v16902_v11 = vld [vmem:[#allocation2 + $0x8] ss:$16 sps:$4 sm:$0xff]  }
  0x5a   : > { %s19131_s28 = scalar_lea.vmem %s20819_s0, %s14087_s20  ;;  %v16903_v13 = vld [vmem:[#allocation2 + $0x2c] ss:$16 sps:$4 sm:$0xff]   ;;  %554 = vmatpush1.bf16.msra.mxu1 %v16902_v11  ;;  %v16905_v14 = vld [vmem:[#allocation2 + $0x28] ss:$16 sps:$4 sm:$0xff]   ;;  %v16912_v18 = vld [vmem:[#allocation4] ss:$16 sps:$4 sm:$0xff]   ;;  %s20767_s9 = scalar_lea.vmem %s20824_s5, %s14087_s20 }
  0x5b   : > { %v273_v9 = vld [vmem:[%s19131_s28] sm:$0xff]  ;;  %v274_v12 = vld [vmem:[%s19131_s28 + $0x8] sm:$0xff]  ;;  %555 = vmatprep.subr.bf16.mxu1 %v16903_v13  ;;  %v275_v20 = vld [vmem:[%s19131_s28 + $0x10] sm:$0xff] }
  0x5c   : > { %443 = vmatpush1.bf16.msra.mxu0 %v16893_v4  ;;  %v289_v15 = vpack.c.bf16 %v274_v12, %v273_v9  ;;  %v16906_v16 = vld [vmem:[#allocation2 + $0x4c] ss:$16 sps:$4 sm:$0xff]   ;;  %v16908_v17 = vld [vmem:[#allocation2 + $0x48] ss:$16 sps:$4 sm:$0xff]   ;;  %v16914_v19 = vld [vmem:[#allocation4 + $0x4] ss:$16 sps:$4 sm:$0xff]  }
  0x5d   : > { %444 = vmatprep.subr.bf16.mxu0 %v16894_v5  ;;  %v16909_v21 = vld [vmem:[#allocation2 + $0x6c] ss:$16 sps:$4 sm:$0xff]   ;;  %v16920_v23 = vld [vmem:[#allocation4 + $0x24] ss:$16 sps:$4 sm:$0xff]   ;;  %v16918_v24 = vld [vmem:[#allocation4 + $0x20] ss:$16 sps:$4 sm:$0xff]  }
  0x5e   : > { %556 = vmatpush1.bf16.msra.mxu1 %v16905_v14  ;;  %v276_v22 = vld [vmem:[%s19131_s28 + $0x18] sm:$0xff]  ;;  %v16926_v28 = vld [vmem:[#allocation4 + $0x44] ss:$16 sps:$4 sm:$0xff]   ;;  %v16924_v29 = vld [vmem:[#allocation4 + $0x40] ss:$16 sps:$4 sm:$0xff]  }
  0x5f   : > { %557 = vmatprep.subr.bf16.mxu1 %v16906_v16  ;;  %v16911_v25 = vld [vmem:[#allocation2 + $0x68] ss:$16 sps:$4 sm:$0xff]   ;;  %v290_v26 = vpack.c.bf16 %v276_v22, %v275_v20  ;;  %v16917_v27 = vld [vmem:[#allocation4 + $0xc] ss:$16 sps:$4 sm:$0xff]   ;;  %v277_v30 = vld [vmem:[%s19131_s28 + $0x20] sm:$0xff] }
  0x60   : > { %445 = vmatpush1.bf16.msra.mxu0 %v16896_v6  ;;  %v16915_v31 = vld [vmem:[#allocation4 + $0x8] ss:$16 sps:$4 sm:$0xff]   ;;  %v16923_v32 = vld [vmem:[#allocation4 + $0x2c] ss:$16 sps:$4 sm:$0xff]   ;;  %v16932_v33 = vld [vmem:[#allocation4 + $0x64] ss:$16 sps:$4 sm:$0xff]  }
  0x61   : > { %446 = vmatprep.subr.bf16.mxu0 %v16897_v7  ;;  %v278_v34 = vld [vmem:[%s19131_s28 + $0x28] sm:$0xff]  ;;  %v16930_v36 = vld [vmem:[#allocation4 + $0x60] ss:$16 sps:$4 sm:$0xff]   ;;  %v16938_v37 = vld [vmem:[#allocation4 + $0x84] ss:$16 sps:$4 sm:$0xff]  }
  0x62   : > { %558 = vmatpush1.bf16.msra.mxu1 %v16908_v17  ;;  %v16921_v35 = vld [vmem:[#allocation4 + $0x28] ss:$16 sps:$4 sm:$0xff]   ;;  %v291_v38 = vpack.c.bf16 %v278_v34, %v277_v30  ;;  %v16929_v39 = vld [vmem:[#allocation4 + $0x4c] ss:$16 sps:$4 sm:$0xff]   ;;  %v16936_v40 = vld [vmem:[#allocation4 + $0x80] ss:$16 sps:$4 sm:$0xff]  }
  0x63   : > { %559 = vmatprep.subr.bf16.mxu1 %v16909_v21  ;;  %v279_v41 = vld [vmem:[%s19131_s28 + $0x30] sm:$0xff]  ;;  %v16927_v42 = vld [vmem:[#allocation4 + $0x48] ss:$16 sps:$4 sm:$0xff]   ;;  %v16935_v43 = vld [vmem:[#allocation4 + $0x6c] ss:$16 sps:$4 sm:$0xff]  }
  0x64   : > { %447 = vmatpush1.bf16.msra.mxu0 %v16899_v8  ;;  %v16944_v44 = vld [vmem:[#allocation4 + $0xa4] ss:$16 sps:$4 sm:$0xff]   ;;  %v280_v45 = vld [vmem:[%s19131_s28 + $0x38] sm:$0xff]  ;;  %v16942_v47 = vld [vmem:[#allocation4 + $0xa0] ss:$16 sps:$4 sm:$0xff]  }
  0x65   : > { %1553 = vmatprep.subr.bf16.mxu0 %v16914_v19  ;;  %v16933_v46 = vld [vmem:[#allocation4 + $0x68] ss:$16 sps:$4 sm:$0xff]   ;;  %v16950_v48 = vld [vmem:[#allocation4 + $0xc4] ss:$16 sps:$4 sm:$0xff]   ;;  %v292_v49 = vpack.c.bf16 %v280_v45, %v279_v41  ;;  %v16941_v50 = vld [vmem:[#allocation4 + $0x8c] ss:$16 sps:$4 sm:$0xff]  }
  0x66   : > { %560 = vmatpush1.bf16.msra.mxu1 %v16911_v25  ;;  %v16948_v51 = vld [vmem:[#allocation4 + $0xc0] ss:$16 sps:$4 sm:$0xff]   ;;  %v16939_v53 = vld [vmem:[#allocation4 + $0x88] ss:$16 sps:$4 sm:$0xff]   ;;  %v16947_v54 = vld [vmem:[#allocation4 + $0xac] ss:$16 sps:$4 sm:$0xff]  }
  0x67   : > { %14106 = vmatmul.mubr.msk.bf16.vlgmr.msra.gmra.mrb[0].mxu0 %vm415_vm0, %v289_v15  ;;  %1779 = vmatprep.subr.bf16.mxu1 %v16917_v27  ;;  %v281_v52 = vld [vmem:[%s19131_s28 + $0x40] sm:$0xff]  ;;  %v282_v56 = vld [vmem:[%s19131_s28 + $0x48] sm:$0xff]  ;;  %v283_v63 = vld [vmem:[%s19131_s28 + $0x50] sm:$0xff] }
  0x68   : > { %482 = vmatprep.mubr.bf16.mxu0 %v18971_v0  ;;  %1554 = vmatpush1.bf16.msra.mxu0 %v16912_v18  ;;  %v16956_v55 = vld [vmem:[#allocation4 + $0xe4] ss:$16 sps:$4 sm:$0xff]   ;;  %v16945_v57 = vld [vmem:[#allocation4 + $0xa8] ss:$16 sps:$4 sm:$0xff]   ;;  %v16954_v58 = vld [vmem:[#allocation4 + $0xe0] ss:$16 sps:$4 sm:$0xff]   ;;  %v293_v60 = vpack.c.bf16 %v282_v56, %v281_v52 }
  0x69   : > { %1555 = vmatprep.subr.bf16.mxu0 %v16920_v23  ;;  %14114 = vmatmul.mubr.msk.bf16.vlgmr.msra.gmra.mrb[0].mxu1 %vm415_vm0, %v289_v15  ;;  %v16962_v59 = vld [vmem:[#allocation4 + $0x104] ss:$16 sps:$4 sm:$0xff]   ;;  %v16953_v61 = vld [vmem:[#allocation4 + $0xcc] ss:$16 sps:$4 sm:$0xff]   ;;  %v16960_v62 = vld [vmem:[#allocation4 + $0x100] ss:$16 sps:$4 sm:$0xff]  }
  0x6a   : > { %595 = vmatprep.mubr.bf16.mxu1 %v18971_v0  ;;  %1780 = vmatpush1.bf16.msra.mxu1 %v16915_v31  ;;  %v16951_v1 = vld [vmem:[#allocation4 + $0xc8] ss:$16 sps:$4 sm:$0xff]   ;;  %v16959_v2 = vld [vmem:[#allocation4 + $0xec] ss:$16 sps:$4 sm:$0xff]   ;;  %v16968_v3 = vld [vmem:[#allocation4 + $0x124] ss:$16 sps:$4 sm:$0xff]  }
  0x6b   : > { %1781 = vmatprep.subr.bf16.mxu1 %v16923_v32  ;;  %v284_v4 = vld [vmem:[%s19131_s28 + $0x58] sm:$0xff]  ;;  %v16966_v6 = vld [vmem:[#allocation4 + $0x120] ss:$16 sps:$4 sm:$0xff]   ;;  %v16974_v8 = vld [vmem:[#allocation4 + $0x144] ss:$16 sps:$4 sm:$0xff]  }
  0x6c   : > { %1556 = vmatpush1.bf16.msra.mxu0 %v16918_v24  ;;  %v16957_v5 = vld [vmem:[#allocation4 + $0xe8] ss:$16 sps:$4 sm:$0xff]   ;;  %v16965_v7 = vld [vmem:[#allocation4 + $0x10c] ss:$16 sps:$4 sm:$0xff]   ;;  %v294_v9 = vpack.c.bf16 %v284_v4, %v283_v63  ;;  %v16972_v10 = vld [vmem:[#allocation4 + $0x140] ss:$16 sps:$4 sm:$0xff]  }
  0x6d   : > { %1557 = vmatprep.subr.bf16.mxu0 %v16926_v28  ;;  %v16963_v11 = vld [vmem:[#allocation4 + $0x108] ss:$16 sps:$4 sm:$0xff]   ;;  %v16971_v12 = vld [vmem:[#allocation4 + $0x12c] ss:$16 sps:$4 sm:$0xff]   ;;  %v16980_v13 = vld [vmem:[#allocation4 + $0x164] ss:$16 sps:$4 sm:$0xff]  }
  0x6e   : > { %1782 = vmatpush1.bf16.msra.mxu1 %v16921_v35  ;;  %v285_v14 = vld [vmem:[%s19131_s28 + $0x60] sm:$0xff]  ;;  %v286_v15 = vld [vmem:[%s19131_s28 + $0x68] sm:$0xff]  ;;  %v287_v25 = vld [vmem:[%s19131_s28 + $0x70] sm:$0xff] }
  0x6f   : > { %14107 = vmatmul.mubr.msk.bf16.gmra.mrb[4].mxu0 %vm415_vm0, %v290_v26  ;;  %1783 = vmatprep.subr.bf16.mxu1 %v16929_v39  ;;  %v16978_v16 = vld [vmem:[#allocation4 + $0x160] ss:$16 sps:$4 sm:$0xff]   ;;  %v16969_v17 = vld [vmem:[#allocation4 + $0x128] ss:$16 sps:$4 sm:$0xff]   ;;  %v16986_v18 = vld [vmem:[#allocation4 + $0x184] ss:$16 sps:$4 sm:$0xff]   ;;  %v295_v20 = vpack.c.bf16 %v286_v15, %v285_v14 }
  0x70   : > { %492 = vmatprep.mubr.bf16.mxu0 %v18971_v0  ;;  %1558 = vmatpush1.bf16.msra.mxu0 %v16924_v29  ;;  %v16977_v19 = vld [vmem:[#allocation4 + $0x14c] ss:$16 sps:$4 sm:$0xff]   ;;  %v16984_v21 = vld [vmem:[#allocation4 + $0x180] ss:$16 sps:$4 sm:$0xff]   ;;  %v16975_v22 = vld [vmem:[#allocation4 + $0x148] ss:$16 sps:$4 sm:$0xff]  }
  0x71   : > { %1559 = vmatprep.subr.bf16.mxu0 %v16932_v33  ;;  %14115 = vmatmul.mubr.msk.bf16.gmra.mrb[4].mxu1 %vm415_vm0, %v290_v26  ;;  %v16983_v23 = vld [vmem:[#allocation4 + $0x16c] ss:$16 sps:$4 sm:$0xff]   ;;  %v16992_v24 = vld [vmem:[#allocation4 + $0x1a4] ss:$16 sps:$4 sm:$0xff]   ;;  %v16990_v27 = vld [vmem:[#allocation4 + $0x1a0] ss:$16 sps:$4 sm:$0xff]  }
  0x72   : > { %605 = vmatprep.mubr.bf16.mxu1 %v18971_v0  ;;  %1784 = vmatpush1.bf16.msra.mxu1 %v16927_v42  ;;  %v288_v26 = vld [vmem:[%s19131_s28 + $0x78] sm:$0xff]  ;;  %v16998_v34 = vld [vmem:[#allocation4 + $0x1c4] ss:$16 sps:$4 sm:$0xff]   ;;  %v17014_v14 = vld [vmem:[#allocation4 + $0x220] ss:$16 sps:$4 sm:$0xff]  }
  0x73   : > { %1785 = vmatprep.subr.bf16.mxu1 %v16935_v43  ;;  %v16981_v28 = vld [vmem:[#allocation4 + $0x168] ss:$16 sps:$4 sm:$0xff]   ;;  %v16989_v29 = vld [vmem:[#allocation4 + $0x18c] ss:$16 sps:$4 sm:$0xff]   ;;  %v296_v30 = vpack.c.bf16 %v288_v26, %v287_v25  ;;  %v315_v43 = vlaneseq }
  0x74   : > { %1560 = vmatpush1.bf16.msra.mxu0 %v16930_v36  ;;  %v16987_v31 = vld [vmem:[#allocation4 + $0x188] ss:$16 sps:$4 sm:$0xff]   ;;  %v16995_v32 = vld [vmem:[#allocation4 + $0x1ac] ss:$16 sps:$4 sm:$0xff]   ;;  %v16996_v36 = vld [vmem:[#allocation4 + $0x1c0] ss:$16 sps:$4 sm:$0xff]  }
  0x75   : > { %1561 = vmatprep.subr.bf16.mxu0 %v16938_v37  ;;  %v16993_v33 = vld [vmem:[#allocation4 + $0x1a8] ss:$16 sps:$4 sm:$0xff]   ;;  %v17001_v35 = vld [vmem:[#allocation4 + $0x1cc] ss:$16 sps:$4 sm:$0xff]  }
  0x76   : > { %1786 = vmatpush1.bf16.msra.mxu1 %v16933_v46  ;;  %v16999_v37 = vld [vmem:[#allocation4 + $0x1c8] ss:$16 sps:$4 sm:$0xff]   ;;  %v17007_v39 = vld [vmem:[#allocation4 + $0x1ec] ss:$16 sps:$4 sm:$0xff]  }
  0x77   : > { %14108 = vmatmul.mubr.msk.bf16.gmra.mrb[8].mxu0 %vm415_vm0, %v291_v38  ;;  %1787 = vmatprep.subr.bf16.mxu1 %v16941_v50  ;;  %v17005_v41 = vld [vmem:[#allocation4 + $0x1e8] ss:$16 sps:$4 sm:$0xff]   ;;  %v17013_v42 = vld [vmem:[#allocation4 + $0x20c] ss:$16 sps:$4 sm:$0xff]  }
  0x78   : > { %502 = vmatprep.mubr.bf16.mxu0 %v18971_v0  ;;  %1562 = vmatpush1.bf16.msra.mxu0 %v16936_v40  ;;  %v17002_v40 = vld [vmem:[#allocation4 + $0x1e0] ss:$16 sps:$4 sm:$0xff]  }
  0x79   : > { %1563 = vmatprep.subr.bf16.mxu0 %v16944_v44  ;;  %14116 = vmatmul.mubr.msk.bf16.gmra.mrb[8].mxu1 %vm415_vm0, %v291_v38  ;;  %v17004_v38 = vld [vmem:[#allocation4 + $0x1e4] ss:$16 sps:$4 sm:$0xff]   ;;  %v316_v44 = vshrl.u32 %v315_v43, 7  ;;  %v313_v45 = vld [vmem:[#allocation6] ss:$8 sm:$0xf] }
  0x7a   : > { %615 = vmatprep.mubr.bf16.mxu1 %v18971_v0  ;;  %1788 = vmatpush1.bf16.msra.mxu1 %v16939_v53  ;;  %v17028_v43 = vld [vmem:[#allocation4 + $0x264] ss:$16 sps:$4 sm:$0xff]  }
  0x7b   : > { %1789 = vmatprep.subr.bf16.mxu1 %v16947_v54  ;;  %v19179_v46 = vsub.s32 0, %v316_v44 }
  0x7c   : > { %1564 = vmatpush1.bf16.msra.mxu0 %v16942_v47  ;;  %v19181_v47 = vsub.s32 1, %v316_v44 }
  0x7d   : > { %1565 = vmatprep.subr.bf16.mxu0 %v16950_v48  ;;  %v19184_v48 = vrot.slane %v313_v45, %v19179_v46 }
  0x7e   : > { %1790 = vmatpush1.bf16.msra.mxu1 %v16945_v57  ;;  %v19192_v57 = vsub.s32 2, %v316_v44 }
  0x7f   : > { %14109 = vmatmul.mubr.msk.bf16.gmra.mrb[12].mxu0 %vm415_vm0, %v292_v49  ;;  %1791 = vmatprep.subr.bf16.mxu1 %v16953_v61 }
  0x80   : > { %512 = vmatprep.mubr.bf16.mxu0 %v18971_v0  ;;  %1566 = vmatpush1.bf16.msra.mxu0 %v16948_v51 }
  0x81   : > { %1567 = vmatprep.subr.bf16.mxu0 %v16956_v55  ;;  %14117 = vmatmul.mubr.msk.bf16.gmra.mrb[12].mxu1 %vm415_vm0, %v292_v49  ;;  %v19187_v49 = vrot.slane %v313_v45, %v19181_v47 }
  0x82   : > { %625 = vmatprep.mubr.bf16.mxu1 %v18971_v0  ;;  %1792 = vmatpush1.bf16.msra.mxu1 %v16951_v1 }
  0x83   : > { %1793 = vmatprep.subr.bf16.mxu1 %v16959_v2  ;;  %v19198_v2 = vrot.slane %v313_v45, %v19192_v57 }
  0x84   : > { %1568 = vmatpush1.bf16.msra.mxu0 %v16954_v58 }
  0x85   : > { %1569 = vmatprep.subr.bf16.mxu0 %v16962_v59  ;;  %v19195_v59 = vsub.s32 3, %v316_v44  ;;  %v17031_v44 = vld [vmem:[#allocation4 + $0x26c] ss:$16 sps:$4 sm:$0xff]  }
  0x86   : > { %1794 = vmatpush1.bf16.msra.mxu1 %v16957_v5  ;;  %v17008_v5 = vld [vmem:[#allocation4 + $0x200] ss:$16 sps:$4 sm:$0xff]  }
  0x87   : > { %14110 = vmatmul.mubr.msk.bf16.gmra.mrb[16].mxu0 %vm415_vm0, %v293_v60  ;;  %1795 = vmatprep.subr.bf16.mxu1 %v16965_v7  ;;  %v19201_v7 = vrot.slane %v313_v45, %v19195_v59 }
  0x88   : > { %522 = vmatprep.mubr.bf16.mxu0 %v18971_v0  ;;  %1570 = vmatpush1.bf16.msra.mxu0 %v16960_v62 }
  0x89   : > { %1571 = vmatprep.subr.bf16.mxu0 %v16968_v3  ;;  %14118 = vmatmul.mubr.msk.bf16.gmra.mrb[16].mxu1 %vm415_vm0, %v293_v60 }
  0x8a   : > { %635 = vmatprep.mubr.bf16.mxu1 %v18971_v0  ;;  %1796 = vmatpush1.bf16.msra.mxu1 %v16963_v11  ;;  %v17019_v11 = vld [vmem:[#allocation4 + $0x22c] ss:$16 sps:$4 sm:$0xff]  }
  0x8b   : > { %1797 = vmatprep.subr.bf16.mxu1 %v16971_v12 }
  0x8c   : > { %1572 = vmatpush1.bf16.msra.mxu0 %v16966_v6  ;;  %v17011_v6 = vld [vmem:[#allocation4 + $0x208] ss:$16 sps:$4 sm:$0xff]  }
  0x8d   : > { %1573 = vmatprep.subr.bf16.mxu0 %v16974_v8 }
  0x8e   : > { %1798 = vmatpush1.bf16.msra.mxu1 %v16969_v17 }
  0x8f   : > { %14111 = vmatmul.mubr.msk.bf16.gmra.mrb[20].mxu0 %vm415_vm0, %v294_v9  ;;  %1799 = vmatprep.subr.bf16.mxu1 %v16977_v19 }
  0x90   : > { %532 = vmatprep.mubr.bf16.mxu0 %v18971_v0  ;;  %1574 = vmatpush1.bf16.msra.mxu0 %v16972_v10  ;;  %v17016_v10 = vld [vmem:[#allocation4 + $0x224] ss:$16 sps:$4 sm:$0xff]  }
  0x91   : > { %1575 = vmatprep.subr.bf16.mxu0 %v16980_v13  ;;  %14119 = vmatmul.mubr.msk.bf16.gmra.mrb[20].mxu1 %vm415_vm0, %v294_v9 }
  0x92   : > { %645 = vmatprep.mubr.bf16.mxu1 %v18971_v0  ;;  %1800 = vmatpush1.bf16.msra.mxu1 %v16975_v22  ;;  %v17022_v22 = vld [vmem:[#allocation4 + $0x244] ss:$16 sps:$4 sm:$0xff]  }
  0x93   : > { %1801 = vmatprep.subr.bf16.mxu1 %v16983_v23  ;;  %v17025_v23 = vld [vmem:[#allocation4 + $0x24c] ss:$16 sps:$4 sm:$0xff]  }
  0x94   : > { %1576 = vmatpush1.bf16.msra.mxu0 %v16978_v16 }
  0x95   : > { %1577 = vmatprep.subr.bf16.mxu0 %v16986_v18  ;;  %v17017_v18 = vld [vmem:[#allocation4 + $0x228] ss:$16 sps:$4 sm:$0xff]  }
  0x96   : > { %1802 = vmatpush1.bf16.msra.mxu1 %v16981_v28 }
  0x97   : > { %14112 = vmatmul.mubr.msk.bf16.gmra.mrb[24].mxu0 %vm415_vm0, %v295_v20  ;;  %1803 = vmatprep.subr.bf16.mxu1 %v16989_v29 }
  0x98   : > { %542 = vmatprep.mubr.bf16.mxu0 %v18971_v0  ;;  %1578 = vmatpush1.bf16.msra.mxu0 %v16984_v21 }
  0x99   : > { %1579 = vmatprep.subr.bf16.mxu0 %v16992_v24  ;;  %14120 = vmatmul.mubr.msk.bf16.gmra.mrb[24].mxu1 %vm415_vm0, %v295_v20 }
  0x9a   : > { %655 = vmatprep.mubr.bf16.mxu1 %v18971_v0  ;;  %1804 = vmatpush1.bf16.msra.mxu1 %v16987_v31  ;;  %v17010_v0 = vld [vmem:[#allocation4 + $0x204] ss:$16 sps:$4 sm:$0xff]  }
  0x9b   : > { %1805 = vmatprep.subr.bf16.mxu1 %v16995_v32 }
  0x9c   : > { %1580 = vmatpush1.bf16.msra.mxu0 %v16990_v27 }
  0x9d   : > { %1581 = vmatprep.subr.bf16.mxu0 %v16998_v34 }
  0x9e   : > { %1806 = vmatpush1.bf16.msra.mxu1 %v16993_v33 }
  0x9f   : > { %14113 = vmatmul.mubr.msk.bf16.gmra.mrb[28].mxu0 %vm415_vm0, %v296_v30  ;;  %1807 = vmatprep.subr.bf16.mxu1 %v17001_v35 }
  0xa0   : > { %1582 = vmatpush1.bf16.msra.mxu0 %v16996_v36 }
  0xa1   : > { %14121 = vmatmul.mubr.msk.bf16.gmra.mrb[28].mxu1 %vm415_vm0, %v296_v30  ;;  %1583 = vmatprep.subr.bf16.mxu0 %v17004_v38 }
  0xa2   : > { %1808 = vmatpush1.bf16.msra.mxu1 %v16999_v37 }
  0xa3   : > { %1809 = vmatprep.subr.bf16.mxu1 %v17007_v39  ;;  %v17020_v39 = vld [vmem:[#allocation4 + $0x240] ss:$16 sps:$4 sm:$0xff]  }
  0xa4   : > { %1584 = vmatpush1.bf16.msra.mxu0 %v17002_v40  ;;  %v17023_v40 = vld [vmem:[#allocation4 + $0x248] ss:$16 sps:$4 sm:$0xff]  }
  0xa5   : > { %1666 = vmatprep.subr.bf16.mxu0 %v17010_v0 }
  0xa6   : > { %1810 = vmatpush1.bf16.msra.mxu1 %v17005_v41 }
  0xa7   : > { %1892 = vmatprep.subr.bf16.mxu1 %v17013_v42 }
 0x13a   : > { %v474_v50 = vpop.f32.mrb[0].mxu0 }
 0x13b   : > { %v475_v51 = vadd.f32 %v474_v50, %v19184_v48  ;;  %v476_v52 = vpop.f32.mrb[1].mxu0 }
 0x13c   : > { %v477_v53 = vadd.f32 %v476_v52, %v19187_v49  ;;  %v478_v54 = vpop.f32.mrb[2].mxu0  ;;  %v587_v15 = vpop.f32.mrb[0].mxu1  ;;  %v17026_v52 = vld [vmem:[#allocation4 + $0x260] ss:$16 sps:$4 sm:$0xff]  }
 0x13d   : > { %v479_v55 = vadd.f32 %v478_v54, %v19184_v48  ;;  %v480_v56 = vpop.f32.mrb[3].mxu0  ;;  %v666_v60 = vmax.f32 %v475_v51, 0.0  ;;  %v588_v19 = vadd.f32 %v587_v15, %v19198_v2  ;;  %v589_v20 = vpop.f32.mrb[1].mxu1 }
 0x13e   : > { %v481_v58 = vadd.f32 %v480_v56, %v19187_v49  ;;  %v667_v62 = vmax.f32 %v477_v53, 0.0  ;;  %v590_v24 = vadd.f32 %v589_v20, %v19201_v7  ;;  %v591_v25 = vpop.f32.mrb[2].mxu1  ;;  %v17035_v20 = vld [vmem:[#allocation4 + $0x288] ss:$16 sps:$4 sm:$0xff]  }
 0x13f   : > { %v670_v61 = vmax.f32 %v479_v55, 0.0  ;;  %v668_v28 = vmax.f32 %v588_v19, 0.0  ;;  %v592_v29 = vadd.f32 %v591_v25, %v19198_v2  ;;  %v593_v30 = vpop.f32.mrb[3].mxu1  ;;  %v17032_v19 = vld [vmem:[#allocation4 + $0x280] ss:$16 sps:$4 sm:$0xff]  }
 0x140   : > { %v671_v63 = vmax.f32 %v481_v58, 0.0  ;;  %v594_v33 = vadd.f32 %v593_v30, %v19201_v7  ;;  %v669_v34 = vmax.f32 %v590_v24, 0.0  ;;  %v17029_v58 = vld [vmem:[#allocation4 + $0x268] ss:$16 sps:$4 sm:$0xff]   ;;  %v17040_v24 = vld [vmem:[#allocation4 + $0x2a4] ss:$16 sps:$4 sm:$0xff]  }
 0x141   : > { %v730_v1 = vpack.c.bf16 %v670_v61, %v666_v60  ;;  %v672_v36 = vmax.f32 %v592_v29, 0.0  ;;  %v17043_v25 = vld [vmem:[#allocation4 + $0x2ac] ss:$16 sps:$4 sm:$0xff]   ;;  %v17038_v29 = vld [vmem:[#allocation4 + $0x2a0] ss:$16 sps:$4 sm:$0xff]  }
 0x142   : > { %v484_v3 = vpop.f32.mrb[4].mxu0  ;;  %v731_v4 = vpack.c.bf16 %v671_v63, %v667_v62  ;;  %v673_v41 = vmax.f32 %v594_v33, 0.0  ;;  %v17034_v63 = vld [vmem:[#allocation4 + $0x284] ss:$16 sps:$4 sm:$0xff]  }
 0x143   : > { %v485_v8 = vadd.f32 %v484_v3, %v19184_v48  ;;  %v486_v9 = vpop.f32.mrb[5].mxu0  ;;  %v19212_v45 = vpack.c.bf16 %v672_v36, %v668_v28 }
 0x144   : > { %v487_v12 = vadd.f32 %v486_v9, %v19187_v49  ;;  %v488_v13 = vpop.f32.mrb[6].mxu0  ;;  %1585 = vmatprep.mubr.bf16.mxu0 %v731_v4  ;;  %1811 = vmatprep.mubr.bf16.mxu1 %v731_v4  ;;  %v597_v53 = vpop.f32.mrb[4].mxu1  ;;  %v19215_v54 = vpack.c.bf16 %v673_v41, %v669_v34  ;;  %v17041_v34 = vld [vmem:[#allocation4 + $0x2a8] ss:$16 sps:$4 sm:$0xff]  }
 0x145   : > { %v489_v16 = vadd.f32 %v488_v13, %v19184_v48  ;;  %v490_v17 = vpop.f32.mrb[7].mxu0  ;;  %1586 = vmatmul.mubr.bf16.vlgmr.msra.gmra.mrb[32].mxu0 %v730_v1  ;;  %1812 = vmatmul.mubr.bf16.vlgmr.msra.gmra.mrb[32].mxu1 %v730_v1  ;;  %v674_v26 = vmax.f32 %v485_v8, 0.0  ;;  %v598_v60 = vadd.f32 %v597_v53, %v19198_v2  ;;  %v599_v61 = vpop.f32.mrb[5].mxu1  ;;  %v17037_v1 = vld [vmem:[#allocation4 + $0x28c] ss:$16 sps:$4 sm:$0xff]  }
 0x146   : > { %v491_v21 = vadd.f32 %v490_v17, %v19187_v49  ;;  %1667 = vmatpush1.bf16.msra.mxu0 %v17008_v5  ;;  %1893 = vmatpush1.bf16.msra.mxu1 %v17011_v6  ;;  %v675_v31 = vmax.f32 %v487_v12, 0.0  ;;  %v600_v3 = vadd.f32 %v599_v61, %v19201_v7  ;;  %v601_v4 = vpop.f32.mrb[6].mxu1 }
 0x147   : > { %1668 = vmatprep.subr.bf16.mxu0 %v17016_v10  ;;  %1894 = vmatprep.subr.bf16.mxu1 %v17019_v11  ;;  %v678_v27 = vmax.f32 %v489_v16, 0.0  ;;  %v602_v8 = vadd.f32 %v601_v4, %v19198_v2  ;;  %v603_v9 = vpop.f32.mrb[7].mxu1  ;;  %v676_v10 = vmax.f32 %v598_v60, 0.0 }
 0x148   : > { %v679_v32 = vmax.f32 %v491_v21, 0.0  ;;  %v604_v13 = vadd.f32 %v603_v9, %v19201_v7 }
 0x149   : > { %v734_v35 = vpack.c.bf16 %v678_v27, %v674_v26  ;;  %v680_v16 = vmax.f32 %v602_v8, 0.0 }
 0x14a   : > { %1669 = vmatpush1.bf16.msra.mxu0 %v17014_v14  ;;  %v494_v37 = vpop.f32.mrb[8].mxu0  ;;  %1895 = vmatpush1.bf16.msra.mxu1 %v17017_v18  ;;  %v735_v38 = vpack.c.bf16 %v679_v32, %v675_v31  ;;  %v677_v14 = vmax.f32 %v600_v3, 0.0  ;;  %v681_v21 = vmax.f32 %v604_v13, 0.0 }
 0x14b   : > { %v495_v0 = vadd.f32 %v494_v37, %v19184_v48  ;;  %v496_v42 = vpop.f32.mrb[9].mxu0  ;;  %1670 = vmatprep.subr.bf16.mxu0 %v17022_v22  ;;  %1896 = vmatprep.subr.bf16.mxu1 %v17025_v23  ;;  %v19224_v26 = vpack.c.bf16 %v680_v16, %v676_v10 }
 0x14c   : > { %v497_v50 = vadd.f32 %v496_v42, %v19187_v49  ;;  %v498_v51 = vpop.f32.mrb[10].mxu0  ;;  %1595 = vmatprep.mubr.bf16.mxu0 %v735_v38  ;;  %1821 = vmatprep.mubr.bf16.mxu1 %v735_v38  ;;  %v607_v30 = vpop.f32.mrb[8].mxu1  ;;  %v19227_v31 = vpack.c.bf16 %v681_v21, %v677_v14  ;;  %v17046_v38 = vld [vmem:[#allocation4 + $0x2c4] ss:$16 sps:$4 sm:$0xff]  }
 0x14d   : > { %v499_v55 = vadd.f32 %v498_v51, %v19184_v48  ;;  %v500_v56 = vpop.f32.mrb[11].mxu0  ;;  %1596 = vmatmul.mubr.bf16.gmra.mrb[36].mxu0 %v734_v35  ;;  %1822 = vmatmul.mubr.bf16.gmra.mrb[36].mxu1 %v734_v35  ;;  %v682_v5 = vmax.f32 %v495_v0, 0.0  ;;  %v608_v35 = vadd.f32 %v607_v30, %v19198_v2  ;;  %v609_v36 = vpop.f32.mrb[9].mxu1 }
 0x14e   : > { %v501_v62 = vadd.f32 %v500_v56, %v19187_v49  ;;  %1671 = vmatpush1.bf16.msra.mxu0 %v17020_v39  ;;  %1897 = vmatpush1.bf16.msra.mxu1 %v17023_v40  ;;  %v683_v11 = vmax.f32 %v497_v50, 0.0  ;;  %v17049_v39 = vld [vmem:[#allocation4 + $0x2cc] ss:$16 sps:$4 sm:$0xff]   ;;  %v610_v40 = vadd.f32 %v609_v36, %v19201_v7  ;;  %v611_v41 = vpop.f32.mrb[10].mxu1 }
 0x14f   : > { %1672 = vmatprep.subr.bf16.mxu0 %v17028_v43  ;;  %1898 = vmatprep.subr.bf16.mxu1 %v17031_v44  ;;  %v686_v6 = vmax.f32 %v499_v55, 0.0  ;;  %v612_v43 = vadd.f32 %v611_v41, %v19198_v2  ;;  %v613_v44 = vpop.f32.mrb[11].mxu1  ;;  %v684_v50 = vmax.f32 %v608_v35, 0.0 }
 0x150   : > { %v687_v12 = vmax.f32 %v501_v62, 0.0  ;;  %v614_v53 = vadd.f32 %v613_v44, %v19201_v7  ;;  %v685_v55 = vmax.f32 %v610_v40, 0.0  ;;  %v17044_v62 = vld [vmem:[#allocation4 + $0x2c0] ss:$16 sps:$4 sm:$0xff]  }
 0x151   : > { %v738_v15 = vpack.c.bf16 %v686_v6, %v682_v5  ;;  %v17052_v5 = vld [vmem:[#allocation4 + $0x2e4] ss:$16 sps:$4 sm:$0xff]   ;;  %v17055_v6 = vld [vmem:[#allocation4 + $0x2ec] ss:$16 sps:$4 sm:$0xff]  }
 0x152   : > { %1673 = vmatpush1.bf16.msra.mxu0 %v17026_v52  ;;  %v504_v17 = vpop.f32.mrb[12].mxu0  ;;  %1899 = vmatpush1.bf16.msra.mxu1 %v17029_v58  ;;  %v739_v18 = vpack.c.bf16 %v687_v12, %v683_v11  ;;  %v688_v58 = vmax.f32 %v612_v43, 0.0  ;;  %v17050_v11 = vld [vmem:[#allocation4 + $0x2e0] ss:$16 sps:$4 sm:$0xff]   ;;  %v17053_v12 = vld [vmem:[#allocation4 + $0x2e8] ss:$16 sps:$4 sm:$0xff]  }
 0x153   : > { %v505_v22 = vadd.f32 %v504_v17, %v19184_v48  ;;  %v506_v23 = vpop.f32.mrb[13].mxu0  ;;  %1674 = vmatprep.subr.bf16.mxu0 %v17034_v63  ;;  %1900 = vmatprep.subr.bf16.mxu1 %v17037_v1  ;;  %v17047_v63 = vld [vmem:[#allocation4 + $0x2c8] ss:$16 sps:$4 sm:$0xff]   ;;  %v689_v1 = vmax.f32 %v614_v53, 0.0  ;;  %v17058_v17 = vld [vmem:[#allocation4 + $0x304] ss:$16 sps:$4 sm:$0xff]  }
 0x154   : > { %v507_v27 = vadd.f32 %v506_v23, %v19187_v49  ;;  %v508_v28 = vpop.f32.mrb[14].mxu0  ;;  %1605 = vmatprep.mubr.bf16.mxu0 %v739_v18  ;;  %1831 = vmatprep.mubr.bf16.mxu1 %v739_v18  ;;  %v19236_v8 = vpack.c.bf16 %v688_v58, %v684_v50  ;;  %v617_v13 = vpop.f32.mrb[12].mxu1  ;;  %v17061_v18 = vld [vmem:[#allocation4 + $0x30c] ss:$16 sps:$4 sm:$0xff]   ;;  %v17062_v53 = vld [vmem:[#allocation4 + $0x320] ss:$16 sps:$4 sm:$0xff]  }
 0x155   : > { %v509_v32 = vadd.f32 %v508_v28, %v19184_v48  ;;  %v510_v33 = vpop.f32.mrb[15].mxu0  ;;  %1606 = vmatmul.mubr.bf16.gmra.mrb[40].mxu0 %v738_v15  ;;  %1832 = vmatmul.mubr.bf16.gmra.mrb[40].mxu1 %v738_v15  ;;  %v690_v0 = vmax.f32 %v505_v22, 0.0  ;;  %v19239_v14 = vpack.c.bf16 %v689_v1, %v685_v55  ;;  %v17065_v55 = vld [vmem:[#allocation4 + $0x328] ss:$16 sps:$4 sm:$0xff]  }
 0x156   : > { %v511_v37 = vadd.f32 %v510_v33, %v19187_v49  ;;  %1675 = vmatpush1.bf16.msra.mxu0 %v17032_v19  ;;  %1901 = vmatpush1.bf16.msra.mxu1 %v17035_v20  ;;  %v691_v51 = vmax.f32 %v507_v27, 0.0  ;;  %v618_v19 = vadd.f32 %v617_v13, %v19198_v2  ;;  %v619_v20 = vpop.f32.mrb[13].mxu1  ;;  %v17056_v33 = vld [vmem:[#allocation4 + $0x300] ss:$16 sps:$4 sm:$0xff]  }
 0x157   : > { %1676 = vmatprep.subr.bf16.mxu0 %v17040_v24  ;;  %1902 = vmatprep.subr.bf16.mxu1 %v17043_v25  ;;  %v694_v42 = vmax.f32 %v509_v32, 0.0  ;;  %v620_v23 = vadd.f32 %v619_v20, %v19201_v7  ;;  %v621_v24 = vpop.f32.mrb[14].mxu1 }
 0x158   : > { %v695_v52 = vmax.f32 %v511_v37, 0.0  ;;  %v622_v27 = vadd.f32 %v621_v24, %v19198_v2  ;;  %v623_v28 = vpop.f32.mrb[15].mxu1 }
 0x159   : > { %v742_v56 = vpack.c.bf16 %v694_v42, %v690_v0  ;;  %v624_v35 = vadd.f32 %v623_v28, %v19201_v7  ;;  %v693_v36 = vmax.f32 %v620_v23, 0.0  ;;  %v17079_v23 = vld [vmem:[#allocation4 + $0x36c] ss:$16 sps:$4 sm:$0xff]  }
 0x15a   : > { %1677 = vmatpush1.bf16.msra.mxu0 %v17038_v29  ;;  %v514_v60 = vpop.f32.mrb[16].mxu0  ;;  %1903 = vmatpush1.bf16.msra.mxu1 %v17041_v34  ;;  %v743_v61 = vpack.c.bf16 %v695_v52, %v691_v51  ;;  %v692_v29 = vmax.f32 %v618_v19, 0.0  ;;  %v17059_v34 = vld [vmem:[#allocation4 + $0x308] ss:$16 sps:$4 sm:$0xff]   ;;  %v696_v40 = vmax.f32 %v622_v27, 0.0 }
 0x15b   : > { %v515_v3 = vadd.f32 %v514_v60, %v19184_v48  ;;  %v516_v4 = vpop.f32.mrb[17].mxu0  ;;  %1678 = vmatprep.subr.bf16.mxu0 %v17046_v38  ;;  %1904 = vmatprep.subr.bf16.mxu1 %v17049_v39  ;;  %v17064_v38 = vld [vmem:[#allocation4 + $0x324] ss:$16 sps:$4 sm:$0xff]   ;;  %v17067_v39 = vld [vmem:[#allocation4 + $0x32c] ss:$16 sps:$4 sm:$0xff]   ;;  %v697_v42 = vmax.f32 %v624_v35, 0.0 }
 0x15c   : > { %v517_v9 = vadd.f32 %v516_v4, %v19187_v49  ;;  %v518_v10 = vpop.f32.mrb[18].mxu0  ;;  %1615 = vmatprep.mubr.bf16.mxu0 %v743_v61  ;;  %1841 = vmatprep.mubr.bf16.mxu1 %v743_v61  ;;  %v19248_v50 = vpack.c.bf16 %v696_v40, %v692_v29  ;;  %v17074_v35 = vld [vmem:[#allocation4 + $0x360] ss:$16 sps:$4 sm:$0xff]  }
 0x15d   : > { %v519_v15 = vadd.f32 %v518_v10, %v19184_v48  ;;  %v520_v16 = vpop.f32.mrb[19].mxu0  ;;  %1616 = vmatmul.mubr.bf16.gmra.mrb[44].mxu0 %v742_v56  ;;  %1842 = vmatmul.mubr.bf16.gmra.mrb[44].mxu1 %v742_v56  ;;  %v698_v22 = vmax.f32 %v515_v3, 0.0  ;;  %v627_v56 = vpop.f32.mrb[16].mxu1  ;;  %v19251_v58 = vpack.c.bf16 %v697_v42, %v693_v36  ;;  %v17077_v36 = vld [vmem:[#allocation4 + $0x368] ss:$16 sps:$4 sm:$0xff]  }
 0x15e   : > { %v521_v21 = vadd.f32 %v520_v16, %v19187_v49  ;;  %1679 = vmatpush1.bf16.msra.mxu0 %v17044_v62  ;;  %1905 = vmatpush1.bf16.msra.mxu1 %v17047_v63  ;;  %v699_v30 = vmax.f32 %v517_v9, 0.0  ;;  %v17070_v62 = vld [vmem:[#allocation4 + $0x344] ss:$16 sps:$4 sm:$0xff]   ;;  %v17073_v63 = vld [vmem:[#allocation4 + $0x34c] ss:$16 sps:$4 sm:$0xff]   ;;  %v628_v1 = vadd.f32 %v627_v56, %v19198_v2  ;;  %v629_v3 = vpop.f32.mrb[17].mxu1 }
 0x15f   : > { %1680 = vmatprep.subr.bf16.mxu0 %v17052_v5  ;;  %1906 = vmatprep.subr.bf16.mxu1 %v17055_v6  ;;  %v702_v25 = vmax.f32 %v519_v15, 0.0  ;;  %v630_v6 = vadd.f32 %v629_v3, %v19201_v7  ;;  %v631_v9 = vpop.f32.mrb[18].mxu1  ;;  %v17083_v3 = vld [vmem:[#allocation4 + $0x388] ss:$16 sps:$4 sm:$0xff]  }
 0x160   : > { %v703_v32 = vmax.f32 %v521_v21, 0.0  ;;  %v700_v13 = vmax.f32 %v628_v1, 0.0  ;;  %v17080_v1 = vld [vmem:[#allocation4 + $0x380] ss:$16 sps:$4 sm:$0xff]  }
 0x161   : > { %v746_v37 = vpack.c.bf16 %v702_v25, %v698_v22  ;;  %v701_v20 = vmax.f32 %v630_v6, 0.0  ;;  %v17076_v22 = vld [vmem:[#allocation4 + $0x364] ss:$16 sps:$4 sm:$0xff]  }
 0x162   : > { %1681 = vmatpush1.bf16.msra.mxu0 %v17050_v11  ;;  %v524_v41 = vpop.f32.mrb[20].mxu0  ;;  %1907 = vmatpush1.bf16.msra.mxu1 %v17053_v12  ;;  %v747_v0 = vpack.c.bf16 %v703_v32, %v699_v30  ;;  %v632_v11 = vadd.f32 %v631_v9, %v19198_v2  ;;  %v633_v12 = vpop.f32.mrb[19].mxu1  ;;  %v17088_v9 = vld [vmem:[#allocation4 + $0x3a4] ss:$16 sps:$4 sm:$0xff]  }
 0x163   : > { %v525_v43 = vadd.f32 %v524_v41, %v19184_v48  ;;  %v526_v44 = vpop.f32.mrb[21].mxu0  ;;  %1682 = vmatprep.subr.bf16.mxu0 %v17058_v17  ;;  %1908 = vmatprep.subr.bf16.mxu1 %v17061_v18  ;;  %v17068_v17 = vld [vmem:[#allocation4 + $0x340] ss:$16 sps:$4 sm:$0xff]   ;;  %v17071_v18 = vld [vmem:[#allocation4 + $0x348] ss:$16 sps:$4 sm:$0xff]   ;;  %v634_v19 = vadd.f32 %v633_v12, %v19201_v7 }
 0x164   : > { %v527_v51 = vadd.f32 %v526_v44, %v19187_v49  ;;  %v528_v52 = vpop.f32.mrb[22].mxu0  ;;  %1625 = vmatprep.mubr.bf16.mxu0 %v747_v0  ;;  %1851 = vmatprep.mubr.bf16.mxu1 %v747_v0  ;;  %v704_v24 = vmax.f32 %v632_v11, 0.0  ;;  %v17082_v41 = vld [vmem:[#allocation4 + $0x384] ss:$16 sps:$4 sm:$0xff]   ;;  %v17085_v0 = vld [vmem:[#allocation4 + $0x38c] ss:$16 sps:$4 sm:$0xff]  }
 0x165   : > { %v529_v60 = vadd.f32 %v528_v52, %v19184_v48  ;;  %v530_v61 = vpop.f32.mrb[23].mxu0  ;;  %1626 = vmatmul.mubr.bf16.gmra.mrb[48].mxu0 %v746_v37  ;;  %1852 = vmatmul.mubr.bf16.gmra.mrb[48].mxu1 %v746_v37  ;;  %v706_v5 = vmax.f32 %v525_v43, 0.0  ;;  %v705_v28 = vmax.f32 %v634_v19, 0.0  ;;  %v637_v37 = vpop.f32.mrb[20].mxu1 }
 0x166   : > { %v531_v4 = vadd.f32 %v530_v61, %v19187_v49  ;;  %1683 = vmatpush1.bf16.msra.mxu0 %v17056_v33  ;;  %1909 = vmatpush1.bf16.msra.mxu1 %v17059_v34  ;;  %v707_v15 = vmax.f32 %v527_v51, 0.0  ;;  %v19260_v32 = vpack.c.bf16 %v704_v24, %v700_v13  ;;  %v638_v42 = vadd.f32 %v637_v37, %v19198_v2  ;;  %v639_v43 = vpop.f32.mrb[21].mxu1 }
 0x167   : > { %1684 = vmatprep.subr.bf16.mxu0 %v17064_v38  ;;  %1910 = vmatprep.subr.bf16.mxu1 %v17067_v39  ;;  %v710_v10 = vmax.f32 %v529_v60, 0.0  ;;  %v19263_v38 = vpack.c.bf16 %v705_v28, %v701_v20  ;;  %v640_v52 = vadd.f32 %v639_v43, %v19201_v7  ;;  %v17094_v28 = vld [vmem:[#allocation4 + $0x3c4] ss:$16 sps:$4 sm:$0xff]   ;;  %v17092_v43 = vld [vmem:[#allocation4 + $0x3c0] ss:$16 sps:$4 sm:$0xff]  }
 0x168   : > { %v711_v16 = vmax.f32 %v531_v4, 0.0  ;;  %v708_v61 = vmax.f32 %v638_v42, 0.0 }
 0x169   : > { %v750_v21 = vpack.c.bf16 %v710_v10, %v706_v5  ;;  %v709_v5 = vmax.f32 %v640_v52, 0.0  ;;  %v17091_v10 = vld [vmem:[#allocation4 + $0x3ac] ss:$16 sps:$4 sm:$0xff]  }
 0x16a   : > { %1685 = vmatpush1.bf16.msra.mxu0 %v17062_v53  ;;  %v534_v25 = vpop.f32.mrb[24].mxu0  ;;  %1911 = vmatpush1.bf16.msra.mxu1 %v17065_v55  ;;  %v751_v27 = vpack.c.bf16 %v711_v16, %v707_v15  ;;  %v641_v53 = vpop.f32.mrb[22].mxu1 }
 0x16b   : > { %v535_v29 = vadd.f32 %v534_v25, %v19184_v48  ;;  %v536_v30 = vpop.f32.mrb[25].mxu0  ;;  %1686 = vmatprep.subr.bf16.mxu0 %v17070_v62  ;;  %1912 = vmatprep.subr.bf16.mxu1 %v17073_v63  ;;  %v642_v56 = vadd.f32 %v641_v53, %v19198_v2  ;;  %v643_v60 = vpop.f32.mrb[23].mxu1  ;;  %v17100_v53 = vld [vmem:[#allocation4 + $0x3e4] ss:$16 sps:$4 sm:$0xff]  }
 0x16c   : > { %v537_v33 = vadd.f32 %v536_v30, %v19187_v49  ;;  %v538_v34 = vpop.f32.mrb[26].mxu0  ;;  %1635 = vmatprep.mubr.bf16.mxu0 %v751_v27  ;;  %1861 = vmatprep.mubr.bf16.mxu1 %v751_v27  ;;  %v644_v4 = vadd.f32 %v643_v60, %v19201_v7  ;;  %v17103_v60 = vld [vmem:[#allocation4 + $0x3ec] ss:$16 sps:$4 sm:$0xff]  }
 0x16d   : > { %v539_v39 = vadd.f32 %v538_v34, %v19184_v48  ;;  %v540_v40 = vpop.f32.mrb[27].mxu0  ;;  %1636 = vmatmul.mubr.bf16.gmra.mrb[52].mxu0 %v750_v21  ;;  %1862 = vmatmul.mubr.bf16.gmra.mrb[52].mxu1 %v750_v21  ;;  %v714_v51 = vmax.f32 %v535_v29, 0.0  ;;  %v712_v11 = vmax.f32 %v642_v56, 0.0  ;;  %v17086_v21 = vld [vmem:[#allocation4 + $0x3a0] ss:$16 sps:$4 sm:$0xff]  }
 0x16e   : > { %v541_v44 = vadd.f32 %v540_v40, %v19187_v49  ;;  %1687 = vmatpush1.bf16.msra.mxu0 %v17068_v17  ;;  %1913 = vmatpush1.bf16.msra.mxu1 %v17071_v18  ;;  %v715_v62 = vmax.f32 %v537_v33, 0.0  ;;  %v713_v15 = vmax.f32 %v644_v4, 0.0  ;;  %v17097_v29 = vld [vmem:[#allocation4 + $0x3cc] ss:$16 sps:$4 sm:$0xff]  }
 0x16f   : > { %1688 = vmatprep.subr.bf16.mxu0 %v17076_v22  ;;  %1914 = vmatprep.subr.bf16.mxu1 %v17079_v23  ;;  %v718_v55 = vmax.f32 %v539_v39, 0.0  ;;  %v19272_v18 = vpack.c.bf16 %v712_v11, %v708_v61  ;;  %v17089_v22 = vld [vmem:[#allocation4 + $0x3a8] ss:$16 sps:$4 sm:$0xff]   ;;  %v647_v23 = vpop.f32.mrb[24].mxu1 }
 0x170   : > { %v719_v63 = vmax.f32 %v541_v44, 0.0  ;;  %v19275_v24 = vpack.c.bf16 %v713_v15, %v709_v5  ;;  %v648_v30 = vadd.f32 %v647_v23, %v19198_v2  ;;  %v649_v33 = vpop.f32.mrb[25].mxu1  ;;  %v17095_v44 = vld [vmem:[#allocation4 + $0x3c8] ss:$16 sps:$4 sm:$0xff]  }
 0x171   : > { %v754_v6 = vpack.c.bf16 %v718_v55, %v714_v51  ;;  %v651_v37 = vpop.f32.mrb[26].mxu1 }
 0x172   : > { %1689 = vmatpush1.bf16.msra.mxu0 %v17074_v35  ;;  %v544_v12 = vpop.f32.mrb[28].mxu0  ;;  %1915 = vmatpush1.bf16.msra.mxu1 %v17077_v36  ;;  %v755_v13 = vpack.c.bf16 %v719_v63, %v715_v62  ;;  %v650_v36 = vadd.f32 %v649_v33, %v19201_v7  ;;  %v653_v40 = vpop.f32.mrb[27].mxu1  ;;  %v17098_v63 = vld [vmem:[#allocation4 + $0x3e0] ss:$16 sps:$4 sm:$0xff]  }
 0x173   : > { %v545_v16 = vadd.f32 %v544_v12, %v19184_v48  ;;  %v546_v17 = vpop.f32.mrb[29].mxu0  ;;  %1690 = vmatprep.subr.bf16.mxu0 %v17082_v41  ;;  %1916 = vmatprep.subr.bf16.mxu1 %v17085_v0  ;;  %v716_v41 = vmax.f32 %v648_v30, 0.0  ;;  %v654_v51 = vadd.f32 %v653_v40, %v19201_v7  ;;  %v17121_v30 = vld [vmem:[#allocation4 + $0x44c] ss:$16 sps:$4 sm:$0xff]   ;;  %v17116_v33 = vld [vmem:[#allocation4 + $0x440] ss:$16 sps:$4 sm:$0xff]  }
 0x174   : > { %v547_v19 = vadd.f32 %v546_v17, %v19187_v49  ;;  %v548_v20 = vpop.f32.mrb[30].mxu0  ;;  %1645 = vmatprep.mubr.bf16.mxu0 %v755_v13  ;;  %1871 = vmatprep.mubr.bf16.mxu1 %v755_v13  ;;  %v17131_v40 = vld [vmem:[#allocation4 + $0x488] ss:$16 sps:$4 sm:$0xff]  }
 0x175   : > { %v549_v25 = vadd.f32 %v548_v20, %v19184_v48  ;;  %v550_v27 = vpop.f32.mrb[31].mxu0  ;;  %1646 = vmatmul.mubr.bf16.gmra.mrb[56].mxu0 %v754_v6  ;;  %1872 = vmatmul.mubr.bf16.gmra.mrb[56].mxu1 %v754_v6  ;;  %v722_v35 = vmax.f32 %v545_v16, 0.0  ;;  %v652_v48 = vadd.f32 %v651_v37, %v19198_v2  ;;  %v721_v61 = vmax.f32 %v654_v51, 0.0  ;;  %v17130_v37 = vld [vmem:[#allocation4 + $0x484] ss:$16 sps:$4 sm:$0xff]  }
 0x176   : > { %v551_v34 = vadd.f32 %v550_v27, %v19187_v49  ;;  %1691 = vmatpush1.bf16.msra.mxu0 %v17080_v1  ;;  %1917 = vmatpush1.bf16.msra.mxu1 %v17083_v3  ;;  %v723_v0 = vmax.f32 %v547_v19, 0.0  ;;  %v717_v49 = vmax.f32 %v650_v36, 0.0  ;;  %v17101_v1 = vld [vmem:[#allocation4 + $0x3e8] ss:$16 sps:$4 sm:$0xff]   ;;  %v657_v3 = vpop.f32.mrb[28].mxu1 }
 0x177   : > { %1692 = vmatprep.subr.bf16.mxu0 %v17088_v9  ;;  %1918 = vmatprep.subr.bf16.mxu1 %v17091_v10  ;;  %v726_v39 = vmax.f32 %v549_v25, 0.0  ;;  %v720_v55 = vmax.f32 %v652_v48, 0.0  ;;  %v658_v5 = vadd.f32 %v657_v3, %v19198_v2  ;;  %v659_v6 = vpop.f32.mrb[29].mxu1  ;;  %v17106_v9 = vld [vmem:[#allocation4 + $0x404] ss:$16 sps:$4 sm:$0xff]  }
 0x178   : > { %v727_v42 = vmax.f32 %v551_v34, 0.0  ;;  %v19285_v4 = vpack.c.bf16 %v721_v61, %v717_v49  ;;  %v17109_v10 = vld [vmem:[#allocation4 + $0x40c] ss:$16 sps:$4 sm:$0xff]   ;;  %v660_v11 = vadd.f32 %v659_v6, %v19201_v7  ;;  %v661_v12 = vpop.f32.mrb[30].mxu1  ;;  %v17112_v25 = vld [vmem:[#allocation4 + $0x424] ss:$16 sps:$4 sm:$0xff]  }
 0x179   : > { %v758_v52 = vpack.c.bf16 %v726_v39, %v722_v35  ;;  %v19283_v62 = vpack.c.bf16 %v720_v55, %v716_v41  ;;  %v662_v13 = vadd.f32 %v661_v12, %v19198_v2  ;;  %v663_v15 = vpop.f32.mrb[31].mxu1  ;;  %v724_v16 = vmax.f32 %v658_v5, 0.0  ;;  %v17115_v27 = vld [vmem:[#allocation4 + $0x42c] ss:$16 sps:$4 sm:$0xff]   ;;  %v17119_v34 = vld [vmem:[#allocation4 + $0x448] ss:$16 sps:$4 sm:$0xff]  }
 0x17a   : > { %1693 = vmatpush1.bf16.msra.mxu0 %v17086_v21  ;;  %1919 = vmatpush1.bf16.msra.mxu1 %v17089_v22  ;;  %v759_v56 = vpack.c.bf16 %v727_v42, %v723_v0  ;;  %v664_v17 = vadd.f32 %v663_v15, %v19201_v7  ;;  %v725_v19 = vmax.f32 %v660_v11, 0.0  ;;  %v17104_v21 = vld [vmem:[#allocation4 + $0x400] ss:$16 sps:$4 sm:$0xff]   ;;  %v17107_v22 = vld [vmem:[#allocation4 + $0x408] ss:$16 sps:$4 sm:$0xff]  }
 0x17b   : > { %1694 = vmatprep.subr.bf16.mxu0 %v17094_v28  ;;  %1920 = vmatprep.subr.bf16.mxu1 %v17097_v29  ;;  %v728_v20 = vmax.f32 %v662_v13, 0.0  ;;  %v17110_v7 = vld [vmem:[#allocation4 + $0x420] ss:$16 sps:$4 sm:$0xff]   ;;  %v17118_v29 = vld [vmem:[#allocation4 + $0x444] ss:$16 sps:$4 sm:$0xff]  }
 0x17c   : > { %1655 = vmatprep.mubr.bf16.mxu0 %v759_v56  ;;  %1881 = vmatprep.mubr.bf16.mxu1 %v759_v56  ;;  %v729_v23 = vmax.f32 %v664_v17, 0.0  ;;  %v17124_v35 = vld [vmem:[#allocation4 + $0x464] ss:$16 sps:$4 sm:$0xff]   ;;  %v17127_v36 = vld [vmem:[#allocation4 + $0x46c] ss:$16 sps:$4 sm:$0xff]  }
 0x17d   : > { %1656 = vmatmul.mubr.bf16.gmra.mrb[60].mxu0 %v758_v52  ;;  %1882 = vmatmul.mubr.bf16.gmra.mrb[60].mxu1 %v758_v52  ;;  %v19293_v28 = vpack.c.bf16 %v728_v20, %v724_v16  ;;  %v17133_v39 = vld [vmem:[#allocation4 + $0x48c] ss:$16 sps:$4 sm:$0xff]   ;;  %v17128_v48 = vld [vmem:[#allocation4 + $0x480] ss:$16 sps:$4 sm:$0xff]   ;;  %v17136_v41 = vld [vmem:[#allocation4 + $0x4a4] ss:$16 sps:$4 sm:$0xff]  }
 0x17e   : > { %1695 = vmatpush1.bf16.msra.mxu0 %v17092_v43  ;;  %1921 = vmatpush1.bf16.msra.mxu1 %v17095_v44  ;;  %v19295_v2 = vpack.c.bf16 %v729_v23, %v725_v19  ;;  %v17139_v0 = vld [vmem:[#allocation4 + $0x4ac] ss:$16 sps:$4 sm:$0xff]   ;;  %v17142_v42 = vld [vmem:[#allocation4 + $0x4c4] ss:$16 sps:$4 sm:$0xff]   ;;  %v17140_v44 = vld [vmem:[#allocation4 + $0x4c0] ss:$16 sps:$4 sm:$0xff]  }
 0x17f   : > { %1696 = vmatprep.subr.bf16.mxu0 %v17100_v53  ;;  %1698 = vmatprep.mubr.bf16.mxu0 %v19215_v54  ;;  %v17145_v43 = vld [vmem:[#allocation4 + $0x4cc] ss:$16 sps:$4 sm:$0xff]   ;;  %v17143_v51 = vld [vmem:[#allocation4 + $0x4c8] ss:$16 sps:$4 sm:$0xff]   ;;  %v17148_v49 = vld [vmem:[#allocation4 + $0x4e4] ss:$16 sps:$4 sm:$0xff]  }
 0x180   : > { %1922 = vmatprep.subr.bf16.mxu1 %v17103_v60  ;;  %1924 = vmatprep.mubr.bf16.mxu1 %v19215_v54  ;;  %v17113_v54 = vld [vmem:[#allocation4 + $0x428] ss:$16 sps:$4 sm:$0xff]   ;;  %v17151_v52 = vld [vmem:[#allocation4 + $0x4ec] ss:$16 sps:$4 sm:$0xff]   ;;  %v17154_v53 = vld [vmem:[#allocation4 + $0x504] ss:$16 sps:$4 sm:$0xff]  }
 0x181   : > { %v17157_v55 = vld [vmem:[#allocation4 + $0x50c] ss:$16 sps:$4 sm:$0xff]   ;;  %v17152_v56 = vld [vmem:[#allocation4 + $0x500] ss:$16 sps:$4 sm:$0xff]   ;;  %v17155_v60 = vld [vmem:[#allocation4 + $0x508] ss:$16 sps:$4 sm:$0xff]  }
 0x182   : > { %1697 = vmatpush1.bf16.msra.mxu0 %v17098_v63  ;;  %1923 = vmatpush1.bf16.msra.mxu1 %v17101_v1  ;;  %v17160_v61 = vld [vmem:[#allocation4 + $0x524] ss:$16 sps:$4 sm:$0xff]   ;;  %v17163_v63 = vld [vmem:[#allocation4 + $0x52c] ss:$16 sps:$4 sm:$0xff]   ;;  %v17164_v5 = vld [vmem:[#allocation4 + $0x540] ss:$16 sps:$4 sm:$0xff]  }
 0x183   : > { %2829 = vmatprep.subr.bf16.mxu0 %v17106_v9  ;;  %3055 = vmatprep.subr.bf16.mxu1 %v17109_v10  ;;  %v17166_v1 = vld [vmem:[#allocation4 + $0x544] ss:$16 sps:$4 sm:$0xff]   ;;  %v17169_v3 = vld [vmem:[#allocation4 + $0x54c] ss:$16 sps:$4 sm:$0xff]   ;;  %v17167_v6 = vld [vmem:[#allocation4 + $0x548] ss:$16 sps:$4 sm:$0xff]  }
 0x184   : > { %v17172_v9 = vld [vmem:[#allocation4 + $0x564] ss:$16 sps:$4 sm:$0xff]   ;;  %v17175_v10 = vld [vmem:[#allocation4 + $0x56c] ss:$16 sps:$4 sm:$0xff]   ;;  %v17176_v13 = vld [vmem:[#allocation4 + $0x580] ss:$16 sps:$4 sm:$0xff]  }
 0x185   : > { %1699 = vmatmul.mubr.bf16.vlgmr.msra.gmra.mrb[32].mxu0 %v19212_v45  ;;  %1925 = vmatmul.mubr.bf16.vlgmr.msra.gmra.mrb[32].mxu1 %v19212_v45  ;;  %v17122_v45 = vld [vmem:[#allocation4 + $0x460] ss:$16 sps:$4 sm:$0xff]   ;;  %v17178_v11 = vld [vmem:[#allocation4 + $0x584] ss:$16 sps:$4 sm:$0xff]   ;;  %v17181_v12 = vld [vmem:[#allocation4 + $0x58c] ss:$16 sps:$4 sm:$0xff]  }
 0x186   : > { %1708 = vmatprep.mubr.bf16.mxu0 %v19227_v31  ;;  %1934 = vmatprep.mubr.bf16.mxu1 %v19227_v31  ;;  %v17125_v31 = vld [vmem:[#allocation4 + $0x468] ss:$16 sps:$4 sm:$0xff]   ;;  %v17184_v16 = vld [vmem:[#allocation4 + $0x5a4] ss:$16 sps:$4 sm:$0xff]   ;;  %v17187_v17 = vld [vmem:[#allocation4 + $0x5ac] ss:$16 sps:$4 sm:$0xff]  }
 0x187   : > { %2830 = vmatpush1.bf16.msra.mxu0 %v17104_v21  ;;  %3056 = vmatpush1.bf16.msra.mxu1 %v17107_v22  ;;  %v17179_v15 = vld [vmem:[#allocation4 + $0x588] ss:$16 sps:$4 sm:$0xff]   ;;  %v17190_v19 = vld [vmem:[#allocation4 + $0x5c4] ss:$16 sps:$4 sm:$0xff]   ;;  %v17193_v20 = vld [vmem:[#allocation4 + $0x5cc] ss:$16 sps:$4 sm:$0xff]  }
 0x188   : > { %2831 = vmatprep.subr.bf16.mxu0 %v17112_v25  ;;  %3057 = vmatprep.subr.bf16.mxu1 %v17115_v27  ;;  %v17188_v21 = vld [vmem:[#allocation4 + $0x5c0] ss:$16 sps:$4 sm:$0xff]   ;;  %v17196_v22 = vld [vmem:[#allocation4 + $0x5e4] ss:$16 sps:$4 sm:$0xff]   ;;  %v17199_v23 = vld [vmem:[#allocation4 + $0x5ec] ss:$16 sps:$4 sm:$0xff]  }
 0x189   : > { %v17194_v25 = vld [vmem:[#allocation4 + $0x5e0] ss:$16 sps:$4 sm:$0xff]   ;;  %v17197_v27 = vld [vmem:[#allocation4 + $0x5e8] ss:$16 sps:$4 sm:$0xff]  }
 0x18b   : > { %2832 = vmatpush1.bf16.msra.mxu0 %v17110_v7  ;;  %3058 = vmatpush1.bf16.msra.mxu1 %v17113_v54  ;;  %v17205_v7 = vld [vmem:[#allocation4 + $0x60c] ss:$16 sps:$4 sm:$0xff]  }
 0x18c   : > { %2833 = vmatprep.subr.bf16.mxu0 %v17118_v29  ;;  %3059 = vmatprep.subr.bf16.mxu1 %v17121_v30 }
 0x18d   : > { %1709 = vmatmul.mubr.bf16.gmra.mrb[36].mxu0 %v19224_v26  ;;  %1935 = vmatmul.mubr.bf16.gmra.mrb[36].mxu1 %v19224_v26  ;;  %v17134_v26 = vld [vmem:[#allocation4 + $0x4a0] ss:$16 sps:$4 sm:$0xff]  }
 0x18e   : > { %1718 = vmatprep.mubr.bf16.mxu0 %v19239_v14  ;;  %1944 = vmatprep.mubr.bf16.mxu1 %v19239_v14  ;;  %v17137_v14 = vld [vmem:[#allocation4 + $0x4a8] ss:$16 sps:$4 sm:$0xff]  }
 0x18f   : > { %2834 = vmatpush1.bf16.msra.mxu0 %v17116_v33  ;;  %3060 = vmatpush1.bf16.msra.mxu1 %v17119_v34 }
 0x190   : > { %2835 = vmatprep.subr.bf16.mxu0 %v17124_v35  ;;  %3061 = vmatprep.subr.bf16.mxu1 %v17127_v36 }
 0x193   : > { %2836 = vmatpush1.bf16.msra.mxu0 %v17122_v45  ;;  %3062 = vmatpush1.bf16.msra.mxu1 %v17125_v31 }
 0x194   : > { %2837 = vmatprep.subr.bf16.mxu0 %v17130_v37  ;;  %3063 = vmatprep.subr.bf16.mxu1 %v17133_v39 }
 0x195   : > { %1719 = vmatmul.mubr.bf16.gmra.mrb[40].mxu0 %v19236_v8  ;;  %1945 = vmatmul.mubr.bf16.gmra.mrb[40].mxu1 %v19236_v8  ;;  %v17146_v8 = vld [vmem:[#allocation4 + $0x4e0] ss:$16 sps:$4 sm:$0xff]  }
 0x196   : > { %1728 = vmatprep.mubr.bf16.mxu0 %v19251_v58  ;;  %1954 = vmatprep.mubr.bf16.mxu1 %v19251_v58  ;;  %v17149_v58 = vld [vmem:[#allocation4 + $0x4e8] ss:$16 sps:$4 sm:$0xff]  }
 0x197   : > { %2838 = vmatpush1.bf16.msra.mxu0 %v17128_v48  ;;  %3064 = vmatpush1.bf16.msra.mxu1 %v17131_v40 }
 0x198   : > { %2839 = vmatprep.subr.bf16.mxu0 %v17136_v41  ;;  %3065 = vmatprep.subr.bf16.mxu1 %v17139_v0 }
 0x19b   : > { %2840 = vmatpush1.bf16.msra.mxu0 %v17134_v26  ;;  %3066 = vmatpush1.bf16.msra.mxu1 %v17137_v14 }
 0x19c   : > { %2841 = vmatprep.subr.bf16.mxu0 %v17142_v42  ;;  %3067 = vmatprep.subr.bf16.mxu1 %v17145_v43 }
 0x19d   : > { %1729 = vmatmul.mubr.bf16.gmra.mrb[44].mxu0 %v19248_v50  ;;  %1955 = vmatmul.mubr.bf16.gmra.mrb[44].mxu1 %v19248_v50  ;;  %v17158_v50 = vld [vmem:[#allocation4 + $0x520] ss:$16 sps:$4 sm:$0xff]  }
 0x19e   : > { %1738 = vmatprep.mubr.bf16.mxu0 %v19263_v38  ;;  %1964 = vmatprep.mubr.bf16.mxu1 %v19263_v38  ;;  %v17161_v38 = vld [vmem:[#allocation4 + $0x528] ss:$16 sps:$4 sm:$0xff]  }
 0x19f   : > { %2842 = vmatpush1.bf16.msra.mxu0 %v17140_v44  ;;  %3068 = vmatpush1.bf16.msra.mxu1 %v17143_v51 }
 0x1a0   : > { %2843 = vmatprep.subr.bf16.mxu0 %v17148_v49  ;;  %3069 = vmatprep.subr.bf16.mxu1 %v17151_v52 }
 0x1a3   : > { %2844 = vmatpush1.bf16.msra.mxu0 %v17146_v8  ;;  %3070 = vmatpush1.bf16.msra.mxu1 %v17149_v58  ;;  %v17200_v8 = vld [vmem:[#allocation4 + $0x600] ss:$16 sps:$4 sm:$0xff]   ;;  %v17203_v58 = vld [vmem:[#allocation4 + $0x608] ss:$16 sps:$4 sm:$0xff]  }
 0x1a4   : > { %2845 = vmatprep.subr.bf16.mxu0 %v17154_v53  ;;  %3071 = vmatprep.subr.bf16.mxu1 %v17157_v55  ;;  %v17208_v55 = vld [vmem:[#allocation4 + $0x624] ss:$16 sps:$4 sm:$0xff]  }
 0x1a5   : > { %1739 = vmatmul.mubr.bf16.gmra.mrb[48].mxu0 %v19260_v32  ;;  %1965 = vmatmul.mubr.bf16.gmra.mrb[48].mxu1 %v19260_v32  ;;  %v17170_v32 = vld [vmem:[#allocation4 + $0x560] ss:$16 sps:$4 sm:$0xff]  }
 0x1a6   : > { %1748 = vmatprep.mubr.bf16.mxu0 %v19275_v24  ;;  %1974 = vmatprep.mubr.bf16.mxu1 %v19275_v24  ;;  %v17173_v24 = vld [vmem:[#allocation4 + $0x568] ss:$16 sps:$4 sm:$0xff]  }
 0x1a7   : > { %2846 = vmatpush1.bf16.msra.mxu0 %v17152_v56  ;;  %3072 = vmatpush1.bf16.msra.mxu1 %v17155_v60  ;;  %v17211_v56 = vld [vmem:[#allocation4 + $0x62c] ss:$16 sps:$4 sm:$0xff]  }
 0x1a8   : > { %2847 = vmatprep.subr.bf16.mxu0 %v17160_v61  ;;  %3073 = vmatprep.subr.bf16.mxu1 %v17163_v63 }
 0x1ab   : > { %2848 = vmatpush1.bf16.msra.mxu0 %v17158_v50  ;;  %3074 = vmatpush1.bf16.msra.mxu1 %v17161_v38 }
 0x1ac   : > { %2849 = vmatprep.subr.bf16.mxu0 %v17166_v1  ;;  %3075 = vmatprep.subr.bf16.mxu1 %v17169_v3 }
 0x1ad   : > { %1749 = vmatmul.mubr.bf16.gmra.mrb[52].mxu0 %v19272_v18  ;;  %1975 = vmatmul.mubr.bf16.gmra.mrb[52].mxu1 %v19272_v18  ;;  %v17182_v18 = vld [vmem:[#allocation4 + $0x5a0] ss:$16 sps:$4 sm:$0xff]  }
 0x1ae   : > { %1758 = vmatprep.mubr.bf16.mxu0 %v19285_v4  ;;  %1984 = vmatprep.mubr.bf16.mxu1 %v19285_v4  ;;  %v17185_v4 = vld [vmem:[#allocation4 + $0x5a8] ss:$16 sps:$4 sm:$0xff]  }
 0x1af   : > { %2850 = vmatpush1.bf16.msra.mxu0 %v17164_v5  ;;  %3076 = vmatpush1.bf16.msra.mxu1 %v17167_v6  ;;  %v17206_v5 = vld [vmem:[#allocation4 + $0x620] ss:$16 sps:$4 sm:$0xff]   ;;  %v17209_v6 = vld [vmem:[#allocation4 + $0x628] ss:$16 sps:$4 sm:$0xff]  }
 0x1b0   : > { %2851 = vmatprep.subr.bf16.mxu0 %v17172_v9  ;;  %3077 = vmatprep.subr.bf16.mxu1 %v17175_v10 }
 0x1b3   : > { %2852 = vmatpush1.bf16.msra.mxu0 %v17170_v32  ;;  %3078 = vmatpush1.bf16.msra.mxu1 %v17173_v24 }
 0x1b4   : > { %2853 = vmatprep.subr.bf16.mxu0 %v17178_v11  ;;  %3079 = vmatprep.subr.bf16.mxu1 %v17181_v12  ;;  %v17214_v12 = vld [vmem:[#allocation4 + $0x644] ss:$16 sps:$4 sm:$0xff]  }
 0x1b5   : > { %1759 = vmatmul.mubr.bf16.gmra.mrb[56].mxu0 %v19283_v62  ;;  %1985 = vmatmul.mubr.bf16.gmra.mrb[56].mxu1 %v19283_v62  ;;  %v17191_v62 = vld [vmem:[#allocation4 + $0x5c8] ss:$16 sps:$4 sm:$0xff]  }
 0x1b6   : > { %1768 = vmatprep.mubr.bf16.mxu0 %v19295_v2  ;;  %1994 = vmatprep.mubr.bf16.mxu1 %v19295_v2  ;;  %v17202_v2 = vld [vmem:[#allocation4 + $0x604] ss:$16 sps:$4 sm:$0xff]  }
 0x1b7   : > { %2854 = vmatpush1.bf16.msra.mxu0 %v17176_v13  ;;  %3080 = vmatpush1.bf16.msra.mxu1 %v17179_v15  ;;  %v17217_v13 = vld [vmem:[#allocation4 + $0x64c] ss:$16 sps:$4 sm:$0xff]  }
 0x1b8   : > { %2855 = vmatprep.subr.bf16.mxu0 %v17184_v16  ;;  %3081 = vmatprep.subr.bf16.mxu1 %v17187_v17 }
 0x1bb   : > { %2856 = vmatpush1.bf16.msra.mxu0 %v17182_v18  ;;  %3082 = vmatpush1.bf16.msra.mxu1 %v17185_v4 }
 0x1bc   : > { %2857 = vmatprep.subr.bf16.mxu0 %v17190_v19  ;;  %3083 = vmatprep.subr.bf16.mxu1 %v17193_v20 }
 0x1bd   : > { %1769 = vmatmul.mubr.bf16.gmra.mrb[60].mxu0 %v19293_v28  ;;  %1995 = vmatmul.mubr.bf16.gmra.mrb[60].mxu1 %v19293_v28  ;;  %v891_v28 = vld [vmem:[#allocation6 + $0x1] ss:$8 sm:$0xf] }
 0x1be   : > { %v19328_v54 = vrot.slane %v891_v28, %v19179_v46  ;;  %v19331_v29 = vrot.slane %v891_v28, %v19192_v57  ;;  %v19334_v34 = vrot.slane %v891_v28, %v19181_v47  ;;  %v19337_v35 = vrot.slane %v891_v28, %v19195_v59 }
 0x1bf   : > { %2858 = vmatpush1.bf16.msra.mxu0 %v17188_v21  ;;  %3084 = vmatpush1.bf16.msra.mxu1 %v17191_v62  ;;  %v17212_v21 = vld [vmem:[#allocation4 + $0x640] ss:$16 sps:$4 sm:$0xff]   ;;  %v17215_v62 = vld [vmem:[#allocation4 + $0x648] ss:$16 sps:$4 sm:$0xff]  }
 0x1c0   : > { %2859 = vmatprep.subr.bf16.mxu0 %v17196_v22  ;;  %3085 = vmatprep.subr.bf16.mxu1 %v17199_v23  ;;  %v17220_v23 = vld [vmem:[#allocation4 + $0x664] ss:$16 sps:$4 sm:$0xff]  }
 0x1c3   : > { %2860 = vmatpush1.bf16.msra.mxu0 %v17194_v25  ;;  %3086 = vmatpush1.bf16.msra.mxu1 %v17197_v27  ;;  %v17223_v25 = vld [vmem:[#allocation4 + $0x66c] ss:$16 sps:$4 sm:$0xff]  }
 0x1c4   : > { %2942 = vmatprep.subr.bf16.mxu0 %v17202_v2  ;;  %3168 = vmatprep.subr.bf16.mxu1 %v17205_v7 }
 0x258   : > { %v1700_v30 = vpop.f32.mrb[32].mxu0  ;;  %v1926_v33 = vpop.f32.mrb[32].mxu1 }
 0x259   : > { %v1702_v36 = vpop.f32.mrb[33].mxu0  ;;  %v1928_v45 = vpop.f32.mrb[33].mxu1  ;;  %v15564_v39 = vadd.f32 %v1700_v30, %v19328_v54  ;;  %v15596_v48 = vadd.f32 %v1926_v33, %v19331_v29 }
 0x25a   : > { %v1704_v31 = vpop.f32.mrb[34].mxu0  ;;  %v1930_v37 = vpop.f32.mrb[34].mxu1  ;;  %v15565_v14 = vadd.f32 %v1702_v36, %v19334_v34  ;;  %v15597_v42 = vadd.f32 %v1928_v45, %v19337_v35  ;;  %v17218_v45 = vld [vmem:[#allocation4 + $0x660] ss:$16 sps:$4 sm:$0xff]  }
 0x25b   : > { %v15566_v40 = vadd.f32 %v1704_v31, %v19328_v54  ;;  %v15598_v41 = vadd.f32 %v1930_v37, %v19331_v29  ;;  %v1706_v0 = vpop.f32.mrb[35].mxu0  ;;  %v1932_v26 = vpop.f32.mrb[35].mxu1  ;;  %v17221_v31 = vld [vmem:[#allocation4 + $0x668] ss:$16 sps:$4 sm:$0xff]  }
 0x25c   : > { %v15567_v43 = vadd.f32 %v1706_v0, %v19334_v34  ;;  %v15599_v44 = vadd.f32 %v1932_v26, %v19337_v35  ;;  %v17226_v0 = vld [vmem:[#allocation4 + $0x684] ss:$16 sps:$4 sm:$0xff]   ;;  %v17229_v26 = vld [vmem:[#allocation4 + $0x68c] ss:$16 sps:$4 sm:$0xff]  }
 0x25d   : > { %v2005_v51 = vpack.c.bf16 %v15566_v40, %v15564_v39  ;;  %v19347_v49 = vpack.c.bf16 %v15598_v41, %v15596_v48 }
 0x25e   : > { %v2006_v52 = vpack.c.bf16 %v15567_v43, %v15565_v14  ;;  %v19349_v53 = vpack.c.bf16 %v15599_v44, %v15597_v42 }
 0x260   : > { %v1710_v60 = vpop.f32.mrb[36].mxu0  ;;  %v1936_v61 = vpop.f32.mrb[36].mxu1  ;;  %2861 = vmatprep.mubr.bf16.mxu0 %v2006_v52  ;;  %3087 = vmatprep.mubr.bf16.mxu1 %v2006_v52 }
 0x261   : > { %v1712_v63 = vpop.f32.mrb[37].mxu0  ;;  %v1938_v50 = vpop.f32.mrb[37].mxu1  ;;  %2862 = vmatmul.mubr.bf16.vlgmr.msra.gmra.mrb[64].mxu0 %v2005_v51  ;;  %3088 = vmatmul.mubr.bf16.vlgmr.msra.gmra.mrb[64].mxu1 %v2005_v51  ;;  %v15568_v38 = vadd.f32 %v1710_v60, %v19328_v54  ;;  %v15600_v9 = vadd.f32 %v1936_v61, %v19331_v29  ;;  %v17232_v60 = vld [vmem:[#allocation4 + $0x6a4] ss:$16 sps:$4 sm:$0xff]   ;;  %v17235_v61 = vld [vmem:[#allocation4 + $0x6ac] ss:$16 sps:$4 sm:$0xff]  }
 0x262   : > { %2943 = vmatpush1.bf16.msra.mxu0 %v17200_v8  ;;  %v1714_v1 = vpop.f32.mrb[38].mxu0  ;;  %v1940_v3 = vpop.f32.mrb[38].mxu1  ;;  %3169 = vmatpush1.bf16.msra.mxu1 %v17203_v58  ;;  %v15569_v15 = vadd.f32 %v1712_v63, %v19334_v34  ;;  %v15601_v16 = vadd.f32 %v1938_v50, %v19337_v35  ;;  %v17224_v58 = vld [vmem:[#allocation4 + $0x680] ss:$16 sps:$4 sm:$0xff]  }
 0x263   : > { %v15570_v10 = vadd.f32 %v1714_v1, %v19328_v54  ;;  %v15602_v32 = vadd.f32 %v1940_v3, %v19331_v29  ;;  %v1716_v24 = vpop.f32.mrb[39].mxu0  ;;  %v1942_v11 = vpop.f32.mrb[39].mxu1  ;;  %2944 = vmatprep.subr.bf16.mxu0 %v17208_v55  ;;  %3170 = vmatprep.subr.bf16.mxu1 %v17211_v56  ;;  %v17227_v55 = vld [vmem:[#allocation4 + $0x688] ss:$16 sps:$4 sm:$0xff]  }
 0x264   : > { %v15571_v17 = vadd.f32 %v1716_v24, %v19334_v34  ;;  %v15603_v18 = vadd.f32 %v1942_v11, %v19337_v35  ;;  %v17233_v1 = vld [vmem:[#allocation4 + $0x6a8] ss:$16 sps:$4 sm:$0xff]  }
 0x265   : > { %v2009_v4 = vpack.c.bf16 %v15570_v10, %v15568_v38  ;;  %v19359_v19 = vpack.c.bf16 %v15602_v32, %v15600_v9  ;;  %v17230_v38 = vld [vmem:[#allocation4 + $0x6a0] ss:$16 sps:$4 sm:$0xff]   ;;  %v17241_v9 = vld [vmem:[#allocation4 + $0x6cc] ss:$16 sps:$4 sm:$0xff]  }
 0x266   : > { %2945 = vmatpush1.bf16.msra.mxu0 %v17206_v5  ;;  %3171 = vmatpush1.bf16.msra.mxu1 %v17209_v6  ;;  %v2010_v20 = vpack.c.bf16 %v15571_v17, %v15569_v15  ;;  %v19361_v22 = vpack.c.bf16 %v15603_v18, %v15601_v16  ;;  %v17238_v6 = vld [vmem:[#allocation4 + $0x6c4] ss:$16 sps:$4 sm:$0xff]  }
 0x267   : > { %2946 = vmatprep.subr.bf16.mxu0 %v17214_v12  ;;  %3172 = vmatprep.subr.bf16.mxu1 %v17217_v13 }
 0x268   : > { %v1720_v27 = vpop.f32.mrb[40].mxu0  ;;  %v1946_v2 = vpop.f32.mrb[40].mxu1  ;;  %2871 = vmatprep.mubr.bf16.mxu0 %v2010_v20  ;;  %3097 = vmatprep.mubr.bf16.mxu1 %v2010_v20 }
 0x269   : > { %v1722_v7 = vpop.f32.mrb[41].mxu0  ;;  %v1948_v28 = vpop.f32.mrb[41].mxu1  ;;  %2872 = vmatmul.mubr.bf16.gmra.mrb[68].mxu0 %v2009_v4  ;;  %3098 = vmatmul.mubr.bf16.gmra.mrb[68].mxu1 %v2009_v4  ;;  %v15572_v30 = vadd.f32 %v1720_v27, %v19328_v54  ;;  %v15604_v37 = vadd.f32 %v1946_v2, %v19331_v29  ;;  %v17247_v27 = vld [vmem:[#allocation4 + $0x6ec] ss:$16 sps:$4 sm:$0xff]  }
 0x26a   : > { %2947 = vmatpush1.bf16.msra.mxu0 %v17212_v21  ;;  %v1724_v33 = vpop.f32.mrb[42].mxu0  ;;  %v1950_v36 = vpop.f32.mrb[42].mxu1  ;;  %3173 = vmatpush1.bf16.msra.mxu1 %v17215_v62  ;;  %v15573_v14 = vadd.f32 %v1722_v7, %v19334_v34  ;;  %v15605_v42 = vadd.f32 %v1948_v28, %v19337_v35  ;;  %v17236_v21 = vld [vmem:[#allocation4 + $0x6c0] ss:$16 sps:$4 sm:$0xff]   ;;  %v17239_v62 = vld [vmem:[#allocation4 + $0x6c8] ss:$16 sps:$4 sm:$0xff]  }
 0x26b   : > { %v15574_v39 = vadd.f32 %v1724_v33, %v19328_v54  ;;  %v15606_v48 = vadd.f32 %v1950_v36, %v19331_v29  ;;  %v1726_v40 = vpop.f32.mrb[43].mxu0  ;;  %v1952_v41 = vpop.f32.mrb[43].mxu1  ;;  %2948 = vmatprep.subr.bf16.mxu0 %v17220_v23  ;;  %3174 = vmatprep.subr.bf16.mxu1 %v17223_v25  ;;  %v17244_v25 = vld [vmem:[#allocation4 + $0x6e4] ss:$16 sps:$4 sm:$0xff]   ;;  %v17242_v36 = vld [vmem:[#allocation4 + $0x6e0] ss:$16 sps:$4 sm:$0xff]  }
 0x26c   : > { %v15575_v43 = vadd.f32 %v1726_v40, %v19334_v34  ;;  %v15607_v44 = vadd.f32 %v1952_v41, %v19337_v35 }
 0x26d   : > { %v2013_v51 = vpack.c.bf16 %v15574_v39, %v15572_v30  ;;  %v19371_v52 = vpack.c.bf16 %v15606_v48, %v15604_v37  ;;  %v17250_v39 = vld [vmem:[#allocation4 + $0x704] ss:$16 sps:$4 sm:$0xff]   ;;  %v17253_v48 = vld [vmem:[#allocation4 + $0x70c] ss:$16 sps:$4 sm:$0xff]  }
 0x26e   : > { %2949 = vmatpush1.bf16.msra.mxu0 %v17218_v45  ;;  %3175 = vmatpush1.bf16.msra.mxu1 %v17221_v31  ;;  %v2014_v8 = vpack.c.bf16 %v15575_v43, %v15573_v14  ;;  %v19373_v56 = vpack.c.bf16 %v15607_v44, %v15605_v42  ;;  %v17245_v45 = vld [vmem:[#allocation4 + $0x6e8] ss:$16 sps:$4 sm:$0xff]  }
 0x26f   : > { %2950 = vmatprep.subr.bf16.mxu0 %v17226_v0  ;;  %3176 = vmatprep.subr.bf16.mxu1 %v17229_v26 }
 0x270   : > { %v1730_v63 = vpop.f32.mrb[44].mxu0  ;;  %v1956_v50 = vpop.f32.mrb[44].mxu1  ;;  %2881 = vmatprep.mubr.bf16.mxu0 %v2014_v8  ;;  %3107 = vmatprep.mubr.bf16.mxu1 %v2014_v8 }
 0x271   : > { %v1732_v3 = vpop.f32.mrb[45].mxu0  ;;  %v1958_v5 = vpop.f32.mrb[45].mxu1  ;;  %2882 = vmatmul.mubr.bf16.gmra.mrb[72].mxu0 %v2013_v51  ;;  %3108 = vmatmul.mubr.bf16.gmra.mrb[72].mxu1 %v2013_v51  ;;  %v15576_v10 = vadd.f32 %v1730_v63, %v19328_v54  ;;  %v15608_v11 = vadd.f32 %v1956_v50, %v19331_v29  ;;  %v17256_v50 = vld [vmem:[#allocation4 + $0x724] ss:$16 sps:$4 sm:$0xff]  }
 0x272   : > { %2951 = vmatpush1.bf16.msra.mxu0 %v17224_v58  ;;  %v1734_v32 = vpop.f32.mrb[46].mxu0  ;;  %v1960_v24 = vpop.f32.mrb[46].mxu1  ;;  %3177 = vmatpush1.bf16.msra.mxu1 %v17227_v55  ;;  %v15577_v17 = vadd.f32 %v1732_v3, %v19334_v34  ;;  %v15609_v18 = vadd.f32 %v1958_v5, %v19337_v35 }
 0x273   : > { %v15578_v12 = vadd.f32 %v1734_v32, %v19328_v54  ;;  %v15610_v13 = vadd.f32 %v1960_v24, %v19331_v29  ;;  %v1736_v15 = vpop.f32.mrb[47].mxu0  ;;  %v1962_v16 = vpop.f32.mrb[47].mxu1  ;;  %2952 = vmatprep.subr.bf16.mxu0 %v17232_v60  ;;  %3178 = vmatprep.subr.bf16.mxu1 %v17235_v61  ;;  %v17248_v60 = vld [vmem:[#allocation4 + $0x700] ss:$16 sps:$4 sm:$0xff]   ;;  %v17251_v61 = vld [vmem:[#allocation4 + $0x708] ss:$16 sps:$4 sm:$0xff]  }
 0x274   : > { %v15579_v4 = vadd.f32 %v1736_v15, %v19334_v34  ;;  %v15611_v20 = vadd.f32 %v1962_v16, %v19337_v35  ;;  %v17257_v32 = vld [vmem:[#allocation4 + $0x728] ss:$16 sps:$4 sm:$0xff]  }
 0x275   : > { %v2017_v23 = vpack.c.bf16 %v15578_v12, %v15576_v10  ;;  %v19383_v2 = vpack.c.bf16 %v15610_v13, %v15608_v11  ;;  %v17254_v10 = vld [vmem:[#allocation4 + $0x720] ss:$16 sps:$4 sm:$0xff]   ;;  %v17262_v12 = vld [vmem:[#allocation4 + $0x744] ss:$16 sps:$4 sm:$0xff]   ;;  %v17265_v13 = vld [vmem:[#allocation4 + $0x74c] ss:$16 sps:$4 sm:$0xff]  }
 0x276   : > { %2953 = vmatpush1.bf16.msra.mxu0 %v17230_v38  ;;  %3179 = vmatpush1.bf16.msra.mxu1 %v17233_v1  ;;  %v2018_v7 = vpack.c.bf16 %v15579_v4, %v15577_v17  ;;  %v19385_v28 = vpack.c.bf16 %v15611_v20, %v15609_v18  ;;  %v17259_v38 = vld [vmem:[#allocation4 + $0x72c] ss:$16 sps:$4 sm:$0xff]  }
 0x277   : > { %2954 = vmatprep.subr.bf16.mxu0 %v17238_v6  ;;  %3180 = vmatprep.subr.bf16.mxu1 %v17241_v9 }
 0x278   : > { %v1740_v30 = vpop.f32.mrb[48].mxu0  ;;  %v1966_v33 = vpop.f32.mrb[48].mxu1  ;;  %2891 = vmatprep.mubr.bf16.mxu0 %v2018_v7  ;;  %3117 = vmatprep.mubr.bf16.mxu1 %v2018_v7 }
 0x279   : > { %v1742_v31 = vpop.f32.mrb[49].mxu0  ;;  %v1968_v37 = vpop.f32.mrb[49].mxu1  ;;  %2892 = vmatmul.mubr.bf16.gmra.mrb[76].mxu0 %v2017_v23  ;;  %3118 = vmatmul.mubr.bf16.gmra.mrb[76].mxu1 %v2017_v23  ;;  %v15580_v40 = vadd.f32 %v1740_v30, %v19328_v54  ;;  %v15612_v26 = vadd.f32 %v1966_v33, %v19331_v29  ;;  %v17260_v30 = vld [vmem:[#allocation4 + $0x740] ss:$16 sps:$4 sm:$0xff]   ;;  %v17263_v33 = vld [vmem:[#allocation4 + $0x748] ss:$16 sps:$4 sm:$0xff]  }
 0x27a   : > { %2955 = vmatpush1.bf16.msra.mxu0 %v17236_v21  ;;  %v1744_v41 = vpop.f32.mrb[50].mxu0  ;;  %v1970_v0 = vpop.f32.mrb[50].mxu1  ;;  %3181 = vmatpush1.bf16.msra.mxu1 %v17239_v62  ;;  %v15581_v51 = vadd.f32 %v1742_v31, %v19334_v34  ;;  %v15613_v8 = vadd.f32 %v1968_v37, %v19337_v35  ;;  %v17271_v31 = vld [vmem:[#allocation4 + $0x76c] ss:$16 sps:$4 sm:$0xff]  }
 0x27b   : > { %v15582_v14 = vadd.f32 %v1744_v41, %v19328_v54  ;;  %v15614_v42 = vadd.f32 %v1970_v0, %v19331_v29  ;;  %v1746_v43 = vpop.f32.mrb[51].mxu0  ;;  %v1972_v44 = vpop.f32.mrb[51].mxu1  ;;  %2956 = vmatprep.subr.bf16.mxu0 %v17244_v25  ;;  %3182 = vmatprep.subr.bf16.mxu1 %v17247_v27  ;;  %v17266_v0 = vld [vmem:[#allocation4 + $0x760] ss:$16 sps:$4 sm:$0xff]  }
 0x27c   : > { %v15583_v58 = vadd.f32 %v1746_v43, %v19334_v34  ;;  %v15615_v55 = vadd.f32 %v1972_v44, %v19337_v35  ;;  %v17274_v43 = vld [vmem:[#allocation4 + $0x784] ss:$16 sps:$4 sm:$0xff]   ;;  %v17277_v44 = vld [vmem:[#allocation4 + $0x78c] ss:$16 sps:$4 sm:$0xff]  }
 0x27d   : > { %v2021_v63 = vpack.c.bf16 %v15582_v14, %v15580_v40  ;;  %v19395_v1 = vpack.c.bf16 %v15614_v42, %v15612_v26  ;;  %v17269_v26 = vld [vmem:[#allocation4 + $0x768] ss:$16 sps:$4 sm:$0xff]  }
 0x27e   : > { %2957 = vmatpush1.bf16.msra.mxu0 %v17242_v36  ;;  %3183 = vmatpush1.bf16.msra.mxu1 %v17245_v45  ;;  %v2022_v3 = vpack.c.bf16 %v15583_v58, %v15581_v51  ;;  %v19397_v5 = vpack.c.bf16 %v15615_v55, %v15613_v8  ;;  %v17268_v45 = vld [vmem:[#allocation4 + $0x764] ss:$16 sps:$4 sm:$0xff]  }
 0x27f   : > { %2958 = vmatprep.subr.bf16.mxu0 %v17250_v39  ;;  %3184 = vmatprep.subr.bf16.mxu1 %v17253_v48 }
 0x280   : > { %v1750_v6 = vpop.f32.mrb[52].mxu0  ;;  %v1976_v9 = vpop.f32.mrb[52].mxu1  ;;  %2901 = vmatprep.mubr.bf16.mxu0 %v2022_v3  ;;  %3127 = vmatprep.mubr.bf16.mxu1 %v2022_v3 }
 0x281   : > { %v1752_v24 = vpop.f32.mrb[53].mxu0  ;;  %v1978_v11 = vpop.f32.mrb[53].mxu1  ;;  %2902 = vmatmul.mubr.bf16.gmra.mrb[80].mxu0 %v2021_v63  ;;  %3128 = vmatmul.mubr.bf16.gmra.mrb[80].mxu1 %v2021_v63  ;;  %v15584_v15 = vadd.f32 %v1750_v6, %v19328_v54  ;;  %v15616_v18 = vadd.f32 %v1976_v9, %v19331_v29 }
 0x282   : > { %2959 = vmatpush1.bf16.msra.mxu0 %v17248_v60  ;;  %v1754_v16 = vpop.f32.mrb[54].mxu0  ;;  %v1980_v17 = vpop.f32.mrb[54].mxu1  ;;  %3185 = vmatpush1.bf16.msra.mxu1 %v17251_v61  ;;  %v15585_v23 = vadd.f32 %v1752_v24, %v19334_v34  ;;  %v15617_v25 = vadd.f32 %v1978_v11, %v19337_v35  ;;  %v17280_v11 = vld [vmem:[#allocation4 + $0x7a4] ss:$16 sps:$4 sm:$0xff]  }
 0x283   : > { %v15586_v4 = vadd.f32 %v1754_v16, %v19328_v54  ;;  %v15618_v20 = vadd.f32 %v1980_v17, %v19331_v29  ;;  %v1756_v21 = vpop.f32.mrb[55].mxu0  ;;  %v1982_v62 = vpop.f32.mrb[55].mxu1  ;;  %2960 = vmatprep.subr.bf16.mxu0 %v17256_v50  ;;  %3186 = vmatprep.subr.bf16.mxu1 %v17259_v38 }
 0x284   : > { %v15587_v27 = vadd.f32 %v1756_v21, %v19334_v34  ;;  %v15619_v7 = vadd.f32 %v1982_v62, %v19337_v35 }
 0x285   : > { %v2025_v36 = vpack.c.bf16 %v15586_v4, %v15584_v15  ;;  %v19407_v37 = vpack.c.bf16 %v15618_v20, %v15616_v18  ;;  %v17278_v4 = vld [vmem:[#allocation4 + $0x7a0] ss:$16 sps:$4 sm:$0xff]   ;;  %v17281_v20 = vld [vmem:[#allocation4 + $0x7a8] ss:$16 sps:$4 sm:$0xff]  }
 0x286   : > { %2961 = vmatpush1.bf16.msra.mxu0 %v17254_v10  ;;  %3187 = vmatpush1.bf16.msra.mxu1 %v17257_v32  ;;  %v2026_v39 = vpack.c.bf16 %v15587_v27, %v15585_v23  ;;  %v19409_v48 = vpack.c.bf16 %v15619_v7, %v15617_v25  ;;  %v17272_v10 = vld [vmem:[#allocation4 + $0x780] ss:$16 sps:$4 sm:$0xff]   ;;  %v17275_v32 = vld [vmem:[#allocation4 + $0x788] ss:$16 sps:$4 sm:$0xff]   ;;  %v17286_v23 = vld [vmem:[#allocation4 + $0x7c4] ss:$16 sps:$4 sm:$0xff]  }
 0x287   : > { %2962 = vmatprep.subr.bf16.mxu0 %v17262_v12  ;;  %3188 = vmatprep.subr.bf16.mxu1 %v17265_v13  ;;  %v17283_v12 = vld [vmem:[#allocation4 + $0x7ac] ss:$16 sps:$4 sm:$0xff]  }
 0x288   : > { %v1760_v40 = vpop.f32.mrb[56].mxu0  ;;  %v1986_v41 = vpop.f32.mrb[56].mxu1  ;;  %2911 = vmatprep.mubr.bf16.mxu0 %v2026_v39  ;;  %3137 = vmatprep.mubr.bf16.mxu1 %v2026_v39  ;;  %v17289_v25 = vld [vmem:[#allocation4 + $0x7cc] ss:$16 sps:$4 sm:$0xff]  }
 0x289   : > { %v1762_v14 = vpop.f32.mrb[57].mxu0  ;;  %v1988_v42 = vpop.f32.mrb[57].mxu1  ;;  %2912 = vmatmul.mubr.bf16.gmra.mrb[84].mxu0 %v2025_v36  ;;  %3138 = vmatmul.mubr.bf16.gmra.mrb[84].mxu1 %v2025_v36  ;;  %v15588_v51 = vadd.f32 %v1760_v40, %v19328_v54  ;;  %v15620_v55 = vadd.f32 %v1986_v41, %v19331_v29 }
 0x28a   : > { %2963 = vmatpush1.bf16.msra.mxu0 %v17260_v30  ;;  %v1764_v8 = vpop.f32.mrb[58].mxu0  ;;  %v1990_v58 = vpop.f32.mrb[58].mxu1  ;;  %3189 = vmatpush1.bf16.msra.mxu1 %v17263_v33  ;;  %v15589_v38 = vadd.f32 %v1762_v14, %v19334_v34  ;;  %v15621_v3 = vadd.f32 %v1988_v42, %v19337_v35  ;;  %v17284_v14 = vld [vmem:[#allocation4 + $0x7c0] ss:$16 sps:$4 sm:$0xff]  }
 0x28b   : > { %v15590_v60 = vadd.f32 %v1764_v8, %v19328_v54  ;;  %v15622_v61 = vadd.f32 %v1990_v58, %v19331_v29  ;;  %v1766_v63 = vpop.f32.mrb[59].mxu0  ;;  %v1992_v50 = vpop.f32.mrb[59].mxu1  ;;  %2964 = vmatprep.subr.bf16.mxu0 %v17268_v45  ;;  %3190 = vmatprep.subr.bf16.mxu1 %v17271_v31  ;;  %v17290_v58 = vld [vmem:[#allocation4 + $0x7e0] ss:$16 sps:$4 sm:$0xff]  }
 0x28c   : > { %v15591_v6 = vadd.f32 %v1766_v63, %v19334_v34  ;;  %v15623_v9 = vadd.f32 %v1992_v50, %v19337_v35  ;;  %v17304_v63 = vld [vmem:[#allocation4 + $0x824] ss:$16 sps:$4 sm:$0xff]   ;;  %v17307_v50 = vld [vmem:[#allocation4 + $0x82c] ss:$16 sps:$4 sm:$0xff]  }
 0x28d   : > { %v2029_v24 = vpack.c.bf16 %v15590_v60, %v15588_v51  ;;  %v19419_v13 = vpack.c.bf16 %v15622_v61, %v15620_v55  ;;  %v17295_v51 = vld [vmem:[#allocation4 + $0x7ec] ss:$16 sps:$4 sm:$0xff]   ;;  %v17296_v60 = vld [vmem:[#allocation4 + $0x800] ss:$16 sps:$4 sm:$0xff]   ;;  %v17299_v61 = vld [vmem:[#allocation4 + $0x808] ss:$16 sps:$4 sm:$0xff]  }
 0x28e   : > { %2965 = vmatpush1.bf16.msra.mxu0 %v17266_v0  ;;  %3191 = vmatpush1.bf16.msra.mxu1 %v17269_v26  ;;  %v2030_v15 = vpack.c.bf16 %v15591_v6, %v15589_v38  ;;  %v19421_v16 = vpack.c.bf16 %v15623_v9, %v15621_v3  ;;  %v17301_v55 = vld [vmem:[#allocation4 + $0x80c] ss:$16 sps:$4 sm:$0xff]   ;;  %v17305_v38 = vld [vmem:[#allocation4 + $0x828] ss:$16 sps:$4 sm:$0xff]   ;;  %v17310_v3 = vld [vmem:[#allocation4 + $0x844] ss:$16 sps:$4 sm:$0xff]  }
 0x28f   : > { %2966 = vmatprep.subr.bf16.mxu0 %v17274_v43  ;;  %3192 = vmatprep.subr.bf16.mxu1 %v17277_v44  ;;  %v17287_v43 = vld [vmem:[#allocation4 + $0x7c8] ss:$16 sps:$4 sm:$0xff]   ;;  %v17313_v6 = vld [vmem:[#allocation4 + $0x84c] ss:$16 sps:$4 sm:$0xff]   ;;  %v17308_v9 = vld [vmem:[#allocation4 + $0x840] ss:$16 sps:$4 sm:$0xff]  }
 0x290   : > { %v1770_v17 = vpop.f32.mrb[60].mxu0  ;;  %v1996_v18 = vpop.f32.mrb[60].mxu1  ;;  %2921 = vmatprep.mubr.bf16.mxu0 %v2030_v15  ;;  %3147 = vmatprep.mubr.bf16.mxu1 %v2030_v15  ;;  %v17320_v15 = vld [vmem:[#allocation4 + $0x880] ss:$16 sps:$4 sm:$0xff]  }
 0x291   : > { %v1772_v21 = vpop.f32.mrb[61].mxu0  ;;  %v1998_v62 = vpop.f32.mrb[61].mxu1  ;;  %2922 = vmatmul.mubr.bf16.gmra.mrb[88].mxu0 %v2029_v24  ;;  %3148 = vmatmul.mubr.bf16.gmra.mrb[88].mxu1 %v2029_v24  ;;  %v15592_v27 = vadd.f32 %v1770_v17, %v19328_v54  ;;  %v15624_v33 = vadd.f32 %v1996_v18, %v19331_v29  ;;  %v17317_v24 = vld [vmem:[#allocation4 + $0x868] ss:$16 sps:$4 sm:$0xff]   ;;  %v17328_v18 = vld [vmem:[#allocation4 + $0x8a4] ss:$16 sps:$4 sm:$0xff]  }
 0x292   : > { %2967 = vmatpush1.bf16.msra.mxu0 %v17272_v10  ;;  %v1774_v7 = vpop.f32.mrb[62].mxu0  ;;  %v2000_v30 = vpop.f32.mrb[62].mxu1  ;;  %3193 = vmatpush1.bf16.msra.mxu1 %v17275_v32  ;;  %v15593_v40 = vadd.f32 %v1772_v21, %v19334_v34  ;;  %v15625_v41 = vadd.f32 %v1998_v62, %v19337_v35  ;;  %v17311_v10 = vld [vmem:[#allocation4 + $0x848] ss:$16 sps:$4 sm:$0xff]   ;;  %v17316_v32 = vld [vmem:[#allocation4 + $0x864] ss:$16 sps:$4 sm:$0xff]  }
 0x293   : > { %v15594_v36 = vadd.f32 %v1774_v7, %v19328_v54  ;;  %v15626_v45 = vadd.f32 %v2000_v30, %v19331_v29  ;;  %v1776_v31 = vpop.f32.mrb[63].mxu0  ;;  %v2002_v39 = vpop.f32.mrb[63].mxu1  ;;  %2968 = vmatprep.subr.bf16.mxu0 %v17280_v11  ;;  %3194 = vmatprep.subr.bf16.mxu1 %v17283_v12  ;;  %v17292_v29 = vld [vmem:[#allocation4 + $0x7e4] ss:$16 sps:$4 sm:$0xff]   ;;  %v17325_v12 = vld [vmem:[#allocation4 + $0x88c] ss:$16 sps:$4 sm:$0xff]  }
 0x294   : > { %v15595_v0 = vadd.f32 %v1776_v31, %v19334_v34  ;;  %v15627_v26 = vadd.f32 %v2002_v39, %v19337_v35  ;;  %v17293_v34 = vld [vmem:[#allocation4 + $0x7e8] ss:$16 sps:$4 sm:$0xff]   ;;  %v17298_v35 = vld [vmem:[#allocation4 + $0x804] ss:$16 sps:$4 sm:$0xff]   ;;  %v17337_v21 = vld [vmem:[#allocation4 + $0x8cc] ss:$16 sps:$4 sm:$0xff]  }
 0x295   : > { %v2033_v42 = vpack.c.bf16 %v15594_v36, %v15592_v27  ;;  %v19431_v44 = vpack.c.bf16 %v15626_v45, %v15624_v33  ;;  %v17322_v11 = vld [vmem:[#allocation4 + $0x884] ss:$16 sps:$4 sm:$0xff]   ;;  %v17323_v17 = vld [vmem:[#allocation4 + $0x888] ss:$16 sps:$4 sm:$0xff]   ;;  %v17332_v62 = vld [vmem:[#allocation4 + $0x8c0] ss:$16 sps:$4 sm:$0xff]  }
 0x296   : > { %2969 = vmatpush1.bf16.msra.mxu0 %v17278_v4  ;;  %3195 = vmatpush1.bf16.msra.mxu1 %v17281_v20  ;;  %v2034_v54 = vpack.c.bf16 %v15595_v0, %v15593_v40  ;;  %v19433_v8 = vpack.c.bf16 %v15627_v26, %v15625_v41  ;;  %v17329_v4 = vld [vmem:[#allocation4 + $0x8a8] ss:$16 sps:$4 sm:$0xff]   ;;  %v17334_v20 = vld [vmem:[#allocation4 + $0x8c4] ss:$16 sps:$4 sm:$0xff]   ;;  %v17349_v30 = vld [vmem:[#allocation4 + $0x90c] ss:$16 sps:$4 sm:$0xff]  }
 0x297   : > { %2970 = vmatprep.subr.bf16.mxu0 %v17286_v23  ;;  %3196 = vmatprep.subr.bf16.mxu1 %v17289_v25  ;;  %v17335_v23 = vld [vmem:[#allocation4 + $0x8c8] ss:$16 sps:$4 sm:$0xff]   ;;  %v17340_v25 = vld [vmem:[#allocation4 + $0x8e4] ss:$16 sps:$4 sm:$0xff]   ;;  %v17344_v33 = vld [vmem:[#allocation4 + $0x900] ss:$16 sps:$4 sm:$0xff]  }
 0x298   : > { %2931 = vmatprep.mubr.bf16.mxu0 %v2034_v54  ;;  %3157 = vmatprep.mubr.bf16.mxu1 %v2034_v54  ;;  %v17341_v27 = vld [vmem:[#allocation4 + $0x8e8] ss:$16 sps:$4 sm:$0xff]   ;;  %v17346_v7 = vld [vmem:[#allocation4 + $0x904] ss:$16 sps:$4 sm:$0xff]   ;;  %v17361_v40 = vld [vmem:[#allocation4 + $0x94c] ss:$16 sps:$4 sm:$0xff]  }
 0x299   : > { %2932 = vmatmul.mubr.bf16.gmra.mrb[92].mxu0 %v2033_v42  ;;  %3158 = vmatmul.mubr.bf16.gmra.mrb[92].mxu1 %v2033_v42  ;;  %v17347_v36 = vld [vmem:[#allocation4 + $0x908] ss:$16 sps:$4 sm:$0xff]   ;;  %v17352_v45 = vld [vmem:[#allocation4 + $0x924] ss:$16 sps:$4 sm:$0xff]   ;;  %v17356_v41 = vld [vmem:[#allocation4 + $0x940] ss:$16 sps:$4 sm:$0xff]  }
 0x29a   : > { %2971 = vmatpush1.bf16.msra.mxu0 %v17284_v14  ;;  %2974 = vmatprep.mubr.bf16.mxu0 %v19349_v53  ;;  %v17353_v31 = vld [vmem:[#allocation4 + $0x928] ss:$16 sps:$4 sm:$0xff]   ;;  %v17358_v39 = vld [vmem:[#allocation4 + $0x944] ss:$16 sps:$4 sm:$0xff]   ;;  %v17368_v54 = vld [vmem:[#allocation4 + $0x980] ss:$16 sps:$4 sm:$0xff]  }
 0x29b   : > { %3197 = vmatpush1.bf16.msra.mxu1 %v17287_v43  ;;  %3200 = vmatprep.mubr.bf16.mxu1 %v19349_v53  ;;  %v17302_v53 = vld [vmem:[#allocation4 + $0x820] ss:$16 sps:$4 sm:$0xff]   ;;  %v17359_v0 = vld [vmem:[#allocation4 + $0x948] ss:$16 sps:$4 sm:$0xff]   ;;  %v17364_v26 = vld [vmem:[#allocation4 + $0x964] ss:$16 sps:$4 sm:$0xff]  }
 0x29c   : > { %2972 = vmatprep.subr.bf16.mxu0 %v17292_v29  ;;  %3198 = vmatprep.subr.bf16.mxu1 %v17295_v51  ;;  %v17365_v14 = vld [vmem:[#allocation4 + $0x968] ss:$16 sps:$4 sm:$0xff]   ;;  %v17370_v42 = vld [vmem:[#allocation4 + $0x984] ss:$16 sps:$4 sm:$0xff]   ;;  %v17373_v43 = vld [vmem:[#allocation4 + $0x98c] ss:$16 sps:$4 sm:$0xff]  }
 0x29d   : > { %v17371_v29 = vld [vmem:[#allocation4 + $0x988] ss:$16 sps:$4 sm:$0xff]   ;;  %v17376_v51 = vld [vmem:[#allocation4 + $0x9a4] ss:$16 sps:$4 sm:$0xff]  }
 0x29e   : > { %2973 = vmatpush1.bf16.msra.mxu0 %v17290_v58  ;;  %v17377_v58 = vld [vmem:[#allocation4 + $0x9a8] ss:$16 sps:$4 sm:$0xff]  }
 0x29f   : > { %3199 = vmatpush1.bf16.msra.mxu1 %v17293_v34  ;;  %4105 = vmatprep.subr.bf16.mxu0 %v17298_v35  ;;  %v17382_v34 = vld [vmem:[#allocation4 + $0x9c4] ss:$16 sps:$4 sm:$0xff]   ;;  %v17385_v35 = vld [vmem:[#allocation4 + $0x9cc] ss:$16 sps:$4 sm:$0xff]  }
 0x2a0   : > { %4331 = vmatprep.subr.bf16.mxu1 %v17301_v55  ;;  %v17380_v55 = vld [vmem:[#allocation4 + $0x9c0] ss:$16 sps:$4 sm:$0xff]  }
 0x2a1   : > { %2975 = vmatmul.mubr.bf16.vlgmr.msra.gmra.mrb[64].mxu0 %v19347_v49 }
 0x2a2   : > { %3201 = vmatmul.mubr.bf16.vlgmr.msra.gmra.mrb[64].mxu1 %v19347_v49  ;;  %2984 = vmatprep.mubr.bf16.mxu0 %v19361_v22  ;;  %v17319_v49 = vld [vmem:[#allocation4 + $0x86c] ss:$16 sps:$4 sm:$0xff]  }
 0x2a3   : > { %3210 = vmatprep.mubr.bf16.mxu1 %v19361_v22  ;;  %4106 = vmatpush1.bf16.msra.mxu0 %v17296_v60  ;;  %v17314_v22 = vld [vmem:[#allocation4 + $0x860] ss:$16 sps:$4 sm:$0xff]   ;;  %v17391_v60 = vld [vmem:[#allocation4 + $0x9ec] ss:$16 sps:$4 sm:$0xff]  }
 0x2a4   : > { %4332 = vmatpush1.bf16.msra.mxu1 %v17299_v61  ;;  %4107 = vmatprep.subr.bf16.mxu0 %v17304_v63  ;;  %v17386_v61 = vld [vmem:[#allocation4 + $0x9e0] ss:$16 sps:$4 sm:$0xff]   ;;  %v17389_v63 = vld [vmem:[#allocation4 + $0x9e8] ss:$16 sps:$4 sm:$0xff]  }
 0x2a5   : > { %4333 = vmatprep.subr.bf16.mxu1 %v17307_v50  ;;  %v17394_v50 = vld [vmem:[#allocation4 + $0xa04] ss:$16 sps:$4 sm:$0xff]  }
 0x2a7   : > { %4108 = vmatpush1.bf16.msra.mxu0 %v17302_v53  ;;  %v17397_v53 = vld [vmem:[#allocation4 + $0xa0c] ss:$16 sps:$4 sm:$0xff]  }
 0x2a8   : > { %4334 = vmatpush1.bf16.msra.mxu1 %v17305_v38  ;;  %4109 = vmatprep.subr.bf16.mxu0 %v17310_v3 }
 0x2a9   : > { %2985 = vmatmul.mubr.bf16.gmra.mrb[68].mxu0 %v19359_v19  ;;  %4335 = vmatprep.subr.bf16.mxu1 %v17313_v6 }
 0x2aa   : > { %3211 = vmatmul.mubr.bf16.gmra.mrb[68].mxu1 %v19359_v19  ;;  %2994 = vmatprep.mubr.bf16.mxu0 %v19373_v56  ;;  %v17331_v19 = vld [vmem:[#allocation4 + $0x8ac] ss:$16 sps:$4 sm:$0xff]  }
 0x2ab   : > { %3220 = vmatprep.mubr.bf16.mxu1 %v19373_v56  ;;  %4110 = vmatpush1.bf16.msra.mxu0 %v17308_v9  ;;  %v17326_v56 = vld [vmem:[#allocation4 + $0x8a0] ss:$16 sps:$4 sm:$0xff]  }
 0x2ac   : > { %4336 = vmatpush1.bf16.msra.mxu1 %v17311_v10  ;;  %4111 = vmatprep.subr.bf16.mxu0 %v17316_v32 }
 0x2ad   : > { %4337 = vmatprep.subr.bf16.mxu1 %v17319_v49 }
 0x2af   : > { %4112 = vmatpush1.bf16.msra.mxu0 %v17314_v22 }
 0x2b0   : > { %4338 = vmatpush1.bf16.msra.mxu1 %v17317_v24  ;;  %4113 = vmatprep.subr.bf16.mxu0 %v17322_v11 }
 0x2b1   : > { %2995 = vmatmul.mubr.bf16.gmra.mrb[72].mxu0 %v19371_v52  ;;  %4339 = vmatprep.subr.bf16.mxu1 %v17325_v12 }
 0x2b2   : > { %3221 = vmatmul.mubr.bf16.gmra.mrb[72].mxu1 %v19371_v52  ;;  %3004 = vmatprep.mubr.bf16.mxu0 %v19385_v28  ;;  %v17343_v52 = vld [vmem:[#allocation4 + $0x8ec] ss:$16 sps:$4 sm:$0xff]  }
 0x2b3   : > { %3230 = vmatprep.mubr.bf16.mxu1 %v19385_v28  ;;  %4114 = vmatpush1.bf16.msra.mxu0 %v17320_v15  ;;  %v17338_v28 = vld [vmem:[#allocation4 + $0x8e0] ss:$16 sps:$4 sm:$0xff]  }
 0x2b4   : > { %4340 = vmatpush1.bf16.msra.mxu1 %v17323_v17  ;;  %4115 = vmatprep.subr.bf16.mxu0 %v17328_v18 }
 0x2b5   : > { %4341 = vmatprep.subr.bf16.mxu1 %v17331_v19 }
 0x2b7   : > { %4116 = vmatpush1.bf16.msra.mxu0 %v17326_v56 }
 0x2b8   : > { %4342 = vmatpush1.bf16.msra.mxu1 %v17329_v4  ;;  %4117 = vmatprep.subr.bf16.mxu0 %v17334_v20 }
 0x2b9   : > { %3005 = vmatmul.mubr.bf16.gmra.mrb[76].mxu0 %v19383_v2  ;;  %4343 = vmatprep.subr.bf16.mxu1 %v17337_v21 }
 0x2ba   : > { %3231 = vmatmul.mubr.bf16.gmra.mrb[76].mxu1 %v19383_v2  ;;  %3014 = vmatprep.mubr.bf16.mxu0 %v19397_v5  ;;  %v17355_v2 = vld [vmem:[#allocation4 + $0x92c] ss:$16 sps:$4 sm:$0xff]  }
 0x2bb   : > { %3240 = vmatprep.mubr.bf16.mxu1 %v19397_v5  ;;  %4118 = vmatpush1.bf16.msra.mxu0 %v17332_v62  ;;  %v17350_v5 = vld [vmem:[#allocation4 + $0x920] ss:$16 sps:$4 sm:$0xff]  }
 0x2bc   : > { %4344 = vmatpush1.bf16.msra.mxu1 %v17335_v23  ;;  %4119 = vmatprep.subr.bf16.mxu0 %v17340_v25 }
 0x2bd   : > { %4345 = vmatprep.subr.bf16.mxu1 %v17343_v52 }
 0x2bf   : > { %4120 = vmatpush1.bf16.msra.mxu0 %v17338_v28  ;;  %v17392_v28 = vld [vmem:[#allocation4 + $0xa00] ss:$16 sps:$4 sm:$0xff]  }
 0x2c0   : > { %4346 = vmatpush1.bf16.msra.mxu1 %v17341_v27  ;;  %4121 = vmatprep.subr.bf16.mxu0 %v17346_v7  ;;  %v17395_v27 = vld [vmem:[#allocation4 + $0xa08] ss:$16 sps:$4 sm:$0xff]   ;;  %v17400_v7 = vld [vmem:[#allocation4 + $0xa24] ss:$16 sps:$4 sm:$0xff]  }
 0x2c1   : > { %3015 = vmatmul.mubr.bf16.gmra.mrb[80].mxu0 %v19395_v1  ;;  %4347 = vmatprep.subr.bf16.mxu1 %v17349_v30  ;;  %v17403_v30 = vld [vmem:[#allocation4 + $0xa2c] ss:$16 sps:$4 sm:$0xff]  }
 0x2c2   : > { %3241 = vmatmul.mubr.bf16.gmra.mrb[80].mxu1 %v19395_v1  ;;  %3024 = vmatprep.mubr.bf16.mxu0 %v19409_v48  ;;  %v17367_v1 = vld [vmem:[#allocation4 + $0x96c] ss:$16 sps:$4 sm:$0xff]  }
 0x2c3   : > { %3250 = vmatprep.mubr.bf16.mxu1 %v19409_v48  ;;  %4122 = vmatpush1.bf16.msra.mxu0 %v17344_v33  ;;  %v17362_v48 = vld [vmem:[#allocation4 + $0x960] ss:$16 sps:$4 sm:$0xff]  }
 0x2c4   : > { %4348 = vmatpush1.bf16.msra.mxu1 %v17347_v36  ;;  %4123 = vmatprep.subr.bf16.mxu0 %v17352_v45 }
 0x2c5   : > { %4349 = vmatprep.subr.bf16.mxu1 %v17355_v2 }
 0x2c7   : > { %4124 = vmatpush1.bf16.msra.mxu0 %v17350_v5 }
 0x2c8   : > { %4350 = vmatpush1.bf16.msra.mxu1 %v17353_v31  ;;  %4125 = vmatprep.subr.bf16.mxu0 %v17358_v39  ;;  %v17398_v39 = vld [vmem:[#allocation4 + $0xa20] ss:$16 sps:$4 sm:$0xff]  }
 0x2c9   : > { %3025 = vmatmul.mubr.bf16.gmra.mrb[84].mxu0 %v19407_v37  ;;  %4351 = vmatprep.subr.bf16.mxu1 %v17361_v40  ;;  %v17401_v40 = vld [vmem:[#allocation4 + $0xa28] ss:$16 sps:$4 sm:$0xff]  }
 0x2ca   : > { %3251 = vmatmul.mubr.bf16.gmra.mrb[84].mxu1 %v19407_v37  ;;  %3034 = vmatprep.mubr.bf16.mxu0 %v19421_v16  ;;  %v17379_v37 = vld [vmem:[#allocation4 + $0x9ac] ss:$16 sps:$4 sm:$0xff]  }
 0x2cb   : > { %3260 = vmatprep.mubr.bf16.mxu1 %v19421_v16  ;;  %4126 = vmatpush1.bf16.msra.mxu0 %v17356_v41  ;;  %v17374_v16 = vld [vmem:[#allocation4 + $0x9a0] ss:$16 sps:$4 sm:$0xff]  }
 0x2cc   : > { %4352 = vmatpush1.bf16.msra.mxu1 %v17359_v0  ;;  %4127 = vmatprep.subr.bf16.mxu0 %v17364_v26 }
 0x2cd   : > { %4353 = vmatprep.subr.bf16.mxu1 %v17367_v1 }
 0x2cf   : > { %4128 = vmatpush1.bf16.msra.mxu0 %v17362_v48  ;;  %v17406_v48 = vld [vmem:[#allocation4 + $0xa44] ss:$16 sps:$4 sm:$0xff]  }
 0x2d0   : > { %4354 = vmatpush1.bf16.msra.mxu1 %v17365_v14  ;;  %4129 = vmatprep.subr.bf16.mxu0 %v17370_v42  ;;  %v17409_v14 = vld [vmem:[#allocation4 + $0xa4c] ss:$16 sps:$4 sm:$0xff]  }
 0x2d1   : > { %3035 = vmatmul.mubr.bf16.gmra.mrb[88].mxu0 %v19419_v13  ;;  %4355 = vmatprep.subr.bf16.mxu1 %v17373_v43 }
 0x2d2   : > { %3261 = vmatmul.mubr.bf16.gmra.mrb[88].mxu1 %v19419_v13  ;;  %3044 = vmatprep.mubr.bf16.mxu0 %v19433_v8  ;;  %v17383_v13 = vld [vmem:[#allocation4 + $0x9c8] ss:$16 sps:$4 sm:$0xff]  }
 0x2d3   : > { %3270 = vmatprep.mubr.bf16.mxu1 %v19433_v8  ;;  %4130 = vmatpush1.bf16.msra.mxu0 %v17368_v54  ;;  %v17388_v8 = vld [vmem:[#allocation4 + $0x9e4] ss:$16 sps:$4 sm:$0xff]  }
 0x2d4   : > { %4356 = vmatpush1.bf16.msra.mxu1 %v17371_v29  ;;  %4131 = vmatprep.subr.bf16.mxu0 %v17376_v51 }
 0x2d5   : > { %4357 = vmatprep.subr.bf16.mxu1 %v17379_v37 }
 0x2d7   : > { %4132 = vmatpush1.bf16.msra.mxu0 %v17374_v16 }
 0x2d8   : > { %4358 = vmatpush1.bf16.msra.mxu1 %v17377_v58  ;;  %4133 = vmatprep.subr.bf16.mxu0 %v17382_v34 }
 0x2d9   : > { %3045 = vmatmul.mubr.bf16.gmra.mrb[92].mxu0 %v19431_v44  ;;  %4359 = vmatprep.subr.bf16.mxu1 %v17385_v35  ;;  %v17404_v35 = vld [vmem:[#allocation4 + $0xa40] ss:$16 sps:$4 sm:$0xff]  }
 0x2da   : > { %3271 = vmatmul.mubr.bf16.gmra.mrb[92].mxu1 %v19431_v44  ;;  %v2167_v44 = vld [vmem:[#allocation6 + $0x2] ss:$8 sm:$0xf] }
 0x2db   : > { %4134 = vmatpush1.bf16.msra.mxu0 %v17380_v55  ;;  %v19468_v38 = vrot.slane %v2167_v44, %v19179_v46  ;;  %v19471_v6 = vrot.slane %v2167_v44, %v19192_v57  ;;  %v19474_v9 = vrot.slane %v2167_v44, %v19181_v47  ;;  %v19477_v49 = vrot.slane %v2167_v44, %v19195_v59  ;;  %v17407_v55 = vld [vmem:[#allocation4 + $0xa48] ss:$16 sps:$4 sm:$0xff]  }
 0x2dc   : > { %4360 = vmatpush1.bf16.msra.mxu1 %v17383_v13  ;;  %4135 = vmatprep.subr.bf16.mxu0 %v17388_v8  ;;  %v17412_v8 = vld [vmem:[#allocation4 + $0xa64] ss:$16 sps:$4 sm:$0xff]  }
 0x2dd   : > { %4361 = vmatprep.subr.bf16.mxu1 %v17391_v60  ;;  %v17415_v60 = vld [vmem:[#allocation4 + $0xa6c] ss:$16 sps:$4 sm:$0xff]  }
 0x2df   : > { %4136 = vmatpush1.bf16.msra.mxu0 %v17386_v61 }
 0x2e0   : > { %4362 = vmatpush1.bf16.msra.mxu1 %v17389_v63  ;;  %4218 = vmatprep.subr.bf16.mxu0 %v17394_v50 }
 0x2e1   : > { %4444 = vmatprep.subr.bf16.mxu1 %v17397_v53 }
 0x374   : > { %v2976_v3 = vpop.f32.mrb[64].mxu0 }
 0x375   : > { %v3202_v10 = vpop.f32.mrb[64].mxu1  ;;  %v2978_v32 = vpop.f32.mrb[65].mxu0  ;;  %v15628_v11 = vadd.f32 %v2976_v3, %v19468_v38 }
 0x376   : > { %v3204_v22 = vpop.f32.mrb[65].mxu1  ;;  %v2980_v24 = vpop.f32.mrb[66].mxu0  ;;  %v15660_v18 = vadd.f32 %v3202_v10, %v19471_v6  ;;  %v15629_v19 = vadd.f32 %v2978_v32, %v19474_v9  ;;  %v17410_v10 = vld [vmem:[#allocation4 + $0xa60] ss:$16 sps:$4 sm:$0xff]   ;;  %v17413_v32 = vld [vmem:[#allocation4 + $0xa68] ss:$16 sps:$4 sm:$0xff]  }
 0x377   : > { %v15630_v12 = vadd.f32 %v2980_v24, %v19468_v38  ;;  %v3206_v15 = vpop.f32.mrb[66].mxu1  ;;  %v2982_v17 = vpop.f32.mrb[67].mxu0  ;;  %v15661_v21 = vadd.f32 %v3204_v22, %v19477_v49 }
 0x378   : > { %v15662_v56 = vadd.f32 %v3206_v15, %v19471_v6  ;;  %v15631_v4 = vadd.f32 %v2982_v17, %v19474_v9  ;;  %v3208_v20 = vpop.f32.mrb[67].mxu1  ;;  %v17418_v15 = vld [vmem:[#allocation4 + $0xa84] ss:$16 sps:$4 sm:$0xff]   ;;  %v17421_v17 = vld [vmem:[#allocation4 + $0xa8c] ss:$16 sps:$4 sm:$0xff]  }
 0x379   : > { %v3281_v62 = vpack.c.bf16 %v15630_v12, %v15628_v11  ;;  %v15663_v23 = vadd.f32 %v3208_v20, %v19477_v49 }
 0x37a   : > { %v19487_v25 = vpack.c.bf16 %v15662_v56, %v15660_v18  ;;  %v3282_v52 = vpack.c.bf16 %v15631_v4, %v15629_v19 }
 0x37b   : > { %v19489_v33 = vpack.c.bf16 %v15663_v23, %v15661_v21 }
 0x37c   : > { %v2986_v36 = vpop.f32.mrb[68].mxu0  ;;  %4137 = vmatprep.mubr.bf16.mxu0 %v3282_v52  ;;  %4363 = vmatprep.mubr.bf16.mxu1 %v3282_v52 }
 0x37d   : > { %v3212_v45 = vpop.f32.mrb[68].mxu1  ;;  %v2988_v2 = vpop.f32.mrb[69].mxu0  ;;  %4138 = vmatmul.mubr.bf16.vlgmr.msra.gmra.mrb[96].mxu0 %v3281_v62  ;;  %4364 = vmatmul.mubr.bf16.vlgmr.msra.gmra.mrb[96].mxu1 %v3281_v62  ;;  %v15632_v41 = vadd.f32 %v2986_v36, %v19468_v38  ;;  %v17427_v36 = vld [vmem:[#allocation4 + $0xaac] ss:$16 sps:$4 sm:$0xff]  }
 0x37e   : > { %v3214_v5 = vpop.f32.mrb[69].mxu1  ;;  %4219 = vmatpush1.bf16.msra.mxu0 %v17392_v28  ;;  %v2990_v31 = vpop.f32.mrb[70].mxu0  ;;  %4445 = vmatpush1.bf16.msra.mxu1 %v17395_v27  ;;  %v15664_v42 = vadd.f32 %v3212_v45, %v19471_v6  ;;  %v15633_v43 = vadd.f32 %v2988_v2, %v19474_v9  ;;  %v17416_v28 = vld [vmem:[#allocation4 + $0xa80] ss:$16 sps:$4 sm:$0xff]   ;;  %v17419_v27 = vld [vmem:[#allocation4 + $0xa88] ss:$16 sps:$4 sm:$0xff]  }
 0x37f   : > { %v15634_v0 = vadd.f32 %v2990_v31, %v19468_v38  ;;  %v3216_v26 = vpop.f32.mrb[70].mxu1  ;;  %v2992_v1 = vpop.f32.mrb[71].mxu0  ;;  %4220 = vmatprep.subr.bf16.mxu0 %v17400_v7  ;;  %4446 = vmatprep.subr.bf16.mxu1 %v17403_v30  ;;  %v15665_v37 = vadd.f32 %v3214_v5, %v19477_v49  ;;  %v17424_v30 = vld [vmem:[#allocation4 + $0xaa4] ss:$16 sps:$4 sm:$0xff]  }
 0x380   : > { %v15666_v54 = vadd.f32 %v3216_v26, %v19471_v6  ;;  %v15635_v29 = vadd.f32 %v2992_v1, %v19474_v9  ;;  %v3218_v51 = vpop.f32.mrb[71].mxu1 }
 0x381   : > { %v15667_v16 = vadd.f32 %v3218_v51, %v19477_v49  ;;  %v3285_v58 = vpack.c.bf16 %v15634_v0, %v15632_v41  ;;  %v17422_v41 = vld [vmem:[#allocation4 + $0xaa0] ss:$16 sps:$4 sm:$0xff]   ;;  %v17425_v0 = vld [vmem:[#allocation4 + $0xaa8] ss:$16 sps:$4 sm:$0xff]  }
 0x382   : > { %4221 = vmatpush1.bf16.msra.mxu0 %v17398_v39  ;;  %4447 = vmatpush1.bf16.msra.mxu1 %v17401_v40  ;;  %v3286_v34 = vpack.c.bf16 %v15635_v29, %v15633_v43  ;;  %v19499_v13 = vpack.c.bf16 %v15666_v54, %v15664_v42  ;;  %v17430_v42 = vld [vmem:[#allocation4 + $0xac4] ss:$16 sps:$4 sm:$0xff]   ;;  %v17433_v43 = vld [vmem:[#allocation4 + $0xacc] ss:$16 sps:$4 sm:$0xff]  }
 0x383   : > { %4222 = vmatprep.subr.bf16.mxu0 %v17406_v48  ;;  %4448 = vmatprep.subr.bf16.mxu1 %v17409_v14  ;;  %v19501_v61 = vpack.c.bf16 %v15667_v16, %v15665_v37 }
 0x384   : > { %v2996_v63 = vpop.f32.mrb[72].mxu0  ;;  %4147 = vmatprep.mubr.bf16.mxu0 %v3286_v34  ;;  %4373 = vmatprep.mubr.bf16.mxu1 %v3286_v34 }
 0x385   : > { %v3222_v50 = vpop.f32.mrb[72].mxu1  ;;  %v2998_v53 = vpop.f32.mrb[73].mxu0  ;;  %4148 = vmatmul.mubr.bf16.gmra.mrb[100].mxu0 %v3285_v58  ;;  %4374 = vmatmul.mubr.bf16.gmra.mrb[100].mxu1 %v3285_v58  ;;  %v15636_v22 = vadd.f32 %v2996_v63, %v19468_v38 }
 0x386   : > { %v3224_v44 = vpop.f32.mrb[73].mxu1  ;;  %4223 = vmatpush1.bf16.msra.mxu0 %v17404_v35  ;;  %v3000_v3 = vpop.f32.mrb[74].mxu0  ;;  %4449 = vmatpush1.bf16.msra.mxu1 %v17407_v55  ;;  %v15668_v18 = vadd.f32 %v3222_v50, %v19471_v6  ;;  %v15637_v19 = vadd.f32 %v2998_v53, %v19474_v9  ;;  %v17436_v50 = vld [vmem:[#allocation4 + $0xae4] ss:$16 sps:$4 sm:$0xff]   ;;  %v17439_v53 = vld [vmem:[#allocation4 + $0xaec] ss:$16 sps:$4 sm:$0xff]  }
 0x387   : > { %v15638_v24 = vadd.f32 %v3000_v3, %v19468_v38  ;;  %v3226_v11 = vpop.f32.mrb[74].mxu1  ;;  %v3002_v12 = vpop.f32.mrb[75].mxu0  ;;  %4224 = vmatprep.subr.bf16.mxu0 %v17412_v8  ;;  %4450 = vmatprep.subr.bf16.mxu1 %v17415_v60  ;;  %v15669_v21 = vadd.f32 %v3224_v44, %v19477_v49  ;;  %v17428_v8 = vld [vmem:[#allocation4 + $0xac0] ss:$16 sps:$4 sm:$0xff]   ;;  %v17431_v60 = vld [vmem:[#allocation4 + $0xac8] ss:$16 sps:$4 sm:$0xff]  }
 0x388   : > { %v15670_v56 = vadd.f32 %v3226_v11, %v19471_v6  ;;  %v15639_v4 = vadd.f32 %v3002_v12, %v19474_v9  ;;  %v3228_v20 = vpop.f32.mrb[75].mxu1  ;;  %v17434_v11 = vld [vmem:[#allocation4 + $0xae0] ss:$16 sps:$4 sm:$0xff]   ;;  %v17437_v12 = vld [vmem:[#allocation4 + $0xae8] ss:$16 sps:$4 sm:$0xff]  }
 0x389   : > { %v15671_v62 = vadd.f32 %v3228_v20, %v19477_v49  ;;  %v3289_v23 = vpack.c.bf16 %v15638_v24, %v15636_v22 }
 0x38a   : > { %4225 = vmatpush1.bf16.msra.mxu0 %v17410_v10  ;;  %4451 = vmatpush1.bf16.msra.mxu1 %v17413_v32  ;;  %v3290_v52 = vpack.c.bf16 %v15639_v4, %v15637_v19  ;;  %v19511_v7 = vpack.c.bf16 %v15670_v56, %v15668_v18  ;;  %v17442_v56 = vld [vmem:[#allocation4 + $0xb04] ss:$16 sps:$4 sm:$0xff]   ;;  %v17445_v4 = vld [vmem:[#allocation4 + $0xb0c] ss:$16 sps:$4 sm:$0xff]  }
 0x38b   : > { %4226 = vmatprep.subr.bf16.mxu0 %v17418_v15  ;;  %4452 = vmatprep.subr.bf16.mxu1 %v17421_v17  ;;  %v19513_v45 = vpack.c.bf16 %v15671_v62, %v15669_v21 }
 0x38c   : > { %v3006_v2 = vpop.f32.mrb[76].mxu0  ;;  %4157 = vmatprep.mubr.bf16.mxu0 %v3290_v52  ;;  %4383 = vmatprep.mubr.bf16.mxu1 %v3290_v52 }
 0x38d   : > { %v3232_v5 = vpop.f32.mrb[76].mxu1  ;;  %v3008_v31 = vpop.f32.mrb[77].mxu0  ;;  %4158 = vmatmul.mubr.bf16.gmra.mrb[104].mxu0 %v3289_v23  ;;  %4384 = vmatmul.mubr.bf16.gmra.mrb[104].mxu1 %v3289_v23  ;;  %v15640_v26 = vadd.f32 %v3006_v2, %v19468_v38  ;;  %v17440_v2 = vld [vmem:[#allocation4 + $0xb00] ss:$16 sps:$4 sm:$0xff]  }
 0x38e   : > { %v3234_v39 = vpop.f32.mrb[77].mxu1  ;;  %4227 = vmatpush1.bf16.msra.mxu0 %v17416_v28  ;;  %v3010_v40 = vpop.f32.mrb[78].mxu0  ;;  %4453 = vmatpush1.bf16.msra.mxu1 %v17419_v27  ;;  %v15672_v54 = vadd.f32 %v3232_v5, %v19471_v6  ;;  %v15641_v29 = vadd.f32 %v3008_v31, %v19474_v9  ;;  %v17443_v5 = vld [vmem:[#allocation4 + $0xb08] ss:$16 sps:$4 sm:$0xff]  }
 0x38f   : > { %v15642_v1 = vadd.f32 %v3010_v40, %v19468_v38  ;;  %v3236_v48 = vpop.f32.mrb[78].mxu1  ;;  %v3012_v14 = vpop.f32.mrb[79].mxu0  ;;  %4228 = vmatprep.subr.bf16.mxu0 %v17424_v30  ;;  %4454 = vmatprep.subr.bf16.mxu1 %v17427_v36  ;;  %v15673_v58 = vadd.f32 %v3234_v39, %v19477_v49  ;;  %v17448_v39 = vld [vmem:[#allocation4 + $0xb24] ss:$16 sps:$4 sm:$0xff]   ;;  %v17451_v40 = vld [vmem:[#allocation4 + $0xb2c] ss:$16 sps:$4 sm:$0xff]  }
 0x390   : > { %v15674_v51 = vadd.f32 %v3236_v48, %v19471_v6  ;;  %v15643_v37 = vadd.f32 %v3012_v14, %v19474_v9  ;;  %v3238_v16 = vpop.f32.mrb[79].mxu1 }
 0x391   : > { %v15675_v34 = vadd.f32 %v3238_v16, %v19477_v49  ;;  %v3293_v35 = vpack.c.bf16 %v15642_v1, %v15640_v26  ;;  %v17454_v16 = vld [vmem:[#allocation4 + $0xb44] ss:$16 sps:$4 sm:$0xff]  }
 0x392   : > { %4229 = vmatpush1.bf16.msra.mxu0 %v17422_v41  ;;  %4455 = vmatpush1.bf16.msra.mxu1 %v17425_v0  ;;  %v3294_v55 = vpack.c.bf16 %v15643_v37, %v15641_v29  ;;  %v19523_v63 = vpack.c.bf16 %v15674_v51, %v15672_v54 }
 0x393   : > { %4230 = vmatprep.subr.bf16.mxu0 %v17430_v42  ;;  %4456 = vmatprep.subr.bf16.mxu1 %v17433_v43  ;;  %v19525_v44 = vpack.c.bf16 %v15675_v34, %v15673_v58  ;;  %v17446_v42 = vld [vmem:[#allocation4 + $0xb20] ss:$16 sps:$4 sm:$0xff]   ;;  %v17449_v43 = vld [vmem:[#allocation4 + $0xb28] ss:$16 sps:$4 sm:$0xff]   ;;  %v17457_v58 = vld [vmem:[#allocation4 + $0xb4c] ss:$16 sps:$4 sm:$0xff]  }
 0x394   : > { %v3016_v3 = vpop.f32.mrb[80].mxu0  ;;  %4167 = vmatprep.mubr.bf16.mxu0 %v3294_v55  ;;  %4393 = vmatprep.mubr.bf16.mxu1 %v3294_v55 }
 0x395   : > { %v3242_v10 = vpop.f32.mrb[80].mxu1  ;;  %v3018_v32 = vpop.f32.mrb[81].mxu0  ;;  %4168 = vmatmul.mubr.bf16.gmra.mrb[108].mxu0 %v3293_v35  ;;  %4394 = vmatmul.mubr.bf16.gmra.mrb[108].mxu1 %v3293_v35  ;;  %v15644_v15 = vadd.f32 %v3016_v3, %v19468_v38 }
 0x396   : > { %v3244_v22 = vpop.f32.mrb[81].mxu1  ;;  %4231 = vmatpush1.bf16.msra.mxu0 %v17428_v8  ;;  %v3020_v24 = vpop.f32.mrb[82].mxu0  ;;  %4457 = vmatpush1.bf16.msra.mxu1 %v17431_v60  ;;  %v15676_v20 = vadd.f32 %v3242_v10, %v19471_v6  ;;  %v15645_v21 = vadd.f32 %v3018_v32, %v19474_v9  ;;  %v17452_v32 = vld [vmem:[#allocation4 + $0xb40] ss:$16 sps:$4 sm:$0xff]  }
 0x397   : > { %v15646_v17 = vadd.f32 %v3020_v24, %v19468_v38  ;;  %v3246_v18 = vpop.f32.mrb[82].mxu1  ;;  %v3022_v19 = vpop.f32.mrb[83].mxu0  ;;  %4232 = vmatprep.subr.bf16.mxu0 %v17436_v50  ;;  %4458 = vmatprep.subr.bf16.mxu1 %v17439_v53  ;;  %v15677_v28 = vadd.f32 %v3244_v22, %v19477_v49  ;;  %v17455_v22 = vld [vmem:[#allocation4 + $0xb48] ss:$16 sps:$4 sm:$0xff]  }
 0x398   : > { %v15678_v62 = vadd.f32 %v3246_v18, %v19471_v6  ;;  %v15647_v23 = vadd.f32 %v3022_v19, %v19474_v9  ;;  %v3248_v52 = vpop.f32.mrb[83].mxu1 }
 0x399   : > { %v15679_v27 = vadd.f32 %v3248_v52, %v19477_v49  ;;  %v3297_v30 = vpack.c.bf16 %v15646_v17, %v15644_v15 }
 0x39a   : > { %4233 = vmatpush1.bf16.msra.mxu0 %v17434_v11  ;;  %4459 = vmatpush1.bf16.msra.mxu1 %v17437_v12  ;;  %v3298_v36 = vpack.c.bf16 %v15647_v23, %v15645_v21  ;;  %v19535_v31 = vpack.c.bf16 %v15678_v62, %v15676_v20  ;;  %v17460_v11 = vld [vmem:[#allocation4 + $0xb64] ss:$16 sps:$4 sm:$0xff]   ;;  %v17463_v12 = vld [vmem:[#allocation4 + $0xb6c] ss:$16 sps:$4 sm:$0xff]   ;;  %v17458_v20 = vld [vmem:[#allocation4 + $0xb60] ss:$16 sps:$4 sm:$0xff]  }
 0x39b   : > { %4234 = vmatprep.subr.bf16.mxu0 %v17442_v56  ;;  %4460 = vmatprep.subr.bf16.mxu1 %v17445_v4  ;;  %v19537_v41 = vpack.c.bf16 %v15679_v27, %v15677_v28  ;;  %v17461_v21 = vld [vmem:[#allocation4 + $0xb68] ss:$16 sps:$4 sm:$0xff]   ;;  %v17466_v27 = vld [vmem:[#allocation4 + $0xb84] ss:$16 sps:$4 sm:$0xff]  }
 0x39c   : > { %v3026_v0 = vpop.f32.mrb[84].mxu0  ;;  %4177 = vmatprep.mubr.bf16.mxu0 %v3298_v36  ;;  %4403 = vmatprep.mubr.bf16.mxu1 %v3298_v36 }
 0x39d   : > { %v3252_v26 = vpop.f32.mrb[84].mxu1  ;;  %v3028_v1 = vpop.f32.mrb[85].mxu0  ;;  %4178 = vmatmul.mubr.bf16.gmra.mrb[112].mxu0 %v3297_v30  ;;  %4404 = vmatmul.mubr.bf16.gmra.mrb[112].mxu1 %v3297_v30  ;;  %v15648_v54 = vadd.f32 %v3026_v0, %v19468_v38  ;;  %v17469_v30 = vld [vmem:[#allocation4 + $0xb8c] ss:$16 sps:$4 sm:$0xff]  }
 0x39e   : > { %v3254_v48 = vpop.f32.mrb[85].mxu1  ;;  %4235 = vmatpush1.bf16.msra.mxu0 %v17440_v2  ;;  %v3030_v14 = vpop.f32.mrb[86].mxu0  ;;  %4461 = vmatpush1.bf16.msra.mxu1 %v17443_v5  ;;  %v15680_v34 = vadd.f32 %v3252_v26, %v19471_v6  ;;  %v15649_v35 = vadd.f32 %v3028_v1, %v19474_v9 }
 0x39f   : > { %v15650_v29 = vadd.f32 %v3030_v14, %v19468_v38  ;;  %v3256_v51 = vpop.f32.mrb[86].mxu1  ;;  %v3032_v37 = vpop.f32.mrb[87].mxu0  ;;  %4236 = vmatprep.subr.bf16.mxu0 %v17448_v39  ;;  %4462 = vmatprep.subr.bf16.mxu1 %v17451_v40  ;;  %v15681_v50 = vadd.f32 %v3254_v48, %v19477_v49  ;;  %v17464_v14 = vld [vmem:[#allocation4 + $0xb80] ss:$16 sps:$4 sm:$0xff]  }
 0x3a0   : > { %v15682_v55 = vadd.f32 %v3256_v51, %v19471_v6  ;;  %v15651_v8 = vadd.f32 %v3032_v37, %v19474_v9  ;;  %v3258_v60 = vpop.f32.mrb[87].mxu1 }
 0x3a1   : > { %v15683_v53 = vadd.f32 %v3258_v60, %v19477_v49  ;;  %v3301_v3 = vpack.c.bf16 %v15650_v29, %v15648_v54  ;;  %v17472_v54 = vld [vmem:[#allocation4 + $0xba4] ss:$16 sps:$4 sm:$0xff]   ;;  %v17475_v29 = vld [vmem:[#allocation4 + $0xbac] ss:$16 sps:$4 sm:$0xff]  }
 0x3a2   : > { %4237 = vmatpush1.bf16.msra.mxu0 %v17446_v42  ;;  %4463 = vmatpush1.bf16.msra.mxu1 %v17449_v43  ;;  %v3302_v10 = vpack.c.bf16 %v15651_v8, %v15649_v35  ;;  %v19547_v24 = vpack.c.bf16 %v15682_v55, %v15680_v34  ;;  %v17467_v42 = vld [vmem:[#allocation4 + $0xb88] ss:$16 sps:$4 sm:$0xff]   ;;  %v17470_v55 = vld [vmem:[#allocation4 + $0xba0] ss:$16 sps:$4 sm:$0xff]  }
 0x3a3   : > { %4238 = vmatprep.subr.bf16.mxu0 %v17454_v16  ;;  %4464 = vmatprep.subr.bf16.mxu1 %v17457_v58  ;;  %v19549_v15 = vpack.c.bf16 %v15683_v53, %v15681_v50  ;;  %v17473_v8 = vld [vmem:[#allocation4 + $0xba8] ss:$16 sps:$4 sm:$0xff]  }
 0x3a4   : > { %v3036_v17 = vpop.f32.mrb[88].mxu0  ;;  %4187 = vmatprep.mubr.bf16.mxu0 %v3302_v10  ;;  %4413 = vmatprep.mubr.bf16.mxu1 %v3302_v10  ;;  %v17478_v10 = vld [vmem:[#allocation4 + $0xbc4] ss:$16 sps:$4 sm:$0xff]  }
 0x3a5   : > { %v3262_v18 = vpop.f32.mrb[88].mxu1  ;;  %v3038_v19 = vpop.f32.mrb[89].mxu0  ;;  %4188 = vmatmul.mubr.bf16.gmra.mrb[116].mxu0 %v3301_v3  ;;  %4414 = vmatmul.mubr.bf16.gmra.mrb[116].mxu1 %v3301_v3  ;;  %v15652_v62 = vadd.f32 %v3036_v17, %v19468_v38 }
 0x3a6   : > { %v3264_v56 = vpop.f32.mrb[89].mxu1  ;;  %4239 = vmatpush1.bf16.msra.mxu0 %v17452_v32  ;;  %v3040_v4 = vpop.f32.mrb[90].mxu0  ;;  %4465 = vmatpush1.bf16.msra.mxu1 %v17455_v22  ;;  %v15684_v36 = vadd.f32 %v3262_v18, %v19471_v6  ;;  %v15653_v2 = vadd.f32 %v3038_v19, %v19474_v9  ;;  %v17481_v32 = vld [vmem:[#allocation4 + $0xbcc] ss:$16 sps:$4 sm:$0xff]  }
 0x3a7   : > { %v15654_v23 = vadd.f32 %v3040_v4, %v19468_v38  ;;  %v3266_v52 = vpop.f32.mrb[90].mxu1  ;;  %v3042_v28 = vpop.f32.mrb[91].mxu0  ;;  %4240 = vmatprep.subr.bf16.mxu0 %v17460_v11  ;;  %4466 = vmatprep.subr.bf16.mxu1 %v17463_v12  ;;  %v15685_v0 = vadd.f32 %v3264_v56, %v19477_v49 }
 0x3a8   : > { %v15686_v5 = vadd.f32 %v3266_v52, %v19471_v6  ;;  %v15655_v39 = vadd.f32 %v3042_v28, %v19474_v9  ;;  %v3268_v40 = vpop.f32.mrb[91].mxu1  ;;  %v17485_v52 = vld [vmem:[#allocation4 + $0xbe8] ss:$16 sps:$4 sm:$0xff]   ;;  %v17490_v28 = vld [vmem:[#allocation4 + $0xc04] ss:$16 sps:$4 sm:$0xff]  }
 0x3a9   : > { %v15687_v26 = vadd.f32 %v3268_v40, %v19477_v49  ;;  %v3305_v1 = vpack.c.bf16 %v15654_v23, %v15652_v62  ;;  %v17479_v62 = vld [vmem:[#allocation4 + $0xbc8] ss:$16 sps:$4 sm:$0xff]   ;;  %v17502_v40 = vld [vmem:[#allocation4 + $0xc44] ss:$16 sps:$4 sm:$0xff]  }
 0x3aa   : > { %4241 = vmatpush1.bf16.msra.mxu0 %v17458_v20  ;;  %4467 = vmatpush1.bf16.msra.mxu1 %v17461_v21  ;;  %v3306_v48 = vpack.c.bf16 %v15655_v39, %v15653_v2  ;;  %v19559_v43 = vpack.c.bf16 %v15686_v5, %v15684_v36  ;;  %v17476_v20 = vld [vmem:[#allocation4 + $0xbc0] ss:$16 sps:$4 sm:$0xff]   ;;  %v17491_v36 = vld [vmem:[#allocation4 + $0xc08] ss:$16 sps:$4 sm:$0xff]   ;;  %v17496_v2 = vld [vmem:[#allocation4 + $0xc24] ss:$16 sps:$4 sm:$0xff]  }
 0x3ab   : > { %4242 = vmatprep.subr.bf16.mxu0 %v17466_v27  ;;  %4468 = vmatprep.subr.bf16.mxu1 %v17469_v30  ;;  %v19561_v51 = vpack.c.bf16 %v15687_v26, %v15685_v0  ;;  %v17493_v27 = vld [vmem:[#allocation4 + $0xc0c] ss:$16 sps:$4 sm:$0xff]   ;;  %v17488_v30 = vld [vmem:[#allocation4 + $0xc00] ss:$16 sps:$4 sm:$0xff]   ;;  %v17497_v39 = vld [vmem:[#allocation4 + $0xc28] ss:$16 sps:$4 sm:$0xff]  }
 0x3ac   : > { %v3046_v37 = vpop.f32.mrb[92].mxu0  ;;  %4197 = vmatprep.mubr.bf16.mxu0 %v3306_v48  ;;  %4423 = vmatprep.mubr.bf16.mxu1 %v3306_v48  ;;  %v17499_v5 = vld [vmem:[#allocation4 + $0xc2c] ss:$16 sps:$4 sm:$0xff]   ;;  %v17500_v26 = vld [vmem:[#allocation4 + $0xc40] ss:$16 sps:$4 sm:$0xff]  }
 0x3ad   : > { %v3272_v16 = vpop.f32.mrb[92].mxu1  ;;  %v3048_v58 = vpop.f32.mrb[93].mxu0  ;;  %4198 = vmatmul.mubr.bf16.gmra.mrb[120].mxu0 %v3305_v1  ;;  %4424 = vmatmul.mubr.bf16.gmra.mrb[120].mxu1 %v3305_v1  ;;  %v15656_v60 = vadd.f32 %v3046_v37, %v19468_v38  ;;  %v17505_v0 = vld [vmem:[#allocation4 + $0xc4c] ss:$16 sps:$4 sm:$0xff]   ;;  %v17503_v1 = vld [vmem:[#allocation4 + $0xc48] ss:$16 sps:$4 sm:$0xff]  }
 0x3ae   : > { %v3274_v34 = vpop.f32.mrb[93].mxu1  ;;  %4243 = vmatpush1.bf16.msra.mxu0 %v17464_v14  ;;  %v3050_v35 = vpop.f32.mrb[94].mxu0  ;;  %4469 = vmatpush1.bf16.msra.mxu1 %v17467_v42  ;;  %v15688_v22 = vadd.f32 %v3272_v16, %v19471_v6  ;;  %v15657_v11 = vadd.f32 %v3048_v58, %v19474_v9  ;;  %v17508_v48 = vld [vmem:[#allocation4 + $0xc64] ss:$16 sps:$4 sm:$0xff]   ;;  %v17509_v14 = vld [vmem:[#allocation4 + $0xc68] ss:$16 sps:$4 sm:$0xff]  }
 0x3af   : > { %v15658_v50 = vadd.f32 %v3050_v35, %v19468_v38  ;;  %v3276_v53 = vpop.f32.mrb[94].mxu1  ;;  %v3052_v3 = vpop.f32.mrb[95].mxu0  ;;  %4244 = vmatprep.subr.bf16.mxu0 %v17472_v54  ;;  %4470 = vmatprep.subr.bf16.mxu1 %v17475_v29  ;;  %v15689_v19 = vadd.f32 %v3274_v34, %v19477_v49  ;;  %v17514_v42 = vld [vmem:[#allocation4 + $0xc84] ss:$16 sps:$4 sm:$0xff]   ;;  %v17517_v54 = vld [vmem:[#allocation4 + $0xc8c] ss:$16 sps:$4 sm:$0xff]  }
 0x3b0   : > { %v15690_v12 = vadd.f32 %v3276_v53, %v19471_v6  ;;  %v15659_v17 = vadd.f32 %v3052_v3, %v19474_v9  ;;  %v3278_v18 = vpop.f32.mrb[95].mxu1  ;;  %v17484_v6 = vld [vmem:[#allocation4 + $0xbe4] ss:$16 sps:$4 sm:$0xff]   ;;  %v17487_v9 = vld [vmem:[#allocation4 + $0xbec] ss:$16 sps:$4 sm:$0xff]  }
 0x3b1   : > { %v15691_v56 = vadd.f32 %v3278_v18, %v19477_v49  ;;  %v3309_v38 = vpack.c.bf16 %v15658_v50, %v15656_v60  ;;  %v17482_v49 = vld [vmem:[#allocation4 + $0xbe0] ss:$16 sps:$4 sm:$0xff]   ;;  %v17515_v37 = vld [vmem:[#allocation4 + $0xc88] ss:$16 sps:$4 sm:$0xff]   ;;  %v17520_v16 = vld [vmem:[#allocation4 + $0xca4] ss:$16 sps:$4 sm:$0xff]  }
 0x3b2   : > { %4245 = vmatpush1.bf16.msra.mxu0 %v17470_v55  ;;  %4471 = vmatpush1.bf16.msra.mxu1 %v17473_v8  ;;  %v3310_v4 = vpack.c.bf16 %v15659_v17, %v15657_v11  ;;  %v19571_v21 = vpack.c.bf16 %v15690_v12, %v15688_v22  ;;  %v17512_v29 = vld [vmem:[#allocation4 + $0xc80] ss:$16 sps:$4 sm:$0xff]   ;;  %v17521_v58 = vld [vmem:[#allocation4 + $0xca8] ss:$16 sps:$4 sm:$0xff]   ;;  %v17526_v34 = vld [vmem:[#allocation4 + $0xcc4] ss:$16 sps:$4 sm:$0xff]  }
 0x3b3   : > { %4246 = vmatprep.subr.bf16.mxu0 %v17478_v10  ;;  %4472 = vmatprep.subr.bf16.mxu1 %v17481_v32  ;;  %v19573_v23 = vpack.c.bf16 %v15691_v56, %v15689_v19  ;;  %v17529_v35 = vld [vmem:[#allocation4 + $0xccc] ss:$16 sps:$4 sm:$0xff]   ;;  %v17524_v55 = vld [vmem:[#allocation4 + $0xcc0] ss:$16 sps:$4 sm:$0xff]   ;;  %v17527_v8 = vld [vmem:[#allocation4 + $0xcc8] ss:$16 sps:$4 sm:$0xff]  }
 0x3b4   : > { %4207 = vmatprep.mubr.bf16.mxu0 %v3310_v4  ;;  %4433 = vmatprep.mubr.bf16.mxu1 %v3310_v4  ;;  %v17532_v60 = vld [vmem:[#allocation4 + $0xce4] ss:$16 sps:$4 sm:$0xff]   ;;  %v17533_v50 = vld [vmem:[#allocation4 + $0xce8] ss:$16 sps:$4 sm:$0xff]   ;;  %v17541_v3 = vld [vmem:[#allocation4 + $0xd0c] ss:$16 sps:$4 sm:$0xff]  }
 0x3b5   : > { %4208 = vmatmul.mubr.bf16.gmra.mrb[124].mxu0 %v3309_v38  ;;  %4434 = vmatmul.mubr.bf16.gmra.mrb[124].mxu1 %v3309_v38  ;;  %v17538_v53 = vld [vmem:[#allocation4 + $0xd04] ss:$16 sps:$4 sm:$0xff]   ;;  %v17536_v10 = vld [vmem:[#allocation4 + $0xd00] ss:$16 sps:$4 sm:$0xff]   ;;  %v17539_v32 = vld [vmem:[#allocation4 + $0xd08] ss:$16 sps:$4 sm:$0xff]  }
 0x3b6   : > { %4247 = vmatpush1.bf16.msra.mxu0 %v17476_v20  ;;  %4250 = vmatprep.mubr.bf16.mxu0 %v19489_v33  ;;  %v17544_v22 = vld [vmem:[#allocation4 + $0xd24] ss:$16 sps:$4 sm:$0xff]   ;;  %v17545_v11 = vld [vmem:[#allocation4 + $0xd28] ss:$16 sps:$4 sm:$0xff]   ;;  %v17553_v17 = vld [vmem:[#allocation4 + $0xd4c] ss:$16 sps:$4 sm:$0xff]  }
 0x3b7   : > { %4473 = vmatpush1.bf16.msra.mxu1 %v17479_v62  ;;  %4476 = vmatprep.mubr.bf16.mxu1 %v19489_v33  ;;  %v17494_v33 = vld [vmem:[#allocation4 + $0xc20] ss:$16 sps:$4 sm:$0xff]   ;;  %v17550_v12 = vld [vmem:[#allocation4 + $0xd44] ss:$16 sps:$4 sm:$0xff]   ;;  %v17551_v19 = vld [vmem:[#allocation4 + $0xd48] ss:$16 sps:$4 sm:$0xff]  }
 0x3b8   : > { %4248 = vmatprep.subr.bf16.mxu0 %v17484_v6  ;;  %4474 = vmatprep.subr.bf16.mxu1 %v17487_v9  ;;  %v17548_v18 = vld [vmem:[#allocation4 + $0xd40] ss:$16 sps:$4 sm:$0xff]   ;;  %v17556_v56 = vld [vmem:[#allocation4 + $0xd64] ss:$16 sps:$4 sm:$0xff]   ;;  %v17557_v38 = vld [vmem:[#allocation4 + $0xd68] ss:$16 sps:$4 sm:$0xff]  }
 0x3b9   : > { %v17562_v4 = vld [vmem:[#allocation4 + $0xd84] ss:$16 sps:$4 sm:$0xff]   ;;  %v17565_v20 = vld [vmem:[#allocation4 + $0xd8c] ss:$16 sps:$4 sm:$0xff]   ;;  %v17560_v62 = vld [vmem:[#allocation4 + $0xd80] ss:$16 sps:$4 sm:$0xff]  }
 0x3ba   : > { %4249 = vmatpush1.bf16.msra.mxu0 %v17482_v49  ;;  %v17563_v6 = vld [vmem:[#allocation4 + $0xd88] ss:$16 sps:$4 sm:$0xff]   ;;  %v17568_v9 = vld [vmem:[#allocation4 + $0xda4] ss:$16 sps:$4 sm:$0xff]  }
 0x3bb   : > { %4475 = vmatpush1.bf16.msra.mxu1 %v17485_v52  ;;  %5381 = vmatprep.subr.bf16.mxu0 %v17490_v28  ;;  %v17569_v49 = vld [vmem:[#allocation4 + $0xda8] ss:$16 sps:$4 sm:$0xff]   ;;  %v17574_v52 = vld [vmem:[#allocation4 + $0xdc4] ss:$16 sps:$4 sm:$0xff]   ;;  %v17577_v28 = vld [vmem:[#allocation4 + $0xdcc] ss:$16 sps:$4 sm:$0xff]  }
 0x3bc   : > { %5607 = vmatprep.subr.bf16.mxu1 %v17493_v27  ;;  %v17572_v27 = vld [vmem:[#allocation4 + $0xdc0] ss:$16 sps:$4 sm:$0xff]  }
 0x3bd   : > { %4251 = vmatmul.mubr.bf16.vlgmr.msra.gmra.mrb[96].mxu0 %v19487_v25 }
 0x3be   : > { %4477 = vmatmul.mubr.bf16.vlgmr.msra.gmra.mrb[96].mxu1 %v19487_v25  ;;  %4260 = vmatprep.mubr.bf16.mxu0 %v19501_v61  ;;  %v17511_v25 = vld [vmem:[#allocation4 + $0xc6c] ss:$16 sps:$4 sm:$0xff]  }
 0x3bf   : > { %4486 = vmatprep.mubr.bf16.mxu1 %v19501_v61  ;;  %5382 = vmatpush1.bf16.msra.mxu0 %v17488_v30  ;;  %v17506_v61 = vld [vmem:[#allocation4 + $0xc60] ss:$16 sps:$4 sm:$0xff]   ;;  %v17583_v30 = vld [vmem:[#allocation4 + $0xdec] ss:$16 sps:$4 sm:$0xff]  }
 0x3c0   : > { %5608 = vmatpush1.bf16.msra.mxu1 %v17491_v36  ;;  %5383 = vmatprep.subr.bf16.mxu0 %v17496_v2  ;;  %v17578_v36 = vld [vmem:[#allocation4 + $0xde0] ss:$16 sps:$4 sm:$0xff]   ;;  %v17581_v2 = vld [vmem:[#allocation4 + $0xde8] ss:$16 sps:$4 sm:$0xff]  }
 0x3c1   : > { %5609 = vmatprep.subr.bf16.mxu1 %v17499_v5  ;;  %v17586_v5 = vld [vmem:[#allocation4 + $0xe04] ss:$16 sps:$4 sm:$0xff]  }
 0x3c3   : > { %5384 = vmatpush1.bf16.msra.mxu0 %v17494_v33  ;;  %v17589_v33 = vld [vmem:[#allocation4 + $0xe0c] ss:$16 sps:$4 sm:$0xff]  }
 0x3c4   : > { %5610 = vmatpush1.bf16.msra.mxu1 %v17497_v39  ;;  %5385 = vmatprep.subr.bf16.mxu0 %v17502_v40 }
 0x3c5   : > { %4261 = vmatmul.mubr.bf16.gmra.mrb[100].mxu0 %v19499_v13  ;;  %5611 = vmatprep.subr.bf16.mxu1 %v17505_v0 }
 0x3c6   : > { %4487 = vmatmul.mubr.bf16.gmra.mrb[100].mxu1 %v19499_v13  ;;  %4270 = vmatprep.mubr.bf16.mxu0 %v19513_v45  ;;  %v17523_v13 = vld [vmem:[#allocation4 + $0xcac] ss:$16 sps:$4 sm:$0xff]  }
 0x3c7   : > { %4496 = vmatprep.mubr.bf16.mxu1 %v19513_v45  ;;  %5386 = vmatpush1.bf16.msra.mxu0 %v17500_v26  ;;  %v17518_v45 = vld [vmem:[#allocation4 + $0xca0] ss:$16 sps:$4 sm:$0xff]  }
 0x3c8   : > { %5612 = vmatpush1.bf16.msra.mxu1 %v17503_v1  ;;  %5387 = vmatprep.subr.bf16.mxu0 %v17508_v48 }
 0x3c9   : > { %5613 = vmatprep.subr.bf16.mxu1 %v17511_v25 }
 0x3cb   : > { %5388 = vmatpush1.bf16.msra.mxu0 %v17506_v61 }
 0x3cc   : > { %5614 = vmatpush1.bf16.msra.mxu1 %v17509_v14  ;;  %5389 = vmatprep.subr.bf16.mxu0 %v17514_v42 }
 0x3cd   : > { %4271 = vmatmul.mubr.bf16.gmra.mrb[104].mxu0 %v19511_v7  ;;  %5615 = vmatprep.subr.bf16.mxu1 %v17517_v54 }
 0x3ce   : > { %4497 = vmatmul.mubr.bf16.gmra.mrb[104].mxu1 %v19511_v7  ;;  %4280 = vmatprep.mubr.bf16.mxu0 %v19525_v44  ;;  %v17535_v7 = vld [vmem:[#allocation4 + $0xcec] ss:$16 sps:$4 sm:$0xff]  }
 0x3cf   : > { %4506 = vmatprep.mubr.bf16.mxu1 %v19525_v44  ;;  %5390 = vmatpush1.bf16.msra.mxu0 %v17512_v29  ;;  %v17530_v44 = vld [vmem:[#allocation4 + $0xce0] ss:$16 sps:$4 sm:$0xff]  }
 0x3d0   : > { %5616 = vmatpush1.bf16.msra.mxu1 %v17515_v37  ;;  %5391 = vmatprep.subr.bf16.mxu0 %v17520_v16 }
 0x3d1   : > { %5617 = vmatprep.subr.bf16.mxu1 %v17523_v13 }
 0x3d3   : > { %5392 = vmatpush1.bf16.msra.mxu0 %v17518_v45 }
 0x3d4   : > { %5618 = vmatpush1.bf16.msra.mxu1 %v17521_v58  ;;  %5393 = vmatprep.subr.bf16.mxu0 %v17526_v34 }
 0x3d5   : > { %4281 = vmatmul.mubr.bf16.gmra.mrb[108].mxu0 %v19523_v63  ;;  %5619 = vmatprep.subr.bf16.mxu1 %v17529_v35 }
 0x3d6   : > { %4507 = vmatmul.mubr.bf16.gmra.mrb[108].mxu1 %v19523_v63  ;;  %4290 = vmatprep.mubr.bf16.mxu0 %v19537_v41  ;;  %v17547_v63 = vld [vmem:[#allocation4 + $0xd2c] ss:$16 sps:$4 sm:$0xff]  }
 0x3d7   : > { %4516 = vmatprep.mubr.bf16.mxu1 %v19537_v41  ;;  %5394 = vmatpush1.bf16.msra.mxu0 %v17524_v55  ;;  %v17542_v41 = vld [vmem:[#allocation4 + $0xd20] ss:$16 sps:$4 sm:$0xff]  }
 0x3d8   : > { %5620 = vmatpush1.bf16.msra.mxu1 %v17527_v8  ;;  %5395 = vmatprep.subr.bf16.mxu0 %v17532_v60 }
 0x3d9   : > { %5621 = vmatprep.subr.bf16.mxu1 %v17535_v7 }
 0x3db   : > { %5396 = vmatpush1.bf16.msra.mxu0 %v17530_v44  ;;  %v17584_v44 = vld [vmem:[#allocation4 + $0xe00] ss:$16 sps:$4 sm:$0xff]  }
 0x3dc   : > { %5622 = vmatpush1.bf16.msra.mxu1 %v17533_v50  ;;  %5397 = vmatprep.subr.bf16.mxu0 %v17538_v53  ;;  %v17587_v50 = vld [vmem:[#allocation4 + $0xe08] ss:$16 sps:$4 sm:$0xff]   ;;  %v17592_v53 = vld [vmem:[#allocation4 + $0xe24] ss:$16 sps:$4 sm:$0xff]  }
 0x3dd   : > { %4291 = vmatmul.mubr.bf16.gmra.mrb[112].mxu0 %v19535_v31  ;;  %5623 = vmatprep.subr.bf16.mxu1 %v17541_v3  ;;  %v17595_v3 = vld [vmem:[#allocation4 + $0xe2c] ss:$16 sps:$4 sm:$0xff]  }
 0x3de   : > { %4517 = vmatmul.mubr.bf16.gmra.mrb[112].mxu1 %v19535_v31  ;;  %4300 = vmatprep.mubr.bf16.mxu0 %v19549_v15  ;;  %v17559_v31 = vld [vmem:[#allocation4 + $0xd6c] ss:$16 sps:$4 sm:$0xff]  }
 0x3df   : > { %4526 = vmatprep.mubr.bf16.mxu1 %v19549_v15  ;;  %5398 = vmatpush1.bf16.msra.mxu0 %v17536_v10  ;;  %v17554_v15 = vld [vmem:[#allocation4 + $0xd60] ss:$16 sps:$4 sm:$0xff]  }
 0x3e0   : > { %5624 = vmatpush1.bf16.msra.mxu1 %v17539_v32  ;;  %5399 = vmatprep.subr.bf16.mxu0 %v17544_v22 }
 0x3e1   : > { %5625 = vmatprep.subr.bf16.mxu1 %v17547_v63 }
 0x3e3   : > { %5400 = vmatpush1.bf16.msra.mxu0 %v17542_v41 }
 0x3e4   : > { %5626 = vmatpush1.bf16.msra.mxu1 %v17545_v11  ;;  %5401 = vmatprep.subr.bf16.mxu0 %v17550_v12  ;;  %v17590_v12 = vld [vmem:[#allocation4 + $0xe20] ss:$16 sps:$4 sm:$0xff]  }
 0x3e5   : > { %4301 = vmatmul.mubr.bf16.gmra.mrb[116].mxu0 %v19547_v24  ;;  %5627 = vmatprep.subr.bf16.mxu1 %v17553_v17  ;;  %v17593_v17 = vld [vmem:[#allocation4 + $0xe28] ss:$16 sps:$4 sm:$0xff]  }
 0x3e6   : > { %4527 = vmatmul.mubr.bf16.gmra.mrb[116].mxu1 %v19547_v24  ;;  %4310 = vmatprep.mubr.bf16.mxu0 %v19561_v51  ;;  %v17571_v24 = vld [vmem:[#allocation4 + $0xdac] ss:$16 sps:$4 sm:$0xff]  }
 0x3e7   : > { %4536 = vmatprep.mubr.bf16.mxu1 %v19561_v51  ;;  %5402 = vmatpush1.bf16.msra.mxu0 %v17548_v18  ;;  %v17566_v51 = vld [vmem:[#allocation4 + $0xda0] ss:$16 sps:$4 sm:$0xff]  }
 0x3e8   : > { %5628 = vmatpush1.bf16.msra.mxu1 %v17551_v19  ;;  %5403 = vmatprep.subr.bf16.mxu0 %v17556_v56 }
 0x3e9   : > { %5629 = vmatprep.subr.bf16.mxu1 %v17559_v31 }
 0x3eb   : > { %5404 = vmatpush1.bf16.msra.mxu0 %v17554_v15  ;;  %v17598_v15 = vld [vmem:[#allocation4 + $0xe44] ss:$16 sps:$4 sm:$0xff]  }
 0x3ec   : > { %5630 = vmatpush1.bf16.msra.mxu1 %v17557_v38  ;;  %5405 = vmatprep.subr.bf16.mxu0 %v17562_v4  ;;  %v17601_v38 = vld [vmem:[#allocation4 + $0xe4c] ss:$16 sps:$4 sm:$0xff]  }
 0x3ed   : > { %4311 = vmatmul.mubr.bf16.gmra.mrb[120].mxu0 %v19559_v43  ;;  %5631 = vmatprep.subr.bf16.mxu1 %v17565_v20 }
 0x3ee   : > { %4537 = vmatmul.mubr.bf16.gmra.mrb[120].mxu1 %v19559_v43  ;;  %4320 = vmatprep.mubr.bf16.mxu0 %v19573_v23  ;;  %v17575_v43 = vld [vmem:[#allocation4 + $0xdc8] ss:$16 sps:$4 sm:$0xff]  }
 0x3ef   : > { %4546 = vmatprep.mubr.bf16.mxu1 %v19573_v23  ;;  %5406 = vmatpush1.bf16.msra.mxu0 %v17560_v62  ;;  %v17580_v23 = vld [vmem:[#allocation4 + $0xde4] ss:$16 sps:$4 sm:$0xff]  }
 0x3f0   : > { %5632 = vmatpush1.bf16.msra.mxu1 %v17563_v6  ;;  %5407 = vmatprep.subr.bf16.mxu0 %v17568_v9 }
 0x3f1   : > { %5633 = vmatprep.subr.bf16.mxu1 %v17571_v24 }
 0x3f3   : > { %5408 = vmatpush1.bf16.msra.mxu0 %v17566_v51 }
 0x3f4   : > { %5634 = vmatpush1.bf16.msra.mxu1 %v17569_v49  ;;  %5409 = vmatprep.subr.bf16.mxu0 %v17574_v52 }
 0x3f5   : > { %4321 = vmatmul.mubr.bf16.gmra.mrb[124].mxu0 %v19571_v21  ;;  %5635 = vmatprep.subr.bf16.mxu1 %v17577_v28  ;;  %v17596_v28 = vld [vmem:[#allocation4 + $0xe40] ss:$16 sps:$4 sm:$0xff]  }
 0x3f6   : > { %4547 = vmatmul.mubr.bf16.gmra.mrb[124].mxu1 %v19571_v21  ;;  %v3443_v21 = vld [vmem:[#allocation6 + $0x3] ss:$8 sm:$0xf] }
 0x3f7   : > { %5410 = vmatpush1.bf16.msra.mxu0 %v17572_v27  ;;  %v19608_v39 = vrot.slane %v3443_v21, %v19179_v46  ;;  %v19611_v0 = vrot.slane %v3443_v21, %v19192_v57  ;;  %v19614_v26 = vrot.slane %v3443_v21, %v19181_v47  ;;  %v19617_v25 = vrot.slane %v3443_v21, %v19195_v59  ;;  %v17599_v27 = vld [vmem:[#allocation4 + $0xe48] ss:$16 sps:$4 sm:$0xff]  }
 0x3f8   : > { %5636 = vmatpush1.bf16.msra.mxu1 %v17575_v43  ;;  %5411 = vmatprep.subr.bf16.mxu0 %v17580_v23  ;;  %v17604_v23 = vld [vmem:[#allocation4 + $0xe64] ss:$16 sps:$4 sm:$0xff]  }
 0x3f9   : > { %5637 = vmatprep.subr.bf16.mxu1 %v17583_v30  ;;  %v17607_v30 = vld [vmem:[#allocation4 + $0xe6c] ss:$16 sps:$4 sm:$0xff]  }
 0x3fb   : > { %5412 = vmatpush1.bf16.msra.mxu0 %v17578_v36 }
 0x3fc   : > { %5638 = vmatpush1.bf16.msra.mxu1 %v17581_v2  ;;  %5494 = vmatprep.subr.bf16.mxu0 %v17586_v5 }
 0x3fd   : > { %5720 = vmatprep.subr.bf16.mxu1 %v17589_v33 }
 0x490   : > { %v4252_v40 = vpop.f32.mrb[96].mxu0 }
 0x491   : > { %v4478_v1 = vpop.f32.mrb[96].mxu1  ;;  %v4254_v48 = vpop.f32.mrb[97].mxu0  ;;  %v15692_v42 = vadd.f32 %v4252_v40, %v19608_v39 }
 0x492   : > { %v4480_v61 = vpop.f32.mrb[97].mxu1  ;;  %v4256_v14 = vpop.f32.mrb[98].mxu0  ;;  %v15724_v16 = vadd.f32 %v4478_v1, %v19611_v0  ;;  %v15693_v13 = vadd.f32 %v4254_v48, %v19614_v26  ;;  %v17602_v1 = vld [vmem:[#allocation4 + $0xe60] ss:$16 sps:$4 sm:$0xff]   ;;  %v17605_v48 = vld [vmem:[#allocation4 + $0xe68] ss:$16 sps:$4 sm:$0xff]  }
 0x493   : > { %v15694_v54 = vadd.f32 %v4256_v14, %v19608_v39  ;;  %v4482_v29 = vpop.f32.mrb[98].mxu1  ;;  %v4258_v37 = vpop.f32.mrb[99].mxu0  ;;  %v15725_v35 = vadd.f32 %v4480_v61, %v19617_v25 }
 0x494   : > { %v15726_v45 = vadd.f32 %v4482_v29, %v19611_v0  ;;  %v15695_v58 = vadd.f32 %v4258_v37, %v19614_v26  ;;  %v4484_v34 = vpop.f32.mrb[99].mxu1  ;;  %v17610_v29 = vld [vmem:[#allocation4 + $0xe84] ss:$16 sps:$4 sm:$0xff]   ;;  %v17613_v37 = vld [vmem:[#allocation4 + $0xe8c] ss:$16 sps:$4 sm:$0xff]  }
 0x495   : > { %v4557_v55 = vpack.c.bf16 %v15694_v54, %v15692_v42  ;;  %v15727_v8 = vadd.f32 %v4484_v34, %v19617_v25 }
 0x496   : > { %v19627_v60 = vpack.c.bf16 %v15726_v45, %v15724_v16  ;;  %v4558_v7 = vpack.c.bf16 %v15695_v58, %v15693_v13 }
 0x497   : > { %v19629_v10 = vpack.c.bf16 %v15727_v8, %v15725_v35 }
 0x498   : > { %v4262_v32 = vpop.f32.mrb[100].mxu0  ;;  %5413 = vmatprep.mubr.bf16.mxu0 %v4558_v7  ;;  %5639 = vmatprep.mubr.bf16.mxu1 %v4558_v7 }
 0x499   : > { %v4488_v22 = vpop.f32.mrb[100].mxu1  ;;  %v4264_v63 = vpop.f32.mrb[101].mxu0  ;;  %5414 = vmatmul.mubr.bf16.vlgmr.msra.gmra.mrb[128].mxu0 %v4557_v55  ;;  %5640 = vmatmul.mubr.bf16.vlgmr.msra.gmra.mrb[128].mxu1 %v4557_v55  ;;  %v15696_v18 = vadd.f32 %v4262_v32, %v19608_v39  ;;  %v17619_v32 = vld [vmem:[#allocation4 + $0xeac] ss:$16 sps:$4 sm:$0xff]  }
 0x49a   : > { %v4490_v41 = vpop.f32.mrb[101].mxu1  ;;  %5495 = vmatpush1.bf16.msra.mxu0 %v17584_v44  ;;  %v4266_v11 = vpop.f32.mrb[102].mxu0  ;;  %5721 = vmatpush1.bf16.msra.mxu1 %v17587_v50  ;;  %v15728_v4 = vadd.f32 %v4488_v22, %v19611_v0  ;;  %v15697_v20 = vadd.f32 %v4264_v63, %v19614_v26  ;;  %v17608_v44 = vld [vmem:[#allocation4 + $0xe80] ss:$16 sps:$4 sm:$0xff]   ;;  %v17611_v50 = vld [vmem:[#allocation4 + $0xe88] ss:$16 sps:$4 sm:$0xff]  }
 0x49b   : > { %v15698_v19 = vadd.f32 %v4266_v11, %v19608_v39  ;;  %v4492_v56 = vpop.f32.mrb[102].mxu1  ;;  %v4268_v31 = vpop.f32.mrb[103].mxu0  ;;  %5496 = vmatprep.subr.bf16.mxu0 %v17592_v53  ;;  %5722 = vmatprep.subr.bf16.mxu1 %v17595_v3  ;;  %v15729_v24 = vadd.f32 %v4490_v41, %v19617_v25  ;;  %v17616_v3 = vld [vmem:[#allocation4 + $0xea4] ss:$16 sps:$4 sm:$0xff]  }
 0x49c   : > { %v15730_v62 = vadd.f32 %v4492_v56, %v19611_v0  ;;  %v15699_v6 = vadd.f32 %v4268_v31, %v19614_v26  ;;  %v4494_v9 = vpop.f32.mrb[103].mxu1 }
 0x49d   : > { %v15731_v51 = vadd.f32 %v4494_v9, %v19617_v25  ;;  %v4561_v49 = vpack.c.bf16 %v15698_v19, %v15696_v18  ;;  %v17614_v18 = vld [vmem:[#allocation4 + $0xea0] ss:$16 sps:$4 sm:$0xff]   ;;  %v17617_v19 = vld [vmem:[#allocation4 + $0xea8] ss:$16 sps:$4 sm:$0xff]  }
 0x49e   : > { %5497 = vmatpush1.bf16.msra.mxu0 %v17590_v12  ;;  %5723 = vmatpush1.bf16.msra.mxu1 %v17593_v17  ;;  %v4562_v52 = vpack.c.bf16 %v15699_v6, %v15697_v20  ;;  %v19639_v43 = vpack.c.bf16 %v15730_v62, %v15728_v4  ;;  %v17622_v4 = vld [vmem:[#allocation4 + $0xec4] ss:$16 sps:$4 sm:$0xff]   ;;  %v17625_v20 = vld [vmem:[#allocation4 + $0xecc] ss:$16 sps:$4 sm:$0xff]  }
 0x49f   : > { %5498 = vmatprep.subr.bf16.mxu0 %v17598_v15  ;;  %5724 = vmatprep.subr.bf16.mxu1 %v17601_v38  ;;  %v19641_v36 = vpack.c.bf16 %v15731_v51, %v15729_v24 }
 0x4a0   : > { %v4272_v2 = vpop.f32.mrb[104].mxu0  ;;  %5423 = vmatprep.mubr.bf16.mxu0 %v4562_v52  ;;  %5649 = vmatprep.mubr.bf16.mxu1 %v4562_v52 }
 0x4a1   : > { %v4498_v5 = vpop.f32.mrb[104].mxu1  ;;  %v4274_v33 = vpop.f32.mrb[105].mxu0  ;;  %5424 = vmatmul.mubr.bf16.gmra.mrb[132].mxu0 %v4561_v49  ;;  %5650 = vmatmul.mubr.bf16.gmra.mrb[132].mxu1 %v4561_v49  ;;  %v15700_v61 = vadd.f32 %v4272_v2, %v19608_v39 }
 0x4a2   : > { %v4500_v21 = vpop.f32.mrb[105].mxu1  ;;  %5499 = vmatpush1.bf16.msra.mxu0 %v17596_v28  ;;  %v4276_v40 = vpop.f32.mrb[106].mxu0  ;;  %5725 = vmatpush1.bf16.msra.mxu1 %v17599_v27  ;;  %v15732_v16 = vadd.f32 %v4498_v5, %v19611_v0  ;;  %v15701_v13 = vadd.f32 %v4274_v33, %v19614_v26  ;;  %v17628_v5 = vld [vmem:[#allocation4 + $0xee4] ss:$16 sps:$4 sm:$0xff]   ;;  %v17631_v33 = vld [vmem:[#allocation4 + $0xeec] ss:$16 sps:$4 sm:$0xff]  }
 0x4a3   : > { %v15702_v14 = vadd.f32 %v4276_v40, %v19608_v39  ;;  %v4502_v42 = vpop.f32.mrb[106].mxu1  ;;  %v4278_v54 = vpop.f32.mrb[107].mxu0  ;;  %5500 = vmatprep.subr.bf16.mxu0 %v17604_v23  ;;  %5726 = vmatprep.subr.bf16.mxu1 %v17607_v30  ;;  %v15733_v35 = vadd.f32 %v4500_v21, %v19617_v25  ;;  %v17620_v23 = vld [vmem:[#allocation4 + $0xec0] ss:$16 sps:$4 sm:$0xff]   ;;  %v17623_v30 = vld [vmem:[#allocation4 + $0xec8] ss:$16 sps:$4 sm:$0xff]  }
 0x4a4   : > { %v15734_v45 = vadd.f32 %v4502_v42, %v19611_v0  ;;  %v15703_v58 = vadd.f32 %v4278_v54, %v19614_v26  ;;  %v4504_v34 = vpop.f32.mrb[107].mxu1  ;;  %v17626_v42 = vld [vmem:[#allocation4 + $0xee0] ss:$16 sps:$4 sm:$0xff]   ;;  %v17629_v54 = vld [vmem:[#allocation4 + $0xee8] ss:$16 sps:$4 sm:$0xff]  }
 0x4a5   : > { %v15735_v55 = vadd.f32 %v4504_v34, %v19617_v25  ;;  %v4565_v8 = vpack.c.bf16 %v15702_v14, %v15700_v61 }
 0x4a6   : > { %5501 = vmatpush1.bf16.msra.mxu0 %v17602_v1  ;;  %5727 = vmatpush1.bf16.msra.mxu1 %v17605_v48  ;;  %v4566_v7 = vpack.c.bf16 %v15703_v58, %v15701_v13  ;;  %v19651_v53 = vpack.c.bf16 %v15734_v45, %v15732_v16  ;;  %v17634_v45 = vld [vmem:[#allocation4 + $0xf04] ss:$16 sps:$4 sm:$0xff]   ;;  %v17637_v58 = vld [vmem:[#allocation4 + $0xf0c] ss:$16 sps:$4 sm:$0xff]  }
 0x4a7   : > { %5502 = vmatprep.subr.bf16.mxu0 %v17610_v29  ;;  %5728 = vmatprep.subr.bf16.mxu1 %v17613_v37  ;;  %v19653_v22 = vpack.c.bf16 %v15735_v55, %v15733_v35 }
 0x4a8   : > { %v4282_v63 = vpop.f32.mrb[108].mxu0  ;;  %5433 = vmatprep.mubr.bf16.mxu0 %v4566_v7  ;;  %5659 = vmatprep.mubr.bf16.mxu1 %v4566_v7 }
 0x4a9   : > { %v4508_v41 = vpop.f32.mrb[108].mxu1  ;;  %v4284_v11 = vpop.f32.mrb[109].mxu0  ;;  %5434 = vmatmul.mubr.bf16.gmra.mrb[136].mxu0 %v4565_v8  ;;  %5660 = vmatmul.mubr.bf16.gmra.mrb[136].mxu1 %v4565_v8  ;;  %v15704_v56 = vadd.f32 %v4282_v63, %v19608_v39  ;;  %v17632_v63 = vld [vmem:[#allocation4 + $0xf00] ss:$16 sps:$4 sm:$0xff]  }
 0x4aa   : > { %v4510_v12 = vpop.f32.mrb[109].mxu1  ;;  %5503 = vmatpush1.bf16.msra.mxu0 %v17608_v44  ;;  %v4286_v17 = vpop.f32.mrb[110].mxu0  ;;  %5729 = vmatpush1.bf16.msra.mxu1 %v17611_v50  ;;  %v15736_v62 = vadd.f32 %v4508_v41, %v19611_v0  ;;  %v15705_v6 = vadd.f32 %v4284_v11, %v19614_v26  ;;  %v17635_v41 = vld [vmem:[#allocation4 + $0xf08] ss:$16 sps:$4 sm:$0xff]  }
 0x4ab   : > { %v15706_v31 = vadd.f32 %v4286_v17, %v19608_v39  ;;  %v4512_v15 = vpop.f32.mrb[110].mxu1  ;;  %v4288_v38 = vpop.f32.mrb[111].mxu0  ;;  %5504 = vmatprep.subr.bf16.mxu0 %v17616_v3  ;;  %5730 = vmatprep.subr.bf16.mxu1 %v17619_v32  ;;  %v15737_v49 = vadd.f32 %v4510_v12, %v19617_v25  ;;  %v17640_v12 = vld [vmem:[#allocation4 + $0xf24] ss:$16 sps:$4 sm:$0xff]   ;;  %v17643_v17 = vld [vmem:[#allocation4 + $0xf2c] ss:$16 sps:$4 sm:$0xff]  }
 0x4ac   : > { %v15738_v9 = vadd.f32 %v4512_v15, %v19611_v0  ;;  %v15707_v24 = vadd.f32 %v4288_v38, %v19614_v26  ;;  %v4514_v51 = vpop.f32.mrb[111].mxu1 }
 0x4ad   : > { %v15739_v52 = vadd.f32 %v4514_v51, %v19617_v25  ;;  %v4569_v28 = vpack.c.bf16 %v15706_v31, %v15704_v56  ;;  %v17646_v51 = vld [vmem:[#allocation4 + $0xf44] ss:$16 sps:$4 sm:$0xff]  }
 0x4ae   : > { %5505 = vmatpush1.bf16.msra.mxu0 %v17614_v18  ;;  %5731 = vmatpush1.bf16.msra.mxu1 %v17617_v19  ;;  %v4570_v27 = vpack.c.bf16 %v15707_v24, %v15705_v6  ;;  %v19663_v2 = vpack.c.bf16 %v15738_v9, %v15736_v62 }
 0x4af   : > { %5506 = vmatprep.subr.bf16.mxu0 %v17622_v4  ;;  %5732 = vmatprep.subr.bf16.mxu1 %v17625_v20  ;;  %v19665_v21 = vpack.c.bf16 %v15739_v52, %v15737_v49  ;;  %v17638_v4 = vld [vmem:[#allocation4 + $0xf20] ss:$16 sps:$4 sm:$0xff]   ;;  %v17641_v20 = vld [vmem:[#allocation4 + $0xf28] ss:$16 sps:$4 sm:$0xff]   ;;  %v17649_v49 = vld [vmem:[#allocation4 + $0xf4c] ss:$16 sps:$4 sm:$0xff]  }
 0x4b0   : > { %v4292_v40 = vpop.f32.mrb[112].mxu0  ;;  %5443 = vmatprep.mubr.bf16.mxu0 %v4570_v27  ;;  %5669 = vmatprep.mubr.bf16.mxu1 %v4570_v27 }
 0x4b1   : > { %v4518_v1 = vpop.f32.mrb[112].mxu1  ;;  %v4294_v48 = vpop.f32.mrb[113].mxu0  ;;  %5444 = vmatmul.mubr.bf16.gmra.mrb[140].mxu0 %v4569_v28  ;;  %5670 = vmatmul.mubr.bf16.gmra.mrb[140].mxu1 %v4569_v28  ;;  %v15708_v29 = vadd.f32 %v4292_v40, %v19608_v39 }
 0x4b2   : > { %v4520_v61 = vpop.f32.mrb[113].mxu1  ;;  %5507 = vmatpush1.bf16.msra.mxu0 %v17620_v23  ;;  %v4296_v14 = vpop.f32.mrb[114].mxu0  ;;  %5733 = vmatpush1.bf16.msra.mxu1 %v17623_v30  ;;  %v15740_v34 = vadd.f32 %v4518_v1, %v19611_v0  ;;  %v15709_v35 = vadd.f32 %v4294_v48, %v19614_v26  ;;  %v17644_v48 = vld [vmem:[#allocation4 + $0xf40] ss:$16 sps:$4 sm:$0xff]  }
 0x4b3   : > { %v15710_v37 = vadd.f32 %v4296_v14, %v19608_v39  ;;  %v4522_v16 = vpop.f32.mrb[114].mxu1  ;;  %v4298_v13 = vpop.f32.mrb[115].mxu0  ;;  %5508 = vmatprep.subr.bf16.mxu0 %v17628_v5  ;;  %5734 = vmatprep.subr.bf16.mxu1 %v17631_v33  ;;  %v15741_v44 = vadd.f32 %v4520_v61, %v19617_v25  ;;  %v17647_v61 = vld [vmem:[#allocation4 + $0xf48] ss:$16 sps:$4 sm:$0xff]  }
 0x4b4   : > { %v15742_v55 = vadd.f32 %v4522_v16, %v19611_v0  ;;  %v15711_v8 = vadd.f32 %v4298_v13, %v19614_v26  ;;  %v4524_v7 = vpop.f32.mrb[115].mxu1 }
 0x4b5   : > { %v15743_v50 = vadd.f32 %v4524_v7, %v19617_v25  ;;  %v4573_v3 = vpack.c.bf16 %v15710_v37, %v15708_v29 }
 0x4b6   : > { %5509 = vmatpush1.bf16.msra.mxu0 %v17626_v42  ;;  %5735 = vmatpush1.bf16.msra.mxu1 %v17629_v54  ;;  %v4574_v32 = vpack.c.bf16 %v15711_v8, %v15709_v35  ;;  %v19675_v11 = vpack.c.bf16 %v15742_v55, %v15740_v34  ;;  %v17652_v42 = vld [vmem:[#allocation4 + $0xf64] ss:$16 sps:$4 sm:$0xff]   ;;  %v17655_v54 = vld [vmem:[#allocation4 + $0xf6c] ss:$16 sps:$4 sm:$0xff]   ;;  %v17650_v34 = vld [vmem:[#allocation4 + $0xf60] ss:$16 sps:$4 sm:$0xff]  }
 0x4b7   : > { %5510 = vmatprep.subr.bf16.mxu0 %v17634_v45  ;;  %5736 = vmatprep.subr.bf16.mxu1 %v17637_v58  ;;  %v19677_v18 = vpack.c.bf16 %v15743_v50, %v15741_v44  ;;  %v17653_v35 = vld [vmem:[#allocation4 + $0xf68] ss:$16 sps:$4 sm:$0xff]   ;;  %v17658_v50 = vld [vmem:[#allocation4 + $0xf84] ss:$16 sps:$4 sm:$0xff]  }
 0x4b8   : > { %v4302_v19 = vpop.f32.mrb[116].mxu0  ;;  %5453 = vmatprep.mubr.bf16.mxu0 %v4574_v32  ;;  %5679 = vmatprep.mubr.bf16.mxu1 %v4574_v32 }
 0x4b9   : > { %v4528_v56 = vpop.f32.mrb[116].mxu1  ;;  %v4304_v31 = vpop.f32.mrb[117].mxu0  ;;  %5454 = vmatmul.mubr.bf16.gmra.mrb[144].mxu0 %v4573_v3  ;;  %5680 = vmatmul.mubr.bf16.gmra.mrb[144].mxu1 %v4573_v3  ;;  %v15712_v62 = vadd.f32 %v4302_v19, %v19608_v39  ;;  %v17661_v3 = vld [vmem:[#allocation4 + $0xf8c] ss:$16 sps:$4 sm:$0xff]  }
 0x4ba   : > { %v4530_v15 = vpop.f32.mrb[117].mxu1  ;;  %5511 = vmatpush1.bf16.msra.mxu0 %v17632_v63  ;;  %v4306_v38 = vpop.f32.mrb[118].mxu0  ;;  %5737 = vmatpush1.bf16.msra.mxu1 %v17635_v41  ;;  %v15744_v52 = vadd.f32 %v4528_v56, %v19611_v0  ;;  %v15713_v28 = vadd.f32 %v4304_v31, %v19614_v26 }
 0x4bb   : > { %v15714_v6 = vadd.f32 %v4306_v38, %v19608_v39  ;;  %v4532_v9 = vpop.f32.mrb[118].mxu1  ;;  %v4308_v24 = vpop.f32.mrb[119].mxu0  ;;  %5512 = vmatprep.subr.bf16.mxu0 %v17640_v12  ;;  %5738 = vmatprep.subr.bf16.mxu1 %v17643_v17  ;;  %v15745_v5 = vadd.f32 %v4530_v15, %v19617_v25  ;;  %v17656_v38 = vld [vmem:[#allocation4 + $0xf80] ss:$16 sps:$4 sm:$0xff]  }
 0x4bc   : > { %v15746_v27 = vadd.f32 %v4532_v9, %v19611_v0  ;;  %v15715_v23 = vadd.f32 %v4308_v24, %v19614_v26  ;;  %v4534_v30 = vpop.f32.mrb[119].mxu1 }
 0x4bd   : > { %v15747_v33 = vadd.f32 %v4534_v30, %v19617_v25  ;;  %v4577_v40 = vpack.c.bf16 %v15714_v6, %v15712_v62  ;;  %v17664_v62 = vld [vmem:[#allocation4 + $0xfa4] ss:$16 sps:$4 sm:$0xff]   ;;  %v17667_v6 = vld [vmem:[#allocation4 + $0xfac] ss:$16 sps:$4 sm:$0xff]  }
 0x4be   : > { %5513 = vmatpush1.bf16.msra.mxu0 %v17638_v4  ;;  %5739 = vmatpush1.bf16.msra.mxu1 %v17641_v20  ;;  %v4578_v1 = vpack.c.bf16 %v15715_v23, %v15713_v28  ;;  %v19687_v14 = vpack.c.bf16 %v15746_v27, %v15744_v52  ;;  %v17659_v4 = vld [vmem:[#allocation4 + $0xf88] ss:$16 sps:$4 sm:$0xff]   ;;  %v17662_v27 = vld [vmem:[#allocation4 + $0xfa0] ss:$16 sps:$4 sm:$0xff]  }
 0x4bf   : > { %5514 = vmatprep.subr.bf16.mxu0 %v17646_v51  ;;  %5740 = vmatprep.subr.bf16.mxu1 %v17649_v49  ;;  %v19689_v29 = vpack.c.bf16 %v15747_v33, %v15745_v5  ;;  %v17665_v23 = vld [vmem:[#allocation4 + $0xfa8] ss:$16 sps:$4 sm:$0xff]  }
 0x4c0   : > { %v4312_v37 = vpop.f32.mrb[120].mxu0  ;;  %5463 = vmatprep.mubr.bf16.mxu0 %v4578_v1  ;;  %5689 = vmatprep.mubr.bf16.mxu1 %v4578_v1  ;;  %v17670_v1 = vld [vmem:[#allocation4 + $0xfc4] ss:$16 sps:$4 sm:$0xff]  }
 0x4c1   : > { %v4538_v16 = vpop.f32.mrb[120].mxu1  ;;  %v4314_v13 = vpop.f32.mrb[121].mxu0  ;;  %5464 = vmatmul.mubr.bf16.gmra.mrb[148].mxu0 %v4577_v40  ;;  %5690 = vmatmul.mubr.bf16.gmra.mrb[148].mxu1 %v4577_v40  ;;  %v15716_v55 = vadd.f32 %v4312_v37, %v19608_v39 }
 0x4c2   : > { %v4540_v45 = vpop.f32.mrb[121].mxu1  ;;  %5515 = vmatpush1.bf16.msra.mxu0 %v17644_v48  ;;  %v4316_v58 = vpop.f32.mrb[122].mxu0  ;;  %5741 = vmatpush1.bf16.msra.mxu1 %v17647_v61  ;;  %v15748_v32 = vadd.f32 %v4538_v16, %v19611_v0  ;;  %v15717_v63 = vadd.f32 %v4314_v13, %v19614_v26  ;;  %v17673_v48 = vld [vmem:[#allocation4 + $0xfcc] ss:$16 sps:$4 sm:$0xff]  }
 0x4c3   : > { %v15718_v8 = vadd.f32 %v4316_v58, %v19608_v39  ;;  %v4542_v7 = vpop.f32.mrb[122].mxu1  ;;  %v4318_v44 = vpop.f32.mrb[123].mxu0  ;;  %5516 = vmatprep.subr.bf16.mxu0 %v17652_v42  ;;  %5742 = vmatprep.subr.bf16.mxu1 %v17655_v54  ;;  %v15749_v19 = vadd.f32 %v4540_v45, %v19617_v25 }
 0x4c4   : > { %v15750_v41 = vadd.f32 %v4542_v7, %v19611_v0  ;;  %v15719_v12 = vadd.f32 %v4318_v44, %v19614_v26  ;;  %v4544_v17 = vpop.f32.mrb[123].mxu1  ;;  %v17677_v7 = vld [vmem:[#allocation4 + $0xfe8] ss:$16 sps:$4 sm:$0xff]   ;;  %v17682_v44 = vld [vmem:[#allocation4 + $0x1004] ss:$16 sps:$4 sm:$0xff]  }
 0x4c5   : > { %v15751_v56 = vadd.f32 %v4544_v17, %v19617_v25  ;;  %v4581_v31 = vpack.c.bf16 %v15718_v8, %v15716_v55  ;;  %v17671_v55 = vld [vmem:[#allocation4 + $0xfc8] ss:$16 sps:$4 sm:$0xff]   ;;  %v17694_v17 = vld [vmem:[#allocation4 + $0x1044] ss:$16 sps:$4 sm:$0xff]  }
 0x4c6   : > { %5517 = vmatpush1.bf16.msra.mxu0 %v17650_v34  ;;  %5743 = vmatpush1.bf16.msra.mxu1 %v17653_v35  ;;  %v4582_v15 = vpack.c.bf16 %v15719_v12, %v15717_v63  ;;  %v19699_v20 = vpack.c.bf16 %v15750_v41, %v15748_v32  ;;  %v17668_v34 = vld [vmem:[#allocation4 + $0xfc0] ss:$16 sps:$4 sm:$0xff]   ;;  %v17683_v32 = vld [vmem:[#allocation4 + $0x1008] ss:$16 sps:$4 sm:$0xff]   ;;  %v17688_v63 = vld [vmem:[#allocation4 + $0x1024] ss:$16 sps:$4 sm:$0xff]  }
 0x4c7   : > { %5518 = vmatprep.subr.bf16.mxu0 %v17658_v50  ;;  %5744 = vmatprep.subr.bf16.mxu1 %v17661_v3  ;;  %v19701_v9 = vpack.c.bf16 %v15751_v56, %v15749_v19  ;;  %v17685_v50 = vld [vmem:[#allocation4 + $0x100c] ss:$16 sps:$4 sm:$0xff]   ;;  %v17680_v3 = vld [vmem:[#allocation4 + $0x1000] ss:$16 sps:$4 sm:$0xff]   ;;  %v17689_v12 = vld [vmem:[#allocation4 + $0x1028] ss:$16 sps:$4 sm:$0xff]  }
 0x4c8   : > { %v4322_v24 = vpop.f32.mrb[124].mxu0  ;;  %5473 = vmatprep.mubr.bf16.mxu0 %v4582_v15  ;;  %5699 = vmatprep.mubr.bf16.mxu1 %v4582_v15  ;;  %v17691_v41 = vld [vmem:[#allocation4 + $0x102c] ss:$16 sps:$4 sm:$0xff]   ;;  %v17692_v56 = vld [vmem:[#allocation4 + $0x1040] ss:$16 sps:$4 sm:$0xff]  }
 0x4c9   : > { %v4548_v51 = vpop.f32.mrb[124].mxu1  ;;  %v4324_v49 = vpop.f32.mrb[125].mxu0  ;;  %5474 = vmatmul.mubr.bf16.gmra.mrb[152].mxu0 %v4581_v31  ;;  %5700 = vmatmul.mubr.bf16.gmra.mrb[152].mxu1 %v4581_v31  ;;  %v15720_v30 = vadd.f32 %v4322_v24, %v19608_v39  ;;  %v17697_v19 = vld [vmem:[#allocation4 + $0x104c] ss:$16 sps:$4 sm:$0xff]   ;;  %v17695_v31 = vld [vmem:[#allocation4 + $0x1048] ss:$16 sps:$4 sm:$0xff]  }
 0x4ca   : > { %v4550_v52 = vpop.f32.mrb[125].mxu1  ;;  %5519 = vmatpush1.bf16.msra.mxu0 %v17656_v38  ;;  %v4326_v28 = vpop.f32.mrb[126].mxu0  ;;  %5745 = vmatpush1.bf16.msra.mxu1 %v17659_v4  ;;  %v15752_v61 = vadd.f32 %v4548_v51, %v19611_v0  ;;  %v15721_v42 = vadd.f32 %v4324_v49, %v19614_v26  ;;  %v17700_v15 = vld [vmem:[#allocation4 + $0x1064] ss:$16 sps:$4 sm:$0xff]   ;;  %v17701_v38 = vld [vmem:[#allocation4 + $0x1068] ss:$16 sps:$4 sm:$0xff]  }
 0x4cb   : > { %v15722_v5 = vadd.f32 %v4326_v28, %v19608_v39  ;;  %v4552_v33 = vpop.f32.mrb[126].mxu1  ;;  %v4328_v40 = vpop.f32.mrb[127].mxu0  ;;  %5520 = vmatprep.subr.bf16.mxu0 %v17664_v62  ;;  %5746 = vmatprep.subr.bf16.mxu1 %v17667_v6  ;;  %v15753_v13 = vadd.f32 %v4550_v52, %v19617_v25  ;;  %v17706_v4 = vld [vmem:[#allocation4 + $0x1084] ss:$16 sps:$4 sm:$0xff]   ;;  %v17709_v62 = vld [vmem:[#allocation4 + $0x108c] ss:$16 sps:$4 sm:$0xff]  }
 0x4cc   : > { %v15754_v54 = vadd.f32 %v4552_v33, %v19611_v0  ;;  %v15723_v37 = vadd.f32 %v4328_v40, %v19614_v26  ;;  %v4554_v16 = vpop.f32.mrb[127].mxu1  ;;  %v17676_v0 = vld [vmem:[#allocation4 + $0xfe4] ss:$16 sps:$4 sm:$0xff]   ;;  %v17679_v26 = vld [vmem:[#allocation4 + $0xfec] ss:$16 sps:$4 sm:$0xff]  }
 0x4cd   : > { %v15755_v45 = vadd.f32 %v4554_v16, %v19617_v25  ;;  %v4585_v39 = vpack.c.bf16 %v15722_v5, %v15720_v30  ;;  %v17674_v25 = vld [vmem:[#allocation4 + $0xfe0] ss:$16 sps:$4 sm:$0xff]   ;;  %v17707_v24 = vld [vmem:[#allocation4 + $0x1088] ss:$16 sps:$4 sm:$0xff]   ;;  %v17712_v51 = vld [vmem:[#allocation4 + $0x10a4] ss:$16 sps:$4 sm:$0xff]  }
 0x4ce   : > { %5521 = vmatpush1.bf16.msra.mxu0 %v17662_v27  ;;  %5747 = vmatpush1.bf16.msra.mxu1 %v17665_v23  ;;  %v4586_v58 = vpack.c.bf16 %v15723_v37, %v15721_v42  ;;  %v19711_v35 = vpack.c.bf16 %v15754_v54, %v15752_v61  ;;  %v17704_v6 = vld [vmem:[#allocation4 + $0x1080] ss:$16 sps:$4 sm:$0xff]   ;;  %v17713_v49 = vld [vmem:[#allocation4 + $0x10a8] ss:$16 sps:$4 sm:$0xff]   ;;  %v17718_v52 = vld [vmem:[#allocation4 + $0x10c4] ss:$16 sps:$4 sm:$0xff]  }
 0x4cf   : > { %5522 = vmatprep.subr.bf16.mxu0 %v17670_v1  ;;  %5748 = vmatprep.subr.bf16.mxu1 %v17673_v48  ;;  %v19713_v8 = vpack.c.bf16 %v15755_v45, %v15753_v13  ;;  %v17721_v28 = vld [vmem:[#allocation4 + $0x10cc] ss:$16 sps:$4 sm:$0xff]   ;;  %v17716_v27 = vld [vmem:[#allocation4 + $0x10c0] ss:$16 sps:$4 sm:$0xff]   ;;  %v17719_v23 = vld [vmem:[#allocation4 + $0x10c8] ss:$16 sps:$4 sm:$0xff]  }
 0x4d0   : > { %5483 = vmatprep.mubr.bf16.mxu0 %v4586_v58  ;;  %5709 = vmatprep.mubr.bf16.mxu1 %v4586_v58  ;;  %v17724_v30 = vld [vmem:[#allocation4 + $0x10e4] ss:$16 sps:$4 sm:$0xff]   ;;  %v17725_v5 = vld [vmem:[#allocation4 + $0x10e8] ss:$16 sps:$4 sm:$0xff]   ;;  %v17733_v40 = vld [vmem:[#allocation4 + $0x110c] ss:$16 sps:$4 sm:$0xff]  }
 0x4d1   : > { %5484 = vmatmul.mubr.bf16.gmra.mrb[156].mxu0 %v4585_v39  ;;  %5710 = vmatmul.mubr.bf16.gmra.mrb[156].mxu1 %v4585_v39  ;;  %v17730_v33 = vld [vmem:[#allocation4 + $0x1104] ss:$16 sps:$4 sm:$0xff]   ;;  %v17728_v1 = vld [vmem:[#allocation4 + $0x1100] ss:$16 sps:$4 sm:$0xff]   ;;  %v17731_v48 = vld [vmem:[#allocation4 + $0x1108] ss:$16 sps:$4 sm:$0xff]  }
 0x4d2   : > { %5523 = vmatpush1.bf16.msra.mxu0 %v17668_v34  ;;  %5526 = vmatprep.mubr.bf16.mxu0 %v19629_v10  ;;  %v17736_v61 = vld [vmem:[#allocation4 + $0x1124] ss:$16 sps:$4 sm:$0xff]   ;;  %v17737_v42 = vld [vmem:[#allocation4 + $0x1128] ss:$16 sps:$4 sm:$0xff]   ;;  %v17745_v37 = vld [vmem:[#allocation4 + $0x114c] ss:$16 sps:$4 sm:$0xff]  }
 0x4d3   : > { %5749 = vmatpush1.bf16.msra.mxu1 %v17671_v55  ;;  %5752 = vmatprep.mubr.bf16.mxu1 %v19629_v10  ;;  %v17686_v10 = vld [vmem:[#allocation4 + $0x1020] ss:$16 sps:$4 sm:$0xff]   ;;  %v17742_v54 = vld [vmem:[#allocation4 + $0x1144] ss:$16 sps:$4 sm:$0xff]   ;;  %v17743_v13 = vld [vmem:[#allocation4 + $0x1148] ss:$16 sps:$4 sm:$0xff]  }
 0x4d4   : > { %5524 = vmatprep.subr.bf16.mxu0 %v17676_v0  ;;  %5750 = vmatprep.subr.bf16.mxu1 %v17679_v26  ;;  %v17740_v16 = vld [vmem:[#allocation4 + $0x1140] ss:$16 sps:$4 sm:$0xff]   ;;  %v17748_v45 = vld [vmem:[#allocation4 + $0x1164] ss:$16 sps:$4 sm:$0xff]   ;;  %v17749_v39 = vld [vmem:[#allocation4 + $0x1168] ss:$16 sps:$4 sm:$0xff]  }
 0x4d5   : > { %v17754_v58 = vld [vmem:[#allocation4 + $0x1184] ss:$16 sps:$4 sm:$0xff]   ;;  %v17757_v34 = vld [vmem:[#allocation4 + $0x118c] ss:$16 sps:$4 sm:$0xff]   ;;  %v17752_v55 = vld [vmem:[#allocation4 + $0x1180] ss:$16 sps:$4 sm:$0xff]  }
 0x4d6   : > { %5525 = vmatpush1.bf16.msra.mxu0 %v17674_v25  ;;  %v17755_v0 = vld [vmem:[#allocation4 + $0x1188] ss:$16 sps:$4 sm:$0xff]   ;;  %v17760_v26 = vld [vmem:[#allocation4 + $0x11a4] ss:$16 sps:$4 sm:$0xff]  }
 0x4d7   : > { %5751 = vmatpush1.bf16.msra.mxu1 %v17677_v7  ;;  %6657 = vmatprep.subr.bf16.mxu0 %v17682_v44  ;;  %v17761_v25 = vld [vmem:[#allocation4 + $0x11a8] ss:$16 sps:$4 sm:$0xff]   ;;  %v17766_v7 = vld [vmem:[#allocation4 + $0x11c4] ss:$16 sps:$4 sm:$0xff]   ;;  %v17769_v44 = vld [vmem:[#allocation4 + $0x11cc] ss:$16 sps:$4 sm:$0xff]  }
 0x4d8   : > { %6883 = vmatprep.subr.bf16.mxu1 %v17685_v50  ;;  %v17764_v50 = vld [vmem:[#allocation4 + $0x11c0] ss:$16 sps:$4 sm:$0xff]  }
 0x4d9   : > { %5527 = vmatmul.mubr.bf16.vlgmr.msra.gmra.mrb[128].mxu0 %v19627_v60 }
 0x4da   : > { %5753 = vmatmul.mubr.bf16.vlgmr.msra.gmra.mrb[128].mxu1 %v19627_v60  ;;  %5536 = vmatprep.mubr.bf16.mxu0 %v19641_v36  ;;  %v17703_v60 = vld [vmem:[#allocation4 + $0x106c] ss:$16 sps:$4 sm:$0xff]  }
 0x4db   : > { %5762 = vmatprep.mubr.bf16.mxu1 %v19641_v36  ;;  %6658 = vmatpush1.bf16.msra.mxu0 %v17680_v3  ;;  %v17698_v36 = vld [vmem:[#allocation4 + $0x1060] ss:$16 sps:$4 sm:$0xff]   ;;  %v17775_v3 = vld [vmem:[#allocation4 + $0x11ec] ss:$16 sps:$4 sm:$0xff]  }
 0x4dc   : > { %6884 = vmatpush1.bf16.msra.mxu1 %v17683_v32  ;;  %6659 = vmatprep.subr.bf16.mxu0 %v17688_v63  ;;  %v17770_v32 = vld [vmem:[#allocation4 + $0x11e0] ss:$16 sps:$4 sm:$0xff]   ;;  %v17773_v63 = vld [vmem:[#allocation4 + $0x11e8] ss:$16 sps:$4 sm:$0xff]  }
 0x4dd   : > { %6885 = vmatprep.subr.bf16.mxu1 %v17691_v41  ;;  %v17778_v41 = vld [vmem:[#allocation4 + $0x1204] ss:$16 sps:$4 sm:$0xff]  }
 0x4df   : > { %6660 = vmatpush1.bf16.msra.mxu0 %v17686_v10  ;;  %v17781_v10 = vld [vmem:[#allocation4 + $0x120c] ss:$16 sps:$4 sm:$0xff]  }
 0x4e0   : > { %6886 = vmatpush1.bf16.msra.mxu1 %v17689_v12  ;;  %6661 = vmatprep.subr.bf16.mxu0 %v17694_v17 }
 0x4e1   : > { %5537 = vmatmul.mubr.bf16.gmra.mrb[132].mxu0 %v19639_v43  ;;  %6887 = vmatprep.subr.bf16.mxu1 %v17697_v19 }
 0x4e2   : > { %5763 = vmatmul.mubr.bf16.gmra.mrb[132].mxu1 %v19639_v43  ;;  %5546 = vmatprep.mubr.bf16.mxu0 %v19653_v22  ;;  %v17715_v43 = vld [vmem:[#allocation4 + $0x10ac] ss:$16 sps:$4 sm:$0xff]  }
 0x4e3   : > { %5772 = vmatprep.mubr.bf16.mxu1 %v19653_v22  ;;  %6662 = vmatpush1.bf16.msra.mxu0 %v17692_v56  ;;  %v17710_v22 = vld [vmem:[#allocation4 + $0x10a0] ss:$16 sps:$4 sm:$0xff]  }
 0x4e4   : > { %6888 = vmatpush1.bf16.msra.mxu1 %v17695_v31  ;;  %6663 = vmatprep.subr.bf16.mxu0 %v17700_v15 }
 0x4e5   : > { %6889 = vmatprep.subr.bf16.mxu1 %v17703_v60 }
 0x4e7   : > { %6664 = vmatpush1.bf16.msra.mxu0 %v17698_v36 }
 0x4e8   : > { %6890 = vmatpush1.bf16.msra.mxu1 %v17701_v38  ;;  %6665 = vmatprep.subr.bf16.mxu0 %v17706_v4 }
 0x4e9   : > { %5547 = vmatmul.mubr.bf16.gmra.mrb[136].mxu0 %v19651_v53  ;;  %6891 = vmatprep.subr.bf16.mxu1 %v17709_v62 }
 0x4ea   : > { %5773 = vmatmul.mubr.bf16.gmra.mrb[136].mxu1 %v19651_v53  ;;  %5556 = vmatprep.mubr.bf16.mxu0 %v19665_v21  ;;  %v17727_v53 = vld [vmem:[#allocation4 + $0x10ec] ss:$16 sps:$4 sm:$0xff]  }
 0x4eb   : > { %5782 = vmatprep.mubr.bf16.mxu1 %v19665_v21  ;;  %6666 = vmatpush1.bf16.msra.mxu0 %v17704_v6  ;;  %v17722_v21 = vld [vmem:[#allocation4 + $0x10e0] ss:$16 sps:$4 sm:$0xff]  }
 0x4ec   : > { %6892 = vmatpush1.bf16.msra.mxu1 %v17707_v24  ;;  %6667 = vmatprep.subr.bf16.mxu0 %v17712_v51 }
 0x4ed   : > { %6893 = vmatprep.subr.bf16.mxu1 %v17715_v43 }
 0x4ef   : > { %6668 = vmatpush1.bf16.msra.mxu0 %v17710_v22 }
 0x4f0   : > { %6894 = vmatpush1.bf16.msra.mxu1 %v17713_v49  ;;  %6669 = vmatprep.subr.bf16.mxu0 %v17718_v52 }
 0x4f1   : > { %5557 = vmatmul.mubr.bf16.gmra.mrb[140].mxu0 %v19663_v2  ;;  %6895 = vmatprep.subr.bf16.mxu1 %v17721_v28 }
 0x4f2   : > { %5783 = vmatmul.mubr.bf16.gmra.mrb[140].mxu1 %v19663_v2  ;;  %5566 = vmatprep.mubr.bf16.mxu0 %v19677_v18  ;;  %v17739_v2 = vld [vmem:[#allocation4 + $0x112c] ss:$16 sps:$4 sm:$0xff]  }
 0x4f3   : > { %5792 = vmatprep.mubr.bf16.mxu1 %v19677_v18  ;;  %6670 = vmatpush1.bf16.msra.mxu0 %v17716_v27  ;;  %v17734_v18 = vld [vmem:[#allocation4 + $0x1120] ss:$16 sps:$4 sm:$0xff]  }
 0x4f4   : > { %6896 = vmatpush1.bf16.msra.mxu1 %v17719_v23  ;;  %6671 = vmatprep.subr.bf16.mxu0 %v17724_v30 }
 0x4f5   : > { %6897 = vmatprep.subr.bf16.mxu1 %v17727_v53 }
 0x4f7   : > { %6672 = vmatpush1.bf16.msra.mxu0 %v17722_v21  ;;  %v17776_v21 = vld [vmem:[#allocation4 + $0x1200] ss:$16 sps:$4 sm:$0xff]  }
 0x4f8   : > { %6898 = vmatpush1.bf16.msra.mxu1 %v17725_v5  ;;  %6673 = vmatprep.subr.bf16.mxu0 %v17730_v33  ;;  %v17779_v5 = vld [vmem:[#allocation4 + $0x1208] ss:$16 sps:$4 sm:$0xff]  }
 0x4f9   : > { %5567 = vmatmul.mubr.bf16.gmra.mrb[144].mxu0 %v19675_v11  ;;  %6899 = vmatprep.subr.bf16.mxu1 %v17733_v40  ;;  %v17784_v40 = vld [vmem:[#allocation4 + $0x1224] ss:$16 sps:$4 sm:$0xff]  }
 0x4fa   : > { %5793 = vmatmul.mubr.bf16.gmra.mrb[144].mxu1 %v19675_v11  ;;  %5576 = vmatprep.mubr.bf16.mxu0 %v19689_v29  ;;  %v17751_v11 = vld [vmem:[#allocation4 + $0x116c] ss:$16 sps:$4 sm:$0xff]  }
 0x4fb   : > { %5802 = vmatprep.mubr.bf16.mxu1 %v19689_v29  ;;  %6674 = vmatpush1.bf16.msra.mxu0 %v17728_v1  ;;  %v17746_v29 = vld [vmem:[#allocation4 + $0x1160] ss:$16 sps:$4 sm:$0xff]   ;;  %v17787_v1 = vld [vmem:[#allocation4 + $0x122c] ss:$16 sps:$4 sm:$0xff]  }
 0x4fc   : > { %6900 = vmatpush1.bf16.msra.mxu1 %v17731_v48  ;;  %6675 = vmatprep.subr.bf16.mxu0 %v17736_v61 }
 0x4fd   : > { %6901 = vmatprep.subr.bf16.mxu1 %v17739_v2 }
 0x4ff   : > { %6676 = vmatpush1.bf16.msra.mxu0 %v17734_v18 }
 0x500   : > { %6902 = vmatpush1.bf16.msra.mxu1 %v17737_v42  ;;  %6677 = vmatprep.subr.bf16.mxu0 %v17742_v54  ;;  %v17782_v54 = vld [vmem:[#allocation4 + $0x1220] ss:$16 sps:$4 sm:$0xff]  }
 0x501   : > { %5577 = vmatmul.mubr.bf16.gmra.mrb[148].mxu0 %v19687_v14  ;;  %6903 = vmatprep.subr.bf16.mxu1 %v17745_v37  ;;  %v17785_v37 = vld [vmem:[#allocation4 + $0x1228] ss:$16 sps:$4 sm:$0xff]  }
 0x502   : > { %5803 = vmatmul.mubr.bf16.gmra.mrb[148].mxu1 %v19687_v14  ;;  %5586 = vmatprep.mubr.bf16.mxu0 %v19701_v9  ;;  %v17763_v14 = vld [vmem:[#allocation4 + $0x11ac] ss:$16 sps:$4 sm:$0xff]  }
 0x503   : > { %5812 = vmatprep.mubr.bf16.mxu1 %v19701_v9  ;;  %6678 = vmatpush1.bf16.msra.mxu0 %v17740_v16  ;;  %v17758_v9 = vld [vmem:[#allocation4 + $0x11a0] ss:$16 sps:$4 sm:$0xff]  }
 0x504   : > { %6904 = vmatpush1.bf16.msra.mxu1 %v17743_v13  ;;  %6679 = vmatprep.subr.bf16.mxu0 %v17748_v45 }
 0x505   : > { %6905 = vmatprep.subr.bf16.mxu1 %v17751_v11 }
 0x507   : > { %6680 = vmatpush1.bf16.msra.mxu0 %v17746_v29  ;;  %v17790_v29 = vld [vmem:[#allocation4 + $0x1244] ss:$16 sps:$4 sm:$0xff]  }
 0x508   : > { %6906 = vmatpush1.bf16.msra.mxu1 %v17749_v39  ;;  %6681 = vmatprep.subr.bf16.mxu0 %v17754_v58  ;;  %v17793_v39 = vld [vmem:[#allocation4 + $0x124c] ss:$16 sps:$4 sm:$0xff]  }
 0x509   : > { %5587 = vmatmul.mubr.bf16.gmra.mrb[152].mxu0 %v19699_v20  ;;  %6907 = vmatprep.subr.bf16.mxu1 %v17757_v34 }
 0x50a   : > { %5813 = vmatmul.mubr.bf16.gmra.mrb[152].mxu1 %v19699_v20  ;;  %5596 = vmatprep.mubr.bf16.mxu0 %v19713_v8  ;;  %v17767_v20 = vld [vmem:[#allocation4 + $0x11c8] ss:$16 sps:$4 sm:$0xff]  }
 0x50b   : > { %5822 = vmatprep.mubr.bf16.mxu1 %v19713_v8  ;;  %6682 = vmatpush1.bf16.msra.mxu0 %v17752_v55  ;;  %v17772_v8 = vld [vmem:[#allocation4 + $0x11e4] ss:$16 sps:$4 sm:$0xff]  }
 0x50c   : > { %6908 = vmatpush1.bf16.msra.mxu1 %v17755_v0  ;;  %6683 = vmatprep.subr.bf16.mxu0 %v17760_v26 }
 0x50d   : > { %6909 = vmatprep.subr.bf16.mxu1 %v17763_v14 }
 0x50f   : > { %6684 = vmatpush1.bf16.msra.mxu0 %v17758_v9 }
 0x510   : > { %6910 = vmatpush1.bf16.msra.mxu1 %v17761_v25  ;;  %6685 = vmatprep.subr.bf16.mxu0 %v17766_v7 }
 0x511   : > { %5597 = vmatmul.mubr.bf16.gmra.mrb[156].mxu0 %v19711_v35  ;;  %6911 = vmatprep.subr.bf16.mxu1 %v17769_v44 }
 0x512   : > { %5823 = vmatmul.mubr.bf16.gmra.mrb[156].mxu1 %v19711_v35  ;;  %v4719_v35 = vld [vmem:[#allocation6 + $0x4] ss:$8 sm:$0xf] }
 0x513   : > { %6686 = vmatpush1.bf16.msra.mxu0 %v17764_v50  ;;  %v19748_v12 = vrot.slane %v4719_v35, %v19179_v46  ;;  %v19751_v19 = vrot.slane %v4719_v35, %v19192_v57  ;;  %v19754_v56 = vrot.slane %v4719_v35, %v19181_v47  ;;  %v19757_v60 = vrot.slane %v4719_v35, %v19195_v59  ;;  %v17788_v50 = vld [vmem:[#allocation4 + $0x1240] ss:$16 sps:$4 sm:$0xff]  }
 0x514   : > { %6912 = vmatpush1.bf16.msra.mxu1 %v17767_v20  ;;  %6687 = vmatprep.subr.bf16.mxu0 %v17772_v8  ;;  %v17791_v20 = vld [vmem:[#allocation4 + $0x1248] ss:$16 sps:$4 sm:$0xff]  }
 0x515   : > { %6913 = vmatprep.subr.bf16.mxu1 %v17775_v3  ;;  %v17796_v3 = vld [vmem:[#allocation4 + $0x1264] ss:$16 sps:$4 sm:$0xff]  }
 0x517   : > { %6688 = vmatpush1.bf16.msra.mxu0 %v17770_v32  ;;  %v17799_v32 = vld [vmem:[#allocation4 + $0x126c] ss:$16 sps:$4 sm:$0xff]  }
 0x518   : > { %6914 = vmatpush1.bf16.msra.mxu1 %v17773_v63  ;;  %6770 = vmatprep.subr.bf16.mxu0 %v17778_v41 }
 0x519   : > { %6996 = vmatprep.subr.bf16.mxu1 %v17781_v10 }
 0x5ac   : > { %v5528_v17 = vpop.f32.mrb[128].mxu0 }
 0x5ad   : > { %v5754_v31 = vpop.f32.mrb[128].mxu1  ;;  %v5530_v15 = vpop.f32.mrb[129].mxu0  ;;  %v15756_v4 = vadd.f32 %v5528_v17, %v19748_v12 }
 0x5ae   : > { %v5756_v36 = vpop.f32.mrb[129].mxu1  ;;  %v5532_v38 = vpop.f32.mrb[130].mxu0  ;;  %v15788_v51 = vadd.f32 %v5754_v31, %v19751_v19  ;;  %v15757_v43 = vadd.f32 %v5530_v15, %v19754_v56  ;;  %v17794_v31 = vld [vmem:[#allocation4 + $0x1260] ss:$16 sps:$4 sm:$0xff]   ;;  %v17797_v15 = vld [vmem:[#allocation4 + $0x1268] ss:$16 sps:$4 sm:$0xff]  }
 0x5af   : > { %v15758_v62 = vadd.f32 %v5532_v38, %v19748_v12  ;;  %v5758_v6 = vpop.f32.mrb[130].mxu1  ;;  %v5534_v24 = vpop.f32.mrb[131].mxu0  ;;  %v15789_v28 = vadd.f32 %v5756_v36, %v19757_v60 }
 0x5b0   : > { %v15790_v22 = vadd.f32 %v5758_v6, %v19751_v19  ;;  %v15759_v49 = vadd.f32 %v5534_v24, %v19754_v56  ;;  %v5760_v52 = vpop.f32.mrb[131].mxu1  ;;  %v17802_v6 = vld [vmem:[#allocation4 + $0x1284] ss:$16 sps:$4 sm:$0xff]   ;;  %v17805_v24 = vld [vmem:[#allocation4 + $0x128c] ss:$16 sps:$4 sm:$0xff]  }
 0x5b1   : > { %v5833_v27 = vpack.c.bf16 %v15758_v62, %v15756_v4  ;;  %v15791_v23 = vadd.f32 %v5760_v52, %v19757_v60 }
 0x5b2   : > { %v19767_v30 = vpack.c.bf16 %v15790_v22, %v15788_v51  ;;  %v5834_v53 = vpack.c.bf16 %v15759_v49, %v15757_v43 }
 0x5b3   : > { %v19769_v33 = vpack.c.bf16 %v15791_v23, %v15789_v28 }
 0x5b4   : > { %v5538_v48 = vpop.f32.mrb[132].mxu0  ;;  %6689 = vmatprep.mubr.bf16.mxu0 %v5834_v53  ;;  %6915 = vmatprep.mubr.bf16.mxu1 %v5834_v53 }
 0x5b5   : > { %v5764_v61 = vpop.f32.mrb[132].mxu1  ;;  %v5540_v2 = vpop.f32.mrb[133].mxu0  ;;  %6690 = vmatmul.mubr.bf16.vlgmr.msra.gmra.mrb[160].mxu0 %v5833_v27  ;;  %6916 = vmatmul.mubr.bf16.vlgmr.msra.gmra.mrb[160].mxu1 %v5833_v27  ;;  %v15760_v16 = vadd.f32 %v5538_v48, %v19748_v12  ;;  %v17808_v48 = vld [vmem:[#allocation4 + $0x12a4] ss:$16 sps:$4 sm:$0xff]  }
 0x5b6   : > { %v5766_v18 = vpop.f32.mrb[133].mxu1  ;;  %6771 = vmatpush1.bf16.msra.mxu0 %v17776_v21  ;;  %v5542_v42 = vpop.f32.mrb[134].mxu0  ;;  %6997 = vmatpush1.bf16.msra.mxu1 %v17779_v5  ;;  %v15792_v58 = vadd.f32 %v5764_v61, %v19751_v19  ;;  %v15761_v34 = vadd.f32 %v5540_v2, %v19754_v56  ;;  %v17800_v5 = vld [vmem:[#allocation4 + $0x1280] ss:$16 sps:$4 sm:$0xff]   ;;  %v17811_v61 = vld [vmem:[#allocation4 + $0x12ac] ss:$16 sps:$4 sm:$0xff]  }
 0x5b7   : > { %v15762_v13 = vadd.f32 %v5542_v42, %v19748_v12  ;;  %v5768_v45 = vpop.f32.mrb[134].mxu1  ;;  %v5544_v11 = vpop.f32.mrb[135].mxu0  ;;  %6772 = vmatprep.subr.bf16.mxu0 %v17784_v40  ;;  %6998 = vmatprep.subr.bf16.mxu1 %v17787_v1  ;;  %v15793_v14 = vadd.f32 %v5766_v18, %v19757_v60  ;;  %v17803_v40 = vld [vmem:[#allocation4 + $0x1288] ss:$16 sps:$4 sm:$0xff]  }
 0x5b8   : > { %v15794_v55 = vadd.f32 %v5768_v45, %v19751_v19  ;;  %v15763_v0 = vadd.f32 %v5544_v11, %v19754_v56  ;;  %v5770_v26 = vpop.f32.mrb[135].mxu1 }
 0x5b9   : > { %v5837_v9 = vpack.c.bf16 %v15762_v13, %v15760_v16  ;;  %v15795_v25 = vadd.f32 %v5770_v26, %v19757_v60  ;;  %v17806_v16 = vld [vmem:[#allocation4 + $0x12a0] ss:$16 sps:$4 sm:$0xff]   ;;  %v17809_v13 = vld [vmem:[#allocation4 + $0x12a8] ss:$16 sps:$4 sm:$0xff]  }
 0x5ba   : > { %v19779_v7 = vpack.c.bf16 %v15794_v55, %v15792_v58  ;;  %v5838_v44 = vpack.c.bf16 %v15763_v0, %v15761_v34  ;;  %6773 = vmatpush1.bf16.msra.mxu0 %v17782_v54  ;;  %6999 = vmatpush1.bf16.msra.mxu1 %v17785_v37  ;;  %v17814_v58 = vld [vmem:[#allocation4 + $0x12c4] ss:$16 sps:$4 sm:$0xff]   ;;  %v17817_v34 = vld [vmem:[#allocation4 + $0x12cc] ss:$16 sps:$4 sm:$0xff]  }
 0x5bb   : > { %v19781_v8 = vpack.c.bf16 %v15795_v25, %v15793_v14  ;;  %6774 = vmatprep.subr.bf16.mxu0 %v17790_v29  ;;  %7000 = vmatprep.subr.bf16.mxu1 %v17793_v39 }
 0x5bc   : > { %v5548_v63 = vpop.f32.mrb[136].mxu0  ;;  %6699 = vmatprep.mubr.bf16.mxu0 %v5838_v44  ;;  %6925 = vmatprep.mubr.bf16.mxu1 %v5838_v44 }
 0x5bd   : > { %v5774_v41 = vpop.f32.mrb[136].mxu1  ;;  %v5550_v10 = vpop.f32.mrb[137].mxu0  ;;  %6700 = vmatmul.mubr.bf16.gmra.mrb[164].mxu0 %v5837_v9  ;;  %6926 = vmatmul.mubr.bf16.gmra.mrb[164].mxu1 %v5837_v9  ;;  %v15764_v36 = vadd.f32 %v5548_v63, %v19748_v12  ;;  %v17815_v63 = vld [vmem:[#allocation4 + $0x12c8] ss:$16 sps:$4 sm:$0xff]  }
 0x5be   : > { %v5776_v35 = vpop.f32.mrb[137].mxu1  ;;  %6775 = vmatpush1.bf16.msra.mxu0 %v17788_v50  ;;  %v5552_v17 = vpop.f32.mrb[138].mxu0  ;;  %7001 = vmatpush1.bf16.msra.mxu1 %v17791_v20  ;;  %v15796_v51 = vadd.f32 %v5774_v41, %v19751_v19  ;;  %v15765_v43 = vadd.f32 %v5550_v10, %v19754_v56  ;;  %v17820_v10 = vld [vmem:[#allocation4 + $0x12e4] ss:$16 sps:$4 sm:$0xff]  }
 0x5bf   : > { %v15766_v38 = vadd.f32 %v5552_v17, %v19748_v12  ;;  %v5778_v4 = vpop.f32.mrb[138].mxu1  ;;  %v5554_v62 = vpop.f32.mrb[139].mxu0  ;;  %6776 = vmatprep.subr.bf16.mxu0 %v17796_v3  ;;  %7002 = vmatprep.subr.bf16.mxu1 %v17799_v32  ;;  %v15797_v28 = vadd.f32 %v5776_v35, %v19757_v60  ;;  %v17812_v32 = vld [vmem:[#allocation4 + $0x12c0] ss:$16 sps:$4 sm:$0xff]   ;;  %v17823_v35 = vld [vmem:[#allocation4 + $0x12ec] ss:$16 sps:$4 sm:$0xff]  }
 0x5c0   : > { %v15798_v22 = vadd.f32 %v5778_v4, %v19751_v19  ;;  %v15767_v49 = vadd.f32 %v5554_v62, %v19754_v56  ;;  %v5780_v52 = vpop.f32.mrb[139].mxu1  ;;  %v17818_v4 = vld [vmem:[#allocation4 + $0x12e0] ss:$16 sps:$4 sm:$0xff]   ;;  %v17821_v62 = vld [vmem:[#allocation4 + $0x12e8] ss:$16 sps:$4 sm:$0xff]  }
 0x5c1   : > { %v5841_v27 = vpack.c.bf16 %v15766_v38, %v15764_v36  ;;  %v15799_v23 = vadd.f32 %v5780_v52, %v19757_v60 }
 0x5c2   : > { %v19791_v53 = vpack.c.bf16 %v15798_v22, %v15796_v51  ;;  %v5842_v21 = vpack.c.bf16 %v15767_v49, %v15765_v43  ;;  %6777 = vmatpush1.bf16.msra.mxu0 %v17794_v31  ;;  %7003 = vmatpush1.bf16.msra.mxu1 %v17797_v15  ;;  %v17826_v22 = vld [vmem:[#allocation4 + $0x1304] ss:$16 sps:$4 sm:$0xff]   ;;  %v17829_v49 = vld [vmem:[#allocation4 + $0x130c] ss:$16 sps:$4 sm:$0xff]  }
 0x5c3   : > { %v19793_v1 = vpack.c.bf16 %v15799_v23, %v15797_v28  ;;  %6778 = vmatprep.subr.bf16.mxu0 %v17802_v6  ;;  %7004 = vmatprep.subr.bf16.mxu1 %v17805_v24 }
 0x5c4   : > { %v5558_v2 = vpop.f32.mrb[140].mxu0  ;;  %6709 = vmatprep.mubr.bf16.mxu0 %v5842_v21  ;;  %6935 = vmatprep.mubr.bf16.mxu1 %v5842_v21 }
 0x5c5   : > { %v5784_v18 = vpop.f32.mrb[140].mxu1  ;;  %v5560_v42 = vpop.f32.mrb[141].mxu0  ;;  %6710 = vmatmul.mubr.bf16.gmra.mrb[168].mxu0 %v5841_v27  ;;  %6936 = vmatmul.mubr.bf16.gmra.mrb[168].mxu1 %v5841_v27  ;;  %v15768_v45 = vadd.f32 %v5558_v2, %v19748_v12 }
 0x5c6   : > { %v5786_v54 = vpop.f32.mrb[141].mxu1  ;;  %6779 = vmatpush1.bf16.msra.mxu0 %v17800_v5  ;;  %v5562_v37 = vpop.f32.mrb[142].mxu0  ;;  %7005 = vmatpush1.bf16.msra.mxu1 %v17803_v40  ;;  %v15800_v55 = vadd.f32 %v5784_v18, %v19751_v19  ;;  %v15769_v0 = vadd.f32 %v5560_v42, %v19754_v56  ;;  %v17824_v18 = vld [vmem:[#allocation4 + $0x1300] ss:$16 sps:$4 sm:$0xff]   ;;  %v17827_v42 = vld [vmem:[#allocation4 + $0x1308] ss:$16 sps:$4 sm:$0xff]  }
 0x5c7   : > { %v15770_v11 = vadd.f32 %v5562_v37, %v19748_v12  ;;  %v5788_v29 = vpop.f32.mrb[142].mxu1  ;;  %v5564_v39 = vpop.f32.mrb[143].mxu0  ;;  %6780 = vmatprep.subr.bf16.mxu0 %v17808_v48  ;;  %7006 = vmatprep.subr.bf16.mxu1 %v17811_v61  ;;  %v15801_v25 = vadd.f32 %v5786_v54, %v19757_v60  ;;  %v17832_v37 = vld [vmem:[#allocation4 + $0x1324] ss:$16 sps:$4 sm:$0xff]  }
 0x5c8   : > { %v15802_v26 = vadd.f32 %v5788_v29, %v19751_v19  ;;  %v15771_v14 = vadd.f32 %v5564_v39, %v19754_v56  ;;  %v5790_v9 = vpop.f32.mrb[143].mxu1 }
 0x5c9   : > { %v5845_v44 = vpack.c.bf16 %v15770_v11, %v15768_v45  ;;  %v15803_v50 = vadd.f32 %v5790_v9, %v19757_v60  ;;  %v17838_v9 = vld [vmem:[#allocation4 + $0x1344] ss:$16 sps:$4 sm:$0xff]  }
 0x5ca   : > { %v19803_v20 = vpack.c.bf16 %v15802_v26, %v15800_v55  ;;  %v5846_v3 = vpack.c.bf16 %v15771_v14, %v15769_v0  ;;  %6781 = vmatpush1.bf16.msra.mxu0 %v17806_v16  ;;  %7007 = vmatpush1.bf16.msra.mxu1 %v17809_v13  ;;  %v17835_v16 = vld [vmem:[#allocation4 + $0x132c] ss:$16 sps:$4 sm:$0xff]  }
 0x5cb   : > { %v19805_v41 = vpack.c.bf16 %v15803_v50, %v15801_v25  ;;  %6782 = vmatprep.subr.bf16.mxu0 %v17814_v58  ;;  %7008 = vmatprep.subr.bf16.mxu1 %v17817_v34  ;;  %v17830_v58 = vld [vmem:[#allocation4 + $0x1320] ss:$16 sps:$4 sm:$0xff]   ;;  %v17833_v34 = vld [vmem:[#allocation4 + $0x1328] ss:$16 sps:$4 sm:$0xff]   ;;  %v17841_v25 = vld [vmem:[#allocation4 + $0x134c] ss:$16 sps:$4 sm:$0xff]  }
 0x5cc   : > { %v5568_v17 = vpop.f32.mrb[144].mxu0  ;;  %6719 = vmatprep.mubr.bf16.mxu0 %v5846_v3  ;;  %6945 = vmatprep.mubr.bf16.mxu1 %v5846_v3 }
 0x5cd   : > { %v5794_v31 = vpop.f32.mrb[144].mxu1  ;;  %v5570_v15 = vpop.f32.mrb[145].mxu0  ;;  %6720 = vmatmul.mubr.bf16.gmra.mrb[172].mxu0 %v5845_v44  ;;  %6946 = vmatmul.mubr.bf16.gmra.mrb[172].mxu1 %v5845_v44  ;;  %v15772_v6 = vadd.f32 %v5568_v17, %v19748_v12 }
 0x5ce   : > { %v5796_v36 = vpop.f32.mrb[145].mxu1  ;;  %6783 = vmatpush1.bf16.msra.mxu0 %v17812_v32  ;;  %v5572_v38 = vpop.f32.mrb[146].mxu0  ;;  %7009 = vmatpush1.bf16.msra.mxu1 %v17815_v63  ;;  %v15804_v52 = vadd.f32 %v5794_v31, %v19751_v19  ;;  %v15773_v28 = vadd.f32 %v5570_v15, %v19754_v56 }
 0x5cf   : > { %v15774_v24 = vadd.f32 %v5572_v38, %v19748_v12  ;;  %v5798_v51 = vpop.f32.mrb[146].mxu1  ;;  %v5574_v43 = vpop.f32.mrb[147].mxu0  ;;  %6784 = vmatprep.subr.bf16.mxu0 %v17820_v10  ;;  %7010 = vmatprep.subr.bf16.mxu1 %v17823_v35  ;;  %v15805_v5 = vadd.f32 %v5796_v36, %v19757_v60  ;;  %v17836_v36 = vld [vmem:[#allocation4 + $0x1340] ss:$16 sps:$4 sm:$0xff]   ;;  %v17839_v38 = vld [vmem:[#allocation4 + $0x1348] ss:$16 sps:$4 sm:$0xff]  }
 0x5d0   : > { %v15806_v27 = vadd.f32 %v5798_v51, %v19751_v19  ;;  %v15775_v23 = vadd.f32 %v5574_v43, %v19754_v56  ;;  %v5800_v21 = vpop.f32.mrb[147].mxu1 }
 0x5d1   : > { %v5849_v40 = vpack.c.bf16 %v15774_v24, %v15772_v6  ;;  %v15807_v48 = vadd.f32 %v5800_v21, %v19757_v60  ;;  %v17847_v6 = vld [vmem:[#allocation4 + $0x136c] ss:$16 sps:$4 sm:$0xff]  }
 0x5d2   : > { %v19815_v61 = vpack.c.bf16 %v15806_v27, %v15804_v52  ;;  %v5850_v2 = vpack.c.bf16 %v15775_v23, %v15773_v28  ;;  %6785 = vmatpush1.bf16.msra.mxu0 %v17818_v4  ;;  %7011 = vmatpush1.bf16.msra.mxu1 %v17821_v62  ;;  %v17844_v62 = vld [vmem:[#allocation4 + $0x1364] ss:$16 sps:$4 sm:$0xff]   ;;  %v17842_v52 = vld [vmem:[#allocation4 + $0x1360] ss:$16 sps:$4 sm:$0xff]   ;;  %v17845_v28 = vld [vmem:[#allocation4 + $0x1368] ss:$16 sps:$4 sm:$0xff]  }
 0x5d3   : > { %v19817_v54 = vpack.c.bf16 %v15807_v48, %v15805_v5  ;;  %6786 = vmatprep.subr.bf16.mxu0 %v17826_v22  ;;  %7012 = vmatprep.subr.bf16.mxu1 %v17829_v49  ;;  %v17853_v48 = vld [vmem:[#allocation4 + $0x138c] ss:$16 sps:$4 sm:$0xff]  }
 0x5d4   : > { %v5578_v13 = vpop.f32.mrb[148].mxu0  ;;  %6729 = vmatprep.mubr.bf16.mxu0 %v5850_v2  ;;  %6955 = vmatprep.mubr.bf16.mxu1 %v5850_v2 }
 0x5d5   : > { %v5804_v45 = vpop.f32.mrb[148].mxu1  ;;  %v5580_v11 = vpop.f32.mrb[149].mxu0  ;;  %6730 = vmatmul.mubr.bf16.gmra.mrb[176].mxu0 %v5849_v40  ;;  %6956 = vmatmul.mubr.bf16.gmra.mrb[176].mxu1 %v5849_v40  ;;  %v15776_v55 = vadd.f32 %v5578_v13, %v19748_v12  ;;  %v17850_v40 = vld [vmem:[#allocation4 + $0x1384] ss:$16 sps:$4 sm:$0xff]  }
 0x5d6   : > { %v5806_v29 = vpop.f32.mrb[149].mxu1  ;;  %6787 = vmatpush1.bf16.msra.mxu0 %v17824_v18  ;;  %v5582_v39 = vpop.f32.mrb[150].mxu0  ;;  %7013 = vmatpush1.bf16.msra.mxu1 %v17827_v42  ;;  %v15808_v44 = vadd.f32 %v5804_v45, %v19751_v19  ;;  %v15777_v50 = vadd.f32 %v5580_v11, %v19754_v56 }
 0x5d7   : > { %v15778_v0 = vadd.f32 %v5582_v39, %v19748_v12  ;;  %v5808_v26 = vpop.f32.mrb[150].mxu1  ;;  %v5584_v14 = vpop.f32.mrb[151].mxu0  ;;  %6788 = vmatprep.subr.bf16.mxu0 %v17832_v37  ;;  %7014 = vmatprep.subr.bf16.mxu1 %v17835_v16  ;;  %v15809_v10 = vadd.f32 %v5806_v29, %v19757_v60 }
 0x5d8   : > { %v15810_v3 = vadd.f32 %v5808_v26, %v19751_v19  ;;  %v15779_v32 = vadd.f32 %v5584_v14, %v19754_v56  ;;  %v5810_v63 = vpop.f32.mrb[151].mxu1  ;;  %v17859_v26 = vld [vmem:[#allocation4 + $0x13ac] ss:$16 sps:$4 sm:$0xff]  }
 0x5d9   : > { %v5853_v35 = vpack.c.bf16 %v15778_v0, %v15776_v55  ;;  %v15811_v17 = vadd.f32 %v5810_v63, %v19757_v60  ;;  %v17856_v0 = vld [vmem:[#allocation4 + $0x13a4] ss:$16 sps:$4 sm:$0xff]  }
 0x5da   : > { %v19827_v31 = vpack.c.bf16 %v15810_v3, %v15808_v44  ;;  %v5854_v15 = vpack.c.bf16 %v15779_v32, %v15777_v50  ;;  %6789 = vmatpush1.bf16.msra.mxu0 %v17830_v58  ;;  %7015 = vmatpush1.bf16.msra.mxu1 %v17833_v34  ;;  %v17848_v58 = vld [vmem:[#allocation4 + $0x1380] ss:$16 sps:$4 sm:$0xff]   ;;  %v17851_v34 = vld [vmem:[#allocation4 + $0x1388] ss:$16 sps:$4 sm:$0xff]  }
 0x5db   : > { %v19829_v4 = vpack.c.bf16 %v15811_v17, %v15809_v10  ;;  %6790 = vmatprep.subr.bf16.mxu0 %v17838_v9  ;;  %7016 = vmatprep.subr.bf16.mxu1 %v17841_v25  ;;  %v17854_v3 = vld [vmem:[#allocation4 + $0x13a0] ss:$16 sps:$4 sm:$0xff]   ;;  %v17857_v32 = vld [vmem:[#allocation4 + $0x13a8] ss:$16 sps:$4 sm:$0xff]  }
 0x5dc   : > { %v5588_v24 = vpop.f32.mrb[152].mxu0  ;;  %6739 = vmatprep.mubr.bf16.mxu0 %v5854_v15  ;;  %6965 = vmatprep.mubr.bf16.mxu1 %v5854_v15  ;;  %v17862_v15 = vld [vmem:[#allocation4 + $0x13c4] ss:$16 sps:$4 sm:$0xff]  }
 0x5dd   : > { %v5814_v51 = vpop.f32.mrb[152].mxu1  ;;  %v5590_v43 = vpop.f32.mrb[153].mxu0  ;;  %6740 = vmatmul.mubr.bf16.gmra.mrb[180].mxu0 %v5853_v35  ;;  %6966 = vmatmul.mubr.bf16.gmra.mrb[180].mxu1 %v5853_v35  ;;  %v15780_v27 = vadd.f32 %v5588_v24, %v19748_v12 }
 0x5de   : > { %v5816_v22 = vpop.f32.mrb[153].mxu1  ;;  %6791 = vmatpush1.bf16.msra.mxu0 %v17836_v36  ;;  %v5592_v49 = vpop.f32.mrb[154].mxu0  ;;  %7017 = vmatpush1.bf16.msra.mxu1 %v17839_v38  ;;  %v15812_v2 = vadd.f32 %v5814_v51, %v19751_v19  ;;  %v15781_v18 = vadd.f32 %v5590_v43, %v19754_v56  ;;  %v17865_v36 = vld [vmem:[#allocation4 + $0x13cc] ss:$16 sps:$4 sm:$0xff]  }
 0x5df   : > { %v15782_v23 = vadd.f32 %v5592_v49, %v19748_v12  ;;  %v5818_v21 = vpop.f32.mrb[154].mxu1  ;;  %v5594_v5 = vpop.f32.mrb[155].mxu0  ;;  %6792 = vmatprep.subr.bf16.mxu0 %v17844_v62  ;;  %7018 = vmatprep.subr.bf16.mxu1 %v17847_v6  ;;  %v15813_v13 = vadd.f32 %v5816_v22, %v19757_v60 }
 0x5e0   : > { %v15814_v42 = vadd.f32 %v5818_v21, %v19751_v19  ;;  %v15783_v37 = vadd.f32 %v5594_v5, %v19754_v56  ;;  %v5820_v16 = vpop.f32.mrb[155].mxu1  ;;  %v17869_v21 = vld [vmem:[#allocation4 + $0x13e8] ss:$16 sps:$4 sm:$0xff]   ;;  %v17874_v5 = vld [vmem:[#allocation4 + $0x1404] ss:$16 sps:$4 sm:$0xff]  }
 0x5e1   : > { %v5857_v45 = vpack.c.bf16 %v15782_v23, %v15780_v27  ;;  %v15815_v11 = vadd.f32 %v5820_v16, %v19757_v60  ;;  %v17863_v23 = vld [vmem:[#allocation4 + $0x13c8] ss:$16 sps:$4 sm:$0xff]   ;;  %v17886_v16 = vld [vmem:[#allocation4 + $0x1444] ss:$16 sps:$4 sm:$0xff]  }
 0x5e2   : > { %v19839_v29 = vpack.c.bf16 %v15814_v42, %v15812_v2  ;;  %v5858_v39 = vpack.c.bf16 %v15783_v37, %v15781_v18  ;;  %6793 = vmatpush1.bf16.msra.mxu0 %v17842_v52  ;;  %7019 = vmatpush1.bf16.msra.mxu1 %v17845_v28  ;;  %v17860_v28 = vld [vmem:[#allocation4 + $0x13c0] ss:$16 sps:$4 sm:$0xff]   ;;  %v17875_v2 = vld [vmem:[#allocation4 + $0x1408] ss:$16 sps:$4 sm:$0xff]   ;;  %v17880_v18 = vld [vmem:[#allocation4 + $0x1424] ss:$16 sps:$4 sm:$0xff]  }
 0x5e3   : > { %v19841_v55 = vpack.c.bf16 %v15815_v11, %v15813_v13  ;;  %6794 = vmatprep.subr.bf16.mxu0 %v17850_v40  ;;  %7020 = vmatprep.subr.bf16.mxu1 %v17853_v48  ;;  %v17877_v40 = vld [vmem:[#allocation4 + $0x140c] ss:$16 sps:$4 sm:$0xff]   ;;  %v17872_v48 = vld [vmem:[#allocation4 + $0x1400] ss:$16 sps:$4 sm:$0xff]   ;;  %v17881_v37 = vld [vmem:[#allocation4 + $0x1428] ss:$16 sps:$4 sm:$0xff]  }
 0x5e4   : > { %v5598_v14 = vpop.f32.mrb[156].mxu0  ;;  %6749 = vmatprep.mubr.bf16.mxu0 %v5858_v39  ;;  %6975 = vmatprep.mubr.bf16.mxu1 %v5858_v39  ;;  %v17883_v42 = vld [vmem:[#allocation4 + $0x142c] ss:$16 sps:$4 sm:$0xff]   ;;  %v17887_v11 = vld [vmem:[#allocation4 + $0x1448] ss:$16 sps:$4 sm:$0xff]  }
 0x5e5   : > { %v5824_v9 = vpop.f32.mrb[156].mxu1  ;;  %v5600_v25 = vpop.f32.mrb[157].mxu0  ;;  %6750 = vmatmul.mubr.bf16.gmra.mrb[184].mxu0 %v5857_v45  ;;  %6976 = vmatmul.mubr.bf16.gmra.mrb[184].mxu1 %v5857_v45  ;;  %v15784_v63 = vadd.f32 %v5598_v14, %v19748_v12  ;;  %v17889_v13 = vld [vmem:[#allocation4 + $0x144c] ss:$16 sps:$4 sm:$0xff]   ;;  %v17884_v45 = vld [vmem:[#allocation4 + $0x1440] ss:$16 sps:$4 sm:$0xff]  }
 0x5e6   : > { %v5826_v44 = vpop.f32.mrb[157].mxu1  ;;  %6795 = vmatpush1.bf16.msra.mxu0 %v17848_v58  ;;  %v5602_v50 = vpop.f32.mrb[158].mxu0  ;;  %7021 = vmatpush1.bf16.msra.mxu1 %v17851_v34  ;;  %v15816_v38 = vadd.f32 %v5824_v9, %v19751_v19  ;;  %v15785_v62 = vadd.f32 %v5600_v25, %v19754_v56  ;;  %v17892_v39 = vld [vmem:[#allocation4 + $0x1464] ss:$16 sps:$4 sm:$0xff]   ;;  %v17893_v58 = vld [vmem:[#allocation4 + $0x1468] ss:$16 sps:$4 sm:$0xff]  }
 0x5e7   : > { %v15786_v10 = vadd.f32 %v5602_v50, %v19748_v12  ;;  %v5828_v35 = vpop.f32.mrb[158].mxu1  ;;  %v5604_v17 = vpop.f32.mrb[159].mxu0  ;;  %6796 = vmatprep.subr.bf16.mxu0 %v17856_v0  ;;  %7022 = vmatprep.subr.bf16.mxu1 %v17859_v26  ;;  %v15817_v43 = vadd.f32 %v5826_v44, %v19757_v60  ;;  %v17898_v34 = vld [vmem:[#allocation4 + $0x1484] ss:$16 sps:$4 sm:$0xff]   ;;  %v17901_v0 = vld [vmem:[#allocation4 + $0x148c] ss:$16 sps:$4 sm:$0xff]  }
 0x5e8   : > { %v15818_v6 = vadd.f32 %v5828_v35, %v19751_v19  ;;  %v15787_v24 = vadd.f32 %v5604_v17, %v19754_v56  ;;  %v5830_v51 = vpop.f32.mrb[159].mxu1  ;;  %v17868_v19 = vld [vmem:[#allocation4 + $0x13e4] ss:$16 sps:$4 sm:$0xff]   ;;  %v17871_v56 = vld [vmem:[#allocation4 + $0x13ec] ss:$16 sps:$4 sm:$0xff]  }
 0x5e9   : > { %v5861_v22 = vpack.c.bf16 %v15786_v10, %v15784_v63  ;;  %v15819_v12 = vadd.f32 %v5830_v51, %v19757_v60  ;;  %v17866_v60 = vld [vmem:[#allocation4 + $0x13e0] ss:$16 sps:$4 sm:$0xff]   ;;  %v17899_v14 = vld [vmem:[#allocation4 + $0x1488] ss:$16 sps:$4 sm:$0xff]   ;;  %v17904_v9 = vld [vmem:[#allocation4 + $0x14a4] ss:$16 sps:$4 sm:$0xff]  }
 0x5ea   : > { %v19851_v49 = vpack.c.bf16 %v15818_v6, %v15816_v38  ;;  %v5862_v52 = vpack.c.bf16 %v15787_v24, %v15785_v62  ;;  %6797 = vmatpush1.bf16.msra.mxu0 %v17854_v3  ;;  %7023 = vmatpush1.bf16.msra.mxu1 %v17857_v32  ;;  %v17896_v26 = vld [vmem:[#allocation4 + $0x1480] ss:$16 sps:$4 sm:$0xff]   ;;  %v17905_v25 = vld [vmem:[#allocation4 + $0x14a8] ss:$16 sps:$4 sm:$0xff]   ;;  %v17910_v44 = vld [vmem:[#allocation4 + $0x14c4] ss:$16 sps:$4 sm:$0xff]  }
 0x5eb   : > { %v19853_v27 = vpack.c.bf16 %v15819_v12, %v15817_v43  ;;  %6798 = vmatprep.subr.bf16.mxu0 %v17862_v15  ;;  %7024 = vmatprep.subr.bf16.mxu1 %v17865_v36  ;;  %v17913_v50 = vld [vmem:[#allocation4 + $0x14cc] ss:$16 sps:$4 sm:$0xff]   ;;  %v17908_v3 = vld [vmem:[#allocation4 + $0x14c0] ss:$16 sps:$4 sm:$0xff]   ;;  %v17911_v32 = vld [vmem:[#allocation4 + $0x14c8] ss:$16 sps:$4 sm:$0xff]  }
 0x5ec   : > { %6759 = vmatprep.mubr.bf16.mxu0 %v5862_v52  ;;  %6985 = vmatprep.mubr.bf16.mxu1 %v5862_v52  ;;  %v17916_v63 = vld [vmem:[#allocation4 + $0x14e4] ss:$16 sps:$4 sm:$0xff]   ;;  %v17917_v10 = vld [vmem:[#allocation4 + $0x14e8] ss:$16 sps:$4 sm:$0xff]   ;;  %v17925_v17 = vld [vmem:[#allocation4 + $0x150c] ss:$16 sps:$4 sm:$0xff]  }
 0x5ed   : > { %6760 = vmatmul.mubr.bf16.gmra.mrb[188].mxu0 %v5861_v22  ;;  %6986 = vmatmul.mubr.bf16.gmra.mrb[188].mxu1 %v5861_v22  ;;  %v17922_v35 = vld [vmem:[#allocation4 + $0x1504] ss:$16 sps:$4 sm:$0xff]   ;;  %v17920_v15 = vld [vmem:[#allocation4 + $0x1500] ss:$16 sps:$4 sm:$0xff]   ;;  %v17923_v36 = vld [vmem:[#allocation4 + $0x1508] ss:$16 sps:$4 sm:$0xff]  }
 0x5ee   : > { %6799 = vmatpush1.bf16.msra.mxu0 %v17860_v28  ;;  %6802 = vmatprep.mubr.bf16.mxu0 %v19769_v33  ;;  %v17928_v38 = vld [vmem:[#allocation4 + $0x1524] ss:$16 sps:$4 sm:$0xff]   ;;  %v17929_v62 = vld [vmem:[#allocation4 + $0x1528] ss:$16 sps:$4 sm:$0xff]   ;;  %v17937_v24 = vld [vmem:[#allocation4 + $0x154c] ss:$16 sps:$4 sm:$0xff]  }
 0x5ef   : > { %7025 = vmatpush1.bf16.msra.mxu1 %v17863_v23  ;;  %7028 = vmatprep.mubr.bf16.mxu1 %v19769_v33  ;;  %v17878_v33 = vld [vmem:[#allocation4 + $0x1420] ss:$16 sps:$4 sm:$0xff]   ;;  %v17934_v6 = vld [vmem:[#allocation4 + $0x1544] ss:$16 sps:$4 sm:$0xff]   ;;  %v17935_v43 = vld [vmem:[#allocation4 + $0x1548] ss:$16 sps:$4 sm:$0xff]  }
 0x5f0   : > { %6800 = vmatprep.subr.bf16.mxu0 %v17868_v19  ;;  %7026 = vmatprep.subr.bf16.mxu1 %v17871_v56  ;;  %v17932_v51 = vld [vmem:[#allocation4 + $0x1540] ss:$16 sps:$4 sm:$0xff]   ;;  %v17940_v22 = vld [vmem:[#allocation4 + $0x1564] ss:$16 sps:$4 sm:$0xff]   ;;  %v17941_v12 = vld [vmem:[#allocation4 + $0x1568] ss:$16 sps:$4 sm:$0xff]  }
 0x5f1   : > { %v17946_v52 = vld [vmem:[#allocation4 + $0x1584] ss:$16 sps:$4 sm:$0xff]   ;;  %v17949_v28 = vld [vmem:[#allocation4 + $0x158c] ss:$16 sps:$4 sm:$0xff]   ;;  %v17944_v23 = vld [vmem:[#allocation4 + $0x1580] ss:$16 sps:$4 sm:$0xff]  }
 0x5f2   : > { %6801 = vmatpush1.bf16.msra.mxu0 %v17866_v60  ;;  %v17947_v19 = vld [vmem:[#allocation4 + $0x1588] ss:$16 sps:$4 sm:$0xff]   ;;  %v17952_v56 = vld [vmem:[#allocation4 + $0x15a4] ss:$16 sps:$4 sm:$0xff]  }
 0x5f3   : > { %7027 = vmatpush1.bf16.msra.mxu1 %v17869_v21  ;;  %7933 = vmatprep.subr.bf16.mxu0 %v17874_v5  ;;  %v17953_v60 = vld [vmem:[#allocation4 + $0x15a8] ss:$16 sps:$4 sm:$0xff]   ;;  %v17958_v21 = vld [vmem:[#allocation4 + $0x15c4] ss:$16 sps:$4 sm:$0xff]   ;;  %v17961_v5 = vld [vmem:[#allocation4 + $0x15cc] ss:$16 sps:$4 sm:$0xff]  }
 0x5f4   : > { %8159 = vmatprep.subr.bf16.mxu1 %v17877_v40  ;;  %v17956_v40 = vld [vmem:[#allocation4 + $0x15c0] ss:$16 sps:$4 sm:$0xff]  }
 0x5f5   : > { %6803 = vmatmul.mubr.bf16.vlgmr.msra.gmra.mrb[160].mxu0 %v19767_v30 }
 0x5f6   : > { %7029 = vmatmul.mubr.bf16.vlgmr.msra.gmra.mrb[160].mxu1 %v19767_v30  ;;  %6812 = vmatprep.mubr.bf16.mxu0 %v19781_v8  ;;  %v17895_v30 = vld [vmem:[#allocation4 + $0x146c] ss:$16 sps:$4 sm:$0xff]  }
 0x5f7   : > { %7038 = vmatprep.mubr.bf16.mxu1 %v19781_v8  ;;  %7934 = vmatpush1.bf16.msra.mxu0 %v17872_v48  ;;  %v17890_v8 = vld [vmem:[#allocation4 + $0x1460] ss:$16 sps:$4 sm:$0xff]   ;;  %v17967_v48 = vld [vmem:[#allocation4 + $0x15ec] ss:$16 sps:$4 sm:$0xff]  }
 0x5f8   : > { %8160 = vmatpush1.bf16.msra.mxu1 %v17875_v2  ;;  %7935 = vmatprep.subr.bf16.mxu0 %v17880_v18  ;;  %v17962_v2 = vld [vmem:[#allocation4 + $0x15e0] ss:$16 sps:$4 sm:$0xff]   ;;  %v17965_v18 = vld [vmem:[#allocation4 + $0x15e8] ss:$16 sps:$4 sm:$0xff]  }
 0x5f9   : > { %8161 = vmatprep.subr.bf16.mxu1 %v17883_v42  ;;  %v17970_v42 = vld [vmem:[#allocation4 + $0x1604] ss:$16 sps:$4 sm:$0xff]  }
 0x5fb   : > { %7936 = vmatpush1.bf16.msra.mxu0 %v17878_v33  ;;  %v17973_v33 = vld [vmem:[#allocation4 + $0x160c] ss:$16 sps:$4 sm:$0xff]  }
 0x5fc   : > { %8162 = vmatpush1.bf16.msra.mxu1 %v17881_v37  ;;  %7937 = vmatprep.subr.bf16.mxu0 %v17886_v16 }
 0x5fd   : > { %6813 = vmatmul.mubr.bf16.gmra.mrb[164].mxu0 %v19779_v7  ;;  %8163 = vmatprep.subr.bf16.mxu1 %v17889_v13 }
 0x5fe   : > { %7039 = vmatmul.mubr.bf16.gmra.mrb[164].mxu1 %v19779_v7  ;;  %6822 = vmatprep.mubr.bf16.mxu0 %v19793_v1  ;;  %v17907_v7 = vld [vmem:[#allocation4 + $0x14ac] ss:$16 sps:$4 sm:$0xff]  }
 0x5ff   : > { %7048 = vmatprep.mubr.bf16.mxu1 %v19793_v1  ;;  %7938 = vmatpush1.bf16.msra.mxu0 %v17884_v45  ;;  %v17902_v1 = vld [vmem:[#allocation4 + $0x14a0] ss:$16 sps:$4 sm:$0xff]  }
 0x600   : > { %8164 = vmatpush1.bf16.msra.mxu1 %v17887_v11  ;;  %7939 = vmatprep.subr.bf16.mxu0 %v17892_v39 }
 0x601   : > { %8165 = vmatprep.subr.bf16.mxu1 %v17895_v30 }
 0x603   : > { %7940 = vmatpush1.bf16.msra.mxu0 %v17890_v8 }
 0x604   : > { %8166 = vmatpush1.bf16.msra.mxu1 %v17893_v58  ;;  %7941 = vmatprep.subr.bf16.mxu0 %v17898_v34 }
 0x605   : > { %6823 = vmatmul.mubr.bf16.gmra.mrb[168].mxu0 %v19791_v53  ;;  %8167 = vmatprep.subr.bf16.mxu1 %v17901_v0 }
 0x606   : > { %7049 = vmatmul.mubr.bf16.gmra.mrb[168].mxu1 %v19791_v53  ;;  %6832 = vmatprep.mubr.bf16.mxu0 %v19805_v41  ;;  %v17919_v53 = vld [vmem:[#allocation4 + $0x14ec] ss:$16 sps:$4 sm:$0xff]  }
 0x607   : > { %7058 = vmatprep.mubr.bf16.mxu1 %v19805_v41  ;;  %7942 = vmatpush1.bf16.msra.mxu0 %v17896_v26  ;;  %v17914_v41 = vld [vmem:[#allocation4 + $0x14e0] ss:$16 sps:$4 sm:$0xff]  }
 0x608   : > { %8168 = vmatpush1.bf16.msra.mxu1 %v17899_v14  ;;  %7943 = vmatprep.subr.bf16.mxu0 %v17904_v9 }
 0x609   : > { %8169 = vmatprep.subr.bf16.mxu1 %v17907_v7 }
 0x60b   : > { %7944 = vmatpush1.bf16.msra.mxu0 %v17902_v1 }
 0x60c   : > { %8170 = vmatpush1.bf16.msra.mxu1 %v17905_v25  ;;  %7945 = vmatprep.subr.bf16.mxu0 %v17910_v44 }
 0x60d   : > { %6833 = vmatmul.mubr.bf16.gmra.mrb[172].mxu0 %v19803_v20  ;;  %8171 = vmatprep.subr.bf16.mxu1 %v17913_v50 }
 0x60e   : > { %7059 = vmatmul.mubr.bf16.gmra.mrb[172].mxu1 %v19803_v20  ;;  %6842 = vmatprep.mubr.bf16.mxu0 %v19817_v54  ;;  %v17931_v20 = vld [vmem:[#allocation4 + $0x152c] ss:$16 sps:$4 sm:$0xff]  }
 0x60f   : > { %7068 = vmatprep.mubr.bf16.mxu1 %v19817_v54  ;;  %7946 = vmatpush1.bf16.msra.mxu0 %v17908_v3  ;;  %v17926_v54 = vld [vmem:[#allocation4 + $0x1520] ss:$16 sps:$4 sm:$0xff]  }
 0x610   : > { %8172 = vmatpush1.bf16.msra.mxu1 %v17911_v32  ;;  %7947 = vmatprep.subr.bf16.mxu0 %v17916_v63 }
 0x611   : > { %8173 = vmatprep.subr.bf16.mxu1 %v17919_v53 }
 0x613   : > { %7948 = vmatpush1.bf16.msra.mxu0 %v17914_v41  ;;  %v17968_v41 = vld [vmem:[#allocation4 + $0x1600] ss:$16 sps:$4 sm:$0xff]  }
 0x614   : > { %8174 = vmatpush1.bf16.msra.mxu1 %v17917_v10  ;;  %7949 = vmatprep.subr.bf16.mxu0 %v17922_v35  ;;  %v17971_v10 = vld [vmem:[#allocation4 + $0x1608] ss:$16 sps:$4 sm:$0xff]  }
 0x615   : > { %6843 = vmatmul.mubr.bf16.gmra.mrb[176].mxu0 %v19815_v61  ;;  %8175 = vmatprep.subr.bf16.mxu1 %v17925_v17  ;;  %v17976_v17 = vld [vmem:[#allocation4 + $0x1624] ss:$16 sps:$4 sm:$0xff]  }
 0x616   : > { %7069 = vmatmul.mubr.bf16.gmra.mrb[176].mxu1 %v19815_v61  ;;  %6852 = vmatprep.mubr.bf16.mxu0 %v19829_v4  ;;  %v17943_v61 = vld [vmem:[#allocation4 + $0x156c] ss:$16 sps:$4 sm:$0xff]  }
 0x617   : > { %7078 = vmatprep.mubr.bf16.mxu1 %v19829_v4  ;;  %7950 = vmatpush1.bf16.msra.mxu0 %v17920_v15  ;;  %v17938_v4 = vld [vmem:[#allocation4 + $0x1560] ss:$16 sps:$4 sm:$0xff]   ;;  %v17979_v15 = vld [vmem:[#allocation4 + $0x162c] ss:$16 sps:$4 sm:$0xff]  }
 0x618   : > { %8176 = vmatpush1.bf16.msra.mxu1 %v17923_v36  ;;  %7951 = vmatprep.subr.bf16.mxu0 %v17928_v38 }
 0x619   : > { %8177 = vmatprep.subr.bf16.mxu1 %v17931_v20 }
 0x61b   : > { %7952 = vmatpush1.bf16.msra.mxu0 %v17926_v54 }
 0x61c   : > { %8178 = vmatpush1.bf16.msra.mxu1 %v17929_v62  ;;  %7953 = vmatprep.subr.bf16.mxu0 %v17934_v6  ;;  %v17974_v6 = vld [vmem:[#allocation4 + $0x1620] ss:$16 sps:$4 sm:$0xff]  }
 0x61d   : > { %6853 = vmatmul.mubr.bf16.gmra.mrb[180].mxu0 %v19827_v31  ;;  %8179 = vmatprep.subr.bf16.mxu1 %v17937_v24  ;;  %v17977_v24 = vld [vmem:[#allocation4 + $0x1628] ss:$16 sps:$4 sm:$0xff]  }
 0x61e   : > { %7079 = vmatmul.mubr.bf16.gmra.mrb[180].mxu1 %v19827_v31  ;;  %6862 = vmatprep.mubr.bf16.mxu0 %v19841_v55  ;;  %v17955_v31 = vld [vmem:[#allocation4 + $0x15ac] ss:$16 sps:$4 sm:$0xff]  }
 0x61f   : > { %7088 = vmatprep.mubr.bf16.mxu1 %v19841_v55  ;;  %7954 = vmatpush1.bf16.msra.mxu0 %v17932_v51  ;;  %v17950_v55 = vld [vmem:[#allocation4 + $0x15a0] ss:$16 sps:$4 sm:$0xff]  }
 0x620   : > { %8180 = vmatpush1.bf16.msra.mxu1 %v17935_v43  ;;  %7955 = vmatprep.subr.bf16.mxu0 %v17940_v22 }
 0x621   : > { %8181 = vmatprep.subr.bf16.mxu1 %v17943_v61 }
 0x623   : > { %7956 = vmatpush1.bf16.msra.mxu0 %v17938_v4  ;;  %v17982_v4 = vld [vmem:[#allocation4 + $0x1644] ss:$16 sps:$4 sm:$0xff]  }
 0x624   : > { %8182 = vmatpush1.bf16.msra.mxu1 %v17941_v12  ;;  %7957 = vmatprep.subr.bf16.mxu0 %v17946_v52  ;;  %v17985_v12 = vld [vmem:[#allocation4 + $0x164c] ss:$16 sps:$4 sm:$0xff]  }
 0x625   : > { %6863 = vmatmul.mubr.bf16.gmra.mrb[184].mxu0 %v19839_v29  ;;  %8183 = vmatprep.subr.bf16.mxu1 %v17949_v28 }
 0x626   : > { %7089 = vmatmul.mubr.bf16.gmra.mrb[184].mxu1 %v19839_v29  ;;  %6872 = vmatprep.mubr.bf16.mxu0 %v19853_v27  ;;  %v17959_v29 = vld [vmem:[#allocation4 + $0x15c8] ss:$16 sps:$4 sm:$0xff]  }
 0x627   : > { %7098 = vmatprep.mubr.bf16.mxu1 %v19853_v27  ;;  %7958 = vmatpush1.bf16.msra.mxu0 %v17944_v23  ;;  %v17964_v27 = vld [vmem:[#allocation4 + $0x15e4] ss:$16 sps:$4 sm:$0xff]  }
 0x628   : > { %8184 = vmatpush1.bf16.msra.mxu1 %v17947_v19  ;;  %7959 = vmatprep.subr.bf16.mxu0 %v17952_v56 }
 0x629   : > { %8185 = vmatprep.subr.bf16.mxu1 %v17955_v31 }
 0x62b   : > { %7960 = vmatpush1.bf16.msra.mxu0 %v17950_v55 }
 0x62c   : > { %8186 = vmatpush1.bf16.msra.mxu1 %v17953_v60  ;;  %7961 = vmatprep.subr.bf16.mxu0 %v17958_v21 }
 0x62d   : > { %6873 = vmatmul.mubr.bf16.gmra.mrb[188].mxu0 %v19851_v49  ;;  %8187 = vmatprep.subr.bf16.mxu1 %v17961_v5 }
 0x62e   : > { %7099 = vmatmul.mubr.bf16.gmra.mrb[188].mxu1 %v19851_v49  ;;  %v5995_v49 = vld [vmem:[#allocation6 + $0x5] ss:$8 sm:$0xf] }
 0x62f   : > { %7962 = vmatpush1.bf16.msra.mxu0 %v17956_v40  ;;  %v19888_v37 = vrot.slane %v5995_v49, %v19179_v46  ;;  %v19891_v13 = vrot.slane %v5995_v49, %v19192_v57  ;;  %v19894_v45 = vrot.slane %v5995_v49, %v19181_v47  ;;  %v19897_v30 = vrot.slane %v5995_v49, %v19195_v59  ;;  %v17980_v40 = vld [vmem:[#allocation4 + $0x1640] ss:$16 sps:$4 sm:$0xff]  }
 0x630   : > { %8188 = vmatpush1.bf16.msra.mxu1 %v17959_v29  ;;  %7963 = vmatprep.subr.bf16.mxu0 %v17964_v27  ;;  %v17983_v29 = vld [vmem:[#allocation4 + $0x1648] ss:$16 sps:$4 sm:$0xff]  }
 0x631   : > { %8189 = vmatprep.subr.bf16.mxu1 %v17967_v48  ;;  %v17988_v48 = vld [vmem:[#allocation4 + $0x1664] ss:$16 sps:$4 sm:$0xff]  }
 0x633   : > { %7964 = vmatpush1.bf16.msra.mxu0 %v17962_v2  ;;  %v17991_v2 = vld [vmem:[#allocation4 + $0x166c] ss:$16 sps:$4 sm:$0xff]  }
 0x634   : > { %8190 = vmatpush1.bf16.msra.mxu1 %v17965_v18  ;;  %8046 = vmatprep.subr.bf16.mxu0 %v17970_v42 }
 0x635   : > { %8272 = vmatprep.subr.bf16.mxu1 %v17973_v33 }
 0x6c8   : > { %v6804_v16 = vpop.f32.mrb[160].mxu0 }
 0x6c9   : > { %v7030_v11 = vpop.f32.mrb[160].mxu1  ;;  %v6806_v39 = vpop.f32.mrb[161].mxu0  ;;  %v15820_v34 = vadd.f32 %v6804_v16, %v19888_v37 }
 0x6ca   : > { %v7032_v8 = vpop.f32.mrb[161].mxu1  ;;  %v6808_v58 = vpop.f32.mrb[162].mxu0  ;;  %v15852_v9 = vadd.f32 %v7030_v11, %v19891_v13  ;;  %v15821_v7 = vadd.f32 %v6806_v39, %v19894_v45  ;;  %v17986_v11 = vld [vmem:[#allocation4 + $0x1660] ss:$16 sps:$4 sm:$0xff]   ;;  %v17989_v39 = vld [vmem:[#allocation4 + $0x1668] ss:$16 sps:$4 sm:$0xff]  }
 0x6cb   : > { %v15822_v0 = vadd.f32 %v6808_v58, %v19888_v37  ;;  %v7034_v26 = vpop.f32.mrb[162].mxu1  ;;  %v6810_v14 = vpop.f32.mrb[163].mxu0  ;;  %v15853_v50 = vadd.f32 %v7032_v8, %v19897_v30 }
 0x6cc   : > { %v15854_v1 = vadd.f32 %v7034_v26, %v19891_v13  ;;  %v15823_v25 = vadd.f32 %v6810_v14, %v19894_v45  ;;  %v7036_v44 = vpop.f32.mrb[163].mxu1  ;;  %v17994_v26 = vld [vmem:[#allocation4 + $0x1684] ss:$16 sps:$4 sm:$0xff]   ;;  %v17997_v14 = vld [vmem:[#allocation4 + $0x168c] ss:$16 sps:$4 sm:$0xff]  }
 0x6cd   : > { %v7109_v3 = vpack.c.bf16 %v15822_v0, %v15820_v34  ;;  %v15855_v32 = vadd.f32 %v7036_v44, %v19897_v30 }
 0x6ce   : > { %v19907_v63 = vpack.c.bf16 %v15854_v1, %v15852_v9  ;;  %v7110_v53 = vpack.c.bf16 %v15823_v25, %v15821_v7 }
 0x6cf   : > { %v19909_v35 = vpack.c.bf16 %v15855_v32, %v15853_v50 }
 0x6d0   : > { %v6814_v36 = vpop.f32.mrb[164].mxu0  ;;  %7965 = vmatprep.mubr.bf16.mxu0 %v7110_v53  ;;  %8191 = vmatprep.mubr.bf16.mxu1 %v7110_v53 }
 0x6d1   : > { %v7040_v38 = vpop.f32.mrb[164].mxu1  ;;  %v6816_v20 = vpop.f32.mrb[165].mxu0  ;;  %7966 = vmatmul.mubr.bf16.vlgmr.msra.gmra.mrb[192].mxu0 %v7109_v3  ;;  %8192 = vmatmul.mubr.bf16.vlgmr.msra.gmra.mrb[192].mxu1 %v7109_v3  ;;  %v15824_v51 = vadd.f32 %v6814_v36, %v19888_v37  ;;  %v18000_v36 = vld [vmem:[#allocation4 + $0x16a4] ss:$16 sps:$4 sm:$0xff]  }
 0x6d2   : > { %v7042_v54 = vpop.f32.mrb[165].mxu1  ;;  %8047 = vmatpush1.bf16.msra.mxu0 %v17968_v41  ;;  %v6818_v62 = vpop.f32.mrb[166].mxu0  ;;  %8273 = vmatpush1.bf16.msra.mxu1 %v17971_v10  ;;  %v15856_v52 = vadd.f32 %v7040_v38, %v19891_v13  ;;  %v15825_v28 = vadd.f32 %v6816_v20, %v19894_v45  ;;  %v17992_v10 = vld [vmem:[#allocation4 + $0x1680] ss:$16 sps:$4 sm:$0xff]   ;;  %v18003_v38 = vld [vmem:[#allocation4 + $0x16ac] ss:$16 sps:$4 sm:$0xff]  }
 0x6d3   : > { %v15826_v43 = vadd.f32 %v6818_v62, %v19888_v37  ;;  %v7044_v22 = vpop.f32.mrb[166].mxu1  ;;  %v6820_v61 = vpop.f32.mrb[167].mxu0  ;;  %8048 = vmatprep.subr.bf16.mxu0 %v17976_v17  ;;  %8274 = vmatprep.subr.bf16.mxu1 %v17979_v15  ;;  %v15857_v31 = vadd.f32 %v7042_v54, %v19897_v30  ;;  %v17995_v17 = vld [vmem:[#allocation4 + $0x1688] ss:$16 sps:$4 sm:$0xff]  }
 0x6d4   : > { %v15858_v23 = vadd.f32 %v7044_v22, %v19891_v13  ;;  %v15827_v19 = vadd.f32 %v6820_v61, %v19894_v45  ;;  %v7046_v56 = vpop.f32.mrb[167].mxu1 }
 0x6d5   : > { %v7113_v55 = vpack.c.bf16 %v15826_v43, %v15824_v51  ;;  %v15859_v60 = vadd.f32 %v7046_v56, %v19897_v30  ;;  %v17998_v51 = vld [vmem:[#allocation4 + $0x16a0] ss:$16 sps:$4 sm:$0xff]   ;;  %v18001_v43 = vld [vmem:[#allocation4 + $0x16a8] ss:$16 sps:$4 sm:$0xff]  }
 0x6d6   : > { %v19919_v21 = vpack.c.bf16 %v15858_v23, %v15856_v52  ;;  %v7114_v5 = vpack.c.bf16 %v15827_v19, %v15825_v28  ;;  %8049 = vmatpush1.bf16.msra.mxu0 %v17974_v6  ;;  %8275 = vmatpush1.bf16.msra.mxu1 %v17977_v24  ;;  %v18006_v52 = vld [vmem:[#allocation4 + $0x16c4] ss:$16 sps:$4 sm:$0xff]   ;;  %v18009_v28 = vld [vmem:[#allocation4 + $0x16cc] ss:$16 sps:$4 sm:$0xff]  }
 0x6d7   : > { %v19921_v27 = vpack.c.bf16 %v15859_v60, %v15857_v31  ;;  %8050 = vmatprep.subr.bf16.mxu0 %v17982_v4  ;;  %8276 = vmatprep.subr.bf16.mxu1 %v17985_v12 }
 0x6d8   : > { %v6824_v18 = vpop.f32.mrb[168].mxu0  ;;  %7975 = vmatprep.mubr.bf16.mxu0 %v7114_v5  ;;  %8201 = vmatprep.mubr.bf16.mxu1 %v7114_v5 }
 0x6d9   : > { %v7050_v42 = vpop.f32.mrb[168].mxu1  ;;  %v6826_v33 = vpop.f32.mrb[169].mxu0  ;;  %7976 = vmatmul.mubr.bf16.gmra.mrb[196].mxu0 %v7113_v55  ;;  %8202 = vmatmul.mubr.bf16.gmra.mrb[196].mxu1 %v7113_v55  ;;  %v15828_v8 = vadd.f32 %v6824_v18, %v19888_v37  ;;  %v18007_v18 = vld [vmem:[#allocation4 + $0x16c8] ss:$16 sps:$4 sm:$0xff]  }
 0x6da   : > { %v7052_v49 = vpop.f32.mrb[169].mxu1  ;;  %8051 = vmatpush1.bf16.msra.mxu0 %v17980_v40  ;;  %v6828_v16 = vpop.f32.mrb[170].mxu0  ;;  %8277 = vmatpush1.bf16.msra.mxu1 %v17983_v29  ;;  %v15860_v9 = vadd.f32 %v7050_v42, %v19891_v13  ;;  %v15829_v7 = vadd.f32 %v6826_v33, %v19894_v45  ;;  %v18012_v33 = vld [vmem:[#allocation4 + $0x16e4] ss:$16 sps:$4 sm:$0xff]  }
 0x6db   : > { %v15830_v58 = vadd.f32 %v6828_v16, %v19888_v37  ;;  %v7054_v34 = vpop.f32.mrb[170].mxu1  ;;  %v6830_v0 = vpop.f32.mrb[171].mxu0  ;;  %8052 = vmatprep.subr.bf16.mxu0 %v17988_v48  ;;  %8278 = vmatprep.subr.bf16.mxu1 %v17991_v2  ;;  %v15861_v50 = vadd.f32 %v7052_v49, %v19897_v30  ;;  %v18004_v2 = vld [vmem:[#allocation4 + $0x16c0] ss:$16 sps:$4 sm:$0xff]   ;;  %v18015_v49 = vld [vmem:[#allocation4 + $0x16ec] ss:$16 sps:$4 sm:$0xff]  }
 0x6dc   : > { %v15862_v1 = vadd.f32 %v7054_v34, %v19891_v13  ;;  %v15831_v25 = vadd.f32 %v6830_v0, %v19894_v45  ;;  %v7056_v44 = vpop.f32.mrb[171].mxu1  ;;  %v18010_v34 = vld [vmem:[#allocation4 + $0x16e0] ss:$16 sps:$4 sm:$0xff]   ;;  %v18013_v0 = vld [vmem:[#allocation4 + $0x16e8] ss:$16 sps:$4 sm:$0xff]  }
 0x6dd   : > { %v7117_v3 = vpack.c.bf16 %v15830_v58, %v15828_v8  ;;  %v15863_v32 = vadd.f32 %v7056_v44, %v19897_v30 }
 0x6de   : > { %v19931_v53 = vpack.c.bf16 %v15862_v1, %v15860_v9  ;;  %v7118_v41 = vpack.c.bf16 %v15831_v25, %v15829_v7  ;;  %8053 = vmatpush1.bf16.msra.mxu0 %v17986_v11  ;;  %8279 = vmatpush1.bf16.msra.mxu1 %v17989_v39  ;;  %v18018_v1 = vld [vmem:[#allocation4 + $0x1704] ss:$16 sps:$4 sm:$0xff]   ;;  %v18021_v25 = vld [vmem:[#allocation4 + $0x170c] ss:$16 sps:$4 sm:$0xff]  }
 0x6df   : > { %v19933_v15 = vpack.c.bf16 %v15863_v32, %v15861_v50  ;;  %8054 = vmatprep.subr.bf16.mxu0 %v17994_v26  ;;  %8280 = vmatprep.subr.bf16.mxu1 %v17997_v14 }
 0x6e0   : > { %v6834_v20 = vpop.f32.mrb[172].mxu0  ;;  %7985 = vmatprep.mubr.bf16.mxu0 %v7118_v41  ;;  %8211 = vmatprep.mubr.bf16.mxu1 %v7118_v41 }
 0x6e1   : > { %v7060_v54 = vpop.f32.mrb[172].mxu1  ;;  %v6836_v62 = vpop.f32.mrb[173].mxu0  ;;  %7986 = vmatmul.mubr.bf16.gmra.mrb[200].mxu0 %v7117_v3  ;;  %8212 = vmatmul.mubr.bf16.gmra.mrb[200].mxu1 %v7117_v3  ;;  %v15832_v22 = vadd.f32 %v6834_v20, %v19888_v37 }
 0x6e2   : > { %v7062_v6 = vpop.f32.mrb[173].mxu1  ;;  %8055 = vmatpush1.bf16.msra.mxu0 %v17992_v10  ;;  %v6838_v24 = vpop.f32.mrb[174].mxu0  ;;  %8281 = vmatpush1.bf16.msra.mxu1 %v17995_v17  ;;  %v15864_v23 = vadd.f32 %v7060_v54, %v19891_v13  ;;  %v15833_v19 = vadd.f32 %v6836_v62, %v19894_v45  ;;  %v18016_v54 = vld [vmem:[#allocation4 + $0x1700] ss:$16 sps:$4 sm:$0xff]   ;;  %v18019_v62 = vld [vmem:[#allocation4 + $0x1708] ss:$16 sps:$4 sm:$0xff]  }
 0x6e3   : > { %v15834_v61 = vadd.f32 %v6838_v24, %v19888_v37  ;;  %v7064_v4 = vpop.f32.mrb[174].mxu1  ;;  %v6840_v12 = vpop.f32.mrb[175].mxu0  ;;  %8056 = vmatprep.subr.bf16.mxu0 %v18000_v36  ;;  %8282 = vmatprep.subr.bf16.mxu1 %v18003_v38  ;;  %v15865_v60 = vadd.f32 %v7062_v6, %v19897_v30  ;;  %v18024_v24 = vld [vmem:[#allocation4 + $0x1724] ss:$16 sps:$4 sm:$0xff]  }
 0x6e4   : > { %v15866_v56 = vadd.f32 %v7064_v4, %v19891_v13  ;;  %v15835_v31 = vadd.f32 %v6840_v12, %v19894_v45  ;;  %v7066_v55 = vpop.f32.mrb[175].mxu1 }
 0x6e5   : > { %v7121_v5 = vpack.c.bf16 %v15834_v61, %v15832_v22  ;;  %v15867_v40 = vadd.f32 %v7066_v55, %v19897_v30  ;;  %v18030_v55 = vld [vmem:[#allocation4 + $0x1744] ss:$16 sps:$4 sm:$0xff]  }
 0x6e6   : > { %v19943_v29 = vpack.c.bf16 %v15866_v56, %v15864_v23  ;;  %v7122_v48 = vpack.c.bf16 %v15835_v31, %v15833_v19  ;;  %8057 = vmatpush1.bf16.msra.mxu0 %v17998_v51  ;;  %8283 = vmatpush1.bf16.msra.mxu1 %v18001_v43  ;;  %v18027_v51 = vld [vmem:[#allocation4 + $0x172c] ss:$16 sps:$4 sm:$0xff]  }
 0x6e7   : > { %v19945_v42 = vpack.c.bf16 %v15867_v40, %v15865_v60  ;;  %8058 = vmatprep.subr.bf16.mxu0 %v18006_v52  ;;  %8284 = vmatprep.subr.bf16.mxu1 %v18009_v28  ;;  %v18022_v52 = vld [vmem:[#allocation4 + $0x1720] ss:$16 sps:$4 sm:$0xff]   ;;  %v18025_v28 = vld [vmem:[#allocation4 + $0x1728] ss:$16 sps:$4 sm:$0xff]   ;;  %v18033_v60 = vld [vmem:[#allocation4 + $0x174c] ss:$16 sps:$4 sm:$0xff]  }
 0x6e8   : > { %v6844_v16 = vpop.f32.mrb[176].mxu0  ;;  %7995 = vmatprep.mubr.bf16.mxu0 %v7122_v48  ;;  %8221 = vmatprep.mubr.bf16.mxu1 %v7122_v48 }
 0x6e9   : > { %v7070_v11 = vpop.f32.mrb[176].mxu1  ;;  %v6846_v39 = vpop.f32.mrb[177].mxu0  ;;  %7996 = vmatmul.mubr.bf16.gmra.mrb[204].mxu0 %v7121_v5  ;;  %8222 = vmatmul.mubr.bf16.gmra.mrb[204].mxu1 %v7121_v5  ;;  %v15836_v26 = vadd.f32 %v6844_v16, %v19888_v37 }
 0x6ea   : > { %v7072_v8 = vpop.f32.mrb[177].mxu1  ;;  %8059 = vmatpush1.bf16.msra.mxu0 %v18004_v2  ;;  %v6848_v58 = vpop.f32.mrb[178].mxu0  ;;  %8285 = vmatpush1.bf16.msra.mxu1 %v18007_v18  ;;  %v15868_v44 = vadd.f32 %v7070_v11, %v19891_v13  ;;  %v15837_v50 = vadd.f32 %v6846_v39, %v19894_v45 }
 0x6eb   : > { %v15838_v14 = vadd.f32 %v6848_v58, %v19888_v37  ;;  %v7074_v9 = vpop.f32.mrb[178].mxu1  ;;  %v6850_v7 = vpop.f32.mrb[179].mxu0  ;;  %8060 = vmatprep.subr.bf16.mxu0 %v18012_v33  ;;  %8286 = vmatprep.subr.bf16.mxu1 %v18015_v49  ;;  %v15869_v10 = vadd.f32 %v7072_v8, %v19897_v30  ;;  %v18028_v8 = vld [vmem:[#allocation4 + $0x1740] ss:$16 sps:$4 sm:$0xff]   ;;  %v18031_v58 = vld [vmem:[#allocation4 + $0x1748] ss:$16 sps:$4 sm:$0xff]  }
 0x6ec   : > { %v15870_v3 = vadd.f32 %v7074_v9, %v19891_v13  ;;  %v15839_v32 = vadd.f32 %v6850_v7, %v19894_v45  ;;  %v7076_v41 = vpop.f32.mrb[179].mxu1 }
 0x6ed   : > { %v7125_v17 = vpack.c.bf16 %v15838_v14, %v15836_v26  ;;  %v15871_v36 = vadd.f32 %v7076_v41, %v19897_v30  ;;  %v18039_v26 = vld [vmem:[#allocation4 + $0x176c] ss:$16 sps:$4 sm:$0xff]  }
 0x6ee   : > { %v19955_v38 = vpack.c.bf16 %v15870_v3, %v15868_v44  ;;  %v7126_v20 = vpack.c.bf16 %v15839_v32, %v15837_v50  ;;  %8061 = vmatpush1.bf16.msra.mxu0 %v18010_v34  ;;  %8287 = vmatpush1.bf16.msra.mxu1 %v18013_v0  ;;  %v18036_v0 = vld [vmem:[#allocation4 + $0x1764] ss:$16 sps:$4 sm:$0xff]   ;;  %v18034_v44 = vld [vmem:[#allocation4 + $0x1760] ss:$16 sps:$4 sm:$0xff]   ;;  %v18037_v50 = vld [vmem:[#allocation4 + $0x1768] ss:$16 sps:$4 sm:$0xff]  }
 0x6ef   : > { %v19957_v6 = vpack.c.bf16 %v15871_v36, %v15869_v10  ;;  %8062 = vmatprep.subr.bf16.mxu0 %v18018_v1  ;;  %8288 = vmatprep.subr.bf16.mxu1 %v18021_v25  ;;  %v18045_v36 = vld [vmem:[#allocation4 + $0x178c] ss:$16 sps:$4 sm:$0xff]  }
 0x6f0   : > { %v6854_v43 = vpop.f32.mrb[180].mxu0  ;;  %8005 = vmatprep.mubr.bf16.mxu0 %v7126_v20  ;;  %8231 = vmatprep.mubr.bf16.mxu1 %v7126_v20 }
 0x6f1   : > { %v7080_v22 = vpop.f32.mrb[180].mxu1  ;;  %v6856_v61 = vpop.f32.mrb[181].mxu0  ;;  %8006 = vmatmul.mubr.bf16.gmra.mrb[208].mxu0 %v7125_v17  ;;  %8232 = vmatmul.mubr.bf16.gmra.mrb[208].mxu1 %v7125_v17  ;;  %v15840_v23 = vadd.f32 %v6854_v43, %v19888_v37  ;;  %v18042_v17 = vld [vmem:[#allocation4 + $0x1784] ss:$16 sps:$4 sm:$0xff]  }
 0x6f2   : > { %v7082_v4 = vpop.f32.mrb[181].mxu1  ;;  %8063 = vmatpush1.bf16.msra.mxu0 %v18016_v54  ;;  %v6858_v12 = vpop.f32.mrb[182].mxu0  ;;  %8289 = vmatpush1.bf16.msra.mxu1 %v18019_v62  ;;  %v15872_v5 = vadd.f32 %v7080_v22, %v19891_v13  ;;  %v15841_v40 = vadd.f32 %v6856_v61, %v19894_v45 }
 0x6f3   : > { %v15842_v19 = vadd.f32 %v6858_v12, %v19888_v37  ;;  %v7084_v56 = vpop.f32.mrb[182].mxu1  ;;  %v6860_v31 = vpop.f32.mrb[183].mxu0  ;;  %8064 = vmatprep.subr.bf16.mxu0 %v18024_v24  ;;  %8290 = vmatprep.subr.bf16.mxu1 %v18027_v51  ;;  %v15873_v33 = vadd.f32 %v7082_v4, %v19897_v30 }
 0x6f4   : > { %v15874_v48 = vadd.f32 %v7084_v56, %v19891_v13  ;;  %v15843_v2 = vadd.f32 %v6860_v31, %v19894_v45  ;;  %v7086_v18 = vpop.f32.mrb[183].mxu1  ;;  %v18051_v56 = vld [vmem:[#allocation4 + $0x17ac] ss:$16 sps:$4 sm:$0xff]  }
 0x6f5   : > { %v7129_v49 = vpack.c.bf16 %v15842_v19, %v15840_v23  ;;  %v15875_v16 = vadd.f32 %v7086_v18, %v19897_v30  ;;  %v18048_v19 = vld [vmem:[#allocation4 + $0x17a4] ss:$16 sps:$4 sm:$0xff]  }
 0x6f6   : > { %v19967_v11 = vpack.c.bf16 %v15874_v48, %v15872_v5  ;;  %v7130_v39 = vpack.c.bf16 %v15843_v2, %v15841_v40  ;;  %8065 = vmatpush1.bf16.msra.mxu0 %v18022_v52  ;;  %8291 = vmatpush1.bf16.msra.mxu1 %v18025_v28  ;;  %v18040_v52 = vld [vmem:[#allocation4 + $0x1780] ss:$16 sps:$4 sm:$0xff]   ;;  %v18043_v28 = vld [vmem:[#allocation4 + $0x1788] ss:$16 sps:$4 sm:$0xff]  }
 0x6f7   : > { %v19969_v34 = vpack.c.bf16 %v15875_v16, %v15873_v33  ;;  %8066 = vmatprep.subr.bf16.mxu0 %v18030_v55  ;;  %8292 = vmatprep.subr.bf16.mxu1 %v18033_v60  ;;  %v18046_v48 = vld [vmem:[#allocation4 + $0x17a0] ss:$16 sps:$4 sm:$0xff]   ;;  %v18049_v2 = vld [vmem:[#allocation4 + $0x17a8] ss:$16 sps:$4 sm:$0xff]  }
 0x6f8   : > { %v6864_v14 = vpop.f32.mrb[184].mxu0  ;;  %8015 = vmatprep.mubr.bf16.mxu0 %v7130_v39  ;;  %8241 = vmatprep.mubr.bf16.mxu1 %v7130_v39  ;;  %v18054_v39 = vld [vmem:[#allocation4 + $0x17c4] ss:$16 sps:$4 sm:$0xff]  }
 0x6f9   : > { %v7090_v9 = vpop.f32.mrb[184].mxu1  ;;  %v6866_v7 = vpop.f32.mrb[185].mxu0  ;;  %8016 = vmatmul.mubr.bf16.gmra.mrb[212].mxu0 %v7129_v49  ;;  %8242 = vmatmul.mubr.bf16.gmra.mrb[212].mxu1 %v7129_v49  ;;  %v15844_v3 = vadd.f32 %v6864_v14, %v19888_v37 }
 0x6fa   : > { %v7092_v1 = vpop.f32.mrb[185].mxu1  ;;  %8067 = vmatpush1.bf16.msra.mxu0 %v18028_v8  ;;  %v6868_v25 = vpop.f32.mrb[186].mxu0  ;;  %8293 = vmatpush1.bf16.msra.mxu1 %v18031_v58  ;;  %v15876_v20 = vadd.f32 %v7090_v9, %v19891_v13  ;;  %v15845_v54 = vadd.f32 %v6866_v7, %v19894_v45  ;;  %v18057_v8 = vld [vmem:[#allocation4 + $0x17cc] ss:$16 sps:$4 sm:$0xff]  }
 0x6fb   : > { %v15846_v32 = vadd.f32 %v6868_v25, %v19888_v37  ;;  %v7094_v41 = vpop.f32.mrb[186].mxu1  ;;  %v6870_v10 = vpop.f32.mrb[187].mxu0  ;;  %8068 = vmatprep.subr.bf16.mxu0 %v18036_v0  ;;  %8294 = vmatprep.subr.bf16.mxu1 %v18039_v26  ;;  %v15877_v43 = vadd.f32 %v7092_v1, %v19897_v30 }
 0x6fc   : > { %v15878_v62 = vadd.f32 %v7094_v41, %v19891_v13  ;;  %v15847_v24 = vadd.f32 %v6870_v10, %v19894_v45  ;;  %v7096_v51 = vpop.f32.mrb[187].mxu1  ;;  %v18061_v41 = vld [vmem:[#allocation4 + $0x17e8] ss:$16 sps:$4 sm:$0xff]   ;;  %v18066_v10 = vld [vmem:[#allocation4 + $0x1804] ss:$16 sps:$4 sm:$0xff]  }
 0x6fd   : > { %v7133_v22 = vpack.c.bf16 %v15846_v32, %v15844_v3  ;;  %v15879_v61 = vadd.f32 %v7096_v51, %v19897_v30  ;;  %v18055_v32 = vld [vmem:[#allocation4 + $0x17c8] ss:$16 sps:$4 sm:$0xff]   ;;  %v18078_v51 = vld [vmem:[#allocation4 + $0x1844] ss:$16 sps:$4 sm:$0xff]  }
 0x6fe   : > { %v19979_v4 = vpack.c.bf16 %v15878_v62, %v15876_v20  ;;  %v7134_v12 = vpack.c.bf16 %v15847_v24, %v15845_v54  ;;  %8069 = vmatpush1.bf16.msra.mxu0 %v18034_v44  ;;  %8295 = vmatpush1.bf16.msra.mxu1 %v18037_v50  ;;  %v18052_v50 = vld [vmem:[#allocation4 + $0x17c0] ss:$16 sps:$4 sm:$0xff]   ;;  %v18067_v20 = vld [vmem:[#allocation4 + $0x1808] ss:$16 sps:$4 sm:$0xff]   ;;  %v18072_v54 = vld [vmem:[#allocation4 + $0x1824] ss:$16 sps:$4 sm:$0xff]  }
 0x6ff   : > { %v19981_v23 = vpack.c.bf16 %v15879_v61, %v15877_v43  ;;  %8070 = vmatprep.subr.bf16.mxu0 %v18042_v17  ;;  %8296 = vmatprep.subr.bf16.mxu1 %v18045_v36  ;;  %v18069_v17 = vld [vmem:[#allocation4 + $0x180c] ss:$16 sps:$4 sm:$0xff]   ;;  %v18064_v36 = vld [vmem:[#allocation4 + $0x1800] ss:$16 sps:$4 sm:$0xff]   ;;  %v18073_v24 = vld [vmem:[#allocation4 + $0x1828] ss:$16 sps:$4 sm:$0xff]  }
 0x700   : > { %v6874_v31 = vpop.f32.mrb[188].mxu0  ;;  %8025 = vmatprep.mubr.bf16.mxu0 %v7134_v12  ;;  %8251 = vmatprep.mubr.bf16.mxu1 %v7134_v12  ;;  %v18075_v62 = vld [vmem:[#allocation4 + $0x182c] ss:$16 sps:$4 sm:$0xff]   ;;  %v18079_v61 = vld [vmem:[#allocation4 + $0x1848] ss:$16 sps:$4 sm:$0xff]  }
 0x701   : > { %v7100_v55 = vpop.f32.mrb[188].mxu1  ;;  %v6876_v60 = vpop.f32.mrb[189].mxu0  ;;  %8026 = vmatmul.mubr.bf16.gmra.mrb[216].mxu0 %v7133_v22  ;;  %8252 = vmatmul.mubr.bf16.gmra.mrb[216].mxu1 %v7133_v22  ;;  %v15848_v18 = vadd.f32 %v6874_v31, %v19888_v37  ;;  %v18081_v43 = vld [vmem:[#allocation4 + $0x184c] ss:$16 sps:$4 sm:$0xff]   ;;  %v18076_v22 = vld [vmem:[#allocation4 + $0x1840] ss:$16 sps:$4 sm:$0xff]  }
 0x702   : > { %v7102_v5 = vpop.f32.mrb[189].mxu1  ;;  %8071 = vmatpush1.bf16.msra.mxu0 %v18040_v52  ;;  %v6878_v40 = vpop.f32.mrb[190].mxu0  ;;  %8297 = vmatpush1.bf16.msra.mxu1 %v18043_v28  ;;  %v15880_v58 = vadd.f32 %v7100_v55, %v19891_v13  ;;  %v15849_v0 = vadd.f32 %v6876_v60, %v19894_v45  ;;  %v18084_v12 = vld [vmem:[#allocation4 + $0x1864] ss:$16 sps:$4 sm:$0xff]   ;;  %v18085_v52 = vld [vmem:[#allocation4 + $0x1868] ss:$16 sps:$4 sm:$0xff]  }
 0x703   : > { %v15850_v33 = vadd.f32 %v6878_v40, %v19888_v37  ;;  %v7104_v49 = vpop.f32.mrb[190].mxu1  ;;  %v6880_v16 = vpop.f32.mrb[191].mxu0  ;;  %8072 = vmatprep.subr.bf16.mxu0 %v18048_v19  ;;  %8298 = vmatprep.subr.bf16.mxu1 %v18051_v56  ;;  %v15881_v7 = vadd.f32 %v7102_v5, %v19897_v30  ;;  %v18090_v28 = vld [vmem:[#allocation4 + $0x1884] ss:$16 sps:$4 sm:$0xff]   ;;  %v18093_v19 = vld [vmem:[#allocation4 + $0x188c] ss:$16 sps:$4 sm:$0xff]  }
 0x704   : > { %v15882_v26 = vadd.f32 %v7104_v49, %v19891_v13  ;;  %v15851_v14 = vadd.f32 %v6880_v16, %v19894_v45  ;;  %v7106_v9 = vpop.f32.mrb[191].mxu1  ;;  %v18060_v13 = vld [vmem:[#allocation4 + $0x17e4] ss:$16 sps:$4 sm:$0xff]   ;;  %v18063_v45 = vld [vmem:[#allocation4 + $0x17ec] ss:$16 sps:$4 sm:$0xff]  }
 0x705   : > { %v7137_v1 = vpack.c.bf16 %v15850_v33, %v15848_v18  ;;  %v15883_v37 = vadd.f32 %v7106_v9, %v19897_v30  ;;  %v18058_v30 = vld [vmem:[#allocation4 + $0x17e0] ss:$16 sps:$4 sm:$0xff]   ;;  %v18091_v31 = vld [vmem:[#allocation4 + $0x1888] ss:$16 sps:$4 sm:$0xff]   ;;  %v18096_v55 = vld [vmem:[#allocation4 + $0x18a4] ss:$16 sps:$4 sm:$0xff]  }
 0x706   : > { %v19991_v25 = vpack.c.bf16 %v15882_v26, %v15880_v58  ;;  %v7138_v44 = vpack.c.bf16 %v15851_v14, %v15849_v0  ;;  %8073 = vmatpush1.bf16.msra.mxu0 %v18046_v48  ;;  %8299 = vmatpush1.bf16.msra.mxu1 %v18049_v2  ;;  %v18088_v56 = vld [vmem:[#allocation4 + $0x1880] ss:$16 sps:$4 sm:$0xff]   ;;  %v18097_v60 = vld [vmem:[#allocation4 + $0x18a8] ss:$16 sps:$4 sm:$0xff]   ;;  %v18102_v5 = vld [vmem:[#allocation4 + $0x18c4] ss:$16 sps:$4 sm:$0xff]  }
 0x707   : > { %v19993_v3 = vpack.c.bf16 %v15883_v37, %v15881_v7  ;;  %8074 = vmatprep.subr.bf16.mxu0 %v18054_v39  ;;  %8300 = vmatprep.subr.bf16.mxu1 %v18057_v8  ;;  %v18105_v40 = vld [vmem:[#allocation4 + $0x18cc] ss:$16 sps:$4 sm:$0xff]   ;;  %v18100_v48 = vld [vmem:[#allocation4 + $0x18c0] ss:$16 sps:$4 sm:$0xff]   ;;  %v18103_v2 = vld [vmem:[#allocation4 + $0x18c8] ss:$16 sps:$4 sm:$0xff]  }
 0x708   : > { %8035 = vmatprep.mubr.bf16.mxu0 %v7138_v44  ;;  %8261 = vmatprep.mubr.bf16.mxu1 %v7138_v44  ;;  %v18108_v18 = vld [vmem:[#allocation4 + $0x18e4] ss:$16 sps:$4 sm:$0xff]   ;;  %v18109_v33 = vld [vmem:[#allocation4 + $0x18e8] ss:$16 sps:$4 sm:$0xff]   ;;  %v18117_v16 = vld [vmem:[#allocation4 + $0x190c] ss:$16 sps:$4 sm:$0xff]  }
 0x709   : > { %8036 = vmatmul.mubr.bf16.gmra.mrb[220].mxu0 %v7137_v1  ;;  %8262 = vmatmul.mubr.bf16.gmra.mrb[220].mxu1 %v7137_v1  ;;  %v18114_v49 = vld [vmem:[#allocation4 + $0x1904] ss:$16 sps:$4 sm:$0xff]   ;;  %v18112_v39 = vld [vmem:[#allocation4 + $0x1900] ss:$16 sps:$4 sm:$0xff]   ;;  %v18115_v8 = vld [vmem:[#allocation4 + $0x1908] ss:$16 sps:$4 sm:$0xff]  }
 0x70a   : > { %8075 = vmatpush1.bf16.msra.mxu0 %v18052_v50  ;;  %8078 = vmatprep.mubr.bf16.mxu0 %v19909_v35  ;;  %v18120_v58 = vld [vmem:[#allocation4 + $0x1924] ss:$16 sps:$4 sm:$0xff]   ;;  %v18121_v0 = vld [vmem:[#allocation4 + $0x1928] ss:$16 sps:$4 sm:$0xff]   ;;  %v18129_v14 = vld [vmem:[#allocation4 + $0x194c] ss:$16 sps:$4 sm:$0xff]  }
 0x70b   : > { %8301 = vmatpush1.bf16.msra.mxu1 %v18055_v32  ;;  %8304 = vmatprep.mubr.bf16.mxu1 %v19909_v35  ;;  %v18070_v35 = vld [vmem:[#allocation4 + $0x1820] ss:$16 sps:$4 sm:$0xff]   ;;  %v18126_v26 = vld [vmem:[#allocation4 + $0x1944] ss:$16 sps:$4 sm:$0xff]   ;;  %v18127_v7 = vld [vmem:[#allocation4 + $0x1948] ss:$16 sps:$4 sm:$0xff]  }
 0x70c   : > { %8076 = vmatprep.subr.bf16.mxu0 %v18060_v13  ;;  %8302 = vmatprep.subr.bf16.mxu1 %v18063_v45  ;;  %v18124_v9 = vld [vmem:[#allocation4 + $0x1940] ss:$16 sps:$4 sm:$0xff]   ;;  %v18132_v1 = vld [vmem:[#allocation4 + $0x1964] ss:$16 sps:$4 sm:$0xff]   ;;  %v18133_v37 = vld [vmem:[#allocation4 + $0x1968] ss:$16 sps:$4 sm:$0xff]  }
 0x70d   : > { %v18138_v44 = vld [vmem:[#allocation4 + $0x1984] ss:$16 sps:$4 sm:$0xff]   ;;  %v18141_v50 = vld [vmem:[#allocation4 + $0x198c] ss:$16 sps:$4 sm:$0xff]   ;;  %v18136_v32 = vld [vmem:[#allocation4 + $0x1980] ss:$16 sps:$4 sm:$0xff]  }
 0x70e   : > { %8077 = vmatpush1.bf16.msra.mxu0 %v18058_v30  ;;  %v18139_v13 = vld [vmem:[#allocation4 + $0x1988] ss:$16 sps:$4 sm:$0xff]   ;;  %v18144_v45 = vld [vmem:[#allocation4 + $0x19a4] ss:$16 sps:$4 sm:$0xff]  }
 0x70f   : > { %8303 = vmatpush1.bf16.msra.mxu1 %v18061_v41  ;;  %9209 = vmatprep.subr.bf16.mxu0 %v18066_v10  ;;  %v18145_v30 = vld [vmem:[#allocation4 + $0x19a8] ss:$16 sps:$4 sm:$0xff]   ;;  %v18150_v41 = vld [vmem:[#allocation4 + $0x19c4] ss:$16 sps:$4 sm:$0xff]   ;;  %v18153_v10 = vld [vmem:[#allocation4 + $0x19cc] ss:$16 sps:$4 sm:$0xff]  }
 0x710   : > { %9435 = vmatprep.subr.bf16.mxu1 %v18069_v17  ;;  %v18148_v17 = vld [vmem:[#allocation4 + $0x19c0] ss:$16 sps:$4 sm:$0xff]  }
 0x711   : > { %8079 = vmatmul.mubr.bf16.vlgmr.msra.gmra.mrb[192].mxu0 %v19907_v63 }
 0x712   : > { %8305 = vmatmul.mubr.bf16.vlgmr.msra.gmra.mrb[192].mxu1 %v19907_v63  ;;  %8088 = vmatprep.mubr.bf16.mxu0 %v19921_v27  ;;  %v18087_v63 = vld [vmem:[#allocation4 + $0x186c] ss:$16 sps:$4 sm:$0xff]  }
 0x713   : > { %8314 = vmatprep.mubr.bf16.mxu1 %v19921_v27  ;;  %9210 = vmatpush1.bf16.msra.mxu0 %v18064_v36  ;;  %v18082_v27 = vld [vmem:[#allocation4 + $0x1860] ss:$16 sps:$4 sm:$0xff]   ;;  %v18159_v36 = vld [vmem:[#allocation4 + $0x19ec] ss:$16 sps:$4 sm:$0xff]  }
 0x714   : > { %9436 = vmatpush1.bf16.msra.mxu1 %v18067_v20  ;;  %9211 = vmatprep.subr.bf16.mxu0 %v18072_v54  ;;  %v18154_v20 = vld [vmem:[#allocation4 + $0x19e0] ss:$16 sps:$4 sm:$0xff]   ;;  %v18157_v54 = vld [vmem:[#allocation4 + $0x19e8] ss:$16 sps:$4 sm:$0xff]  }
 0x715   : > { %9437 = vmatprep.subr.bf16.mxu1 %v18075_v62  ;;  %v18162_v62 = vld [vmem:[#allocation4 + $0x1a04] ss:$16 sps:$4 sm:$0xff]  }
 0x717   : > { %9212 = vmatpush1.bf16.msra.mxu0 %v18070_v35  ;;  %v18165_v35 = vld [vmem:[#allocation4 + $0x1a0c] ss:$16 sps:$4 sm:$0xff]  }
 0x718   : > { %9438 = vmatpush1.bf16.msra.mxu1 %v18073_v24  ;;  %9213 = vmatprep.subr.bf16.mxu0 %v18078_v51 }
 0x719   : > { %8089 = vmatmul.mubr.bf16.gmra.mrb[196].mxu0 %v19919_v21  ;;  %9439 = vmatprep.subr.bf16.mxu1 %v18081_v43 }
 0x71a   : > { %8315 = vmatmul.mubr.bf16.gmra.mrb[196].mxu1 %v19919_v21  ;;  %8098 = vmatprep.mubr.bf16.mxu0 %v19933_v15  ;;  %v18099_v21 = vld [vmem:[#allocation4 + $0x18ac] ss:$16 sps:$4 sm:$0xff]  }
 0x71b   : > { %8324 = vmatprep.mubr.bf16.mxu1 %v19933_v15  ;;  %9214 = vmatpush1.bf16.msra.mxu0 %v18076_v22  ;;  %v18094_v15 = vld [vmem:[#allocation4 + $0x18a0] ss:$16 sps:$4 sm:$0xff]  }
 0x71c   : > { %9440 = vmatpush1.bf16.msra.mxu1 %v18079_v61  ;;  %9215 = vmatprep.subr.bf16.mxu0 %v18084_v12 }
 0x71d   : > { %9441 = vmatprep.subr.bf16.mxu1 %v18087_v63 }
 0x71f   : > { %9216 = vmatpush1.bf16.msra.mxu0 %v18082_v27 }
 0x720   : > { %9442 = vmatpush1.bf16.msra.mxu1 %v18085_v52  ;;  %9217 = vmatprep.subr.bf16.mxu0 %v18090_v28 }
 0x721   : > { %8099 = vmatmul.mubr.bf16.gmra.mrb[200].mxu0 %v19931_v53  ;;  %9443 = vmatprep.subr.bf16.mxu1 %v18093_v19 }
 0x722   : > { %8325 = vmatmul.mubr.bf16.gmra.mrb[200].mxu1 %v19931_v53  ;;  %8108 = vmatprep.mubr.bf16.mxu0 %v19945_v42  ;;  %v18111_v53 = vld [vmem:[#allocation4 + $0x18ec] ss:$16 sps:$4 sm:$0xff]  }
 0x723   : > { %8334 = vmatprep.mubr.bf16.mxu1 %v19945_v42  ;;  %9218 = vmatpush1.bf16.msra.mxu0 %v18088_v56  ;;  %v18106_v42 = vld [vmem:[#allocation4 + $0x18e0] ss:$16 sps:$4 sm:$0xff]  }
 0x724   : > { %9444 = vmatpush1.bf16.msra.mxu1 %v18091_v31  ;;  %9219 = vmatprep.subr.bf16.mxu0 %v18096_v55 }
 0x725   : > { %9445 = vmatprep.subr.bf16.mxu1 %v18099_v21 }
 0x727   : > { %9220 = vmatpush1.bf16.msra.mxu0 %v18094_v15 }
 0x728   : > { %9446 = vmatpush1.bf16.msra.mxu1 %v18097_v60  ;;  %9221 = vmatprep.subr.bf16.mxu0 %v18102_v5 }
 0x729   : > { %8109 = vmatmul.mubr.bf16.gmra.mrb[204].mxu0 %v19943_v29  ;;  %9447 = vmatprep.subr.bf16.mxu1 %v18105_v40 }
 0x72a   : > { %8335 = vmatmul.mubr.bf16.gmra.mrb[204].mxu1 %v19943_v29  ;;  %8118 = vmatprep.mubr.bf16.mxu0 %v19957_v6  ;;  %v18123_v29 = vld [vmem:[#allocation4 + $0x192c] ss:$16 sps:$4 sm:$0xff]  }
 0x72b   : > { %8344 = vmatprep.mubr.bf16.mxu1 %v19957_v6  ;;  %9222 = vmatpush1.bf16.msra.mxu0 %v18100_v48  ;;  %v18118_v6 = vld [vmem:[#allocation4 + $0x1920] ss:$16 sps:$4 sm:$0xff]  }
 0x72c   : > { %9448 = vmatpush1.bf16.msra.mxu1 %v18103_v2  ;;  %9223 = vmatprep.subr.bf16.mxu0 %v18108_v18 }
 0x72d   : > { %9449 = vmatprep.subr.bf16.mxu1 %v18111_v53 }
 0x72f   : > { %9224 = vmatpush1.bf16.msra.mxu0 %v18106_v42  ;;  %v18160_v42 = vld [vmem:[#allocation4 + $0x1a00] ss:$16 sps:$4 sm:$0xff]  }
 0x730   : > { %9450 = vmatpush1.bf16.msra.mxu1 %v18109_v33  ;;  %9225 = vmatprep.subr.bf16.mxu0 %v18114_v49  ;;  %v18163_v33 = vld [vmem:[#allocation4 + $0x1a08] ss:$16 sps:$4 sm:$0xff]  }
 0x731   : > { %8119 = vmatmul.mubr.bf16.gmra.mrb[208].mxu0 %v19955_v38  ;;  %9451 = vmatprep.subr.bf16.mxu1 %v18117_v16  ;;  %v18168_v16 = vld [vmem:[#allocation4 + $0x1a24] ss:$16 sps:$4 sm:$0xff]  }
 0x732   : > { %8345 = vmatmul.mubr.bf16.gmra.mrb[208].mxu1 %v19955_v38  ;;  %8128 = vmatprep.mubr.bf16.mxu0 %v19969_v34  ;;  %v18135_v38 = vld [vmem:[#allocation4 + $0x196c] ss:$16 sps:$4 sm:$0xff]  }
 0x733   : > { %8354 = vmatprep.mubr.bf16.mxu1 %v19969_v34  ;;  %9226 = vmatpush1.bf16.msra.mxu0 %v18112_v39  ;;  %v18130_v34 = vld [vmem:[#allocation4 + $0x1960] ss:$16 sps:$4 sm:$0xff]   ;;  %v18171_v39 = vld [vmem:[#allocation4 + $0x1a2c] ss:$16 sps:$4 sm:$0xff]  }
 0x734   : > { %9452 = vmatpush1.bf16.msra.mxu1 %v18115_v8  ;;  %9227 = vmatprep.subr.bf16.mxu0 %v18120_v58 }
 0x735   : > { %9453 = vmatprep.subr.bf16.mxu1 %v18123_v29 }
 0x737   : > { %9228 = vmatpush1.bf16.msra.mxu0 %v18118_v6 }
 0x738   : > { %9454 = vmatpush1.bf16.msra.mxu1 %v18121_v0  ;;  %9229 = vmatprep.subr.bf16.mxu0 %v18126_v26  ;;  %v18166_v26 = vld [vmem:[#allocation4 + $0x1a20] ss:$16 sps:$4 sm:$0xff]  }
 0x739   : > { %8129 = vmatmul.mubr.bf16.gmra.mrb[212].mxu0 %v19967_v11  ;;  %9455 = vmatprep.subr.bf16.mxu1 %v18129_v14  ;;  %v18169_v14 = vld [vmem:[#allocation4 + $0x1a28] ss:$16 sps:$4 sm:$0xff]  }
 0x73a   : > { %8355 = vmatmul.mubr.bf16.gmra.mrb[212].mxu1 %v19967_v11  ;;  %8138 = vmatprep.mubr.bf16.mxu0 %v19981_v23  ;;  %v18147_v11 = vld [vmem:[#allocation4 + $0x19ac] ss:$16 sps:$4 sm:$0xff]  }
 0x73b   : > { %8364 = vmatprep.mubr.bf16.mxu1 %v19981_v23  ;;  %9230 = vmatpush1.bf16.msra.mxu0 %v18124_v9  ;;  %v18142_v23 = vld [vmem:[#allocation4 + $0x19a0] ss:$16 sps:$4 sm:$0xff]  }
 0x73c   : > { %9456 = vmatpush1.bf16.msra.mxu1 %v18127_v7  ;;  %9231 = vmatprep.subr.bf16.mxu0 %v18132_v1 }
 0x73d   : > { %9457 = vmatprep.subr.bf16.mxu1 %v18135_v38 }
 0x73f   : > { %9232 = vmatpush1.bf16.msra.mxu0 %v18130_v34  ;;  %v18174_v34 = vld [vmem:[#allocation4 + $0x1a44] ss:$16 sps:$4 sm:$0xff]  }
 0x740   : > { %9458 = vmatpush1.bf16.msra.mxu1 %v18133_v37  ;;  %9233 = vmatprep.subr.bf16.mxu0 %v18138_v44  ;;  %v18177_v37 = vld [vmem:[#allocation4 + $0x1a4c] ss:$16 sps:$4 sm:$0xff]  }
 0x741   : > { %8139 = vmatmul.mubr.bf16.gmra.mrb[216].mxu0 %v19979_v4  ;;  %9459 = vmatprep.subr.bf16.mxu1 %v18141_v50 }
 0x742   : > { %8365 = vmatmul.mubr.bf16.gmra.mrb[216].mxu1 %v19979_v4  ;;  %8148 = vmatprep.mubr.bf16.mxu0 %v19993_v3  ;;  %v18151_v4 = vld [vmem:[#allocation4 + $0x19c8] ss:$16 sps:$4 sm:$0xff]  }
 0x743   : > { %8374 = vmatprep.mubr.bf16.mxu1 %v19993_v3  ;;  %9234 = vmatpush1.bf16.msra.mxu0 %v18136_v32  ;;  %v18156_v3 = vld [vmem:[#allocation4 + $0x19e4] ss:$16 sps:$4 sm:$0xff]  }
 0x744   : > { %9460 = vmatpush1.bf16.msra.mxu1 %v18139_v13  ;;  %9235 = vmatprep.subr.bf16.mxu0 %v18144_v45 }
 0x745   : > { %9461 = vmatprep.subr.bf16.mxu1 %v18147_v11 }
 0x747   : > { %9236 = vmatpush1.bf16.msra.mxu0 %v18142_v23 }
 0x748   : > { %9462 = vmatpush1.bf16.msra.mxu1 %v18145_v30  ;;  %9237 = vmatprep.subr.bf16.mxu0 %v18150_v41 }
 0x749   : > { %8149 = vmatmul.mubr.bf16.gmra.mrb[220].mxu0 %v19991_v25  ;;  %9463 = vmatprep.subr.bf16.mxu1 %v18153_v10 }
 0x74a   : > { %8375 = vmatmul.mubr.bf16.gmra.mrb[220].mxu1 %v19991_v25  ;;  %v7271_v25 = vld [vmem:[#allocation6 + $0x6] ss:$8 sm:$0xf] }
 0x74b   : > { %9238 = vmatpush1.bf16.msra.mxu0 %v18148_v17  ;;  %v20028_v24 = vrot.slane %v7271_v25, %v19179_v46  ;;  %v20031_v43 = vrot.slane %v7271_v25, %v19192_v57  ;;  %v20034_v22 = vrot.slane %v7271_v25, %v19181_v47  ;;  %v20037_v63 = vrot.slane %v7271_v25, %v19195_v59  ;;  %v18172_v17 = vld [vmem:[#allocation4 + $0x1a40] ss:$16 sps:$4 sm:$0xff]  }
 0x74c   : > { %9464 = vmatpush1.bf16.msra.mxu1 %v18151_v4  ;;  %9239 = vmatprep.subr.bf16.mxu0 %v18156_v3  ;;  %v18175_v4 = vld [vmem:[#allocation4 + $0x1a48] ss:$16 sps:$4 sm:$0xff]  }
 0x74d   : > { %9465 = vmatprep.subr.bf16.mxu1 %v18159_v36  ;;  %v18180_v36 = vld [vmem:[#allocation4 + $0x1a64] ss:$16 sps:$4 sm:$0xff]  }
 0x74f   : > { %9240 = vmatpush1.bf16.msra.mxu0 %v18154_v20  ;;  %v18183_v20 = vld [vmem:[#allocation4 + $0x1a6c] ss:$16 sps:$4 sm:$0xff]  }
 0x750   : > { %9466 = vmatpush1.bf16.msra.mxu1 %v18157_v54  ;;  %9322 = vmatprep.subr.bf16.mxu0 %v18162_v62 }
 0x751   : > { %9548 = vmatprep.subr.bf16.mxu1 %v18165_v35 }
 0x7e4   : > { %v8080_v51 = vpop.f32.mrb[192].mxu0 }
 0x7e5   : > { %v8306_v61 = vpop.f32.mrb[192].mxu1  ;;  %v8082_v12 = vpop.f32.mrb[193].mxu0  ;;  %v15884_v28 = vadd.f32 %v8080_v51, %v20028_v24 }
 0x7e6   : > { %v8308_v27 = vpop.f32.mrb[193].mxu1  ;;  %v8084_v52 = vpop.f32.mrb[194].mxu0  ;;  %v15916_v55 = vadd.f32 %v8306_v61, %v20031_v43  ;;  %v15885_v21 = vadd.f32 %v8082_v12, %v20034_v22  ;;  %v18178_v61 = vld [vmem:[#allocation4 + $0x1a60] ss:$16 sps:$4 sm:$0xff]   ;;  %v18181_v12 = vld [vmem:[#allocation4 + $0x1a68] ss:$16 sps:$4 sm:$0xff]  }
 0x7e7   : > { %v15886_v19 = vadd.f32 %v8084_v52, %v20028_v24  ;;  %v8310_v56 = vpop.f32.mrb[194].mxu1  ;;  %v8086_v31 = vpop.f32.mrb[195].mxu0  ;;  %v15917_v40 = vadd.f32 %v8308_v27, %v20037_v63 }
 0x7e8   : > { %v15918_v15 = vadd.f32 %v8310_v56, %v20031_v43  ;;  %v15887_v60 = vadd.f32 %v8086_v31, %v20034_v22  ;;  %v8312_v5 = vpop.f32.mrb[195].mxu1  ;;  %v18186_v56 = vld [vmem:[#allocation4 + $0x1a84] ss:$16 sps:$4 sm:$0xff]   ;;  %v18189_v31 = vld [vmem:[#allocation4 + $0x1a8c] ss:$16 sps:$4 sm:$0xff]  }
 0x7e9   : > { %v8385_v48 = vpack.c.bf16 %v15886_v19, %v15884_v28  ;;  %v15919_v2 = vadd.f32 %v8312_v5, %v20037_v63 }
 0x7ea   : > { %v20047_v18 = vpack.c.bf16 %v15918_v15, %v15916_v55  ;;  %v8386_v53 = vpack.c.bf16 %v15887_v60, %v15885_v21 }
 0x7eb   : > { %v20049_v49 = vpack.c.bf16 %v15919_v2, %v15917_v40 }
 0x7ec   : > { %v8090_v8 = vpop.f32.mrb[196].mxu0  ;;  %9241 = vmatprep.mubr.bf16.mxu0 %v8386_v53  ;;  %9467 = vmatprep.mubr.bf16.mxu1 %v8386_v53 }
 0x7ed   : > { %v8316_v58 = vpop.f32.mrb[196].mxu1  ;;  %v8092_v29 = vpop.f32.mrb[197].mxu0  ;;  %9242 = vmatmul.mubr.bf16.vlgmr.msra.gmra.mrb[224].mxu0 %v8385_v48  ;;  %9468 = vmatmul.mubr.bf16.vlgmr.msra.gmra.mrb[224].mxu1 %v8385_v48  ;;  %v15888_v9 = vadd.f32 %v8090_v8, %v20028_v24  ;;  %v18192_v8 = vld [vmem:[#allocation4 + $0x1aa4] ss:$16 sps:$4 sm:$0xff]  }
 0x7ee   : > { %v8318_v6 = vpop.f32.mrb[197].mxu1  ;;  %9323 = vmatpush1.bf16.msra.mxu0 %v18160_v42  ;;  %v8094_v0 = vpop.f32.mrb[198].mxu0  ;;  %9549 = vmatpush1.bf16.msra.mxu1 %v18163_v33  ;;  %v15920_v44 = vadd.f32 %v8316_v58, %v20031_v43  ;;  %v15889_v50 = vadd.f32 %v8092_v29, %v20034_v22  ;;  %v18184_v33 = vld [vmem:[#allocation4 + $0x1a80] ss:$16 sps:$4 sm:$0xff]   ;;  %v18195_v58 = vld [vmem:[#allocation4 + $0x1aac] ss:$16 sps:$4 sm:$0xff]  }
 0x7ef   : > { %v15890_v7 = vadd.f32 %v8094_v0, %v20028_v24  ;;  %v8320_v1 = vpop.f32.mrb[198].mxu1  ;;  %v8096_v38 = vpop.f32.mrb[199].mxu0  ;;  %9324 = vmatprep.subr.bf16.mxu0 %v18168_v16  ;;  %9550 = vmatprep.subr.bf16.mxu1 %v18171_v39  ;;  %v15921_v11 = vadd.f32 %v8318_v6, %v20037_v63  ;;  %v18187_v16 = vld [vmem:[#allocation4 + $0x1a88] ss:$16 sps:$4 sm:$0xff]  }
 0x7f0   : > { %v15922_v32 = vadd.f32 %v8320_v1, %v20031_v43  ;;  %v15891_v13 = vadd.f32 %v8096_v38, %v20034_v22  ;;  %v8322_v45 = vpop.f32.mrb[199].mxu1 }
 0x7f1   : > { %v8389_v23 = vpack.c.bf16 %v15890_v7, %v15888_v9  ;;  %v15923_v30 = vadd.f32 %v8322_v45, %v20037_v63  ;;  %v18190_v9 = vld [vmem:[#allocation4 + $0x1aa0] ss:$16 sps:$4 sm:$0xff]   ;;  %v18193_v7 = vld [vmem:[#allocation4 + $0x1aa8] ss:$16 sps:$4 sm:$0xff]  }
 0x7f2   : > { %v20059_v41 = vpack.c.bf16 %v15922_v32, %v15920_v44  ;;  %v8390_v10 = vpack.c.bf16 %v15891_v13, %v15889_v50  ;;  %9325 = vmatpush1.bf16.msra.mxu0 %v18166_v26  ;;  %9551 = vmatpush1.bf16.msra.mxu1 %v18169_v14  ;;  %v18198_v44 = vld [vmem:[#allocation4 + $0x1ac4] ss:$16 sps:$4 sm:$0xff]   ;;  %v18201_v50 = vld [vmem:[#allocation4 + $0x1acc] ss:$16 sps:$4 sm:$0xff]  }
 0x7f3   : > { %v20061_v3 = vpack.c.bf16 %v15923_v30, %v15921_v11  ;;  %9326 = vmatprep.subr.bf16.mxu0 %v18174_v34  ;;  %9552 = vmatprep.subr.bf16.mxu1 %v18177_v37 }
 0x7f4   : > { %v8100_v54 = vpop.f32.mrb[200].mxu0  ;;  %9251 = vmatprep.mubr.bf16.mxu0 %v8390_v10  ;;  %9477 = vmatprep.mubr.bf16.mxu1 %v8390_v10 }
 0x7f5   : > { %v8326_v62 = vpop.f32.mrb[200].mxu1  ;;  %v8102_v35 = vpop.f32.mrb[201].mxu0  ;;  %9252 = vmatmul.mubr.bf16.gmra.mrb[228].mxu0 %v8389_v23  ;;  %9478 = vmatmul.mubr.bf16.gmra.mrb[228].mxu1 %v8389_v23  ;;  %v15892_v27 = vadd.f32 %v8100_v54, %v20028_v24  ;;  %v18199_v54 = vld [vmem:[#allocation4 + $0x1ac8] ss:$16 sps:$4 sm:$0xff]  }
 0x7f6   : > { %v8328_v25 = vpop.f32.mrb[201].mxu1  ;;  %9327 = vmatpush1.bf16.msra.mxu0 %v18172_v17  ;;  %v8104_v51 = vpop.f32.mrb[202].mxu0  ;;  %9553 = vmatpush1.bf16.msra.mxu1 %v18175_v4  ;;  %v15924_v55 = vadd.f32 %v8326_v62, %v20031_v43  ;;  %v15893_v21 = vadd.f32 %v8102_v35, %v20034_v22  ;;  %v18204_v35 = vld [vmem:[#allocation4 + $0x1ae4] ss:$16 sps:$4 sm:$0xff]  }
 0x7f7   : > { %v15894_v52 = vadd.f32 %v8104_v51, %v20028_v24  ;;  %v8330_v28 = vpop.f32.mrb[202].mxu1  ;;  %v8106_v19 = vpop.f32.mrb[203].mxu0  ;;  %9328 = vmatprep.subr.bf16.mxu0 %v18180_v36  ;;  %9554 = vmatprep.subr.bf16.mxu1 %v18183_v20  ;;  %v15925_v40 = vadd.f32 %v8328_v25, %v20037_v63  ;;  %v18196_v20 = vld [vmem:[#allocation4 + $0x1ac0] ss:$16 sps:$4 sm:$0xff]   ;;  %v18207_v25 = vld [vmem:[#allocation4 + $0x1aec] ss:$16 sps:$4 sm:$0xff]  }
 0x7f8   : > { %v15926_v15 = vadd.f32 %v8330_v28, %v20031_v43  ;;  %v15895_v60 = vadd.f32 %v8106_v19, %v20034_v22  ;;  %v8332_v5 = vpop.f32.mrb[203].mxu1  ;;  %v18202_v28 = vld [vmem:[#allocation4 + $0x1ae0] ss:$16 sps:$4 sm:$0xff]   ;;  %v18205_v19 = vld [vmem:[#allocation4 + $0x1ae8] ss:$16 sps:$4 sm:$0xff]  }
 0x7f9   : > { %v8393_v48 = vpack.c.bf16 %v15894_v52, %v15892_v27  ;;  %v15927_v2 = vadd.f32 %v8332_v5, %v20037_v63 }
 0x7fa   : > { %v20071_v53 = vpack.c.bf16 %v15926_v15, %v15924_v55  ;;  %v8394_v42 = vpack.c.bf16 %v15895_v60, %v15893_v21  ;;  %9329 = vmatpush1.bf16.msra.mxu0 %v18178_v61  ;;  %9555 = vmatpush1.bf16.msra.mxu1 %v18181_v12  ;;  %v18210_v15 = vld [vmem:[#allocation4 + $0x1b04] ss:$16 sps:$4 sm:$0xff]   ;;  %v18213_v60 = vld [vmem:[#allocation4 + $0x1b0c] ss:$16 sps:$4 sm:$0xff]  }
 0x7fb   : > { %v20073_v39 = vpack.c.bf16 %v15927_v2, %v15925_v40  ;;  %9330 = vmatprep.subr.bf16.mxu0 %v18186_v56  ;;  %9556 = vmatprep.subr.bf16.mxu1 %v18189_v31 }
 0x7fc   : > { %v8110_v29 = vpop.f32.mrb[204].mxu0  ;;  %9261 = vmatprep.mubr.bf16.mxu0 %v8394_v42  ;;  %9487 = vmatprep.mubr.bf16.mxu1 %v8394_v42 }
 0x7fd   : > { %v8336_v6 = vpop.f32.mrb[204].mxu1  ;;  %v8112_v0 = vpop.f32.mrb[205].mxu0  ;;  %9262 = vmatmul.mubr.bf16.gmra.mrb[232].mxu0 %v8393_v48  ;;  %9488 = vmatmul.mubr.bf16.gmra.mrb[232].mxu1 %v8393_v48  ;;  %v15896_v1 = vadd.f32 %v8110_v29, %v20028_v24 }
 0x7fe   : > { %v8338_v26 = vpop.f32.mrb[205].mxu1  ;;  %9331 = vmatpush1.bf16.msra.mxu0 %v18184_v33  ;;  %v8114_v14 = vpop.f32.mrb[206].mxu0  ;;  %9557 = vmatpush1.bf16.msra.mxu1 %v18187_v16  ;;  %v15928_v32 = vadd.f32 %v8336_v6, %v20031_v43  ;;  %v15897_v13 = vadd.f32 %v8112_v0, %v20034_v22  ;;  %v18208_v6 = vld [vmem:[#allocation4 + $0x1b00] ss:$16 sps:$4 sm:$0xff]   ;;  %v18211_v0 = vld [vmem:[#allocation4 + $0x1b08] ss:$16 sps:$4 sm:$0xff]  }
 0x7ff   : > { %v15898_v38 = vadd.f32 %v8114_v14, %v20028_v24  ;;  %v8340_v34 = vpop.f32.mrb[206].mxu1  ;;  %v8116_v37 = vpop.f32.mrb[207].mxu0  ;;  %9332 = vmatprep.subr.bf16.mxu0 %v18192_v8  ;;  %9558 = vmatprep.subr.bf16.mxu1 %v18195_v58  ;;  %v15929_v30 = vadd.f32 %v8338_v26, %v20037_v63  ;;  %v18216_v14 = vld [vmem:[#allocation4 + $0x1b24] ss:$16 sps:$4 sm:$0xff]  }
 0x800   : > { %v15930_v45 = vadd.f32 %v8340_v34, %v20031_v43  ;;  %v15899_v11 = vadd.f32 %v8116_v37, %v20034_v22  ;;  %v8342_v23 = vpop.f32.mrb[207].mxu1 }
 0x801   : > { %v8397_v10 = vpack.c.bf16 %v15898_v38, %v15896_v1  ;;  %v15931_v17 = vadd.f32 %v8342_v23, %v20037_v63  ;;  %v18222_v23 = vld [vmem:[#allocation4 + $0x1b44] ss:$16 sps:$4 sm:$0xff]  }
 0x802   : > { %v20083_v4 = vpack.c.bf16 %v15930_v45, %v15928_v32  ;;  %v8398_v36 = vpack.c.bf16 %v15899_v11, %v15897_v13  ;;  %9333 = vmatpush1.bf16.msra.mxu0 %v18190_v9  ;;  %9559 = vmatpush1.bf16.msra.mxu1 %v18193_v7  ;;  %v18219_v9 = vld [vmem:[#allocation4 + $0x1b2c] ss:$16 sps:$4 sm:$0xff]  }
 0x803   : > { %v20085_v62 = vpack.c.bf16 %v15931_v17, %v15929_v30  ;;  %9334 = vmatprep.subr.bf16.mxu0 %v18198_v44  ;;  %9560 = vmatprep.subr.bf16.mxu1 %v18201_v50  ;;  %v18214_v44 = vld [vmem:[#allocation4 + $0x1b20] ss:$16 sps:$4 sm:$0xff]   ;;  %v18217_v50 = vld [vmem:[#allocation4 + $0x1b28] ss:$16 sps:$4 sm:$0xff]   ;;  %v18225_v30 = vld [vmem:[#allocation4 + $0x1b4c] ss:$16 sps:$4 sm:$0xff]  }
 0x804   : > { %v8120_v51 = vpop.f32.mrb[208].mxu0  ;;  %9271 = vmatprep.mubr.bf16.mxu0 %v8398_v36  ;;  %9497 = vmatprep.mubr.bf16.mxu1 %v8398_v36 }
 0x805   : > { %v8346_v61 = vpop.f32.mrb[208].mxu1  ;;  %v8122_v12 = vpop.f32.mrb[209].mxu0  ;;  %9272 = vmatmul.mubr.bf16.gmra.mrb[236].mxu0 %v8397_v10  ;;  %9498 = vmatmul.mubr.bf16.gmra.mrb[236].mxu1 %v8397_v10  ;;  %v15900_v56 = vadd.f32 %v8120_v51, %v20028_v24 }
 0x806   : > { %v8348_v27 = vpop.f32.mrb[209].mxu1  ;;  %9335 = vmatpush1.bf16.msra.mxu0 %v18196_v20  ;;  %v8124_v52 = vpop.f32.mrb[210].mxu0  ;;  %9561 = vmatpush1.bf16.msra.mxu1 %v18199_v54  ;;  %v15932_v5 = vadd.f32 %v8346_v61, %v20031_v43  ;;  %v15901_v40 = vadd.f32 %v8122_v12, %v20034_v22 }
 0x807   : > { %v15902_v31 = vadd.f32 %v8124_v52, %v20028_v24  ;;  %v8350_v55 = vpop.f32.mrb[210].mxu1  ;;  %v8126_v21 = vpop.f32.mrb[211].mxu0  ;;  %9336 = vmatprep.subr.bf16.mxu0 %v18204_v35  ;;  %9562 = vmatprep.subr.bf16.mxu1 %v18207_v25  ;;  %v15933_v33 = vadd.f32 %v8348_v27, %v20037_v63  ;;  %v18220_v27 = vld [vmem:[#allocation4 + $0x1b40] ss:$16 sps:$4 sm:$0xff]   ;;  %v18223_v52 = vld [vmem:[#allocation4 + $0x1b48] ss:$16 sps:$4 sm:$0xff]  }
 0x808   : > { %v15934_v48 = vadd.f32 %v8350_v55, %v20031_v43  ;;  %v15903_v2 = vadd.f32 %v8126_v21, %v20034_v22  ;;  %v8352_v42 = vpop.f32.mrb[211].mxu1 }
 0x809   : > { %v8401_v16 = vpack.c.bf16 %v15902_v31, %v15900_v56  ;;  %v15935_v8 = vadd.f32 %v8352_v42, %v20037_v63  ;;  %v18231_v56 = vld [vmem:[#allocation4 + $0x1b6c] ss:$16 sps:$4 sm:$0xff]  }
 0x80a   : > { %v20095_v58 = vpack.c.bf16 %v15934_v48, %v15932_v5  ;;  %v8402_v29 = vpack.c.bf16 %v15903_v2, %v15901_v40  ;;  %9337 = vmatpush1.bf16.msra.mxu0 %v18202_v28  ;;  %9563 = vmatpush1.bf16.msra.mxu1 %v18205_v19  ;;  %v18228_v19 = vld [vmem:[#allocation4 + $0x1b64] ss:$16 sps:$4 sm:$0xff]   ;;  %v18226_v5 = vld [vmem:[#allocation4 + $0x1b60] ss:$16 sps:$4 sm:$0xff]   ;;  %v18229_v40 = vld [vmem:[#allocation4 + $0x1b68] ss:$16 sps:$4 sm:$0xff]  }
 0x80b   : > { %v20097_v26 = vpack.c.bf16 %v15935_v8, %v15933_v33  ;;  %9338 = vmatprep.subr.bf16.mxu0 %v18210_v15  ;;  %9564 = vmatprep.subr.bf16.mxu1 %v18213_v60  ;;  %v18237_v8 = vld [vmem:[#allocation4 + $0x1b8c] ss:$16 sps:$4 sm:$0xff]  }
 0x80c   : > { %v8130_v7 = vpop.f32.mrb[212].mxu0  ;;  %9281 = vmatprep.mubr.bf16.mxu0 %v8402_v29  ;;  %9507 = vmatprep.mubr.bf16.mxu1 %v8402_v29 }
 0x80d   : > { %v8356_v1 = vpop.f32.mrb[212].mxu1  ;;  %v8132_v38 = vpop.f32.mrb[213].mxu0  ;;  %9282 = vmatmul.mubr.bf16.gmra.mrb[240].mxu0 %v8401_v16  ;;  %9508 = vmatmul.mubr.bf16.gmra.mrb[240].mxu1 %v8401_v16  ;;  %v15904_v32 = vadd.f32 %v8130_v7, %v20028_v24  ;;  %v18234_v16 = vld [vmem:[#allocation4 + $0x1b84] ss:$16 sps:$4 sm:$0xff]  }
 0x80e   : > { %v8358_v34 = vpop.f32.mrb[213].mxu1  ;;  %9339 = vmatpush1.bf16.msra.mxu0 %v18208_v6  ;;  %v8134_v37 = vpop.f32.mrb[214].mxu0  ;;  %9565 = vmatpush1.bf16.msra.mxu1 %v18211_v0  ;;  %v15936_v10 = vadd.f32 %v8356_v1, %v20031_v43  ;;  %v15905_v17 = vadd.f32 %v8132_v38, %v20034_v22 }
 0x80f   : > { %v15906_v13 = vadd.f32 %v8134_v37, %v20028_v24  ;;  %v8360_v45 = vpop.f32.mrb[214].mxu1  ;;  %v8136_v11 = vpop.f32.mrb[215].mxu0  ;;  %9340 = vmatprep.subr.bf16.mxu0 %v18216_v14  ;;  %9566 = vmatprep.subr.bf16.mxu1 %v18219_v9  ;;  %v15937_v35 = vadd.f32 %v8358_v34, %v20037_v63 }
 0x810   : > { %v15938_v36 = vadd.f32 %v8360_v45, %v20031_v43  ;;  %v15907_v20 = vadd.f32 %v8136_v11, %v20034_v22  ;;  %v8362_v54 = vpop.f32.mrb[215].mxu1  ;;  %v18243_v45 = vld [vmem:[#allocation4 + $0x1bac] ss:$16 sps:$4 sm:$0xff]  }
 0x811   : > { %v8405_v25 = vpack.c.bf16 %v15906_v13, %v15904_v32  ;;  %v15939_v51 = vadd.f32 %v8362_v54, %v20037_v63  ;;  %v18240_v13 = vld [vmem:[#allocation4 + $0x1ba4] ss:$16 sps:$4 sm:$0xff]  }
 0x812   : > { %v20107_v61 = vpack.c.bf16 %v15938_v36, %v15936_v10  ;;  %v8406_v12 = vpack.c.bf16 %v15907_v20, %v15905_v17  ;;  %9341 = vmatpush1.bf16.msra.mxu0 %v18214_v44  ;;  %9567 = vmatpush1.bf16.msra.mxu1 %v18217_v50  ;;  %v18232_v44 = vld [vmem:[#allocation4 + $0x1b80] ss:$16 sps:$4 sm:$0xff]   ;;  %v18235_v50 = vld [vmem:[#allocation4 + $0x1b88] ss:$16 sps:$4 sm:$0xff]  }
 0x813   : > { %v20109_v28 = vpack.c.bf16 %v15939_v51, %v15937_v35  ;;  %9342 = vmatprep.subr.bf16.mxu0 %v18222_v23  ;;  %9568 = vmatprep.subr.bf16.mxu1 %v18225_v30  ;;  %v18238_v36 = vld [vmem:[#allocation4 + $0x1ba0] ss:$16 sps:$4 sm:$0xff]   ;;  %v18241_v20 = vld [vmem:[#allocation4 + $0x1ba8] ss:$16 sps:$4 sm:$0xff]  }
 0x814   : > { %v8140_v31 = vpop.f32.mrb[216].mxu0  ;;  %9291 = vmatprep.mubr.bf16.mxu0 %v8406_v12  ;;  %9517 = vmatprep.mubr.bf16.mxu1 %v8406_v12  ;;  %v18246_v12 = vld [vmem:[#allocation4 + $0x1bc4] ss:$16 sps:$4 sm:$0xff]  }
 0x815   : > { %v8366_v55 = vpop.f32.mrb[216].mxu1  ;;  %v8142_v21 = vpop.f32.mrb[217].mxu0  ;;  %9292 = vmatmul.mubr.bf16.gmra.mrb[244].mxu0 %v8405_v25  ;;  %9518 = vmatmul.mubr.bf16.gmra.mrb[244].mxu1 %v8405_v25  ;;  %v15908_v48 = vadd.f32 %v8140_v31, %v20028_v24 }
 0x816   : > { %v8368_v15 = vpop.f32.mrb[217].mxu1  ;;  %9343 = vmatpush1.bf16.msra.mxu0 %v18220_v27  ;;  %v8144_v60 = vpop.f32.mrb[218].mxu0  ;;  %9569 = vmatpush1.bf16.msra.mxu1 %v18223_v52  ;;  %v15940_v29 = vadd.f32 %v8366_v55, %v20031_v43  ;;  %v15909_v6 = vadd.f32 %v8142_v21, %v20034_v22  ;;  %v18249_v27 = vld [vmem:[#allocation4 + $0x1bcc] ss:$16 sps:$4 sm:$0xff]  }
 0x817   : > { %v15910_v2 = vadd.f32 %v8144_v60, %v20028_v24  ;;  %v8370_v42 = vpop.f32.mrb[218].mxu1  ;;  %v8146_v33 = vpop.f32.mrb[219].mxu0  ;;  %9344 = vmatprep.subr.bf16.mxu0 %v18228_v19  ;;  %9570 = vmatprep.subr.bf16.mxu1 %v18231_v56  ;;  %v15941_v7 = vadd.f32 %v8368_v15, %v20037_v63 }
 0x818   : > { %v15942_v0 = vadd.f32 %v8370_v42, %v20031_v43  ;;  %v15911_v14 = vadd.f32 %v8146_v33, %v20034_v22  ;;  %v8372_v9 = vpop.f32.mrb[219].mxu1  ;;  %v18253_v42 = vld [vmem:[#allocation4 + $0x1be8] ss:$16 sps:$4 sm:$0xff]   ;;  %v18258_v33 = vld [vmem:[#allocation4 + $0x1c04] ss:$16 sps:$4 sm:$0xff]  }
 0x819   : > { %v8409_v1 = vpack.c.bf16 %v15910_v2, %v15908_v48  ;;  %v15943_v38 = vadd.f32 %v8372_v9, %v20037_v63  ;;  %v18247_v2 = vld [vmem:[#allocation4 + $0x1bc8] ss:$16 sps:$4 sm:$0xff]   ;;  %v18270_v9 = vld [vmem:[#allocation4 + $0x1c44] ss:$16 sps:$4 sm:$0xff]  }
 0x81a   : > { %v20119_v34 = vpack.c.bf16 %v15942_v0, %v15940_v29  ;;  %v8410_v37 = vpack.c.bf16 %v15911_v14, %v15909_v6  ;;  %9345 = vmatpush1.bf16.msra.mxu0 %v18226_v5  ;;  %9571 = vmatpush1.bf16.msra.mxu1 %v18229_v40  ;;  %v18244_v40 = vld [vmem:[#allocation4 + $0x1bc0] ss:$16 sps:$4 sm:$0xff]   ;;  %v18259_v29 = vld [vmem:[#allocation4 + $0x1c08] ss:$16 sps:$4 sm:$0xff]   ;;  %v18264_v6 = vld [vmem:[#allocation4 + $0x1c24] ss:$16 sps:$4 sm:$0xff]  }
 0x81b   : > { %v20121_v32 = vpack.c.bf16 %v15943_v38, %v15941_v7  ;;  %9346 = vmatprep.subr.bf16.mxu0 %v18234_v16  ;;  %9572 = vmatprep.subr.bf16.mxu1 %v18237_v8  ;;  %v18261_v16 = vld [vmem:[#allocation4 + $0x1c0c] ss:$16 sps:$4 sm:$0xff]   ;;  %v18256_v8 = vld [vmem:[#allocation4 + $0x1c00] ss:$16 sps:$4 sm:$0xff]   ;;  %v18265_v14 = vld [vmem:[#allocation4 + $0x1c28] ss:$16 sps:$4 sm:$0xff]  }
 0x81c   : > { %v8150_v11 = vpop.f32.mrb[220].mxu0  ;;  %9301 = vmatprep.mubr.bf16.mxu0 %v8410_v37  ;;  %9527 = vmatprep.mubr.bf16.mxu1 %v8410_v37  ;;  %v18267_v0 = vld [vmem:[#allocation4 + $0x1c2c] ss:$16 sps:$4 sm:$0xff]   ;;  %v18271_v38 = vld [vmem:[#allocation4 + $0x1c48] ss:$16 sps:$4 sm:$0xff]  }
 0x81d   : > { %v8376_v23 = vpop.f32.mrb[220].mxu1  ;;  %v8152_v30 = vpop.f32.mrb[221].mxu0  ;;  %9302 = vmatmul.mubr.bf16.gmra.mrb[248].mxu0 %v8409_v1  ;;  %9528 = vmatmul.mubr.bf16.gmra.mrb[248].mxu1 %v8409_v1  ;;  %v15912_v54 = vadd.f32 %v8150_v11, %v20028_v24  ;;  %v18273_v7 = vld [vmem:[#allocation4 + $0x1c4c] ss:$16 sps:$4 sm:$0xff]   ;;  %v18268_v1 = vld [vmem:[#allocation4 + $0x1c40] ss:$16 sps:$4 sm:$0xff]  }
 0x81e   : > { %v8378_v10 = vpop.f32.mrb[221].mxu1  ;;  %9347 = vmatpush1.bf16.msra.mxu0 %v18232_v44  ;;  %v8154_v17 = vpop.f32.mrb[222].mxu0  ;;  %9573 = vmatpush1.bf16.msra.mxu1 %v18235_v50  ;;  %v15944_v52 = vadd.f32 %v8376_v23, %v20031_v43  ;;  %v15913_v19 = vadd.f32 %v8152_v30, %v20034_v22  ;;  %v18276_v37 = vld [vmem:[#allocation4 + $0x1c64] ss:$16 sps:$4 sm:$0xff]   ;;  %v18277_v44 = vld [vmem:[#allocation4 + $0x1c68] ss:$16 sps:$4 sm:$0xff]  }
 0x81f   : > { %v15914_v35 = vadd.f32 %v8154_v17, %v20028_v24  ;;  %v8380_v25 = vpop.f32.mrb[222].mxu1  ;;  %v8156_v51 = vpop.f32.mrb[223].mxu0  ;;  %9348 = vmatprep.subr.bf16.mxu0 %v18240_v13  ;;  %9574 = vmatprep.subr.bf16.mxu1 %v18243_v45  ;;  %v15945_v21 = vadd.f32 %v8378_v10, %v20037_v63  ;;  %v18282_v50 = vld [vmem:[#allocation4 + $0x1c84] ss:$16 sps:$4 sm:$0xff]   ;;  %v18285_v13 = vld [vmem:[#allocation4 + $0x1c8c] ss:$16 sps:$4 sm:$0xff]  }
 0x820   : > { %v15946_v56 = vadd.f32 %v8380_v25, %v20031_v43  ;;  %v15915_v31 = vadd.f32 %v8156_v51, %v20034_v22  ;;  %v8382_v55 = vpop.f32.mrb[223].mxu1  ;;  %v18252_v43 = vld [vmem:[#allocation4 + $0x1be4] ss:$16 sps:$4 sm:$0xff]   ;;  %v18255_v22 = vld [vmem:[#allocation4 + $0x1bec] ss:$16 sps:$4 sm:$0xff]  }
 0x821   : > { %v8413_v15 = vpack.c.bf16 %v15914_v35, %v15912_v54  ;;  %v15947_v24 = vadd.f32 %v8382_v55, %v20037_v63  ;;  %v18250_v63 = vld [vmem:[#allocation4 + $0x1be0] ss:$16 sps:$4 sm:$0xff]   ;;  %v18283_v11 = vld [vmem:[#allocation4 + $0x1c88] ss:$16 sps:$4 sm:$0xff]   ;;  %v18288_v23 = vld [vmem:[#allocation4 + $0x1ca4] ss:$16 sps:$4 sm:$0xff]  }
 0x822   : > { %v20131_v60 = vpack.c.bf16 %v15946_v56, %v15944_v52  ;;  %v8414_v5 = vpack.c.bf16 %v15915_v31, %v15913_v19  ;;  %9349 = vmatpush1.bf16.msra.mxu0 %v18238_v36  ;;  %9575 = vmatpush1.bf16.msra.mxu1 %v18241_v20  ;;  %v18280_v45 = vld [vmem:[#allocation4 + $0x1c80] ss:$16 sps:$4 sm:$0xff]   ;;  %v18289_v30 = vld [vmem:[#allocation4 + $0x1ca8] ss:$16 sps:$4 sm:$0xff]   ;;  %v18294_v10 = vld [vmem:[#allocation4 + $0x1cc4] ss:$16 sps:$4 sm:$0xff]  }
 0x823   : > { %v20133_v48 = vpack.c.bf16 %v15947_v24, %v15945_v21  ;;  %9350 = vmatprep.subr.bf16.mxu0 %v18246_v12  ;;  %9576 = vmatprep.subr.bf16.mxu1 %v18249_v27  ;;  %v18297_v17 = vld [vmem:[#allocation4 + $0x1ccc] ss:$16 sps:$4 sm:$0xff]   ;;  %v18292_v36 = vld [vmem:[#allocation4 + $0x1cc0] ss:$16 sps:$4 sm:$0xff]   ;;  %v18295_v20 = vld [vmem:[#allocation4 + $0x1cc8] ss:$16 sps:$4 sm:$0xff]  }
 0x824   : > { %9311 = vmatprep.mubr.bf16.mxu0 %v8414_v5  ;;  %9537 = vmatprep.mubr.bf16.mxu1 %v8414_v5  ;;  %v18300_v54 = vld [vmem:[#allocation4 + $0x1ce4] ss:$16 sps:$4 sm:$0xff]   ;;  %v18301_v35 = vld [vmem:[#allocation4 + $0x1ce8] ss:$16 sps:$4 sm:$0xff]   ;;  %v18309_v51 = vld [vmem:[#allocation4 + $0x1d0c] ss:$16 sps:$4 sm:$0xff]  }
 0x825   : > { %9312 = vmatmul.mubr.bf16.gmra.mrb[252].mxu0 %v8413_v15  ;;  %9538 = vmatmul.mubr.bf16.gmra.mrb[252].mxu1 %v8413_v15  ;;  %v18306_v25 = vld [vmem:[#allocation4 + $0x1d04] ss:$16 sps:$4 sm:$0xff]   ;;  %v18304_v12 = vld [vmem:[#allocation4 + $0x1d00] ss:$16 sps:$4 sm:$0xff]   ;;  %v18307_v27 = vld [vmem:[#allocation4 + $0x1d08] ss:$16 sps:$4 sm:$0xff]  }
 0x826   : > { %9351 = vmatpush1.bf16.msra.mxu0 %v18244_v40  ;;  %9354 = vmatprep.mubr.bf16.mxu0 %v20049_v49  ;;  %v18312_v52 = vld [vmem:[#allocation4 + $0x1d24] ss:$16 sps:$4 sm:$0xff]   ;;  %v18313_v19 = vld [vmem:[#allocation4 + $0x1d28] ss:$16 sps:$4 sm:$0xff]   ;;  %v18321_v31 = vld [vmem:[#allocation4 + $0x1d4c] ss:$16 sps:$4 sm:$0xff]  }
 0x827   : > { %9577 = vmatpush1.bf16.msra.mxu1 %v18247_v2  ;;  %9580 = vmatprep.mubr.bf16.mxu1 %v20049_v49  ;;  %v18262_v49 = vld [vmem:[#allocation4 + $0x1c20] ss:$16 sps:$4 sm:$0xff]   ;;  %v18318_v56 = vld [vmem:[#allocation4 + $0x1d44] ss:$16 sps:$4 sm:$0xff]   ;;  %v18319_v21 = vld [vmem:[#allocation4 + $0x1d48] ss:$16 sps:$4 sm:$0xff]  }
 0x828   : > { %9352 = vmatprep.subr.bf16.mxu0 %v18252_v43  ;;  %9578 = vmatprep.subr.bf16.mxu1 %v18255_v22  ;;  %v18316_v55 = vld [vmem:[#allocation4 + $0x1d40] ss:$16 sps:$4 sm:$0xff]   ;;  %v18324_v15 = vld [vmem:[#allocation4 + $0x1d64] ss:$16 sps:$4 sm:$0xff]   ;;  %v18325_v24 = vld [vmem:[#allocation4 + $0x1d68] ss:$16 sps:$4 sm:$0xff]  }
 0x829   : > { %v18330_v5 = vld [vmem:[#allocation4 + $0x1d84] ss:$16 sps:$4 sm:$0xff]   ;;  %v18333_v40 = vld [vmem:[#allocation4 + $0x1d8c] ss:$16 sps:$4 sm:$0xff]   ;;  %v18328_v2 = vld [vmem:[#allocation4 + $0x1d80] ss:$16 sps:$4 sm:$0xff]  }
 0x82a   : > { %9353 = vmatpush1.bf16.msra.mxu0 %v18250_v63  ;;  %v18331_v43 = vld [vmem:[#allocation4 + $0x1d88] ss:$16 sps:$4 sm:$0xff]   ;;  %v18336_v22 = vld [vmem:[#allocation4 + $0x1da4] ss:$16 sps:$4 sm:$0xff]  }
 0x82b   : > { %9579 = vmatpush1.bf16.msra.mxu1 %v18253_v42  ;;  %10485 = vmatprep.subr.bf16.mxu0 %v18258_v33  ;;  %v18337_v63 = vld [vmem:[#allocation4 + $0x1da8] ss:$16 sps:$4 sm:$0xff]   ;;  %v18342_v42 = vld [vmem:[#allocation4 + $0x1dc4] ss:$16 sps:$4 sm:$0xff]   ;;  %v18345_v33 = vld [vmem:[#allocation4 + $0x1dcc] ss:$16 sps:$4 sm:$0xff]  }
 0x82c   : > { %10711 = vmatprep.subr.bf16.mxu1 %v18261_v16  ;;  %v18340_v16 = vld [vmem:[#allocation4 + $0x1dc0] ss:$16 sps:$4 sm:$0xff]  }
 0x82d   : > { %9355 = vmatmul.mubr.bf16.vlgmr.msra.gmra.mrb[224].mxu0 %v20047_v18 }
 0x82e   : > { %9581 = vmatmul.mubr.bf16.vlgmr.msra.gmra.mrb[224].mxu1 %v20047_v18  ;;  %9364 = vmatprep.mubr.bf16.mxu0 %v20061_v3  ;;  %v18279_v18 = vld [vmem:[#allocation4 + $0x1c6c] ss:$16 sps:$4 sm:$0xff]  }
 0x82f   : > { %9590 = vmatprep.mubr.bf16.mxu1 %v20061_v3  ;;  %10486 = vmatpush1.bf16.msra.mxu0 %v18256_v8  ;;  %v18274_v3 = vld [vmem:[#allocation4 + $0x1c60] ss:$16 sps:$4 sm:$0xff]   ;;  %v18351_v8 = vld [vmem:[#allocation4 + $0x1dec] ss:$16 sps:$4 sm:$0xff]  }
 0x830   : > { %10712 = vmatpush1.bf16.msra.mxu1 %v18259_v29  ;;  %10487 = vmatprep.subr.bf16.mxu0 %v18264_v6  ;;  %v18346_v29 = vld [vmem:[#allocation4 + $0x1de0] ss:$16 sps:$4 sm:$0xff]   ;;  %v18349_v6 = vld [vmem:[#allocation4 + $0x1de8] ss:$16 sps:$4 sm:$0xff]  }
 0x831   : > { %10713 = vmatprep.subr.bf16.mxu1 %v18267_v0  ;;  %v18354_v0 = vld [vmem:[#allocation4 + $0x1e04] ss:$16 sps:$4 sm:$0xff]  }
 0x833   : > { %10488 = vmatpush1.bf16.msra.mxu0 %v18262_v49  ;;  %v18357_v49 = vld [vmem:[#allocation4 + $0x1e0c] ss:$16 sps:$4 sm:$0xff]  }
 0x834   : > { %10714 = vmatpush1.bf16.msra.mxu1 %v18265_v14  ;;  %10489 = vmatprep.subr.bf16.mxu0 %v18270_v9 }
 0x835   : > { %9365 = vmatmul.mubr.bf16.gmra.mrb[228].mxu0 %v20059_v41  ;;  %10715 = vmatprep.subr.bf16.mxu1 %v18273_v7 }
 0x836   : > { %9591 = vmatmul.mubr.bf16.gmra.mrb[228].mxu1 %v20059_v41  ;;  %9374 = vmatprep.mubr.bf16.mxu0 %v20073_v39  ;;  %v18291_v41 = vld [vmem:[#allocation4 + $0x1cac] ss:$16 sps:$4 sm:$0xff]  }
 0x837   : > { %9600 = vmatprep.mubr.bf16.mxu1 %v20073_v39  ;;  %10490 = vmatpush1.bf16.msra.mxu0 %v18268_v1  ;;  %v18286_v39 = vld [vmem:[#allocation4 + $0x1ca0] ss:$16 sps:$4 sm:$0xff]  }
 0x838   : > { %10716 = vmatpush1.bf16.msra.mxu1 %v18271_v38  ;;  %10491 = vmatprep.subr.bf16.mxu0 %v18276_v37 }
 0x839   : > { %10717 = vmatprep.subr.bf16.mxu1 %v18279_v18 }
 0x83b   : > { %10492 = vmatpush1.bf16.msra.mxu0 %v18274_v3 }
 0x83c   : > { %10718 = vmatpush1.bf16.msra.mxu1 %v18277_v44  ;;  %10493 = vmatprep.subr.bf16.mxu0 %v18282_v50 }
 0x83d   : > { %9375 = vmatmul.mubr.bf16.gmra.mrb[232].mxu0 %v20071_v53  ;;  %10719 = vmatprep.subr.bf16.mxu1 %v18285_v13 }
 0x83e   : > { %9601 = vmatmul.mubr.bf16.gmra.mrb[232].mxu1 %v20071_v53  ;;  %9384 = vmatprep.mubr.bf16.mxu0 %v20085_v62  ;;  %v18303_v53 = vld [vmem:[#allocation4 + $0x1cec] ss:$16 sps:$4 sm:$0xff]  }
 0x83f   : > { %9610 = vmatprep.mubr.bf16.mxu1 %v20085_v62  ;;  %10494 = vmatpush1.bf16.msra.mxu0 %v18280_v45  ;;  %v18298_v62 = vld [vmem:[#allocation4 + $0x1ce0] ss:$16 sps:$4 sm:$0xff]  }
 0x840   : > { %10720 = vmatpush1.bf16.msra.mxu1 %v18283_v11  ;;  %10495 = vmatprep.subr.bf16.mxu0 %v18288_v23 }
 0x841   : > { %10721 = vmatprep.subr.bf16.mxu1 %v18291_v41 }
 0x843   : > { %10496 = vmatpush1.bf16.msra.mxu0 %v18286_v39 }
 0x844   : > { %10722 = vmatpush1.bf16.msra.mxu1 %v18289_v30  ;;  %10497 = vmatprep.subr.bf16.mxu0 %v18294_v10 }
 0x845   : > { %9385 = vmatmul.mubr.bf16.gmra.mrb[236].mxu0 %v20083_v4  ;;  %10723 = vmatprep.subr.bf16.mxu1 %v18297_v17 }
 0x846   : > { %9611 = vmatmul.mubr.bf16.gmra.mrb[236].mxu1 %v20083_v4  ;;  %9394 = vmatprep.mubr.bf16.mxu0 %v20097_v26  ;;  %v18315_v4 = vld [vmem:[#allocation4 + $0x1d2c] ss:$16 sps:$4 sm:$0xff]  }
 0x847   : > { %9620 = vmatprep.mubr.bf16.mxu1 %v20097_v26  ;;  %10498 = vmatpush1.bf16.msra.mxu0 %v18292_v36  ;;  %v18310_v26 = vld [vmem:[#allocation4 + $0x1d20] ss:$16 sps:$4 sm:$0xff]  }
 0x848   : > { %10724 = vmatpush1.bf16.msra.mxu1 %v18295_v20  ;;  %10499 = vmatprep.subr.bf16.mxu0 %v18300_v54 }
 0x849   : > { %10725 = vmatprep.subr.bf16.mxu1 %v18303_v53 }
 0x84b   : > { %10500 = vmatpush1.bf16.msra.mxu0 %v18298_v62  ;;  %v18352_v62 = vld [vmem:[#allocation4 + $0x1e00] ss:$16 sps:$4 sm:$0xff]  }
 0x84c   : > { %10726 = vmatpush1.bf16.msra.mxu1 %v18301_v35  ;;  %10501 = vmatprep.subr.bf16.mxu0 %v18306_v25  ;;  %v18355_v35 = vld [vmem:[#allocation4 + $0x1e08] ss:$16 sps:$4 sm:$0xff]  }
 0x84d   : > { %9395 = vmatmul.mubr.bf16.gmra.mrb[240].mxu0 %v20095_v58  ;;  %10727 = vmatprep.subr.bf16.mxu1 %v18309_v51  ;;  %v18360_v51 = vld [vmem:[#allocation4 + $0x1e24] ss:$16 sps:$4 sm:$0xff]  }
 0x84e   : > { %9621 = vmatmul.mubr.bf16.gmra.mrb[240].mxu1 %v20095_v58  ;;  %9404 = vmatprep.mubr.bf16.mxu0 %v20109_v28  ;;  %v18327_v58 = vld [vmem:[#allocation4 + $0x1d6c] ss:$16 sps:$4 sm:$0xff]  }
 0x84f   : > { %9630 = vmatprep.mubr.bf16.mxu1 %v20109_v28  ;;  %10502 = vmatpush1.bf16.msra.mxu0 %v18304_v12  ;;  %v18322_v28 = vld [vmem:[#allocation4 + $0x1d60] ss:$16 sps:$4 sm:$0xff]   ;;  %v18363_v12 = vld [vmem:[#allocation4 + $0x1e2c] ss:$16 sps:$4 sm:$0xff]  }
 0x850   : > { %10728 = vmatpush1.bf16.msra.mxu1 %v18307_v27  ;;  %10503 = vmatprep.subr.bf16.mxu0 %v18312_v52 }
 0x851   : > { %10729 = vmatprep.subr.bf16.mxu1 %v18315_v4 }
 0x853   : > { %10504 = vmatpush1.bf16.msra.mxu0 %v18310_v26 }
 0x854   : > { %10730 = vmatpush1.bf16.msra.mxu1 %v18313_v19  ;;  %10505 = vmatprep.subr.bf16.mxu0 %v18318_v56  ;;  %v18358_v56 = vld [vmem:[#allocation4 + $0x1e20] ss:$16 sps:$4 sm:$0xff]  }
 0x855   : > { %9405 = vmatmul.mubr.bf16.gmra.mrb[244].mxu0 %v20107_v61  ;;  %10731 = vmatprep.subr.bf16.mxu1 %v18321_v31  ;;  %v18361_v31 = vld [vmem:[#allocation4 + $0x1e28] ss:$16 sps:$4 sm:$0xff]  }
 0x856   : > { %9631 = vmatmul.mubr.bf16.gmra.mrb[244].mxu1 %v20107_v61  ;;  %9414 = vmatprep.mubr.bf16.mxu0 %v20121_v32  ;;  %v18339_v61 = vld [vmem:[#allocation4 + $0x1dac] ss:$16 sps:$4 sm:$0xff]  }
 0x857   : > { %9640 = vmatprep.mubr.bf16.mxu1 %v20121_v32  ;;  %10506 = vmatpush1.bf16.msra.mxu0 %v18316_v55  ;;  %v18334_v32 = vld [vmem:[#allocation4 + $0x1da0] ss:$16 sps:$4 sm:$0xff]  }
 0x858   : > { %10732 = vmatpush1.bf16.msra.mxu1 %v18319_v21  ;;  %10507 = vmatprep.subr.bf16.mxu0 %v18324_v15 }
 0x859   : > { %10733 = vmatprep.subr.bf16.mxu1 %v18327_v58 }
 0x85b   : > { %10508 = vmatpush1.bf16.msra.mxu0 %v18322_v28  ;;  %v18366_v28 = vld [vmem:[#allocation4 + $0x1e44] ss:$16 sps:$4 sm:$0xff]  }
 0x85c   : > { %10734 = vmatpush1.bf16.msra.mxu1 %v18325_v24  ;;  %10509 = vmatprep.subr.bf16.mxu0 %v18330_v5  ;;  %v18369_v24 = vld [vmem:[#allocation4 + $0x1e4c] ss:$16 sps:$4 sm:$0xff]  }
 0x85d   : > { %9415 = vmatmul.mubr.bf16.gmra.mrb[248].mxu0 %v20119_v34  ;;  %10735 = vmatprep.subr.bf16.mxu1 %v18333_v40 }
 0x85e   : > { %9641 = vmatmul.mubr.bf16.gmra.mrb[248].mxu1 %v20119_v34  ;;  %9424 = vmatprep.mubr.bf16.mxu0 %v20133_v48  ;;  %v18343_v34 = vld [vmem:[#allocation4 + $0x1dc8] ss:$16 sps:$4 sm:$0xff]  }
 0x85f   : > { %9650 = vmatprep.mubr.bf16.mxu1 %v20133_v48  ;;  %10510 = vmatpush1.bf16.msra.mxu0 %v18328_v2  ;;  %v18348_v48 = vld [vmem:[#allocation4 + $0x1de4] ss:$16 sps:$4 sm:$0xff]  }
 0x860   : > { %10736 = vmatpush1.bf16.msra.mxu1 %v18331_v43  ;;  %10511 = vmatprep.subr.bf16.mxu0 %v18336_v22 }
 0x861   : > { %10737 = vmatprep.subr.bf16.mxu1 %v18339_v61 }
 0x863   : > { %10512 = vmatpush1.bf16.msra.mxu0 %v18334_v32 }
 0x864   : > { %10738 = vmatpush1.bf16.msra.mxu1 %v18337_v63  ;;  %10513 = vmatprep.subr.bf16.mxu0 %v18342_v42 }
 0x865   : > { %9425 = vmatmul.mubr.bf16.gmra.mrb[252].mxu0 %v20131_v60  ;;  %10739 = vmatprep.subr.bf16.mxu1 %v18345_v33 }
 0x866   : > { %9651 = vmatmul.mubr.bf16.gmra.mrb[252].mxu1 %v20131_v60  ;;  %v8547_v60 = vld [vmem:[#allocation6 + $0x7] ss:$8 sm:$0xf] }
 0x867   : > { %10514 = vmatpush1.bf16.msra.mxu0 %v18340_v16  ;;  %v20168_v14 = vrot.slane %v8547_v60, %v19179_v46  ;;  %v20171_v7 = vrot.slane %v8547_v60, %v19192_v57  ;;  %v20174_v1 = vrot.slane %v8547_v60, %v19181_v47  ;;  %v20177_v18 = vrot.slane %v8547_v60, %v19195_v59  ;;  %v18364_v16 = vld [vmem:[#allocation4 + $0x1e40] ss:$16 sps:$4 sm:$0xff]  }
 0x868   : > { %10740 = vmatpush1.bf16.msra.mxu1 %v18343_v34  ;;  %10515 = vmatprep.subr.bf16.mxu0 %v18348_v48  ;;  %v18367_v34 = vld [vmem:[#allocation4 + $0x1e48] ss:$16 sps:$4 sm:$0xff]  }
 0x869   : > { %10741 = vmatprep.subr.bf16.mxu1 %v18351_v8  ;;  %v18372_v8 = vld [vmem:[#allocation4 + $0x1e64] ss:$16 sps:$4 sm:$0xff]  }
 0x86b   : > { %10516 = vmatpush1.bf16.msra.mxu0 %v18346_v29  ;;  %v18375_v29 = vld [vmem:[#allocation4 + $0x1e6c] ss:$16 sps:$4 sm:$0xff]  }
 0x86c   : > { %10742 = vmatpush1.bf16.msra.mxu1 %v18349_v6  ;;  %10598 = vmatprep.subr.bf16.mxu0 %v18354_v0 }
 0x86d   : > { %10824 = vmatprep.subr.bf16.mxu1 %v18357_v49 }
 0x900   : > { %v9356_v9 = vpop.f32.mrb[224].mxu0 }
 0x901   : > { %v9582_v38 = vpop.f32.mrb[224].mxu1  ;;  %v9358_v37 = vpop.f32.mrb[225].mxu0  ;;  %v15948_v50 = vadd.f32 %v9356_v9, %v20168_v14 }
 0x902   : > { %v9584_v3 = vpop.f32.mrb[225].mxu1  ;;  %v9360_v44 = vpop.f32.mrb[226].mxu0  ;;  %v15980_v23 = vadd.f32 %v9582_v38, %v20171_v7  ;;  %v15949_v41 = vadd.f32 %v9358_v37, %v20174_v1  ;;  %v18370_v38 = vld [vmem:[#allocation4 + $0x1e60] ss:$16 sps:$4 sm:$0xff]   ;;  %v18373_v37 = vld [vmem:[#allocation4 + $0x1e68] ss:$16 sps:$4 sm:$0xff]  }
 0x903   : > { %v15950_v13 = vadd.f32 %v9360_v44, %v20168_v14  ;;  %v9586_v45 = vpop.f32.mrb[226].mxu1  ;;  %v9362_v11 = vpop.f32.mrb[227].mxu0  ;;  %v15981_v17 = vadd.f32 %v9584_v3, %v20177_v18 }
 0x904   : > { %v15982_v39 = vadd.f32 %v9586_v45, %v20171_v7  ;;  %v15951_v30 = vadd.f32 %v9362_v11, %v20174_v1  ;;  %v9588_v10 = vpop.f32.mrb[227].mxu1  ;;  %v18378_v45 = vld [vmem:[#allocation4 + $0x1e84] ss:$16 sps:$4 sm:$0xff]   ;;  %v18381_v11 = vld [vmem:[#allocation4 + $0x1e8c] ss:$16 sps:$4 sm:$0xff]  }
 0x905   : > { %v9661_v36 = vpack.c.bf16 %v15950_v13, %v15948_v50  ;;  %v15983_v20 = vadd.f32 %v9588_v10, %v20177_v18 }
 0x906   : > { %v20187_v54 = vpack.c.bf16 %v15982_v39, %v15980_v23  ;;  %v9662_v53 = vpack.c.bf16 %v15951_v30, %v15949_v41 }
 0x907   : > { %v20189_v25 = vpack.c.bf16 %v15983_v20, %v15981_v17 }
 0x908   : > { %v9366_v27 = vpop.f32.mrb[228].mxu0  ;;  %10517 = vmatprep.mubr.bf16.mxu0 %v9662_v53  ;;  %10743 = vmatprep.mubr.bf16.mxu1 %v9662_v53 }
 0x909   : > { %v9592_v52 = vpop.f32.mrb[228].mxu1  ;;  %v9368_v4 = vpop.f32.mrb[229].mxu0  ;;  %10518 = vmatmul.mubr.bf16.vlgmr.msra.gmra.mrb[0].mxu0 %v9661_v36  ;;  %10744 = vmatmul.mubr.bf16.vlgmr.msra.gmra.mrb[0].mxu1 %v9661_v36  ;;  %v15952_v55 = vadd.f32 %v9366_v27, %v20168_v14  ;;  %v18384_v27 = vld [vmem:[#allocation4 + $0x1ea4] ss:$16 sps:$4 sm:$0xff]  }
 0x90a   : > { %v9594_v26 = vpop.f32.mrb[229].mxu1  ;;  %10599 = vmatpush1.bf16.msra.mxu0 %v18352_v62  ;;  %v9370_v19 = vpop.f32.mrb[230].mxu0  ;;  %10825 = vmatpush1.bf16.msra.mxu1 %v18355_v35  ;;  %v15984_v5 = vadd.f32 %v9592_v52, %v20171_v7  ;;  %v15953_v40 = vadd.f32 %v9368_v4, %v20174_v1  ;;  %v18376_v35 = vld [vmem:[#allocation4 + $0x1e80] ss:$16 sps:$4 sm:$0xff]   ;;  %v18387_v52 = vld [vmem:[#allocation4 + $0x1eac] ss:$16 sps:$4 sm:$0xff]  }
 0x90b   : > { %v15954_v21 = vadd.f32 %v9370_v19, %v20168_v14  ;;  %v9596_v15 = vpop.f32.mrb[230].mxu1  ;;  %v9372_v58 = vpop.f32.mrb[231].mxu0  ;;  %10600 = vmatprep.subr.bf16.mxu0 %v18360_v51  ;;  %10826 = vmatprep.subr.bf16.mxu1 %v18363_v12  ;;  %v15985_v61 = vadd.f32 %v9594_v26, %v20177_v18  ;;  %v18379_v51 = vld [vmem:[#allocation4 + $0x1e88] ss:$16 sps:$4 sm:$0xff]  }
 0x90c   : > { %v15986_v2 = vadd.f32 %v9596_v15, %v20171_v7  ;;  %v15955_v43 = vadd.f32 %v9372_v58, %v20174_v1  ;;  %v9598_v22 = vpop.f32.mrb[231].mxu1 }
 0x90d   : > { %v9665_v32 = vpack.c.bf16 %v15954_v21, %v15952_v55  ;;  %v15987_v63 = vadd.f32 %v9598_v22, %v20177_v18  ;;  %v18382_v55 = vld [vmem:[#allocation4 + $0x1ea0] ss:$16 sps:$4 sm:$0xff]   ;;  %v18385_v21 = vld [vmem:[#allocation4 + $0x1ea8] ss:$16 sps:$4 sm:$0xff]  }
 0x90e   : > { %v20199_v42 = vpack.c.bf16 %v15986_v2, %v15984_v5  ;;  %v9666_v33 = vpack.c.bf16 %v15955_v43, %v15953_v40  ;;  %10601 = vmatpush1.bf16.msra.mxu0 %v18358_v56  ;;  %10827 = vmatpush1.bf16.msra.mxu1 %v18361_v31  ;;  %v18390_v5 = vld [vmem:[#allocation4 + $0x1ec4] ss:$16 sps:$4 sm:$0xff]   ;;  %v18393_v40 = vld [vmem:[#allocation4 + $0x1ecc] ss:$16 sps:$4 sm:$0xff]  }
 0x90f   : > { %v20201_v48 = vpack.c.bf16 %v15987_v63, %v15985_v61  ;;  %10602 = vmatprep.subr.bf16.mxu0 %v18366_v28  ;;  %10828 = vmatprep.subr.bf16.mxu1 %v18369_v24 }
 0x910   : > { %v9376_v6 = vpop.f32.mrb[232].mxu0  ;;  %10527 = vmatprep.mubr.bf16.mxu0 %v9666_v33  ;;  %10753 = vmatprep.mubr.bf16.mxu1 %v9666_v33 }
 0x911   : > { %v9602_v0 = vpop.f32.mrb[232].mxu1  ;;  %v9378_v49 = vpop.f32.mrb[233].mxu0  ;;  %10528 = vmatmul.mubr.bf16.gmra.mrb[4].mxu0 %v9665_v32  ;;  %10754 = vmatmul.mubr.bf16.gmra.mrb[4].mxu1 %v9665_v32  ;;  %v15956_v3 = vadd.f32 %v9376_v6, %v20168_v14  ;;  %v18391_v6 = vld [vmem:[#allocation4 + $0x1ec8] ss:$16 sps:$4 sm:$0xff]  }
 0x912   : > { %v9604_v60 = vpop.f32.mrb[233].mxu1  ;;  %10603 = vmatpush1.bf16.msra.mxu0 %v18364_v16  ;;  %v9380_v9 = vpop.f32.mrb[234].mxu0  ;;  %10829 = vmatpush1.bf16.msra.mxu1 %v18367_v34  ;;  %v15988_v23 = vadd.f32 %v9602_v0, %v20171_v7  ;;  %v15957_v41 = vadd.f32 %v9378_v49, %v20174_v1  ;;  %v18396_v49 = vld [vmem:[#allocation4 + $0x1ee4] ss:$16 sps:$4 sm:$0xff]  }
 0x913   : > { %v15958_v44 = vadd.f32 %v9380_v9, %v20168_v14  ;;  %v9606_v50 = vpop.f32.mrb[234].mxu1  ;;  %v9382_v13 = vpop.f32.mrb[235].mxu0  ;;  %10604 = vmatprep.subr.bf16.mxu0 %v18372_v8  ;;  %10830 = vmatprep.subr.bf16.mxu1 %v18375_v29  ;;  %v15989_v17 = vadd.f32 %v9604_v60, %v20177_v18  ;;  %v18388_v29 = vld [vmem:[#allocation4 + $0x1ec0] ss:$16 sps:$4 sm:$0xff]   ;;  %v18399_v60 = vld [vmem:[#allocation4 + $0x1eec] ss:$16 sps:$4 sm:$0xff]  }
 0x914   : > { %v15990_v39 = vadd.f32 %v9606_v50, %v20171_v7  ;;  %v15959_v30 = vadd.f32 %v9382_v13, %v20174_v1  ;;  %v9608_v10 = vpop.f32.mrb[235].mxu1  ;;  %v18394_v50 = vld [vmem:[#allocation4 + $0x1ee0] ss:$16 sps:$4 sm:$0xff]   ;;  %v18397_v13 = vld [vmem:[#allocation4 + $0x1ee8] ss:$16 sps:$4 sm:$0xff]  }
 0x915   : > { %v9669_v36 = vpack.c.bf16 %v15958_v44, %v15956_v3  ;;  %v15991_v20 = vadd.f32 %v9608_v10, %v20177_v18 }
 0x916   : > { %v20211_v53 = vpack.c.bf16 %v15990_v39, %v15988_v23  ;;  %v9670_v62 = vpack.c.bf16 %v15959_v30, %v15957_v41  ;;  %10605 = vmatpush1.bf16.msra.mxu0 %v18370_v38  ;;  %10831 = vmatpush1.bf16.msra.mxu1 %v18373_v37  ;;  %v18402_v39 = vld [vmem:[#allocation4 + $0x1f04] ss:$16 sps:$4 sm:$0xff]   ;;  %v18405_v30 = vld [vmem:[#allocation4 + $0x1f0c] ss:$16 sps:$4 sm:$0xff]  }
 0x917   : > { %v20213_v12 = vpack.c.bf16 %v15991_v20, %v15989_v17  ;;  %10606 = vmatprep.subr.bf16.mxu0 %v18378_v45  ;;  %10832 = vmatprep.subr.bf16.mxu1 %v18381_v11 }
 0x918   : > { %v9386_v4 = vpop.f32.mrb[236].mxu0  ;;  %10537 = vmatprep.mubr.bf16.mxu0 %v9670_v62  ;;  %10763 = vmatprep.mubr.bf16.mxu1 %v9670_v62 }
 0x919   : > { %v9612_v26 = vpop.f32.mrb[236].mxu1  ;;  %v9388_v19 = vpop.f32.mrb[237].mxu0  ;;  %10538 = vmatmul.mubr.bf16.gmra.mrb[8].mxu0 %v9669_v36  ;;  %10764 = vmatmul.mubr.bf16.gmra.mrb[8].mxu1 %v9669_v36  ;;  %v15960_v15 = vadd.f32 %v9386_v4, %v20168_v14 }
 0x91a   : > { %v9614_v56 = vpop.f32.mrb[237].mxu1  ;;  %10607 = vmatpush1.bf16.msra.mxu0 %v18376_v35  ;;  %v9390_v31 = vpop.f32.mrb[238].mxu0  ;;  %10833 = vmatpush1.bf16.msra.mxu1 %v18379_v51  ;;  %v15992_v2 = vadd.f32 %v9612_v26, %v20171_v7  ;;  %v15961_v43 = vadd.f32 %v9388_v19, %v20174_v1  ;;  %v18400_v26 = vld [vmem:[#allocation4 + $0x1f00] ss:$16 sps:$4 sm:$0xff]   ;;  %v18403_v19 = vld [vmem:[#allocation4 + $0x1f08] ss:$16 sps:$4 sm:$0xff]  }
 0x91b   : > { %v15962_v58 = vadd.f32 %v9390_v31, %v20168_v14  ;;  %v9616_v28 = vpop.f32.mrb[238].mxu1  ;;  %v9392_v24 = vpop.f32.mrb[239].mxu0  ;;  %10608 = vmatprep.subr.bf16.mxu0 %v18384_v27  ;;  %10834 = vmatprep.subr.bf16.mxu1 %v18387_v52  ;;  %v15993_v63 = vadd.f32 %v9614_v56, %v20177_v18  ;;  %v18408_v31 = vld [vmem:[#allocation4 + $0x1f24] ss:$16 sps:$4 sm:$0xff]  }
 0x91c   : > { %v15994_v22 = vadd.f32 %v9616_v28, %v20171_v7  ;;  %v15963_v61 = vadd.f32 %v9392_v24, %v20174_v1  ;;  %v9618_v32 = vpop.f32.mrb[239].mxu1 }
 0x91d   : > { %v9673_v33 = vpack.c.bf16 %v15962_v58, %v15960_v15  ;;  %v15995_v16 = vadd.f32 %v9618_v32, %v20177_v18  ;;  %v18414_v32 = vld [vmem:[#allocation4 + $0x1f44] ss:$16 sps:$4 sm:$0xff]  }
 0x91e   : > { %v20223_v34 = vpack.c.bf16 %v15994_v22, %v15992_v2  ;;  %v9674_v8 = vpack.c.bf16 %v15963_v61, %v15961_v43  ;;  %10609 = vmatpush1.bf16.msra.mxu0 %v18382_v55  ;;  %10835 = vmatpush1.bf16.msra.mxu1 %v18385_v21  ;;  %v18411_v55 = vld [vmem:[#allocation4 + $0x1f2c] ss:$16 sps:$4 sm:$0xff]  }
 0x91f   : > { %v20225_v0 = vpack.c.bf16 %v15995_v16, %v15993_v63  ;;  %10610 = vmatprep.subr.bf16.mxu0 %v18390_v5  ;;  %10836 = vmatprep.subr.bf16.mxu1 %v18393_v40  ;;  %v18406_v5 = vld [vmem:[#allocation4 + $0x1f20] ss:$16 sps:$4 sm:$0xff]   ;;  %v18409_v40 = vld [vmem:[#allocation4 + $0x1f28] ss:$16 sps:$4 sm:$0xff]   ;;  %v18417_v63 = vld [vmem:[#allocation4 + $0x1f4c] ss:$16 sps:$4 sm:$0xff]  }
 0x920   : > { %v9396_v9 = vpop.f32.mrb[240].mxu0  ;;  %10547 = vmatprep.mubr.bf16.mxu0 %v9674_v8  ;;  %10773 = vmatprep.mubr.bf16.mxu1 %v9674_v8 }
 0x921   : > { %v9622_v38 = vpop.f32.mrb[240].mxu1  ;;  %v9398_v37 = vpop.f32.mrb[241].mxu0  ;;  %10548 = vmatmul.mubr.bf16.gmra.mrb[12].mxu0 %v9673_v33  ;;  %10774 = vmatmul.mubr.bf16.gmra.mrb[12].mxu1 %v9673_v33  ;;  %v15964_v45 = vadd.f32 %v9396_v9, %v20168_v14 }
 0x922   : > { %v9624_v3 = vpop.f32.mrb[241].mxu1  ;;  %10611 = vmatpush1.bf16.msra.mxu0 %v18388_v29  ;;  %v9400_v44 = vpop.f32.mrb[242].mxu0  ;;  %10837 = vmatpush1.bf16.msra.mxu1 %v18391_v6  ;;  %v15996_v10 = vadd.f32 %v9622_v38, %v20171_v7  ;;  %v15965_v17 = vadd.f32 %v9398_v37, %v20174_v1 }
 0x923   : > { %v15966_v11 = vadd.f32 %v9400_v44, %v20168_v14  ;;  %v9626_v23 = vpop.f32.mrb[242].mxu1  ;;  %v9402_v41 = vpop.f32.mrb[243].mxu0  ;;  %10612 = vmatprep.subr.bf16.mxu0 %v18396_v49  ;;  %10838 = vmatprep.subr.bf16.mxu1 %v18399_v60  ;;  %v15997_v35 = vadd.f32 %v9624_v3, %v20177_v18  ;;  %v18412_v3 = vld [vmem:[#allocation4 + $0x1f40] ss:$16 sps:$4 sm:$0xff]   ;;  %v18415_v44 = vld [vmem:[#allocation4 + $0x1f48] ss:$16 sps:$4 sm:$0xff]  }
 0x924   : > { %v15998_v36 = vadd.f32 %v9626_v23, %v20171_v7  ;;  %v15967_v20 = vadd.f32 %v9402_v41, %v20174_v1  ;;  %v9628_v62 = vpop.f32.mrb[243].mxu1 }
 0x925   : > { %v9677_v51 = vpack.c.bf16 %v15966_v11, %v15964_v45  ;;  %v15999_v27 = vadd.f32 %v9628_v62, %v20177_v18  ;;  %v18423_v45 = vld [vmem:[#allocation4 + $0x1f6c] ss:$16 sps:$4 sm:$0xff]  }
 0x926   : > { %v20235_v52 = vpack.c.bf16 %v15998_v36, %v15996_v10  ;;  %v9678_v4 = vpack.c.bf16 %v15967_v20, %v15965_v17  ;;  %10613 = vmatpush1.bf16.msra.mxu0 %v18394_v50  ;;  %10839 = vmatpush1.bf16.msra.mxu1 %v18397_v13  ;;  %v18420_v13 = vld [vmem:[#allocation4 + $0x1f64] ss:$16 sps:$4 sm:$0xff]   ;;  %v18418_v10 = vld [vmem:[#allocation4 + $0x1f60] ss:$16 sps:$4 sm:$0xff]   ;;  %v18421_v17 = vld [vmem:[#allocation4 + $0x1f68] ss:$16 sps:$4 sm:$0xff]  }
 0x927   : > { %v20237_v56 = vpack.c.bf16 %v15999_v27, %v15997_v35  ;;  %10614 = vmatprep.subr.bf16.mxu0 %v18402_v39  ;;  %10840 = vmatprep.subr.bf16.mxu1 %v18405_v30  ;;  %v18429_v27 = vld [vmem:[#allocation4 + $0x1f8c] ss:$16 sps:$4 sm:$0xff]  }
 0x928   : > { %v9406_v21 = vpop.f32.mrb[244].mxu0  ;;  %10557 = vmatprep.mubr.bf16.mxu0 %v9678_v4  ;;  %10783 = vmatprep.mubr.bf16.mxu1 %v9678_v4 }
 0x929   : > { %v9632_v15 = vpop.f32.mrb[244].mxu1  ;;  %v9408_v58 = vpop.f32.mrb[245].mxu0  ;;  %10558 = vmatmul.mubr.bf16.gmra.mrb[16].mxu0 %v9677_v51  ;;  %10784 = vmatmul.mubr.bf16.gmra.mrb[16].mxu1 %v9677_v51  ;;  %v15968_v2 = vadd.f32 %v9406_v21, %v20168_v14  ;;  %v18426_v51 = vld [vmem:[#allocation4 + $0x1f84] ss:$16 sps:$4 sm:$0xff]  }
 0x92a   : > { %v9634_v28 = vpop.f32.mrb[245].mxu1  ;;  %10615 = vmatpush1.bf16.msra.mxu0 %v18400_v26  ;;  %v9410_v24 = vpop.f32.mrb[246].mxu0  ;;  %10841 = vmatpush1.bf16.msra.mxu1 %v18403_v19  ;;  %v16000_v33 = vadd.f32 %v9632_v15, %v20171_v7  ;;  %v15969_v16 = vadd.f32 %v9408_v58, %v20174_v1 }
 0x92b   : > { %v15970_v43 = vadd.f32 %v9410_v24, %v20168_v14  ;;  %v9636_v22 = vpop.f32.mrb[246].mxu1  ;;  %v9412_v61 = vpop.f32.mrb[247].mxu0  ;;  %10616 = vmatprep.subr.bf16.mxu0 %v18408_v31  ;;  %10842 = vmatprep.subr.bf16.mxu1 %v18411_v55  ;;  %v16001_v49 = vadd.f32 %v9634_v28, %v20177_v18 }
 0x92c   : > { %v16002_v8 = vadd.f32 %v9636_v22, %v20171_v7  ;;  %v15971_v29 = vadd.f32 %v9412_v61, %v20174_v1  ;;  %v9638_v6 = vpop.f32.mrb[247].mxu1  ;;  %v18435_v22 = vld [vmem:[#allocation4 + $0x1fac] ss:$16 sps:$4 sm:$0xff]  }
 0x92d   : > { %v9681_v60 = vpack.c.bf16 %v15970_v43, %v15968_v2  ;;  %v16003_v9 = vadd.f32 %v9638_v6, %v20177_v18  ;;  %v18432_v43 = vld [vmem:[#allocation4 + $0x1fa4] ss:$16 sps:$4 sm:$0xff]  }
 0x92e   : > { %v20247_v38 = vpack.c.bf16 %v16002_v8, %v16000_v33  ;;  %v9682_v37 = vpack.c.bf16 %v15971_v29, %v15969_v16  ;;  %10617 = vmatpush1.bf16.msra.mxu0 %v18406_v5  ;;  %10843 = vmatpush1.bf16.msra.mxu1 %v18409_v40  ;;  %v18424_v5 = vld [vmem:[#allocation4 + $0x1f80] ss:$16 sps:$4 sm:$0xff]   ;;  %v18427_v40 = vld [vmem:[#allocation4 + $0x1f88] ss:$16 sps:$4 sm:$0xff]  }
 0x92f   : > { %v20249_v50 = vpack.c.bf16 %v16003_v9, %v16001_v49  ;;  %10618 = vmatprep.subr.bf16.mxu0 %v18414_v32  ;;  %10844 = vmatprep.subr.bf16.mxu1 %v18417_v63  ;;  %v18430_v8 = vld [vmem:[#allocation4 + $0x1fa0] ss:$16 sps:$4 sm:$0xff]   ;;  %v18433_v29 = vld [vmem:[#allocation4 + $0x1fa8] ss:$16 sps:$4 sm:$0xff]  }
 0x930   : > { %v9416_v11 = vpop.f32.mrb[248].mxu0  ;;  %10567 = vmatprep.mubr.bf16.mxu0 %v9682_v37  ;;  %10793 = vmatprep.mubr.bf16.mxu1 %v9682_v37  ;;  %v18438_v37 = vld [vmem:[#allocation4 + $0x1fc4] ss:$16 sps:$4 sm:$0xff]  }
 0x931   : > { %v9642_v23 = vpop.f32.mrb[248].mxu1  ;;  %v9418_v41 = vpop.f32.mrb[249].mxu0  ;;  %10568 = vmatmul.mubr.bf16.gmra.mrb[20].mxu0 %v9681_v60  ;;  %10794 = vmatmul.mubr.bf16.gmra.mrb[20].mxu1 %v9681_v60  ;;  %v15972_v36 = vadd.f32 %v9416_v11, %v20168_v14 }
 0x932   : > { %v9644_v39 = vpop.f32.mrb[249].mxu1  ;;  %10619 = vmatpush1.bf16.msra.mxu0 %v18412_v3  ;;  %v9420_v30 = vpop.f32.mrb[250].mxu0  ;;  %10845 = vmatpush1.bf16.msra.mxu1 %v18415_v44  ;;  %v16004_v4 = vadd.f32 %v9642_v23, %v20171_v7  ;;  %v15973_v26 = vadd.f32 %v9418_v41, %v20174_v1  ;;  %v18441_v3 = vld [vmem:[#allocation4 + $0x1fcc] ss:$16 sps:$4 sm:$0xff]  }
 0x933   : > { %v15974_v20 = vadd.f32 %v9420_v30, %v20168_v14  ;;  %v9646_v62 = vpop.f32.mrb[250].mxu1  ;;  %v9422_v35 = vpop.f32.mrb[251].mxu0  ;;  %10620 = vmatprep.subr.bf16.mxu0 %v18420_v13  ;;  %10846 = vmatprep.subr.bf16.mxu1 %v18423_v45  ;;  %v16005_v21 = vadd.f32 %v9644_v39, %v20177_v18 }
 0x934   : > { %v16006_v19 = vadd.f32 %v9646_v62, %v20171_v7  ;;  %v15975_v31 = vadd.f32 %v9422_v35, %v20174_v1  ;;  %v9648_v55 = vpop.f32.mrb[251].mxu1  ;;  %v18445_v62 = vld [vmem:[#allocation4 + $0x1fe8] ss:$16 sps:$4 sm:$0xff]   ;;  %v18450_v35 = vld [vmem:[#allocation4 + $0x2004] ss:$16 sps:$4 sm:$0xff]  }
 0x935   : > { %v9685_v15 = vpack.c.bf16 %v15974_v20, %v15972_v36  ;;  %v16007_v58 = vadd.f32 %v9648_v55, %v20177_v18  ;;  %v18439_v20 = vld [vmem:[#allocation4 + $0x1fc8] ss:$16 sps:$4 sm:$0xff]   ;;  %v18462_v55 = vld [vmem:[#allocation4 + $0x2044] ss:$16 sps:$4 sm:$0xff]  }
 0x936   : > { %v20259_v28 = vpack.c.bf16 %v16006_v19, %v16004_v4  ;;  %v9686_v24 = vpack.c.bf16 %v15975_v31, %v15973_v26  ;;  %10621 = vmatpush1.bf16.msra.mxu0 %v18418_v10  ;;  %10847 = vmatpush1.bf16.msra.mxu1 %v18421_v17  ;;  %v18436_v17 = vld [vmem:[#allocation4 + $0x1fc0] ss:$16 sps:$4 sm:$0xff]   ;;  %v18451_v4 = vld [vmem:[#allocation4 + $0x2008] ss:$16 sps:$4 sm:$0xff]   ;;  %v18456_v26 = vld [vmem:[#allocation4 + $0x2024] ss:$16 sps:$4 sm:$0xff]  }
 0x937   : > { %v20261_v2 = vpack.c.bf16 %v16007_v58, %v16005_v21  ;;  %10622 = vmatprep.subr.bf16.mxu0 %v18426_v51  ;;  %10848 = vmatprep.subr.bf16.mxu1 %v18429_v27  ;;  %v18453_v51 = vld [vmem:[#allocation4 + $0x200c] ss:$16 sps:$4 sm:$0xff]   ;;  %v18448_v27 = vld [vmem:[#allocation4 + $0x2000] ss:$16 sps:$4 sm:$0xff]   ;;  %v18457_v31 = vld [vmem:[#allocation4 + $0x2028] ss:$16 sps:$4 sm:$0xff]  }
 0x938   : > { %v9426_v61 = vpop.f32.mrb[252].mxu0  ;;  %10577 = vmatprep.mubr.bf16.mxu0 %v9686_v24  ;;  %10803 = vmatprep.mubr.bf16.mxu1 %v9686_v24  ;;  %v18459_v19 = vld [vmem:[#allocation4 + $0x202c] ss:$16 sps:$4 sm:$0xff]   ;;  %v18463_v58 = vld [vmem:[#allocation4 + $0x2048] ss:$16 sps:$4 sm:$0xff]  }
 0x939   : > { %v9652_v32 = vpop.f32.mrb[252].mxu1  ;;  %v9428_v63 = vpop.f32.mrb[253].mxu0  ;;  %10578 = vmatmul.mubr.bf16.gmra.mrb[24].mxu0 %v9685_v15  ;;  %10804 = vmatmul.mubr.bf16.gmra.mrb[24].mxu1 %v9685_v15  ;;  %v15976_v6 = vadd.f32 %v9426_v61, %v20168_v14  ;;  %v18465_v21 = vld [vmem:[#allocation4 + $0x204c] ss:$16 sps:$4 sm:$0xff]   ;;  %v18460_v15 = vld [vmem:[#allocation4 + $0x2040] ss:$16 sps:$4 sm:$0xff]  }
 0x93a   : > { %v9654_v33 = vpop.f32.mrb[253].mxu1  ;;  %10623 = vmatpush1.bf16.msra.mxu0 %v18424_v5  ;;  %v9430_v16 = vpop.f32.mrb[254].mxu0  ;;  %10849 = vmatpush1.bf16.msra.mxu1 %v18427_v40  ;;  %v16008_v44 = vadd.f32 %v9652_v32, %v20171_v7  ;;  %v15977_v13 = vadd.f32 %v9428_v63, %v20174_v1  ;;  %v18468_v24 = vld [vmem:[#allocation4 + $0x2064] ss:$16 sps:$4 sm:$0xff]   ;;  %v18469_v5 = vld [vmem:[#allocation4 + $0x2068] ss:$16 sps:$4 sm:$0xff]  }
 0x93b   : > { %v15978_v49 = vadd.f32 %v9430_v16, %v20168_v14  ;;  %v9656_v60 = vpop.f32.mrb[254].mxu1  ;;  %v9432_v9 = vpop.f32.mrb[255].mxu0  ;;  %10624 = vmatprep.subr.bf16.mxu0 %v18432_v43  ;;  %10850 = vmatprep.subr.bf16.mxu1 %v18435_v22  ;;  %v16009_v41 = vadd.f32 %v9654_v33, %v20177_v18  ;;  %v18474_v40 = vld [vmem:[#allocation4 + $0x2084] ss:$16 sps:$4 sm:$0xff]   ;;  %v18477_v43 = vld [vmem:[#allocation4 + $0x208c] ss:$16 sps:$4 sm:$0xff]  }
 0x93c   : > { %v16010_v45 = vadd.f32 %v9656_v60, %v20171_v7  ;;  %v15979_v11 = vadd.f32 %v9432_v9, %v20174_v1  ;;  %v9658_v23 = vpop.f32.mrb[255].mxu1  ;;  %v18444_v7 = vld [vmem:[#allocation4 + $0x1fe4] ss:$16 sps:$4 sm:$0xff]   ;;  %v18447_v1 = vld [vmem:[#allocation4 + $0x1fec] ss:$16 sps:$4 sm:$0xff]  }
 0x93d   : > { %v9689_v39 = vpack.c.bf16 %v15978_v49, %v15976_v6  ;;  %v16011_v14 = vadd.f32 %v9658_v23, %v20177_v18  ;;  %v18442_v18 = vld [vmem:[#allocation4 + $0x1fe0] ss:$16 sps:$4 sm:$0xff]   ;;  %v18475_v61 = vld [vmem:[#allocation4 + $0x2088] ss:$16 sps:$4 sm:$0xff]   ;;  %v18480_v32 = vld [vmem:[#allocation4 + $0x20a4] ss:$16 sps:$4 sm:$0xff]  }
 0x93e   : > { %v20271_v30 = vpack.c.bf16 %v16010_v45, %v16008_v44  ;;  %v9690_v10 = vpack.c.bf16 %v15979_v11, %v15977_v13  ;;  %10625 = vmatpush1.bf16.msra.mxu0 %v18430_v8  ;;  %10851 = vmatpush1.bf16.msra.mxu1 %v18433_v29  ;;  %v18472_v22 = vld [vmem:[#allocation4 + $0x2080] ss:$16 sps:$4 sm:$0xff]   ;;  %v18481_v63 = vld [vmem:[#allocation4 + $0x20a8] ss:$16 sps:$4 sm:$0xff]   ;;  %v18486_v33 = vld [vmem:[#allocation4 + $0x20c4] ss:$16 sps:$4 sm:$0xff]  }
 0x93f   : > { %v20273_v36 = vpack.c.bf16 %v16011_v14, %v16009_v41  ;;  %10626 = vmatprep.subr.bf16.mxu0 %v18438_v37  ;;  %10852 = vmatprep.subr.bf16.mxu1 %v18441_v3  ;;  %v18489_v16 = vld [vmem:[#allocation4 + $0x20cc] ss:$16 sps:$4 sm:$0xff]   ;;  %v18484_v8 = vld [vmem:[#allocation4 + $0x20c0] ss:$16 sps:$4 sm:$0xff]   ;;  %v18487_v29 = vld [vmem:[#allocation4 + $0x20c8] ss:$16 sps:$4 sm:$0xff]  }
 0x940   : > { %10587 = vmatprep.mubr.bf16.mxu0 %v9690_v10  ;;  %10813 = vmatprep.mubr.bf16.mxu1 %v9690_v10  ;;  %v18492_v6 = vld [vmem:[#allocation4 + $0x20e4] ss:$16 sps:$4 sm:$0xff]   ;;  %v18493_v49 = vld [vmem:[#allocation4 + $0x20e8] ss:$16 sps:$4 sm:$0xff]   ;;  %v18501_v9 = vld [vmem:[#allocation4 + $0x210c] ss:$16 sps:$4 sm:$0xff]  }
 0x941   : > { %10588 = vmatmul.mubr.bf16.gmra.mrb[28].mxu0 %v9689_v39  ;;  %10814 = vmatmul.mubr.bf16.gmra.mrb[28].mxu1 %v9689_v39  ;;  %v18498_v60 = vld [vmem:[#allocation4 + $0x2104] ss:$16 sps:$4 sm:$0xff]   ;;  %v18496_v37 = vld [vmem:[#allocation4 + $0x2100] ss:$16 sps:$4 sm:$0xff]   ;;  %v18499_v3 = vld [vmem:[#allocation4 + $0x2108] ss:$16 sps:$4 sm:$0xff]  }
 0x942   : > { %10627 = vmatpush1.bf16.msra.mxu0 %v18436_v17  ;;  %10630 = vmatprep.mubr.bf16.mxu0 %v20189_v25  ;;  %v18504_v44 = vld [vmem:[#allocation4 + $0x2124] ss:$16 sps:$4 sm:$0xff]   ;;  %v18505_v13 = vld [vmem:[#allocation4 + $0x2128] ss:$16 sps:$4 sm:$0xff]   ;;  %v18513_v11 = vld [vmem:[#allocation4 + $0x214c] ss:$16 sps:$4 sm:$0xff]  }
 0x943   : > { %10853 = vmatpush1.bf16.msra.mxu1 %v18439_v20  ;;  %10856 = vmatprep.mubr.bf16.mxu1 %v20189_v25  ;;  %v18454_v25 = vld [vmem:[#allocation4 + $0x2020] ss:$16 sps:$4 sm:$0xff]   ;;  %v18510_v45 = vld [vmem:[#allocation4 + $0x2144] ss:$16 sps:$4 sm:$0xff]   ;;  %v18511_v41 = vld [vmem:[#allocation4 + $0x2148] ss:$16 sps:$4 sm:$0xff]  }
 0x944   : > { %10628 = vmatprep.subr.bf16.mxu0 %v18444_v7  ;;  %10854 = vmatprep.subr.bf16.mxu1 %v18447_v1  ;;  %v18508_v23 = vld [vmem:[#allocation4 + $0x2140] ss:$16 sps:$4 sm:$0xff]   ;;  %v18516_v39 = vld [vmem:[#allocation4 + $0x2164] ss:$16 sps:$4 sm:$0xff]   ;;  %v18517_v14 = vld [vmem:[#allocation4 + $0x2168] ss:$16 sps:$4 sm:$0xff]  }
 0x945   : > { %v18522_v10 = vld [vmem:[#allocation4 + $0x2184] ss:$16 sps:$4 sm:$0xff]   ;;  %v18525_v17 = vld [vmem:[#allocation4 + $0x218c] ss:$16 sps:$4 sm:$0xff]   ;;  %v18520_v20 = vld [vmem:[#allocation4 + $0x2180] ss:$16 sps:$4 sm:$0xff]  }
 0x946   : > { %10629 = vmatpush1.bf16.msra.mxu0 %v18442_v18  ;;  %v18523_v7 = vld [vmem:[#allocation4 + $0x2188] ss:$16 sps:$4 sm:$0xff]   ;;  %v18528_v1 = vld [vmem:[#allocation4 + $0x21a4] ss:$16 sps:$4 sm:$0xff]  }
 0x947   : > { %10855 = vmatpush1.bf16.msra.mxu1 %v18445_v62  ;;  %11761 = vmatprep.subr.bf16.mxu0 %v18450_v35  ;;  %v18529_v18 = vld [vmem:[#allocation4 + $0x21a8] ss:$16 sps:$4 sm:$0xff]   ;;  %v18534_v62 = vld [vmem:[#allocation4 + $0x21c4] ss:$16 sps:$4 sm:$0xff]   ;;  %v18537_v35 = vld [vmem:[#allocation4 + $0x21cc] ss:$16 sps:$4 sm:$0xff]  }
 0x948   : > { %11987 = vmatprep.subr.bf16.mxu1 %v18453_v51  ;;  %v18532_v51 = vld [vmem:[#allocation4 + $0x21c0] ss:$16 sps:$4 sm:$0xff]  }
 0x949   : > { %10631 = vmatmul.mubr.bf16.vlgmr.msra.gmra.mrb[0].mxu0 %v20187_v54 }
 0x94a   : > { %10857 = vmatmul.mubr.bf16.vlgmr.msra.gmra.mrb[0].mxu1 %v20187_v54  ;;  %10640 = vmatprep.mubr.bf16.mxu0 %v20201_v48  ;;  %v18471_v54 = vld [vmem:[#allocation4 + $0x206c] ss:$16 sps:$4 sm:$0xff]  }
 0x94b   : > { %10866 = vmatprep.mubr.bf16.mxu1 %v20201_v48  ;;  %11762 = vmatpush1.bf16.msra.mxu0 %v18448_v27  ;;  %v18466_v48 = vld [vmem:[#allocation4 + $0x2060] ss:$16 sps:$4 sm:$0xff]   ;;  %v18543_v27 = vld [vmem:[#allocation4 + $0x21ec] ss:$16 sps:$4 sm:$0xff]  }
 0x94c   : > { %11988 = vmatpush1.bf16.msra.mxu1 %v18451_v4  ;;  %11763 = vmatprep.subr.bf16.mxu0 %v18456_v26  ;;  %v18538_v4 = vld [vmem:[#allocation4 + $0x21e0] ss:$16 sps:$4 sm:$0xff]   ;;  %v18541_v26 = vld [vmem:[#allocation4 + $0x21e8] ss:$16 sps:$4 sm:$0xff]  }
 0x94d   : > { %11989 = vmatprep.subr.bf16.mxu1 %v18459_v19  ;;  %v18546_v19 = vld [vmem:[#allocation4 + $0x2204] ss:$16 sps:$4 sm:$0xff]  }
 0x94f   : > { %11764 = vmatpush1.bf16.msra.mxu0 %v18454_v25  ;;  %v18549_v25 = vld [vmem:[#allocation4 + $0x220c] ss:$16 sps:$4 sm:$0xff]  }
 0x950   : > { %11990 = vmatpush1.bf16.msra.mxu1 %v18457_v31  ;;  %11765 = vmatprep.subr.bf16.mxu0 %v18462_v55 }
 0x951   : > { %10641 = vmatmul.mubr.bf16.gmra.mrb[4].mxu0 %v20199_v42  ;;  %11991 = vmatprep.subr.bf16.mxu1 %v18465_v21 }
 0x952   : > { %10867 = vmatmul.mubr.bf16.gmra.mrb[4].mxu1 %v20199_v42  ;;  %10650 = vmatprep.mubr.bf16.mxu0 %v20213_v12  ;;  %v18483_v42 = vld [vmem:[#allocation4 + $0x20ac] ss:$16 sps:$4 sm:$0xff]  }
 0x953   : > { %10876 = vmatprep.mubr.bf16.mxu1 %v20213_v12  ;;  %11766 = vmatpush1.bf16.msra.mxu0 %v18460_v15  ;;  %v18478_v12 = vld [vmem:[#allocation4 + $0x20a0] ss:$16 sps:$4 sm:$0xff]  }
 0x954   : > { %11992 = vmatpush1.bf16.msra.mxu1 %v18463_v58  ;;  %11767 = vmatprep.subr.bf16.mxu0 %v18468_v24 }
 0x955   : > { %11993 = vmatprep.subr.bf16.mxu1 %v18471_v54 }
 0x957   : > { %11768 = vmatpush1.bf16.msra.mxu0 %v18466_v48 }
 0x958   : > { %11994 = vmatpush1.bf16.msra.mxu1 %v18469_v5  ;;  %11769 = vmatprep.subr.bf16.mxu0 %v18474_v40 }
 0x959   : > { %10651 = vmatmul.mubr.bf16.gmra.mrb[8].mxu0 %v20211_v53  ;;  %11995 = vmatprep.subr.bf16.mxu1 %v18477_v43 }
 0x95a   : > { %10877 = vmatmul.mubr.bf16.gmra.mrb[8].mxu1 %v20211_v53  ;;  %10660 = vmatprep.mubr.bf16.mxu0 %v20225_v0  ;;  %v18495_v53 = vld [vmem:[#allocation4 + $0x20ec] ss:$16 sps:$4 sm:$0xff]  }
 0x95b   : > { %10886 = vmatprep.mubr.bf16.mxu1 %v20225_v0  ;;  %11770 = vmatpush1.bf16.msra.mxu0 %v18472_v22  ;;  %v18490_v0 = vld [vmem:[#allocation4 + $0x20e0] ss:$16 sps:$4 sm:$0xff]  }
 0x95c   : > { %11996 = vmatpush1.bf16.msra.mxu1 %v18475_v61  ;;  %11771 = vmatprep.subr.bf16.mxu0 %v18480_v32 }
 0x95d   : > { %11997 = vmatprep.subr.bf16.mxu1 %v18483_v42 }
 0x95f   : > { %11772 = vmatpush1.bf16.msra.mxu0 %v18478_v12 }
 0x960   : > { %11998 = vmatpush1.bf16.msra.mxu1 %v18481_v63  ;;  %11773 = vmatprep.subr.bf16.mxu0 %v18486_v33 }
 0x961   : > { %10661 = vmatmul.mubr.bf16.gmra.mrb[12].mxu0 %v20223_v34  ;;  %11999 = vmatprep.subr.bf16.mxu1 %v18489_v16 }
 0x962   : > { %10887 = vmatmul.mubr.bf16.gmra.mrb[12].mxu1 %v20223_v34  ;;  %10670 = vmatprep.mubr.bf16.mxu0 %v20237_v56  ;;  %v18507_v34 = vld [vmem:[#allocation4 + $0x212c] ss:$16 sps:$4 sm:$0xff]  }
 0x963   : > { %10896 = vmatprep.mubr.bf16.mxu1 %v20237_v56  ;;  %11774 = vmatpush1.bf16.msra.mxu0 %v18484_v8  ;;  %v18502_v56 = vld [vmem:[#allocation4 + $0x2120] ss:$16 sps:$4 sm:$0xff]  }
 0x964   : > { %12000 = vmatpush1.bf16.msra.mxu1 %v18487_v29  ;;  %11775 = vmatprep.subr.bf16.mxu0 %v18492_v6 }
 0x965   : > { %12001 = vmatprep.subr.bf16.mxu1 %v18495_v53 }
 0x967   : > { %11776 = vmatpush1.bf16.msra.mxu0 %v18490_v0  ;;  %v18544_v0 = vld [vmem:[#allocation4 + $0x2200] ss:$16 sps:$4 sm:$0xff]  }
 0x968   : > { %12002 = vmatpush1.bf16.msra.mxu1 %v18493_v49  ;;  %11777 = vmatprep.subr.bf16.mxu0 %v18498_v60  ;;  %v18547_v49 = vld [vmem:[#allocation4 + $0x2208] ss:$16 sps:$4 sm:$0xff]  }
 0x969   : > { %10671 = vmatmul.mubr.bf16.gmra.mrb[16].mxu0 %v20235_v52  ;;  %12003 = vmatprep.subr.bf16.mxu1 %v18501_v9  ;;  %v18552_v9 = vld [vmem:[#allocation4 + $0x2224] ss:$16 sps:$4 sm:$0xff]  }
 0x96a   : > { %10897 = vmatmul.mubr.bf16.gmra.mrb[16].mxu1 %v20235_v52  ;;  %10680 = vmatprep.mubr.bf16.mxu0 %v20249_v50  ;;  %v18519_v52 = vld [vmem:[#allocation4 + $0x216c] ss:$16 sps:$4 sm:$0xff]  }
 0x96b   : > { %10906 = vmatprep.mubr.bf16.mxu1 %v20249_v50  ;;  %11778 = vmatpush1.bf16.msra.mxu0 %v18496_v37  ;;  %v18514_v50 = vld [vmem:[#allocation4 + $0x2160] ss:$16 sps:$4 sm:$0xff]   ;;  %v18555_v37 = vld [vmem:[#allocation4 + $0x222c] ss:$16 sps:$4 sm:$0xff]  }
 0x96c   : > { %12004 = vmatpush1.bf16.msra.mxu1 %v18499_v3  ;;  %11779 = vmatprep.subr.bf16.mxu0 %v18504_v44 }
 0x96d   : > { %12005 = vmatprep.subr.bf16.mxu1 %v18507_v34 }
 0x96f   : > { %11780 = vmatpush1.bf16.msra.mxu0 %v18502_v56 }
 0x970   : > { %12006 = vmatpush1.bf16.msra.mxu1 %v18505_v13  ;;  %11781 = vmatprep.subr.bf16.mxu0 %v18510_v45  ;;  %v18550_v45 = vld [vmem:[#allocation4 + $0x2220] ss:$16 sps:$4 sm:$0xff]  }
 0x971   : > { %10681 = vmatmul.mubr.bf16.gmra.mrb[20].mxu0 %v20247_v38  ;;  %12007 = vmatprep.subr.bf16.mxu1 %v18513_v11  ;;  %v18553_v11 = vld [vmem:[#allocation4 + $0x2228] ss:$16 sps:$4 sm:$0xff]  }
 0x972   : > { %10907 = vmatmul.mubr.bf16.gmra.mrb[20].mxu1 %v20247_v38  ;;  %10690 = vmatprep.mubr.bf16.mxu0 %v20261_v2  ;;  %v18531_v38 = vld [vmem:[#allocation4 + $0x21ac] ss:$16 sps:$4 sm:$0xff]  }
 0x973   : > { %10916 = vmatprep.mubr.bf16.mxu1 %v20261_v2  ;;  %11782 = vmatpush1.bf16.msra.mxu0 %v18508_v23  ;;  %v18526_v2 = vld [vmem:[#allocation4 + $0x21a0] ss:$16 sps:$4 sm:$0xff]  }
 0x974   : > { %12008 = vmatpush1.bf16.msra.mxu1 %v18511_v41  ;;  %11783 = vmatprep.subr.bf16.mxu0 %v18516_v39 }
 0x975   : > { %12009 = vmatprep.subr.bf16.mxu1 %v18519_v52 }
 0x977   : > { %11784 = vmatpush1.bf16.msra.mxu0 %v18514_v50  ;;  %v18558_v50 = vld [vmem:[#allocation4 + $0x2244] ss:$16 sps:$4 sm:$0xff]  }
 0x978   : > { %12010 = vmatpush1.bf16.msra.mxu1 %v18517_v14  ;;  %11785 = vmatprep.subr.bf16.mxu0 %v18522_v10  ;;  %v18561_v14 = vld [vmem:[#allocation4 + $0x224c] ss:$16 sps:$4 sm:$0xff]  }
 0x979   : > { %10691 = vmatmul.mubr.bf16.gmra.mrb[24].mxu0 %v20259_v28  ;;  %12011 = vmatprep.subr.bf16.mxu1 %v18525_v17 }
 0x97a   : > { %10917 = vmatmul.mubr.bf16.gmra.mrb[24].mxu1 %v20259_v28  ;;  %10700 = vmatprep.mubr.bf16.mxu0 %v20273_v36  ;;  %v18535_v28 = vld [vmem:[#allocation4 + $0x21c8] ss:$16 sps:$4 sm:$0xff]  }
 0x97b   : > { %10926 = vmatprep.mubr.bf16.mxu1 %v20273_v36  ;;  %11786 = vmatpush1.bf16.msra.mxu0 %v18520_v20  ;;  %v18540_v36 = vld [vmem:[#allocation4 + $0x21e4] ss:$16 sps:$4 sm:$0xff]  }
 0x97c   : > { %12012 = vmatpush1.bf16.msra.mxu1 %v18523_v7  ;;  %11787 = vmatprep.subr.bf16.mxu0 %v18528_v1 }
 0x97d   : > { %12013 = vmatprep.subr.bf16.mxu1 %v18531_v38 }
 0x97f   : > { %11788 = vmatpush1.bf16.msra.mxu0 %v18526_v2 }
 0x980   : > { %12014 = vmatpush1.bf16.msra.mxu1 %v18529_v18  ;;  %11789 = vmatprep.subr.bf16.mxu0 %v18534_v62 }
 0x981   : > { %10701 = vmatmul.mubr.bf16.gmra.mrb[28].mxu0 %v20271_v30  ;;  %12015 = vmatprep.subr.bf16.mxu1 %v18537_v35 }
 0x982   : > { %10927 = vmatmul.mubr.bf16.gmra.mrb[28].mxu1 %v20271_v30  ;;  %v9823_v30 = vld [vmem:[#allocation6 + $0x20] ss:$8 sm:$0xf] }
 0x983   : > { %11790 = vmatpush1.bf16.msra.mxu0 %v18532_v51  ;;  %v20308_v31 = vrot.slane %v9823_v30, %v19179_v46  ;;  %v20311_v21 = vrot.slane %v9823_v30, %v19192_v57  ;;  %v20314_v15 = vrot.slane %v9823_v30, %v19181_v47  ;;  %v20317_v54 = vrot.slane %v9823_v30, %v19195_v59  ;;  %v18556_v51 = vld [vmem:[#allocation4 + $0x2240] ss:$16 sps:$4 sm:$0xff]  }
 0x984   : > { %12016 = vmatpush1.bf16.msra.mxu1 %v18535_v28  ;;  %11791 = vmatprep.subr.bf16.mxu0 %v18540_v36  ;;  %v18559_v28 = vld [vmem:[#allocation4 + $0x2248] ss:$16 sps:$4 sm:$0xff]  }
 0x985   : > { %12017 = vmatprep.subr.bf16.mxu1 %v18543_v27  ;;  %v18564_v27 = vld [vmem:[#allocation4 + $0x2264] ss:$16 sps:$4 sm:$0xff]  }
 0x987   : > { %11792 = vmatpush1.bf16.msra.mxu0 %v18538_v4  ;;  %v18567_v4 = vld [vmem:[#allocation4 + $0x226c] ss:$16 sps:$4 sm:$0xff]  }
 0x988   : > { %12018 = vmatpush1.bf16.msra.mxu1 %v18541_v26  ;;  %11874 = vmatprep.subr.bf16.mxu0 %v18546_v19 }
 0x989   : > { %12100 = vmatprep.subr.bf16.mxu1 %v18549_v25 }
 0xa1c   : > { %v10632_v55 = vpop.f32.mrb[0].mxu0 }
 0xa1d   : > { %v10858_v58 = vpop.f32.mrb[0].mxu1  ;;  %v10634_v24 = vpop.f32.mrb[1].mxu0  ;;  %v16012_v40 = vadd.f32 %v10632_v55, %v20308_v31 }
 0xa1e   : > { %v10860_v48 = vpop.f32.mrb[1].mxu1  ;;  %v10636_v5 = vpop.f32.mrb[2].mxu0  ;;  %v16044_v32 = vadd.f32 %v10858_v58, %v20311_v21  ;;  %v16013_v42 = vadd.f32 %v10634_v24, %v20314_v15  ;;  %v18562_v58 = vld [vmem:[#allocation4 + $0x2260] ss:$16 sps:$4 sm:$0xff]   ;;  %v18565_v24 = vld [vmem:[#allocation4 + $0x2268] ss:$16 sps:$4 sm:$0xff]  }
 0xa1f   : > { %v16014_v43 = vadd.f32 %v10636_v5, %v20308_v31  ;;  %v10862_v22 = vpop.f32.mrb[2].mxu1  ;;  %v10638_v61 = vpop.f32.mrb[3].mxu0  ;;  %v16045_v16 = vadd.f32 %v10860_v48, %v20317_v54 }
 0xa20   : > { %v16046_v12 = vadd.f32 %v10862_v22, %v20311_v21  ;;  %v16015_v63 = vadd.f32 %v10638_v61, %v20314_v15  ;;  %v10864_v33 = vpop.f32.mrb[3].mxu1  ;;  %v18570_v22 = vld [vmem:[#allocation4 + $0x2284] ss:$16 sps:$4 sm:$0xff]   ;;  %v18573_v61 = vld [vmem:[#allocation4 + $0x228c] ss:$16 sps:$4 sm:$0xff]  }
 0xa21   : > { %v10937_v8 = vpack.c.bf16 %v16014_v43, %v16012_v40  ;;  %v16047_v29 = vadd.f32 %v10864_v33, %v20317_v54 }
 0xa22   : > { %v20327_v6 = vpack.c.bf16 %v16046_v12, %v16044_v32  ;;  %v10938_v53 = vpack.c.bf16 %v16015_v63, %v16013_v42 }
 0xa23   : > { %v20329_v60 = vpack.c.bf16 %v16047_v29, %v16045_v16 }
 0xa24   : > { %v10642_v3 = vpop.f32.mrb[4].mxu0  ;;  %11793 = vmatprep.mubr.bf16.mxu0 %v10938_v53  ;;  %12019 = vmatprep.mubr.bf16.mxu1 %v10938_v53 }
 0xa25   : > { %v10868_v44 = vpop.f32.mrb[4].mxu1  ;;  %v10644_v34 = vpop.f32.mrb[5].mxu0  ;;  %11794 = vmatmul.mubr.bf16.vlgmr.msra.gmra.mrb[32].mxu0 %v10937_v8  ;;  %12020 = vmatmul.mubr.bf16.vlgmr.msra.gmra.mrb[32].mxu1 %v10937_v8  ;;  %v16016_v23 = vadd.f32 %v10642_v3, %v20308_v31  ;;  %v18576_v3 = vld [vmem:[#allocation4 + $0x22a4] ss:$16 sps:$4 sm:$0xff]  }
 0xa26   : > { %v10870_v56 = vpop.f32.mrb[5].mxu1  ;;  %11875 = vmatpush1.bf16.msra.mxu0 %v18544_v0  ;;  %v10646_v13 = vpop.f32.mrb[6].mxu0  ;;  %12101 = vmatpush1.bf16.msra.mxu1 %v18547_v49  ;;  %v16048_v10 = vadd.f32 %v10868_v44, %v20311_v21  ;;  %v16017_v17 = vadd.f32 %v10644_v34, %v20314_v15  ;;  %v18568_v49 = vld [vmem:[#allocation4 + $0x2280] ss:$16 sps:$4 sm:$0xff]   ;;  %v18579_v44 = vld [vmem:[#allocation4 + $0x22ac] ss:$16 sps:$4 sm:$0xff]  }
 0xa27   : > { %v16018_v41 = vadd.f32 %v10646_v13, %v20308_v31  ;;  %v10872_v39 = vpop.f32.mrb[6].mxu1  ;;  %v10648_v52 = vpop.f32.mrb[7].mxu0  ;;  %11876 = vmatprep.subr.bf16.mxu0 %v18552_v9  ;;  %12102 = vmatprep.subr.bf16.mxu1 %v18555_v37  ;;  %v16049_v38 = vadd.f32 %v10870_v56, %v20317_v54  ;;  %v18571_v9 = vld [vmem:[#allocation4 + $0x2288] ss:$16 sps:$4 sm:$0xff]  }
 0xa28   : > { %v16050_v20 = vadd.f32 %v10872_v39, %v20311_v21  ;;  %v16019_v7 = vadd.f32 %v10648_v52, %v20314_v15  ;;  %v10874_v1 = vpop.f32.mrb[7].mxu1 }
 0xa29   : > { %v10941_v2 = vpack.c.bf16 %v16018_v41, %v16016_v23  ;;  %v16051_v18 = vadd.f32 %v10874_v1, %v20317_v54  ;;  %v18574_v23 = vld [vmem:[#allocation4 + $0x22a0] ss:$16 sps:$4 sm:$0xff]   ;;  %v18577_v41 = vld [vmem:[#allocation4 + $0x22a8] ss:$16 sps:$4 sm:$0xff]  }
 0xa2a   : > { %v20339_v62 = vpack.c.bf16 %v16050_v20, %v16048_v10  ;;  %v10942_v35 = vpack.c.bf16 %v16019_v7, %v16017_v17  ;;  %11877 = vmatpush1.bf16.msra.mxu0 %v18550_v45  ;;  %12103 = vmatpush1.bf16.msra.mxu1 %v18553_v11  ;;  %v18582_v10 = vld [vmem:[#allocation4 + $0x22c4] ss:$16 sps:$4 sm:$0xff]   ;;  %v18585_v17 = vld [vmem:[#allocation4 + $0x22cc] ss:$16 sps:$4 sm:$0xff]  }
 0xa2b   : > { %v20341_v36 = vpack.c.bf16 %v16051_v18, %v16049_v38  ;;  %11878 = vmatprep.subr.bf16.mxu0 %v18558_v50  ;;  %12104 = vmatprep.subr.bf16.mxu1 %v18561_v14 }
 0xa2c   : > { %v10652_v26 = vpop.f32.mrb[8].mxu0  ;;  %11803 = vmatprep.mubr.bf16.mxu0 %v10942_v35  ;;  %12029 = vmatprep.mubr.bf16.mxu1 %v10942_v35 }
 0xa2d   : > { %v10878_v19 = vpop.f32.mrb[8].mxu1  ;;  %v10654_v25 = vpop.f32.mrb[9].mxu0  ;;  %11804 = vmatmul.mubr.bf16.gmra.mrb[36].mxu0 %v10941_v2  ;;  %12030 = vmatmul.mubr.bf16.gmra.mrb[36].mxu1 %v10941_v2  ;;  %v16020_v48 = vadd.f32 %v10652_v26, %v20308_v31  ;;  %v18583_v26 = vld [vmem:[#allocation4 + $0x22c8] ss:$16 sps:$4 sm:$0xff]  }
 0xa2e   : > { %v10880_v30 = vpop.f32.mrb[9].mxu1  ;;  %11879 = vmatpush1.bf16.msra.mxu0 %v18556_v51  ;;  %v10656_v55 = vpop.f32.mrb[10].mxu0  ;;  %12105 = vmatpush1.bf16.msra.mxu1 %v18559_v28  ;;  %v16052_v32 = vadd.f32 %v10878_v19, %v20311_v21  ;;  %v16021_v42 = vadd.f32 %v10654_v25, %v20314_v15  ;;  %v18588_v25 = vld [vmem:[#allocation4 + $0x22e4] ss:$16 sps:$4 sm:$0xff]  }
 0xa2f   : > { %v16022_v5 = vadd.f32 %v10656_v55, %v20308_v31  ;;  %v10882_v40 = vpop.f32.mrb[10].mxu1  ;;  %v10658_v43 = vpop.f32.mrb[11].mxu0  ;;  %11880 = vmatprep.subr.bf16.mxu0 %v18564_v27  ;;  %12106 = vmatprep.subr.bf16.mxu1 %v18567_v4  ;;  %v16053_v16 = vadd.f32 %v10880_v30, %v20317_v54  ;;  %v18580_v4 = vld [vmem:[#allocation4 + $0x22c0] ss:$16 sps:$4 sm:$0xff]   ;;  %v18591_v30 = vld [vmem:[#allocation4 + $0x22ec] ss:$16 sps:$4 sm:$0xff]  }
 0xa30   : > { %v16054_v12 = vadd.f32 %v10882_v40, %v20311_v21  ;;  %v16023_v63 = vadd.f32 %v10658_v43, %v20314_v15  ;;  %v10884_v33 = vpop.f32.mrb[11].mxu1  ;;  %v18586_v40 = vld [vmem:[#allocation4 + $0x22e0] ss:$16 sps:$4 sm:$0xff]   ;;  %v18589_v43 = vld [vmem:[#allocation4 + $0x22e8] ss:$16 sps:$4 sm:$0xff]  }
 0xa31   : > { %v10945_v8 = vpack.c.bf16 %v16022_v5, %v16020_v48  ;;  %v16055_v29 = vadd.f32 %v10884_v33, %v20317_v54 }
 0xa32   : > { %v20351_v53 = vpack.c.bf16 %v16054_v12, %v16052_v32  ;;  %v10946_v0 = vpack.c.bf16 %v16023_v63, %v16021_v42  ;;  %11881 = vmatpush1.bf16.msra.mxu0 %v18562_v58  ;;  %12107 = vmatpush1.bf16.msra.mxu1 %v18565_v24  ;;  %v18594_v12 = vld [vmem:[#allocation4 + $0x2304] ss:$16 sps:$4 sm:$0xff]   ;;  %v18597_v63 = vld [vmem:[#allocation4 + $0x230c] ss:$16 sps:$4 sm:$0xff]  }
 0xa33   : > { %v20353_v37 = vpack.c.bf16 %v16055_v29, %v16053_v16  ;;  %11882 = vmatprep.subr.bf16.mxu0 %v18570_v22  ;;  %12108 = vmatprep.subr.bf16.mxu1 %v18573_v61 }
 0xa34   : > { %v10662_v34 = vpop.f32.mrb[12].mxu0  ;;  %11813 = vmatprep.mubr.bf16.mxu0 %v10946_v0  ;;  %12039 = vmatprep.mubr.bf16.mxu1 %v10946_v0 }
 0xa35   : > { %v10888_v56 = vpop.f32.mrb[12].mxu1  ;;  %v10664_v13 = vpop.f32.mrb[13].mxu0  ;;  %11814 = vmatmul.mubr.bf16.gmra.mrb[40].mxu0 %v10945_v8  ;;  %12040 = vmatmul.mubr.bf16.gmra.mrb[40].mxu1 %v10945_v8  ;;  %v16024_v39 = vadd.f32 %v10662_v34, %v20308_v31 }
 0xa36   : > { %v10890_v45 = vpop.f32.mrb[13].mxu1  ;;  %11883 = vmatpush1.bf16.msra.mxu0 %v18568_v49  ;;  %v10666_v11 = vpop.f32.mrb[14].mxu0  ;;  %12109 = vmatpush1.bf16.msra.mxu1 %v18571_v9  ;;  %v16056_v20 = vadd.f32 %v10888_v56, %v20311_v21  ;;  %v16025_v7 = vadd.f32 %v10664_v13, %v20314_v15  ;;  %v18592_v56 = vld [vmem:[#allocation4 + $0x2300] ss:$16 sps:$4 sm:$0xff]   ;;  %v18595_v13 = vld [vmem:[#allocation4 + $0x2308] ss:$16 sps:$4 sm:$0xff]  }
 0xa37   : > { %v16026_v52 = vadd.f32 %v10666_v11, %v20308_v31  ;;  %v10892_v50 = vpop.f32.mrb[14].mxu1  ;;  %v10668_v14 = vpop.f32.mrb[15].mxu0  ;;  %11884 = vmatprep.subr.bf16.mxu0 %v18576_v3  ;;  %12110 = vmatprep.subr.bf16.mxu1 %v18579_v44  ;;  %v16057_v18 = vadd.f32 %v10890_v45, %v20317_v54  ;;  %v18600_v11 = vld [vmem:[#allocation4 + $0x2324] ss:$16 sps:$4 sm:$0xff]  }
 0xa38   : > { %v16058_v1 = vadd.f32 %v10892_v50, %v20311_v21  ;;  %v16027_v38 = vadd.f32 %v10668_v14, %v20314_v15  ;;  %v10894_v2 = vpop.f32.mrb[15].mxu1 }
 0xa39   : > { %v10949_v35 = vpack.c.bf16 %v16026_v52, %v16024_v39  ;;  %v16059_v51 = vadd.f32 %v10894_v2, %v20317_v54  ;;  %v18606_v2 = vld [vmem:[#allocation4 + $0x2344] ss:$16 sps:$4 sm:$0xff]  }
 0xa3a   : > { %v20363_v28 = vpack.c.bf16 %v16058_v1, %v16056_v20  ;;  %v10950_v27 = vpack.c.bf16 %v16027_v38, %v16025_v7  ;;  %11885 = vmatpush1.bf16.msra.mxu0 %v18574_v23  ;;  %12111 = vmatpush1.bf16.msra.mxu1 %v18577_v41  ;;  %v18603_v23 = vld [vmem:[#allocation4 + $0x232c] ss:$16 sps:$4 sm:$0xff]  }
 0xa3b   : > { %v20365_v19 = vpack.c.bf16 %v16059_v51, %v16057_v18  ;;  %11886 = vmatprep.subr.bf16.mxu0 %v18582_v10  ;;  %12112 = vmatprep.subr.bf16.mxu1 %v18585_v17  ;;  %v18598_v10 = vld [vmem:[#allocation4 + $0x2320] ss:$16 sps:$4 sm:$0xff]   ;;  %v18601_v17 = vld [vmem:[#allocation4 + $0x2328] ss:$16 sps:$4 sm:$0xff]   ;;  %v18609_v18 = vld [vmem:[#allocation4 + $0x234c] ss:$16 sps:$4 sm:$0xff]  }
 0xa3c   : > { %v10672_v55 = vpop.f32.mrb[16].mxu0  ;;  %11823 = vmatprep.mubr.bf16.mxu0 %v10950_v27  ;;  %12049 = vmatprep.mubr.bf16.mxu1 %v10950_v27 }
 0xa3d   : > { %v10898_v58 = vpop.f32.mrb[16].mxu1  ;;  %v10674_v24 = vpop.f32.mrb[17].mxu0  ;;  %11824 = vmatmul.mubr.bf16.gmra.mrb[44].mxu0 %v10949_v35  ;;  %12050 = vmatmul.mubr.bf16.gmra.mrb[44].mxu1 %v10949_v35  ;;  %v16028_v22 = vadd.f32 %v10672_v55, %v20308_v31 }
 0xa3e   : > { %v10900_v48 = vpop.f32.mrb[17].mxu1  ;;  %11887 = vmatpush1.bf16.msra.mxu0 %v18580_v4  ;;  %v10676_v5 = vpop.f32.mrb[18].mxu0  ;;  %12113 = vmatpush1.bf16.msra.mxu1 %v18583_v26  ;;  %v16060_v33 = vadd.f32 %v10898_v58, %v20311_v21  ;;  %v16029_v16 = vadd.f32 %v10674_v24, %v20314_v15 }
 0xa3f   : > { %v16030_v61 = vadd.f32 %v10676_v5, %v20308_v31  ;;  %v10902_v32 = vpop.f32.mrb[18].mxu1  ;;  %v10678_v42 = vpop.f32.mrb[19].mxu0  ;;  %11888 = vmatprep.subr.bf16.mxu0 %v18588_v25  ;;  %12114 = vmatprep.subr.bf16.mxu1 %v18591_v30  ;;  %v16061_v49 = vadd.f32 %v10900_v48, %v20317_v54  ;;  %v18604_v48 = vld [vmem:[#allocation4 + $0x2340] ss:$16 sps:$4 sm:$0xff]   ;;  %v18607_v5 = vld [vmem:[#allocation4 + $0x2348] ss:$16 sps:$4 sm:$0xff]  }
 0xa40   : > { %v16062_v8 = vadd.f32 %v10902_v32, %v20311_v21  ;;  %v16031_v29 = vadd.f32 %v10678_v42, %v20314_v15  ;;  %v10904_v0 = vpop.f32.mrb[19].mxu1 }
 0xa41   : > { %v10953_v9 = vpack.c.bf16 %v16030_v61, %v16028_v22  ;;  %v16063_v3 = vadd.f32 %v10904_v0, %v20317_v54  ;;  %v18615_v22 = vld [vmem:[#allocation4 + $0x236c] ss:$16 sps:$4 sm:$0xff]  }
 0xa42   : > { %v20375_v44 = vpack.c.bf16 %v16062_v8, %v16060_v33  ;;  %v10954_v34 = vpack.c.bf16 %v16031_v29, %v16029_v16  ;;  %11889 = vmatpush1.bf16.msra.mxu0 %v18586_v40  ;;  %12115 = vmatpush1.bf16.msra.mxu1 %v18589_v43  ;;  %v18612_v43 = vld [vmem:[#allocation4 + $0x2364] ss:$16 sps:$4 sm:$0xff]   ;;  %v18610_v33 = vld [vmem:[#allocation4 + $0x2360] ss:$16 sps:$4 sm:$0xff]   ;;  %v18613_v16 = vld [vmem:[#allocation4 + $0x2368] ss:$16 sps:$4 sm:$0xff]  }
 0xa43   : > { %v20377_v45 = vpack.c.bf16 %v16063_v3, %v16061_v49  ;;  %11890 = vmatprep.subr.bf16.mxu0 %v18594_v12  ;;  %12116 = vmatprep.subr.bf16.mxu1 %v18597_v63  ;;  %v18621_v3 = vld [vmem:[#allocation4 + $0x238c] ss:$16 sps:$4 sm:$0xff]  }
 0xa44   : > { %v10682_v41 = vpop.f32.mrb[20].mxu0  ;;  %11833 = vmatprep.mubr.bf16.mxu0 %v10954_v34  ;;  %12059 = vmatprep.mubr.bf16.mxu1 %v10954_v34 }
 0xa45   : > { %v10908_v39 = vpop.f32.mrb[20].mxu1  ;;  %v10684_v52 = vpop.f32.mrb[21].mxu0  ;;  %11834 = vmatmul.mubr.bf16.gmra.mrb[48].mxu0 %v10953_v9  ;;  %12060 = vmatmul.mubr.bf16.gmra.mrb[48].mxu1 %v10953_v9  ;;  %v16032_v20 = vadd.f32 %v10682_v41, %v20308_v31  ;;  %v18618_v9 = vld [vmem:[#allocation4 + $0x2384] ss:$16 sps:$4 sm:$0xff]  }
 0xa46   : > { %v10910_v50 = vpop.f32.mrb[21].mxu1  ;;  %11891 = vmatpush1.bf16.msra.mxu0 %v18592_v56  ;;  %v10686_v14 = vpop.f32.mrb[22].mxu0  ;;  %12117 = vmatpush1.bf16.msra.mxu1 %v18595_v13  ;;  %v16064_v35 = vadd.f32 %v10908_v39, %v20311_v21  ;;  %v16033_v51 = vadd.f32 %v10684_v52, %v20314_v15 }
 0xa47   : > { %v16034_v7 = vadd.f32 %v10686_v14, %v20308_v31  ;;  %v10912_v1 = vpop.f32.mrb[22].mxu1  ;;  %v10688_v38 = vpop.f32.mrb[23].mxu0  ;;  %11892 = vmatprep.subr.bf16.mxu0 %v18600_v11  ;;  %12118 = vmatprep.subr.bf16.mxu1 %v18603_v23  ;;  %v16065_v25 = vadd.f32 %v10910_v50, %v20317_v54 }
 0xa48   : > { %v16066_v27 = vadd.f32 %v10912_v1, %v20311_v21  ;;  %v16035_v4 = vadd.f32 %v10688_v38, %v20314_v15  ;;  %v10914_v26 = vpop.f32.mrb[23].mxu1  ;;  %v18627_v1 = vld [vmem:[#allocation4 + $0x23ac] ss:$16 sps:$4 sm:$0xff]  }
 0xa49   : > { %v10957_v30 = vpack.c.bf16 %v16034_v7, %v16032_v20  ;;  %v16067_v55 = vadd.f32 %v10914_v26, %v20317_v54  ;;  %v18624_v7 = vld [vmem:[#allocation4 + $0x23a4] ss:$16 sps:$4 sm:$0xff]  }
 0xa4a   : > { %v20387_v58 = vpack.c.bf16 %v16066_v27, %v16064_v35  ;;  %v10958_v24 = vpack.c.bf16 %v16035_v4, %v16033_v51  ;;  %11893 = vmatpush1.bf16.msra.mxu0 %v18598_v10  ;;  %12119 = vmatpush1.bf16.msra.mxu1 %v18601_v17  ;;  %v18616_v10 = vld [vmem:[#allocation4 + $0x2380] ss:$16 sps:$4 sm:$0xff]   ;;  %v18619_v17 = vld [vmem:[#allocation4 + $0x2388] ss:$16 sps:$4 sm:$0xff]  }
 0xa4b   : > { %v20389_v40 = vpack.c.bf16 %v16067_v55, %v16065_v25  ;;  %11894 = vmatprep.subr.bf16.mxu0 %v18606_v2  ;;  %12120 = vmatprep.subr.bf16.mxu1 %v18609_v18  ;;  %v18622_v27 = vld [vmem:[#allocation4 + $0x23a0] ss:$16 sps:$4 sm:$0xff]   ;;  %v18625_v4 = vld [vmem:[#allocation4 + $0x23a8] ss:$16 sps:$4 sm:$0xff]  }
 0xa4c   : > { %v10692_v61 = vpop.f32.mrb[24].mxu0  ;;  %11843 = vmatprep.mubr.bf16.mxu0 %v10958_v24  ;;  %12069 = vmatprep.mubr.bf16.mxu1 %v10958_v24  ;;  %v18630_v24 = vld [vmem:[#allocation4 + $0x23c4] ss:$16 sps:$4 sm:$0xff]  }
 0xa4d   : > { %v10918_v32 = vpop.f32.mrb[24].mxu1  ;;  %v10694_v42 = vpop.f32.mrb[25].mxu0  ;;  %11844 = vmatmul.mubr.bf16.gmra.mrb[52].mxu0 %v10957_v30  ;;  %12070 = vmatmul.mubr.bf16.gmra.mrb[52].mxu1 %v10957_v30  ;;  %v16036_v8 = vadd.f32 %v10692_v61, %v20308_v31 }
 0xa4e   : > { %v10920_v12 = vpop.f32.mrb[25].mxu1  ;;  %11895 = vmatpush1.bf16.msra.mxu0 %v18604_v48  ;;  %v10696_v63 = vpop.f32.mrb[26].mxu0  ;;  %12121 = vmatpush1.bf16.msra.mxu1 %v18607_v5  ;;  %v16068_v34 = vadd.f32 %v10918_v32, %v20311_v21  ;;  %v16037_v56 = vadd.f32 %v10694_v42, %v20314_v15  ;;  %v18633_v48 = vld [vmem:[#allocation4 + $0x23cc] ss:$16 sps:$4 sm:$0xff]  }
 0xa4f   : > { %v16038_v29 = vadd.f32 %v10696_v63, %v20308_v31  ;;  %v10922_v0 = vpop.f32.mrb[26].mxu1  ;;  %v10698_v49 = vpop.f32.mrb[27].mxu0  ;;  %11896 = vmatprep.subr.bf16.mxu0 %v18612_v43  ;;  %12122 = vmatprep.subr.bf16.mxu1 %v18615_v22  ;;  %v16069_v41 = vadd.f32 %v10920_v12, %v20317_v54 }
 0xa50   : > { %v16070_v13 = vadd.f32 %v10922_v0, %v20311_v21  ;;  %v16039_v11 = vadd.f32 %v10698_v49, %v20314_v15  ;;  %v10924_v23 = vpop.f32.mrb[27].mxu1  ;;  %v18637_v0 = vld [vmem:[#allocation4 + $0x23e8] ss:$16 sps:$4 sm:$0xff]   ;;  %v18642_v49 = vld [vmem:[#allocation4 + $0x2404] ss:$16 sps:$4 sm:$0xff]  }
 0xa51   : > { %v10961_v39 = vpack.c.bf16 %v16038_v29, %v16036_v8  ;;  %v16071_v52 = vadd.f32 %v10924_v23, %v20317_v54  ;;  %v18631_v29 = vld [vmem:[#allocation4 + $0x23c8] ss:$16 sps:$4 sm:$0xff]   ;;  %v18654_v23 = vld [vmem:[#allocation4 + $0x2444] ss:$16 sps:$4 sm:$0xff]  }
 0xa52   : > { %v20399_v50 = vpack.c.bf16 %v16070_v13, %v16068_v34  ;;  %v10962_v14 = vpack.c.bf16 %v16039_v11, %v16037_v56  ;;  %11897 = vmatpush1.bf16.msra.mxu0 %v18610_v33  ;;  %12123 = vmatpush1.bf16.msra.mxu1 %v18613_v16  ;;  %v18628_v16 = vld [vmem:[#allocation4 + $0x23c0] ss:$16 sps:$4 sm:$0xff]   ;;  %v18643_v34 = vld [vmem:[#allocation4 + $0x2408] ss:$16 sps:$4 sm:$0xff]   ;;  %v18648_v56 = vld [vmem:[#allocation4 + $0x2424] ss:$16 sps:$4 sm:$0xff]  }
 0xa53   : > { %v20401_v20 = vpack.c.bf16 %v16071_v52, %v16069_v41  ;;  %11898 = vmatprep.subr.bf16.mxu0 %v18618_v9  ;;  %12124 = vmatprep.subr.bf16.mxu1 %v18621_v3  ;;  %v18645_v9 = vld [vmem:[#allocation4 + $0x240c] ss:$16 sps:$4 sm:$0xff]   ;;  %v18640_v3 = vld [vmem:[#allocation4 + $0x2400] ss:$16 sps:$4 sm:$0xff]   ;;  %v18649_v11 = vld [vmem:[#allocation4 + $0x2428] ss:$16 sps:$4 sm:$0xff]  }
 0xa54   : > { %v10702_v38 = vpop.f32.mrb[28].mxu0  ;;  %11853 = vmatprep.mubr.bf16.mxu0 %v10962_v14  ;;  %12079 = vmatprep.mubr.bf16.mxu1 %v10962_v14  ;;  %v18651_v13 = vld [vmem:[#allocation4 + $0x242c] ss:$16 sps:$4 sm:$0xff]   ;;  %v18655_v52 = vld [vmem:[#allocation4 + $0x2448] ss:$16 sps:$4 sm:$0xff]  }
 0xa55   : > { %v10928_v2 = vpop.f32.mrb[28].mxu1  ;;  %v10704_v18 = vpop.f32.mrb[29].mxu0  ;;  %11854 = vmatmul.mubr.bf16.gmra.mrb[56].mxu0 %v10961_v39  ;;  %12080 = vmatmul.mubr.bf16.gmra.mrb[56].mxu1 %v10961_v39  ;;  %v16040_v26 = vadd.f32 %v10702_v38, %v20308_v31  ;;  %v18657_v41 = vld [vmem:[#allocation4 + $0x244c] ss:$16 sps:$4 sm:$0xff]   ;;  %v18652_v39 = vld [vmem:[#allocation4 + $0x2440] ss:$16 sps:$4 sm:$0xff]  }
 0xa56   : > { %v10930_v35 = vpop.f32.mrb[29].mxu1  ;;  %11899 = vmatpush1.bf16.msra.mxu0 %v18616_v10  ;;  %v10706_v51 = vpop.f32.mrb[30].mxu0  ;;  %12125 = vmatpush1.bf16.msra.mxu1 %v18619_v17  ;;  %v16072_v5 = vadd.f32 %v10928_v2, %v20311_v21  ;;  %v16041_v43 = vadd.f32 %v10704_v18, %v20314_v15  ;;  %v18660_v14 = vld [vmem:[#allocation4 + $0x2464] ss:$16 sps:$4 sm:$0xff]   ;;  %v18661_v10 = vld [vmem:[#allocation4 + $0x2468] ss:$16 sps:$4 sm:$0xff]  }
 0xa57   : > { %v16042_v25 = vadd.f32 %v10706_v51, %v20308_v31  ;;  %v10932_v30 = vpop.f32.mrb[30].mxu1  ;;  %v10708_v55 = vpop.f32.mrb[31].mxu0  ;;  %11900 = vmatprep.subr.bf16.mxu0 %v18624_v7  ;;  %12126 = vmatprep.subr.bf16.mxu1 %v18627_v1  ;;  %v16073_v42 = vadd.f32 %v10930_v35, %v20317_v54  ;;  %v18666_v17 = vld [vmem:[#allocation4 + $0x2484] ss:$16 sps:$4 sm:$0xff]   ;;  %v18669_v7 = vld [vmem:[#allocation4 + $0x248c] ss:$16 sps:$4 sm:$0xff]  }
 0xa58   : > { %v16074_v22 = vadd.f32 %v10932_v30, %v20311_v21  ;;  %v16043_v61 = vadd.f32 %v10708_v55, %v20314_v15  ;;  %v10934_v32 = vpop.f32.mrb[31].mxu1  ;;  %v18636_v21 = vld [vmem:[#allocation4 + $0x23e4] ss:$16 sps:$4 sm:$0xff]   ;;  %v18639_v15 = vld [vmem:[#allocation4 + $0x23ec] ss:$16 sps:$4 sm:$0xff]  }
 0xa59   : > { %v10965_v12 = vpack.c.bf16 %v16042_v25, %v16040_v26  ;;  %v16075_v31 = vadd.f32 %v10934_v32, %v20317_v54  ;;  %v18634_v54 = vld [vmem:[#allocation4 + $0x23e0] ss:$16 sps:$4 sm:$0xff]   ;;  %v18667_v38 = vld [vmem:[#allocation4 + $0x2488] ss:$16 sps:$4 sm:$0xff]   ;;  %v18672_v2 = vld [vmem:[#allocation4 + $0x24a4] ss:$16 sps:$4 sm:$0xff]  }
 0xa5a   : > { %v20411_v63 = vpack.c.bf16 %v16074_v22, %v16072_v5  ;;  %v10966_v33 = vpack.c.bf16 %v16043_v61, %v16041_v43  ;;  %11901 = vmatpush1.bf16.msra.mxu0 %v18622_v27  ;;  %12127 = vmatpush1.bf16.msra.mxu1 %v18625_v4  ;;  %v18664_v1 = vld [vmem:[#allocation4 + $0x2480] ss:$16 sps:$4 sm:$0xff]   ;;  %v18673_v18 = vld [vmem:[#allocation4 + $0x24a8] ss:$16 sps:$4 sm:$0xff]   ;;  %v18678_v35 = vld [vmem:[#allocation4 + $0x24c4] ss:$16 sps:$4 sm:$0xff]  }
 0xa5b   : > { %v20413_v8 = vpack.c.bf16 %v16075_v31, %v16073_v42  ;;  %11902 = vmatprep.subr.bf16.mxu0 %v18630_v24  ;;  %12128 = vmatprep.subr.bf16.mxu1 %v18633_v48  ;;  %v18681_v51 = vld [vmem:[#allocation4 + $0x24cc] ss:$16 sps:$4 sm:$0xff]   ;;  %v18676_v27 = vld [vmem:[#allocation4 + $0x24c0] ss:$16 sps:$4 sm:$0xff]   ;;  %v18679_v4 = vld [vmem:[#allocation4 + $0x24c8] ss:$16 sps:$4 sm:$0xff]  }
 0xa5c   : > { %11863 = vmatprep.mubr.bf16.mxu0 %v10966_v33  ;;  %12089 = vmatprep.mubr.bf16.mxu1 %v10966_v33  ;;  %v18684_v26 = vld [vmem:[#allocation4 + $0x24e4] ss:$16 sps:$4 sm:$0xff]   ;;  %v18685_v25 = vld [vmem:[#allocation4 + $0x24e8] ss:$16 sps:$4 sm:$0xff]   ;;  %v18693_v55 = vld [vmem:[#allocation4 + $0x250c] ss:$16 sps:$4 sm:$0xff]  }
 0xa5d   : > { %11864 = vmatmul.mubr.bf16.gmra.mrb[60].mxu0 %v10965_v12  ;;  %12090 = vmatmul.mubr.bf16.gmra.mrb[60].mxu1 %v10965_v12  ;;  %v18690_v30 = vld [vmem:[#allocation4 + $0x2504] ss:$16 sps:$4 sm:$0xff]   ;;  %v18688_v24 = vld [vmem:[#allocation4 + $0x2500] ss:$16 sps:$4 sm:$0xff]   ;;  %v18691_v48 = vld [vmem:[#allocation4 + $0x2508] ss:$16 sps:$4 sm:$0xff]  }
 0xa5e   : > { %11903 = vmatpush1.bf16.msra.mxu0 %v18628_v16  ;;  %11906 = vmatprep.mubr.bf16.mxu0 %v20329_v60  ;;  %v18696_v5 = vld [vmem:[#allocation4 + $0x2524] ss:$16 sps:$4 sm:$0xff]   ;;  %v18697_v43 = vld [vmem:[#allocation4 + $0x2528] ss:$16 sps:$4 sm:$0xff]   ;;  %v18705_v61 = vld [vmem:[#allocation4 + $0x254c] ss:$16 sps:$4 sm:$0xff]  }
 0xa5f   : > { %12129 = vmatpush1.bf16.msra.mxu1 %v18631_v29  ;;  %12132 = vmatprep.mubr.bf16.mxu1 %v20329_v60  ;;  %v18646_v60 = vld [vmem:[#allocation4 + $0x2420] ss:$16 sps:$4 sm:$0xff]   ;;  %v18702_v22 = vld [vmem:[#allocation4 + $0x2544] ss:$16 sps:$4 sm:$0xff]   ;;  %v18703_v42 = vld [vmem:[#allocation4 + $0x2548] ss:$16 sps:$4 sm:$0xff]  }
 0xa60   : > { %11904 = vmatprep.subr.bf16.mxu0 %v18636_v21  ;;  %12130 = vmatprep.subr.bf16.mxu1 %v18639_v15  ;;  %v18700_v32 = vld [vmem:[#allocation4 + $0x2540] ss:$16 sps:$4 sm:$0xff]   ;;  %v18708_v12 = vld [vmem:[#allocation4 + $0x2564] ss:$16 sps:$4 sm:$0xff]   ;;  %v18709_v31 = vld [vmem:[#allocation4 + $0x2568] ss:$16 sps:$4 sm:$0xff]  }
 0xa61   : > { %v18714_v33 = vld [vmem:[#allocation4 + $0x2584] ss:$16 sps:$4 sm:$0xff]   ;;  %v18717_v16 = vld [vmem:[#allocation4 + $0x258c] ss:$16 sps:$4 sm:$0xff]   ;;  %v18712_v29 = vld [vmem:[#allocation4 + $0x2580] ss:$16 sps:$4 sm:$0xff]  }
 0xa62   : > { %11905 = vmatpush1.bf16.msra.mxu0 %v18634_v54  ;;  %v18715_v21 = vld [vmem:[#allocation4 + $0x2588] ss:$16 sps:$4 sm:$0xff]   ;;  %v18720_v15 = vld [vmem:[#allocation4 + $0x25a4] ss:$16 sps:$4 sm:$0xff]  }
 0xa63   : > { %12131 = vmatpush1.bf16.msra.mxu1 %v18637_v0  ;;  %13037 = vmatprep.subr.bf16.mxu0 %v18642_v49  ;;  %v18721_v54 = vld [vmem:[#allocation4 + $0x25a8] ss:$16 sps:$4 sm:$0xff]   ;;  %v18726_v0 = vld [vmem:[#allocation4 + $0x25c4] ss:$16 sps:$4 sm:$0xff]   ;;  %v18729_v49 = vld [vmem:[#allocation4 + $0x25cc] ss:$16 sps:$4 sm:$0xff]  }
 0xa64   : > { %13263 = vmatprep.subr.bf16.mxu1 %v18645_v9  ;;  %v18724_v9 = vld [vmem:[#allocation4 + $0x25c0] ss:$16 sps:$4 sm:$0xff]  }
 0xa65   : > { %11907 = vmatmul.mubr.bf16.vlgmr.msra.gmra.mrb[32].mxu0 %v20327_v6 }
 0xa66   : > { %12133 = vmatmul.mubr.bf16.vlgmr.msra.gmra.mrb[32].mxu1 %v20327_v6  ;;  %11916 = vmatprep.mubr.bf16.mxu0 %v20341_v36  ;;  %v18663_v6 = vld [vmem:[#allocation4 + $0x246c] ss:$16 sps:$4 sm:$0xff]  }
 0xa67   : > { %12142 = vmatprep.mubr.bf16.mxu1 %v20341_v36  ;;  %13038 = vmatpush1.bf16.msra.mxu0 %v18640_v3  ;;  %v18658_v36 = vld [vmem:[#allocation4 + $0x2460] ss:$16 sps:$4 sm:$0xff]   ;;  %v18735_v3 = vld [vmem:[#allocation4 + $0x25ec] ss:$16 sps:$4 sm:$0xff]  }
 0xa68   : > { %13264 = vmatpush1.bf16.msra.mxu1 %v18643_v34  ;;  %13039 = vmatprep.subr.bf16.mxu0 %v18648_v56  ;;  %v18730_v34 = vld [vmem:[#allocation4 + $0x25e0] ss:$16 sps:$4 sm:$0xff]   ;;  %v18733_v56 = vld [vmem:[#allocation4 + $0x25e8] ss:$16 sps:$4 sm:$0xff]  }
 0xa69   : > { %13265 = vmatprep.subr.bf16.mxu1 %v18651_v13  ;;  %v18738_v13 = vld [vmem:[#allocation4 + $0x2604] ss:$16 sps:$4 sm:$0xff]  }
 0xa6b   : > { %13040 = vmatpush1.bf16.msra.mxu0 %v18646_v60  ;;  %v18741_v60 = vld [vmem:[#allocation4 + $0x260c] ss:$16 sps:$4 sm:$0xff]  }
 0xa6c   : > { %13266 = vmatpush1.bf16.msra.mxu1 %v18649_v11  ;;  %13041 = vmatprep.subr.bf16.mxu0 %v18654_v23 }
 0xa6d   : > { %11917 = vmatmul.mubr.bf16.gmra.mrb[36].mxu0 %v20339_v62  ;;  %13267 = vmatprep.subr.bf16.mxu1 %v18657_v41 }
 0xa6e   : > { %12143 = vmatmul.mubr.bf16.gmra.mrb[36].mxu1 %v20339_v62  ;;  %11926 = vmatprep.mubr.bf16.mxu0 %v20353_v37  ;;  %v18675_v62 = vld [vmem:[#allocation4 + $0x24ac] ss:$16 sps:$4 sm:$0xff]  }
 0xa6f   : > { %12152 = vmatprep.mubr.bf16.mxu1 %v20353_v37  ;;  %13042 = vmatpush1.bf16.msra.mxu0 %v18652_v39  ;;  %v18670_v37 = vld [vmem:[#allocation4 + $0x24a0] ss:$16 sps:$4 sm:$0xff]  }
 0xa70   : > { %13268 = vmatpush1.bf16.msra.mxu1 %v18655_v52  ;;  %13043 = vmatprep.subr.bf16.mxu0 %v18660_v14 }
 0xa71   : > { %13269 = vmatprep.subr.bf16.mxu1 %v18663_v6 }
 0xa73   : > { %13044 = vmatpush1.bf16.msra.mxu0 %v18658_v36 }
 0xa74   : > { %13270 = vmatpush1.bf16.msra.mxu1 %v18661_v10  ;;  %13045 = vmatprep.subr.bf16.mxu0 %v18666_v17 }
 0xa75   : > { %11927 = vmatmul.mubr.bf16.gmra.mrb[40].mxu0 %v20351_v53  ;;  %13271 = vmatprep.subr.bf16.mxu1 %v18669_v7 }
 0xa76   : > { %12153 = vmatmul.mubr.bf16.gmra.mrb[40].mxu1 %v20351_v53  ;;  %11936 = vmatprep.mubr.bf16.mxu0 %v20365_v19  ;;  %v18687_v53 = vld [vmem:[#allocation4 + $0x24ec] ss:$16 sps:$4 sm:$0xff]  }
 0xa77   : > { %12162 = vmatprep.mubr.bf16.mxu1 %v20365_v19  ;;  %13046 = vmatpush1.bf16.msra.mxu0 %v18664_v1  ;;  %v18682_v19 = vld [vmem:[#allocation4 + $0x24e0] ss:$16 sps:$4 sm:$0xff]  }
 0xa78   : > { %13272 = vmatpush1.bf16.msra.mxu1 %v18667_v38  ;;  %13047 = vmatprep.subr.bf16.mxu0 %v18672_v2 }
 0xa79   : > { %13273 = vmatprep.subr.bf16.mxu1 %v18675_v62 }
 0xa7b   : > { %13048 = vmatpush1.bf16.msra.mxu0 %v18670_v37 }
 0xa7c   : > { %13274 = vmatpush1.bf16.msra.mxu1 %v18673_v18  ;;  %13049 = vmatprep.subr.bf16.mxu0 %v18678_v35 }
 0xa7d   : > { %11937 = vmatmul.mubr.bf16.gmra.mrb[44].mxu0 %v20363_v28  ;;  %13275 = vmatprep.subr.bf16.mxu1 %v18681_v51 }
 0xa7e   : > { %12163 = vmatmul.mubr.bf16.gmra.mrb[44].mxu1 %v20363_v28  ;;  %11946 = vmatprep.mubr.bf16.mxu0 %v20377_v45  ;;  %v18699_v28 = vld [vmem:[#allocation4 + $0x252c] ss:$16 sps:$4 sm:$0xff]  }
 0xa7f   : > { %12172 = vmatprep.mubr.bf16.mxu1 %v20377_v45  ;;  %13050 = vmatpush1.bf16.msra.mxu0 %v18676_v27  ;;  %v18694_v45 = vld [vmem:[#allocation4 + $0x2520] ss:$16 sps:$4 sm:$0xff]  }
 0xa80   : > { %13276 = vmatpush1.bf16.msra.mxu1 %v18679_v4  ;;  %13051 = vmatprep.subr.bf16.mxu0 %v18684_v26 }
 0xa81   : > { %13277 = vmatprep.subr.bf16.mxu1 %v18687_v53 }
 0xa83   : > { %13052 = vmatpush1.bf16.msra.mxu0 %v18682_v19  ;;  %v18736_v19 = vld [vmem:[#allocation4 + $0x2600] ss:$16 sps:$4 sm:$0xff]  }
 0xa84   : > { %13278 = vmatpush1.bf16.msra.mxu1 %v18685_v25  ;;  %13053 = vmatprep.subr.bf16.mxu0 %v18690_v30  ;;  %v18739_v25 = vld [vmem:[#allocation4 + $0x2608] ss:$16 sps:$4 sm:$0xff]  }
 0xa85   : > { %11947 = vmatmul.mubr.bf16.gmra.mrb[48].mxu0 %v20375_v44  ;;  %13279 = vmatprep.subr.bf16.mxu1 %v18693_v55  ;;  %v18744_v55 = vld [vmem:[#allocation4 + $0x2624] ss:$16 sps:$4 sm:$0xff]  }
 0xa86   : > { %12173 = vmatmul.mubr.bf16.gmra.mrb[48].mxu1 %v20375_v44  ;;  %11956 = vmatprep.mubr.bf16.mxu0 %v20389_v40  ;;  %v18711_v44 = vld [vmem:[#allocation4 + $0x256c] ss:$16 sps:$4 sm:$0xff]  }
 0xa87   : > { %12182 = vmatprep.mubr.bf16.mxu1 %v20389_v40  ;;  %13054 = vmatpush1.bf16.msra.mxu0 %v18688_v24  ;;  %v18706_v40 = vld [vmem:[#allocation4 + $0x2560] ss:$16 sps:$4 sm:$0xff]   ;;  %v18747_v24 = vld [vmem:[#allocation4 + $0x262c] ss:$16 sps:$4 sm:$0xff]  }
 0xa88   : > { %13280 = vmatpush1.bf16.msra.mxu1 %v18691_v48  ;;  %13055 = vmatprep.subr.bf16.mxu0 %v18696_v5 }
 0xa89   : > { %13281 = vmatprep.subr.bf16.mxu1 %v18699_v28 }
 0xa8b   : > { %13056 = vmatpush1.bf16.msra.mxu0 %v18694_v45 }
 0xa8c   : > { %13282 = vmatpush1.bf16.msra.mxu1 %v18697_v43  ;;  %13057 = vmatprep.subr.bf16.mxu0 %v18702_v22  ;;  %v18742_v22 = vld [vmem:[#allocation4 + $0x2620] ss:$16 sps:$4 sm:$0xff]  }
 0xa8d   : > { %11957 = vmatmul.mubr.bf16.gmra.mrb[52].mxu0 %v20387_v58  ;;  %13283 = vmatprep.subr.bf16.mxu1 %v18705_v61  ;;  %v18745_v61 = vld [vmem:[#allocation4 + $0x2628] ss:$16 sps:$4 sm:$0xff]  }
 0xa8e   : > { %12183 = vmatmul.mubr.bf16.gmra.mrb[52].mxu1 %v20387_v58  ;;  %11966 = vmatprep.mubr.bf16.mxu0 %v20401_v20  ;;  %v18723_v58 = vld [vmem:[#allocation4 + $0x25ac] ss:$16 sps:$4 sm:$0xff]  }
 0xa8f   : > { %12192 = vmatprep.mubr.bf16.mxu1 %v20401_v20  ;;  %13058 = vmatpush1.bf16.msra.mxu0 %v18700_v32  ;;  %v18718_v20 = vld [vmem:[#allocation4 + $0x25a0] ss:$16 sps:$4 sm:$0xff]  }
 0xa90   : > { %13284 = vmatpush1.bf16.msra.mxu1 %v18703_v42  ;;  %13059 = vmatprep.subr.bf16.mxu0 %v18708_v12 }
 0xa91   : > { %13285 = vmatprep.subr.bf16.mxu1 %v18711_v44 }
 0xa93   : > { %13060 = vmatpush1.bf16.msra.mxu0 %v18706_v40  ;;  %v18750_v40 = vld [vmem:[#allocation4 + $0x2644] ss:$16 sps:$4 sm:$0xff]  }
 0xa94   : > { %13286 = vmatpush1.bf16.msra.mxu1 %v18709_v31  ;;  %13061 = vmatprep.subr.bf16.mxu0 %v18714_v33  ;;  %v18753_v31 = vld [vmem:[#allocation4 + $0x264c] ss:$16 sps:$4 sm:$0xff]  }
 0xa95   : > { %11967 = vmatmul.mubr.bf16.gmra.mrb[56].mxu0 %v20399_v50  ;;  %13287 = vmatprep.subr.bf16.mxu1 %v18717_v16 }
 0xa96   : > { %12193 = vmatmul.mubr.bf16.gmra.mrb[56].mxu1 %v20399_v50  ;;  %11976 = vmatprep.mubr.bf16.mxu0 %v20413_v8  ;;  %v18727_v50 = vld [vmem:[#allocation4 + $0x25c8] ss:$16 sps:$4 sm:$0xff]  }
 0xa97   : > { %12202 = vmatprep.mubr.bf16.mxu1 %v20413_v8  ;;  %13062 = vmatpush1.bf16.msra.mxu0 %v18712_v29  ;;  %v18732_v8 = vld [vmem:[#allocation4 + $0x25e4] ss:$16 sps:$4 sm:$0xff]  }
 0xa98   : > { %13288 = vmatpush1.bf16.msra.mxu1 %v18715_v21  ;;  %13063 = vmatprep.subr.bf16.mxu0 %v18720_v15 }
 0xa99   : > { %13289 = vmatprep.subr.bf16.mxu1 %v18723_v58 }
 0xa9b   : > { %13064 = vmatpush1.bf16.msra.mxu0 %v18718_v20 }
 0xa9c   : > { %13290 = vmatpush1.bf16.msra.mxu1 %v18721_v54  ;;  %13065 = vmatprep.subr.bf16.mxu0 %v18726_v0 }
 0xa9d   : > { %11977 = vmatmul.mubr.bf16.gmra.mrb[60].mxu0 %v20411_v63  ;;  %13291 = vmatprep.subr.bf16.mxu1 %v18729_v49 }
 0xa9e   : > { %12203 = vmatmul.mubr.bf16.gmra.mrb[60].mxu1 %v20411_v63  ;;  %v11099_v63 = vld [vmem:[#allocation6 + $0x21] ss:$8 sm:$0xf] }
 0xa9f   : > { %13066 = vmatpush1.bf16.msra.mxu0 %v18724_v9  ;;  %v20448_v11 = vrot.slane %v11099_v63, %v19179_v46  ;;  %v20451_v41 = vrot.slane %v11099_v63, %v19192_v57  ;;  %v20454_v39 = vrot.slane %v11099_v63, %v19181_v47  ;;  %v20457_v6 = vrot.slane %v11099_v63, %v19195_v59  ;;  %v18748_v9 = vld [vmem:[#allocation4 + $0x2640] ss:$16 sps:$4 sm:$0xff]  }
 0xaa0   : > { %13292 = vmatpush1.bf16.msra.mxu1 %v18727_v50  ;;  %13067 = vmatprep.subr.bf16.mxu0 %v18732_v8  ;;  %v18751_v50 = vld [vmem:[#allocation4 + $0x2648] ss:$16 sps:$4 sm:$0xff]  }
 0xaa1   : > { %13293 = vmatprep.subr.bf16.mxu1 %v18735_v3  ;;  %v18756_v3 = vld [vmem:[#allocation4 + $0x2664] ss:$16 sps:$4 sm:$0xff]  }
 0xaa3   : > { %13068 = vmatpush1.bf16.msra.mxu0 %v18730_v34  ;;  %v18759_v34 = vld [vmem:[#allocation4 + $0x266c] ss:$16 sps:$4 sm:$0xff]  }
 0xaa4   : > { %13294 = vmatpush1.bf16.msra.mxu1 %v18733_v56  ;;  %13150 = vmatprep.subr.bf16.mxu0 %v18738_v13 }
 0xaa5   : > { %13376 = vmatprep.subr.bf16.mxu1 %v18741_v60 }
 0xb38   : > { %v11908_v23 = vpop.f32.mrb[32].mxu0 }
 0xb39   : > { %v12134_v52 = vpop.f32.mrb[32].mxu1  ;;  %v11910_v14 = vpop.f32.mrb[33].mxu0  ;;  %v16076_v17 = vadd.f32 %v11908_v23, %v20448_v11 }
 0xb3a   : > { %v12136_v36 = vpop.f32.mrb[33].mxu1  ;;  %v11912_v10 = vpop.f32.mrb[34].mxu0  ;;  %v16108_v2 = vadd.f32 %v12134_v52, %v20451_v41  ;;  %v16077_v62 = vadd.f32 %v11910_v14, %v20454_v39  ;;  %v18754_v52 = vld [vmem:[#allocation4 + $0x2660] ss:$16 sps:$4 sm:$0xff]   ;;  %v18757_v14 = vld [vmem:[#allocation4 + $0x2668] ss:$16 sps:$4 sm:$0xff]  }
 0xb3b   : > { %v16078_v7 = vadd.f32 %v11912_v10, %v20448_v11  ;;  %v12138_v1 = vpop.f32.mrb[34].mxu1  ;;  %v11914_v38 = vpop.f32.mrb[35].mxu0  ;;  %v16109_v51 = vadd.f32 %v12136_v36, %v20457_v6 }
 0xb3c   : > { %v16110_v37 = vadd.f32 %v12138_v1, %v20451_v41  ;;  %v16079_v18 = vadd.f32 %v11914_v38, %v20454_v39  ;;  %v12140_v35 = vpop.f32.mrb[35].mxu1  ;;  %v18762_v1 = vld [vmem:[#allocation4 + $0x2684] ss:$16 sps:$4 sm:$0xff]   ;;  %v18765_v38 = vld [vmem:[#allocation4 + $0x268c] ss:$16 sps:$4 sm:$0xff]  }
 0xb3d   : > { %v12213_v27 = vpack.c.bf16 %v16078_v7, %v16076_v17  ;;  %v16111_v4 = vadd.f32 %v12140_v35, %v20457_v6 }
 0xb3e   : > { %v20467_v26 = vpack.c.bf16 %v16110_v37, %v16108_v2  ;;  %v12214_v53 = vpack.c.bf16 %v16079_v18, %v16077_v62 }
 0xb3f   : > { %v20469_v30 = vpack.c.bf16 %v16111_v4, %v16109_v51 }
 0xb40   : > { %v11918_v48 = vpop.f32.mrb[36].mxu0  ;;  %13069 = vmatprep.mubr.bf16.mxu0 %v12214_v53  ;;  %13295 = vmatprep.mubr.bf16.mxu1 %v12214_v53 }
 0xb41   : > { %v12144_v5 = vpop.f32.mrb[36].mxu1  ;;  %v11920_v28 = vpop.f32.mrb[37].mxu0  ;;  %13070 = vmatmul.mubr.bf16.vlgmr.msra.gmra.mrb[64].mxu0 %v12213_v27  ;;  %13296 = vmatmul.mubr.bf16.vlgmr.msra.gmra.mrb[64].mxu1 %v12213_v27  ;;  %v16080_v32 = vadd.f32 %v11918_v48, %v20448_v11  ;;  %v18768_v48 = vld [vmem:[#allocation4 + $0x26a4] ss:$16 sps:$4 sm:$0xff]  }
 0xb42   : > { %v12146_v45 = vpop.f32.mrb[37].mxu1  ;;  %13151 = vmatpush1.bf16.msra.mxu0 %v18736_v19  ;;  %v11922_v43 = vpop.f32.mrb[38].mxu0  ;;  %13377 = vmatpush1.bf16.msra.mxu1 %v18739_v25  ;;  %v16112_v33 = vadd.f32 %v12144_v5, %v20451_v41  ;;  %v16081_v16 = vadd.f32 %v11920_v28, %v20454_v39  ;;  %v18760_v25 = vld [vmem:[#allocation4 + $0x2680] ss:$16 sps:$4 sm:$0xff]   ;;  %v18771_v5 = vld [vmem:[#allocation4 + $0x26ac] ss:$16 sps:$4 sm:$0xff]  }
 0xb43   : > { %v16082_v42 = vadd.f32 %v11922_v43, %v20448_v11  ;;  %v12148_v12 = vpop.f32.mrb[38].mxu1  ;;  %v11924_v44 = vpop.f32.mrb[39].mxu0  ;;  %13152 = vmatprep.subr.bf16.mxu0 %v18744_v55  ;;  %13378 = vmatprep.subr.bf16.mxu1 %v18747_v24  ;;  %v16113_v58 = vadd.f32 %v12146_v45, %v20457_v6  ;;  %v18763_v55 = vld [vmem:[#allocation4 + $0x2688] ss:$16 sps:$4 sm:$0xff]  }
 0xb44   : > { %v16114_v29 = vadd.f32 %v12148_v12, %v20451_v41  ;;  %v16083_v21 = vadd.f32 %v11924_v44, %v20454_v39  ;;  %v12150_v15 = vpop.f32.mrb[39].mxu1 }
 0xb45   : > { %v12217_v20 = vpack.c.bf16 %v16082_v42, %v16080_v32  ;;  %v16115_v54 = vadd.f32 %v12150_v15, %v20457_v6  ;;  %v18766_v32 = vld [vmem:[#allocation4 + $0x26a0] ss:$16 sps:$4 sm:$0xff]   ;;  %v18769_v42 = vld [vmem:[#allocation4 + $0x26a8] ss:$16 sps:$4 sm:$0xff]  }
 0xb46   : > { %v20479_v0 = vpack.c.bf16 %v16114_v29, %v16112_v33  ;;  %v12218_v49 = vpack.c.bf16 %v16083_v21, %v16081_v16  ;;  %13153 = vmatpush1.bf16.msra.mxu0 %v18742_v22  ;;  %13379 = vmatpush1.bf16.msra.mxu1 %v18745_v61  ;;  %v18774_v33 = vld [vmem:[#allocation4 + $0x26c4] ss:$16 sps:$4 sm:$0xff]   ;;  %v18777_v16 = vld [vmem:[#allocation4 + $0x26cc] ss:$16 sps:$4 sm:$0xff]  }
 0xb47   : > { %v20481_v8 = vpack.c.bf16 %v16115_v54, %v16113_v58  ;;  %13154 = vmatprep.subr.bf16.mxu0 %v18750_v40  ;;  %13380 = vmatprep.subr.bf16.mxu1 %v18753_v31 }
 0xb48   : > { %v11928_v56 = vpop.f32.mrb[40].mxu0  ;;  %13079 = vmatprep.mubr.bf16.mxu0 %v12218_v49  ;;  %13305 = vmatprep.mubr.bf16.mxu1 %v12218_v49 }
 0xb49   : > { %v12154_v13 = vpop.f32.mrb[40].mxu1  ;;  %v11930_v60 = vpop.f32.mrb[41].mxu0  ;;  %13080 = vmatmul.mubr.bf16.gmra.mrb[68].mxu0 %v12217_v20  ;;  %13306 = vmatmul.mubr.bf16.gmra.mrb[68].mxu1 %v12217_v20  ;;  %v16084_v36 = vadd.f32 %v11928_v56, %v20448_v11  ;;  %v18775_v56 = vld [vmem:[#allocation4 + $0x26c8] ss:$16 sps:$4 sm:$0xff]  }
 0xb4a   : > { %v12156_v63 = vpop.f32.mrb[41].mxu1  ;;  %13155 = vmatpush1.bf16.msra.mxu0 %v18748_v9  ;;  %v11932_v23 = vpop.f32.mrb[42].mxu0  ;;  %13381 = vmatpush1.bf16.msra.mxu1 %v18751_v50  ;;  %v16116_v2 = vadd.f32 %v12154_v13, %v20451_v41  ;;  %v16085_v62 = vadd.f32 %v11930_v60, %v20454_v39  ;;  %v18780_v60 = vld [vmem:[#allocation4 + $0x26e4] ss:$16 sps:$4 sm:$0xff]  }
 0xb4b   : > { %v16086_v10 = vadd.f32 %v11932_v23, %v20448_v11  ;;  %v12158_v17 = vpop.f32.mrb[42].mxu1  ;;  %v11934_v7 = vpop.f32.mrb[43].mxu0  ;;  %13156 = vmatprep.subr.bf16.mxu0 %v18756_v3  ;;  %13382 = vmatprep.subr.bf16.mxu1 %v18759_v34  ;;  %v16117_v51 = vadd.f32 %v12156_v63, %v20457_v6  ;;  %v18772_v34 = vld [vmem:[#allocation4 + $0x26c0] ss:$16 sps:$4 sm:$0xff]   ;;  %v18783_v63 = vld [vmem:[#allocation4 + $0x26ec] ss:$16 sps:$4 sm:$0xff]  }
 0xb4c   : > { %v16118_v37 = vadd.f32 %v12158_v17, %v20451_v41  ;;  %v16087_v18 = vadd.f32 %v11934_v7, %v20454_v39  ;;  %v12160_v35 = vpop.f32.mrb[43].mxu1  ;;  %v18778_v17 = vld [vmem:[#allocation4 + $0x26e0] ss:$16 sps:$4 sm:$0xff]   ;;  %v18781_v7 = vld [vmem:[#allocation4 + $0x26e8] ss:$16 sps:$4 sm:$0xff]  }
 0xb4d   : > { %v12221_v27 = vpack.c.bf16 %v16086_v10, %v16084_v36  ;;  %v16119_v4 = vadd.f32 %v12160_v35, %v20457_v6 }
 0xb4e   : > { %v20491_v53 = vpack.c.bf16 %v16118_v37, %v16116_v2  ;;  %v12222_v19 = vpack.c.bf16 %v16087_v18, %v16085_v62  ;;  %13157 = vmatpush1.bf16.msra.mxu0 %v18754_v52  ;;  %13383 = vmatpush1.bf16.msra.mxu1 %v18757_v14  ;;  %v18786_v37 = vld [vmem:[#allocation4 + $0x2704] ss:$16 sps:$4 sm:$0xff]   ;;  %v18789_v18 = vld [vmem:[#allocation4 + $0x270c] ss:$16 sps:$4 sm:$0xff]  }
 0xb4f   : > { %v20493_v24 = vpack.c.bf16 %v16119_v4, %v16117_v51  ;;  %13158 = vmatprep.subr.bf16.mxu0 %v18762_v1  ;;  %13384 = vmatprep.subr.bf16.mxu1 %v18765_v38 }
 0xb50   : > { %v11938_v28 = vpop.f32.mrb[44].mxu0  ;;  %13089 = vmatprep.mubr.bf16.mxu0 %v12222_v19  ;;  %13315 = vmatprep.mubr.bf16.mxu1 %v12222_v19 }
 0xb51   : > { %v12164_v45 = vpop.f32.mrb[44].mxu1  ;;  %v11940_v43 = vpop.f32.mrb[45].mxu0  ;;  %13090 = vmatmul.mubr.bf16.gmra.mrb[72].mxu0 %v12221_v27  ;;  %13316 = vmatmul.mubr.bf16.gmra.mrb[72].mxu1 %v12221_v27  ;;  %v16088_v12 = vadd.f32 %v11938_v28, %v20448_v11 }
 0xb52   : > { %v12166_v22 = vpop.f32.mrb[45].mxu1  ;;  %13159 = vmatpush1.bf16.msra.mxu0 %v18760_v25  ;;  %v11942_v61 = vpop.f32.mrb[46].mxu0  ;;  %13385 = vmatpush1.bf16.msra.mxu1 %v18763_v55  ;;  %v16120_v29 = vadd.f32 %v12164_v45, %v20451_v41  ;;  %v16089_v21 = vadd.f32 %v11940_v43, %v20454_v39  ;;  %v18784_v45 = vld [vmem:[#allocation4 + $0x2700] ss:$16 sps:$4 sm:$0xff]   ;;  %v18787_v43 = vld [vmem:[#allocation4 + $0x2708] ss:$16 sps:$4 sm:$0xff]  }
 0xb53   : > { %v16090_v44 = vadd.f32 %v11942_v61, %v20448_v11  ;;  %v12168_v40 = vpop.f32.mrb[46].mxu1  ;;  %v11944_v31 = vpop.f32.mrb[47].mxu0  ;;  %13160 = vmatprep.subr.bf16.mxu0 %v18768_v48  ;;  %13386 = vmatprep.subr.bf16.mxu1 %v18771_v5  ;;  %v16121_v54 = vadd.f32 %v12166_v22, %v20457_v6  ;;  %v18792_v61 = vld [vmem:[#allocation4 + $0x2724] ss:$16 sps:$4 sm:$0xff]  }
 0xb54   : > { %v16122_v15 = vadd.f32 %v12168_v40, %v20451_v41  ;;  %v16091_v58 = vadd.f32 %v11944_v31, %v20454_v39  ;;  %v12170_v20 = vpop.f32.mrb[47].mxu1 }
 0xb55   : > { %v12225_v49 = vpack.c.bf16 %v16090_v44, %v16088_v12  ;;  %v16123_v9 = vadd.f32 %v12170_v20, %v20457_v6  ;;  %v18798_v20 = vld [vmem:[#allocation4 + $0x2744] ss:$16 sps:$4 sm:$0xff]  }
 0xb56   : > { %v20503_v50 = vpack.c.bf16 %v16122_v15, %v16120_v29  ;;  %v12226_v3 = vpack.c.bf16 %v16091_v58, %v16089_v21  ;;  %13161 = vmatpush1.bf16.msra.mxu0 %v18766_v32  ;;  %13387 = vmatpush1.bf16.msra.mxu1 %v18769_v42  ;;  %v18795_v32 = vld [vmem:[#allocation4 + $0x272c] ss:$16 sps:$4 sm:$0xff]  }
 0xb57   : > { %v20505_v13 = vpack.c.bf16 %v16123_v9, %v16121_v54  ;;  %13162 = vmatprep.subr.bf16.mxu0 %v18774_v33  ;;  %13388 = vmatprep.subr.bf16.mxu1 %v18777_v16  ;;  %v18790_v33 = vld [vmem:[#allocation4 + $0x2720] ss:$16 sps:$4 sm:$0xff]   ;;  %v18793_v16 = vld [vmem:[#allocation4 + $0x2728] ss:$16 sps:$4 sm:$0xff]   ;;  %v18801_v54 = vld [vmem:[#allocation4 + $0x274c] ss:$16 sps:$4 sm:$0xff]  }
 0xb58   : > { %v11948_v23 = vpop.f32.mrb[48].mxu0  ;;  %13099 = vmatprep.mubr.bf16.mxu0 %v12226_v3  ;;  %13325 = vmatprep.mubr.bf16.mxu1 %v12226_v3 }
 0xb59   : > { %v12174_v52 = vpop.f32.mrb[48].mxu1  ;;  %v11950_v14 = vpop.f32.mrb[49].mxu0  ;;  %13100 = vmatmul.mubr.bf16.gmra.mrb[76].mxu0 %v12225_v49  ;;  %13326 = vmatmul.mubr.bf16.gmra.mrb[76].mxu1 %v12225_v49  ;;  %v16092_v1 = vadd.f32 %v11948_v23, %v20448_v11 }
 0xb5a   : > { %v12176_v36 = vpop.f32.mrb[49].mxu1  ;;  %13163 = vmatpush1.bf16.msra.mxu0 %v18772_v34  ;;  %v11952_v10 = vpop.f32.mrb[50].mxu0  ;;  %13389 = vmatpush1.bf16.msra.mxu1 %v18775_v56  ;;  %v16124_v35 = vadd.f32 %v12174_v52, %v20451_v41  ;;  %v16093_v51 = vadd.f32 %v11950_v14, %v20454_v39 }
 0xb5b   : > { %v16094_v38 = vadd.f32 %v11952_v10, %v20448_v11  ;;  %v12178_v2 = vpop.f32.mrb[50].mxu1  ;;  %v11954_v62 = vpop.f32.mrb[51].mxu0  ;;  %13164 = vmatprep.subr.bf16.mxu0 %v18780_v60  ;;  %13390 = vmatprep.subr.bf16.mxu1 %v18783_v63  ;;  %v16125_v25 = vadd.f32 %v12176_v36, %v20457_v6  ;;  %v18796_v36 = vld [vmem:[#allocation4 + $0x2740] ss:$16 sps:$4 sm:$0xff]   ;;  %v18799_v10 = vld [vmem:[#allocation4 + $0x2748] ss:$16 sps:$4 sm:$0xff]  }
 0xb5c   : > { %v16126_v27 = vadd.f32 %v12178_v2, %v20451_v41  ;;  %v16095_v4 = vadd.f32 %v11954_v62, %v20454_v39  ;;  %v12180_v19 = vpop.f32.mrb[51].mxu1 }
 0xb5d   : > { %v12229_v55 = vpack.c.bf16 %v16094_v38, %v16092_v1  ;;  %v16127_v48 = vadd.f32 %v12180_v19, %v20457_v6  ;;  %v18807_v1 = vld [vmem:[#allocation4 + $0x276c] ss:$16 sps:$4 sm:$0xff]  }
 0xb5e   : > { %v20515_v5 = vpack.c.bf16 %v16126_v27, %v16124_v35  ;;  %v12230_v28 = vpack.c.bf16 %v16095_v4, %v16093_v51  ;;  %13165 = vmatpush1.bf16.msra.mxu0 %v18778_v17  ;;  %13391 = vmatpush1.bf16.msra.mxu1 %v18781_v7  ;;  %v18804_v7 = vld [vmem:[#allocation4 + $0x2764] ss:$16 sps:$4 sm:$0xff]   ;;  %v18802_v35 = vld [vmem:[#allocation4 + $0x2760] ss:$16 sps:$4 sm:$0xff]   ;;  %v18805_v51 = vld [vmem:[#allocation4 + $0x2768] ss:$16 sps:$4 sm:$0xff]  }
 0xb5f   : > { %v20517_v22 = vpack.c.bf16 %v16127_v48, %v16125_v25  ;;  %13166 = vmatprep.subr.bf16.mxu0 %v18786_v37  ;;  %13392 = vmatprep.subr.bf16.mxu1 %v18789_v18  ;;  %v18813_v48 = vld [vmem:[#allocation4 + $0x278c] ss:$16 sps:$4 sm:$0xff]  }
 0xb60   : > { %v11958_v42 = vpop.f32.mrb[52].mxu0  ;;  %13109 = vmatprep.mubr.bf16.mxu0 %v12230_v28  ;;  %13335 = vmatprep.mubr.bf16.mxu1 %v12230_v28 }
 0xb61   : > { %v12184_v12 = vpop.f32.mrb[52].mxu1  ;;  %v11960_v44 = vpop.f32.mrb[53].mxu0  ;;  %13110 = vmatmul.mubr.bf16.gmra.mrb[80].mxu0 %v12229_v55  ;;  %13336 = vmatmul.mubr.bf16.gmra.mrb[80].mxu1 %v12229_v55  ;;  %v16096_v29 = vadd.f32 %v11958_v42, %v20448_v11  ;;  %v18810_v55 = vld [vmem:[#allocation4 + $0x2784] ss:$16 sps:$4 sm:$0xff]  }
 0xb62   : > { %v12186_v40 = vpop.f32.mrb[53].mxu1  ;;  %13167 = vmatpush1.bf16.msra.mxu0 %v18784_v45  ;;  %v11962_v31 = vpop.f32.mrb[54].mxu0  ;;  %13393 = vmatpush1.bf16.msra.mxu1 %v18787_v43  ;;  %v16128_v49 = vadd.f32 %v12184_v12, %v20451_v41  ;;  %v16097_v9 = vadd.f32 %v11960_v44, %v20454_v39 }
 0xb63   : > { %v16098_v21 = vadd.f32 %v11962_v31, %v20448_v11  ;;  %v12188_v15 = vpop.f32.mrb[54].mxu1  ;;  %v11964_v58 = vpop.f32.mrb[55].mxu0  ;;  %13168 = vmatprep.subr.bf16.mxu0 %v18792_v61  ;;  %13394 = vmatprep.subr.bf16.mxu1 %v18795_v32  ;;  %v16129_v60 = vadd.f32 %v12186_v40, %v20457_v6 }
 0xb64   : > { %v16130_v3 = vadd.f32 %v12188_v15, %v20451_v41  ;;  %v16099_v34 = vadd.f32 %v11964_v58, %v20454_v39  ;;  %v12190_v56 = vpop.f32.mrb[55].mxu1  ;;  %v18819_v15 = vld [vmem:[#allocation4 + $0x27ac] ss:$16 sps:$4 sm:$0xff]  }
 0xb65   : > { %v12233_v63 = vpack.c.bf16 %v16098_v21, %v16096_v29  ;;  %v16131_v23 = vadd.f32 %v12190_v56, %v20457_v6  ;;  %v18816_v21 = vld [vmem:[#allocation4 + $0x27a4] ss:$16 sps:$4 sm:$0xff]  }
 0xb66   : > { %v20527_v52 = vpack.c.bf16 %v16130_v3, %v16128_v49  ;;  %v12234_v14 = vpack.c.bf16 %v16099_v34, %v16097_v9  ;;  %13169 = vmatpush1.bf16.msra.mxu0 %v18790_v33  ;;  %13395 = vmatpush1.bf16.msra.mxu1 %v18793_v16  ;;  %v18808_v33 = vld [vmem:[#allocation4 + $0x2780] ss:$16 sps:$4 sm:$0xff]   ;;  %v18811_v16 = vld [vmem:[#allocation4 + $0x2788] ss:$16 sps:$4 sm:$0xff]  }
 0xb67   : > { %v20529_v17 = vpack.c.bf16 %v16131_v23, %v16129_v60  ;;  %13170 = vmatprep.subr.bf16.mxu0 %v18798_v20  ;;  %13396 = vmatprep.subr.bf16.mxu1 %v18801_v54  ;;  %v18814_v3 = vld [vmem:[#allocation4 + $0x27a0] ss:$16 sps:$4 sm:$0xff]   ;;  %v18817_v34 = vld [vmem:[#allocation4 + $0x27a8] ss:$16 sps:$4 sm:$0xff]  }
 0xb68   : > { %v11968_v38 = vpop.f32.mrb[56].mxu0  ;;  %13119 = vmatprep.mubr.bf16.mxu0 %v12234_v14  ;;  %13345 = vmatprep.mubr.bf16.mxu1 %v12234_v14  ;;  %v18822_v14 = vld [vmem:[#allocation4 + $0x27c4] ss:$16 sps:$4 sm:$0xff]  }
 0xb69   : > { %v12194_v2 = vpop.f32.mrb[56].mxu1  ;;  %v11970_v62 = vpop.f32.mrb[57].mxu0  ;;  %13120 = vmatmul.mubr.bf16.gmra.mrb[84].mxu0 %v12233_v63  ;;  %13346 = vmatmul.mubr.bf16.gmra.mrb[84].mxu1 %v12233_v63  ;;  %v16100_v27 = vadd.f32 %v11968_v38, %v20448_v11 }
 0xb6a   : > { %v12196_v37 = vpop.f32.mrb[57].mxu1  ;;  %13171 = vmatpush1.bf16.msra.mxu0 %v18796_v36  ;;  %v11972_v18 = vpop.f32.mrb[58].mxu0  ;;  %13397 = vmatpush1.bf16.msra.mxu1 %v18799_v10  ;;  %v16132_v28 = vadd.f32 %v12194_v2, %v20451_v41  ;;  %v16101_v45 = vadd.f32 %v11970_v62, %v20454_v39  ;;  %v18825_v36 = vld [vmem:[#allocation4 + $0x27cc] ss:$16 sps:$4 sm:$0xff]  }
 0xb6b   : > { %v16102_v4 = vadd.f32 %v11972_v18, %v20448_v11  ;;  %v12198_v19 = vpop.f32.mrb[58].mxu1  ;;  %v11974_v25 = vpop.f32.mrb[59].mxu0  ;;  %13172 = vmatprep.subr.bf16.mxu0 %v18804_v7  ;;  %13398 = vmatprep.subr.bf16.mxu1 %v18807_v1  ;;  %v16133_v42 = vadd.f32 %v12196_v37, %v20457_v6 }
 0xb6c   : > { %v16134_v43 = vadd.f32 %v12198_v19, %v20451_v41  ;;  %v16103_v61 = vadd.f32 %v11974_v25, %v20454_v39  ;;  %v12200_v32 = vpop.f32.mrb[59].mxu1  ;;  %v18829_v19 = vld [vmem:[#allocation4 + $0x27e8] ss:$16 sps:$4 sm:$0xff]   ;;  %v18832_v25 = vld [vmem:[%s20823_s4 + $0x40] sm:$0xff]  }
 0xb6d   : > { %v12237_v12 = vpack.c.bf16 %v16102_v4, %v16100_v27  ;;  %v16135_v44 = vadd.f32 %v12200_v32, %v20457_v6  ;;  %v18823_v4 = vld [vmem:[#allocation4 + $0x27c8] ss:$16 sps:$4 sm:$0xff]   ;;  %v18840_v32 = vld [vmem:[%s20823_s4 + $0x50] sm:$0xff]  }
 0xb6e   : > { %v20539_v40 = vpack.c.bf16 %v16134_v43, %v16132_v28  ;;  %v12238_v31 = vpack.c.bf16 %v16103_v61, %v16101_v45  ;;  %13173 = vmatpush1.bf16.msra.mxu0 %v18802_v35  ;;  %13399 = vmatpush1.bf16.msra.mxu1 %v18805_v51  ;;  %v18820_v51 = vld [vmem:[#allocation4 + $0x27c0] ss:$16 sps:$4 sm:$0xff]   ;;  %v18836_v28 = vld [vmem:[%s20823_s4 + $0x48] sm:$0xff]  }
 0xb6f   : > { %v20541_v29 = vpack.c.bf16 %v16135_v44, %v16133_v42  ;;  %13174 = vmatprep.subr.bf16.mxu0 %v18810_v55  ;;  %13400 = vmatprep.subr.bf16.mxu1 %v18813_v48  ;;  %v18834_v55 = vld [vmem:[%s20823_s4 + $0xc0] sm:$0xff]   ;;  %v18838_v45 = vld [vmem:[%s20823_s4 + $0xc8] sm:$0xff]   ;;  %v18843_v42 = vld [vmem:[%s20823_s4 + $0x90] sm:$0xff]  }
 0xb70   : > { %v11978_v58 = vpop.f32.mrb[60].mxu0  ;;  %13129 = vmatprep.mubr.bf16.mxu0 %v12238_v31  ;;  %13355 = vmatprep.mubr.bf16.mxu1 %v12238_v31  ;;  %v18833_v48 = vld [vmem:[%s20823_s4] sm:$0xff]   ;;  %v18837_v43 = vld [vmem:[%s20823_s4 + $0x8] sm:$0xff]   ;;  %v18846_v44 = vld [vmem:[%s20823_s4 + $0xd8] sm:$0xff]  }
 0xb71   : > { %v12204_v20 = vpop.f32.mrb[60].mxu1  ;;  %v11980_v54 = vpop.f32.mrb[61].mxu0  ;;  %13130 = vmatmul.mubr.bf16.gmra.mrb[88].mxu0 %v12237_v12  ;;  %13356 = vmatmul.mubr.bf16.gmra.mrb[88].mxu1 %v12237_v12  ;;  %v16104_v56 = vadd.f32 %v11978_v58, %v20448_v11  ;;  %v18839_v61 = vld [vmem:[%s20823_s4 + $0x88] sm:$0xff]   ;;  %v18844_v12 = vld [vmem:[%s20823_s4 + $0x58] sm:$0xff]  }
 0xb72   : > { %v12206_v49 = vpop.f32.mrb[61].mxu1  ;;  %13175 = vmatpush1.bf16.msra.mxu0 %v18808_v33  ;;  %v11982_v9 = vpop.f32.mrb[62].mxu0  ;;  %13401 = vmatpush1.bf16.msra.mxu1 %v18811_v16  ;;  %v16136_v10 = vadd.f32 %v12204_v20, %v20451_v41  ;;  %v16105_v7 = vadd.f32 %v11980_v54, %v20454_v39  ;;  %v18845_v31 = vld [vmem:[%s20823_s4 + $0x18] sm:$0xff]   ;;  %v18848_v16 = vld [vmem:[%s20823_s4 + $0x60] sm:$0xff]   ;;  %v18854_v58 = vld [vmem:[%s20823_s4 + $0xe8] sm:$0xff]  }
 0xb73   : > { %v16106_v60 = vadd.f32 %v11982_v9, %v20448_v11  ;;  %v12208_v63 = vpop.f32.mrb[62].mxu1  ;;  %v11984_v23 = vpop.f32.mrb[63].mxu0  ;;  %13176 = vmatprep.subr.bf16.mxu0 %v18816_v21  ;;  %13402 = vmatprep.subr.bf16.mxu1 %v18819_v15  ;;  %v16137_v62 = vadd.f32 %v12206_v49, %v20457_v6  ;;  %v18847_v33 = vld [vmem:[%s20823_s4 + $0x98] sm:$0xff]   ;;  %v18851_v21 = vld [vmem:[%s20823_s4 + $0xa0] sm:$0xff]   ;;  %v18852_v15 = vld [vmem:[%s20823_s4 + $0x68] sm:$0xff]  }
 0xb74   : > { %v16138_v1 = vadd.f32 %v12208_v63, %v20451_v41  ;;  %v16107_v38 = vadd.f32 %v11984_v23, %v20454_v39  ;;  %v12210_v2 = vpop.f32.mrb[63].mxu1  ;;  %v18828_v41 = vld [vmem:[#allocation4 + $0x27e4] ss:$16 sps:$4 sm:$0xff]   ;;  %v18831_v39 = vld [vmem:[#allocation4 + $0x27ec] ss:$16 sps:$4 sm:$0xff]  }
 0xb75   : > { %v12241_v37 = vpack.c.bf16 %v16106_v60, %v16104_v56  ;;  %v16139_v11 = vadd.f32 %v12210_v2, %v20457_v6  ;;  %v18826_v6 = vld [vmem:[#allocation4 + $0x27e0] ss:$16 sps:$4 sm:$0xff]   ;;  %v18853_v20 = vld [vmem:[%s20823_s4 + $0x28] sm:$0xff]  }
 0xb76   : > { %v20551_v18 = vpack.c.bf16 %v16138_v1, %v16136_v10  ;;  %v12242_v35 = vpack.c.bf16 %v16107_v38, %v16105_v7  ;;  %13177 = vmatpush1.bf16.msra.mxu0 %v18814_v3  ;;  %13403 = vmatpush1.bf16.msra.mxu1 %v18817_v34  ;;  %v18855_v54 = vld [vmem:[%s20823_s4 + $0xa8] sm:$0xff]   ;;  %v18856_v49 = vld [vmem:[%s20823_s4 + $0x70] sm:$0xff]  }
 0xb77   : > { %v20553_v27 = vpack.c.bf16 %v16139_v11, %v16137_v62  ;;  %13178 = vmatprep.subr.bf16.mxu0 %v18822_v14  ;;  %13404 = vmatprep.subr.bf16.mxu1 %v18825_v36  ;;  %v18859_v9 = vld [vmem:[%s20823_s4 + $0xb0] sm:$0xff]  }
 0xb78   : > { %13139 = vmatprep.mubr.bf16.mxu0 %v12242_v35  ;;  %13365 = vmatprep.mubr.bf16.mxu1 %v12242_v35 }
 0xb79   : > { %13140 = vmatmul.mubr.bf16.gmra.mrb[92].mxu0 %v12241_v37  ;;  %13366 = vmatmul.mubr.bf16.gmra.mrb[92].mxu1 %v12241_v37 }
 0xb7a   : > { %13179 = vmatpush1.bf16.msra.mxu0 %v18820_v51  ;;  %13182 = vmatprep.mubr.bf16.mxu0 %v20469_v30 }
 0xb7b   : > { %13405 = vmatpush1.bf16.msra.mxu1 %v18823_v4  ;;  %13408 = vmatprep.mubr.bf16.mxu1 %v20469_v30  ;;  %v18835_v30 = vld [vmem:[%s20823_s4 + $0x80] sm:$0xff]  }
 0xb7c   : > { %13180 = vmatprep.subr.bf16.mxu0 %v18828_v41  ;;  %13406 = vmatprep.subr.bf16.mxu1 %v18831_v39 }
 0xb7e   : > { %13181 = vmatpush1.bf16.msra.mxu0 %v18826_v6 }
 0xb7f   : > { %13407 = vmatpush1.bf16.msra.mxu1 %v18829_v19  ;;  %15436 = vmatprep.subr.bf16.mxu0 %v18832_v25 }
 0xb80   : > { %15500 = vmatprep.subr.bf16.mxu1 %v18834_v55 }
 0xb81   : > { %13183 = vmatmul.mubr.bf16.vlgmr.msra.gmra.mrb[64].mxu0 %v20467_v26 }
 0xb82   : > { %13409 = vmatmul.mubr.bf16.vlgmr.msra.gmra.mrb[64].mxu1 %v20467_v26  ;;  %13192 = vmatprep.mubr.bf16.mxu0 %v20481_v8  ;;  %v18842_v26 = vld [vmem:[%s20823_s4 + $0xd0] sm:$0xff]  }
 0xb83   : > { %13418 = vmatprep.mubr.bf16.mxu1 %v20481_v8  ;;  %15437 = vmatpush3.bf16.msra.mxu0 %v18833_v48  ;;  %v18841_v8 = vld [vmem:[%s20823_s4 + $0x10] sm:$0xff]  }
 0xb84   : > { %15501 = vmatpush3.bf16.msra.mxu1 %v18835_v30  ;;  %15438 = vmatprep.subr.bf16.mxu0 %v18836_v28 }
 0xb85   : > { %15502 = vmatprep.subr.bf16.mxu1 %v18838_v45 }
 0xb87   : > { %15439 = vmatpush3.bf16.msra.mxu0 %v18837_v43 }
 0xb88   : > { %15503 = vmatpush3.bf16.msra.mxu1 %v18839_v61  ;;  %15440 = vmatprep.subr.bf16.mxu0 %v18840_v32 }
 0xb89   : > { %13193 = vmatmul.mubr.bf16.gmra.mrb[68].mxu0 %v20479_v0  ;;  %15504 = vmatprep.subr.bf16.mxu1 %v18842_v26 }
 0xb8a   : > { %13419 = vmatmul.mubr.bf16.gmra.mrb[68].mxu1 %v20479_v0  ;;  %13202 = vmatprep.mubr.bf16.mxu0 %v20493_v24  ;;  %v18850_v0 = vld [vmem:[%s20823_s4 + $0xe0] sm:$0xff]  }
 0xb8b   : > { %13428 = vmatprep.mubr.bf16.mxu1 %v20493_v24  ;;  %15441 = vmatpush3.bf16.msra.mxu0 %v18841_v8  ;;  %v18849_v24 = vld [vmem:[%s20823_s4 + $0x20] sm:$0xff]  }
 0xb8c   : > { %15505 = vmatpush3.bf16.msra.mxu1 %v18843_v42  ;;  %15442 = vmatprep.subr.bf16.mxu0 %v18844_v12 }
 0xb8d   : > { %15506 = vmatprep.subr.bf16.mxu1 %v18846_v44 }
 0xb8f   : > { %15443 = vmatpush3.bf16.msra.mxu0 %v18845_v31 }
 0xb90   : > { %15507 = vmatpush3.bf16.msra.mxu1 %v18847_v33  ;;  %15444 = vmatprep.subr.bf16.mxu0 %v18848_v16 }
 0xb91   : > { %13203 = vmatmul.mubr.bf16.gmra.mrb[72].mxu0 %v20491_v53  ;;  %15508 = vmatprep.subr.bf16.mxu1 %v18850_v0 }
 0xb92   : > { %13429 = vmatmul.mubr.bf16.gmra.mrb[72].mxu1 %v20491_v53  ;;  %13212 = vmatprep.mubr.bf16.mxu0 %v20505_v13  ;;  %v18858_v53 = vld [vmem:[%s20823_s4 + $0xf0] sm:$0xff]  }
 0xb93   : > { %13438 = vmatprep.mubr.bf16.mxu1 %v20505_v13  ;;  %15445 = vmatpush3.bf16.msra.mxu0 %v18849_v24  ;;  %v18857_v13 = vld [vmem:[%s20823_s4 + $0x30] sm:$0xff]  }
 0xb94   : > { %15509 = vmatpush3.bf16.msra.mxu1 %v18851_v21  ;;  %15446 = vmatprep.subr.bf16.mxu0 %v18852_v15 }
 0xb95   : > { %15510 = vmatprep.subr.bf16.mxu1 %v18854_v58 }
 0xb97   : > { %15447 = vmatpush3.bf16.msra.mxu0 %v18853_v20 }
 0xb98   : > { %15511 = vmatpush3.bf16.msra.mxu1 %v18855_v54  ;;  %15448 = vmatprep.subr.bf16.mxu0 %v18856_v49 }
 0xb99   : > { %13213 = vmatmul.mubr.bf16.gmra.mrb[76].mxu0 %v20503_v50  ;;  %15512 = vmatprep.subr.bf16.mxu1 %v18858_v53 }
 0xb9a   : > { %13439 = vmatmul.mubr.bf16.gmra.mrb[76].mxu1 %v20503_v50  ;;  %13222 = vmatprep.mubr.bf16.mxu0 %v20517_v22  ;;  %v18860_v50 = vld [vmem:[%s20823_s4 + $0x78] sm:$0xff]  }
 0xb9b   : > { %13448 = vmatprep.mubr.bf16.mxu1 %v20517_v22  ;;  %15449 = vmatpush3.bf16.msra.mxu0 %v18857_v13  ;;  %v18862_v22 = vld [vmem:[%s20823_s4 + $0xf8] sm:$0xff]  }
 0xb9c   : > { %15513 = vmatpush3.bf16.msra.mxu1 %v18859_v9  ;;  %15450 = vmatprep.subr.bf16.mxu0 %v18860_v50 }
 0xb9d   : > { %15514 = vmatprep.subr.bf16.mxu1 %v18862_v22 }
 0xba1   : > { %13223 = vmatmul.mubr.bf16.gmra.mrb[80].mxu0 %v20515_v5 }
 0xba2   : > { %13449 = vmatmul.mubr.bf16.gmra.mrb[80].mxu1 %v20515_v5  ;;  %13232 = vmatprep.mubr.bf16.mxu0 %v20529_v17  ;;  %v18861_v5 = vld [vmem:[%s20823_s4 + $0x38] sm:$0xff]  }
 0xba3   : > { %13458 = vmatprep.mubr.bf16.mxu1 %v20529_v17  ;;  %15451 = vmatpush3.bf16.msra.mxu0 %v18861_v5  ;;  %v12375_v17 = vld [vmem:[#allocation6 + $0x22] ss:$8 sm:$0xf] }
 0xba4   : > { %v20687_v3 = vrot.slane %v12375_v17, %v19192_v57  ;;  %v20690_v34 = vrot.slane %v12375_v17, %v19181_v47  ;;  %v20693_v63 = vrot.slane %v12375_v17, %v19195_v59 }
 0xba9   : > { %13233 = vmatmul.mubr.bf16.gmra.mrb[84].mxu0 %v20527_v52 }
 0xbaa   : > { %13459 = vmatmul.mubr.bf16.gmra.mrb[84].mxu1 %v20527_v52  ;;  %13242 = vmatprep.mubr.bf16.mxu0 %v20541_v29  ;;  %v18863_v52 = vld [vmem:[%s20823_s4 + $0xb8] sm:$0xff]  }
 0xbab   : > { %13468 = vmatprep.mubr.bf16.mxu1 %v20541_v29  ;;  %15515 = vmatpush3.bf16.msra.mxu1 %v18863_v52 }
 0xbb1   : > { %13243 = vmatmul.mubr.bf16.gmra.mrb[88].mxu0 %v20539_v40 }
 0xbb2   : > { %13469 = vmatmul.mubr.bf16.gmra.mrb[88].mxu1 %v20539_v40  ;;  %13252 = vmatprep.mubr.bf16.mxu0 %v20553_v27  ;;  %v20684_v40 = vrot.slane %v12375_v17, %v19179_v46 }
 0xbb3   : > { %13478 = vmatprep.mubr.bf16.mxu1 %v20553_v27 }
 0xbb9   : > { %13253 = vmatmul.mubr.bf16.gmra.mrb[92].mxu0 %v20551_v18 }
 0xbba   : > { %13479 = vmatmul.mubr.bf16.gmra.mrb[92].mxu1 %v20551_v18 }
 0xc54   : > { %v13184_v29 = vpop.f32.mrb[64].mxu0 }
 0xc55   : > { %v13410_v56 = vpop.f32.mrb[64].mxu1  ;;  %v13186_v60 = vpop.f32.mrb[65].mxu0  ;;  %v16140_v36 = vadd.f32 %v13184_v29, %v20684_v40 }
 0xc56   : > { %v13412_v23 = vpop.f32.mrb[65].mxu1  ;;  %v13188_v14 = vpop.f32.mrb[66].mxu0  ;;  %v16172_v1 = vadd.f32 %v13410_v56, %v20687_v3  ;;  %v16141_v57 = vadd.f32 %v13186_v60, %v20690_v34 }
 0xc57   : > { %v16142_v10 = vadd.f32 %v13188_v14, %v20684_v40  ;;  %v13414_v46 = vpop.f32.mrb[66].mxu1  ;;  %v13190_v7 = vpop.f32.mrb[67].mxu0  ;;  %v16173_v59 = vadd.f32 %v13412_v23, %v20693_v63 }
 0xc58   : > { %v16174_v47 = vadd.f32 %v13414_v46, %v20687_v3  ;;  %v16143_v38 = vadd.f32 %v13190_v7, %v20690_v34  ;;  %v13416_v2 = vpop.f32.mrb[67].mxu1 }
 0xc59   : > { %v13489_v62 = vpack.c.bf16 %v16142_v10, %v16140_v36  ;;  %v16175_v37 = vadd.f32 %v13416_v2, %v20693_v63 }
 0xc5a   : > { %v13491_v11 = vpack.c.bf16 %v16174_v47, %v16172_v1  ;;  %v13490_v18 = vpack.c.bf16 %v16143_v38, %v16141_v57 }
 0xc5b   : > { %v13492_v35 = vpack.c.bf16 %v16175_v37, %v16173_v59 }
 0xc5c   : > { %v13194_v51 = vpop.f32.mrb[68].mxu0  ;;  %13810 = vmatprep.mubr.bf16.mxu0 %v13490_v18 }
 0xc5d   : > { %v13420_v27 = vpop.f32.mrb[68].mxu1  ;;  %13907 = vmatprep.mubr.bf16.mxu1 %v13492_v35  ;;  %v13196_v4 = vpop.f32.mrb[69].mxu0  ;;  %13811 = vmatmul.mubr.bf16.vlgmr.msra.gmra.mrb[96].mxu0 %v13489_v62  ;;  %v16144_v6 = vadd.f32 %v13194_v51, %v20684_v40 }
 0xc5e   : > { %v13422_v41 = vpop.f32.mrb[69].mxu1  ;;  %13908 = vmatmul.mubr.bf16.vlgmr.msra.gmra.mrb[96].mxu1 %v13491_v11  ;;  %v13198_v39 = vpop.f32.mrb[70].mxu0  ;;  %v16176_v48 = vadd.f32 %v13420_v27, %v20687_v3  ;;  %v16145_v30 = vadd.f32 %v13196_v4, %v20690_v34 }
 0xc5f   : > { %v16146_v19 = vadd.f32 %v13198_v39, %v20684_v40  ;;  %v13424_v25 = vpop.f32.mrb[70].mxu1  ;;  %v13200_v55 = vpop.f32.mrb[71].mxu0  ;;  %v16177_v61 = vadd.f32 %v13422_v41, %v20693_v63 }
 0xc60   : > { %v16178_v28 = vadd.f32 %v13424_v25, %v20687_v3  ;;  %v16147_v45 = vadd.f32 %v13200_v55, %v20690_v34  ;;  %v13426_v43 = vpop.f32.mrb[71].mxu1 }
 0xc61   : > { %v13493_v32 = vpack.c.bf16 %v16146_v19, %v16144_v6  ;;  %v16179_v26 = vadd.f32 %v13426_v43, %v20693_v63 }
 0xc62   : > { %v13495_v8 = vpack.c.bf16 %v16178_v28, %v16176_v48  ;;  %v13494_v42 = vpack.c.bf16 %v16147_v45, %v16145_v30 }
 0xc63   : > { %v13496_v12 = vpack.c.bf16 %v16179_v26, %v16177_v61 }
 0xc64   : > { %v13204_v44 = vpop.f32.mrb[72].mxu0  ;;  %13818 = vmatprep.mubr.bf16.mxu0 %v13494_v42 }
 0xc65   : > { %v13430_v31 = vpop.f32.mrb[72].mxu1  ;;  %13915 = vmatprep.mubr.bf16.mxu1 %v13496_v12  ;;  %v13206_v33 = vpop.f32.mrb[73].mxu0  ;;  %13819 = vmatmul.mubr.bf16.gmra.mrb[100].mxu0 %v13493_v32  ;;  %v16148_v24 = vadd.f32 %v13204_v44, %v20684_v40 }
 0xc66   : > { %v13432_v16 = vpop.f32.mrb[73].mxu1  ;;  %13916 = vmatmul.mubr.bf16.gmra.mrb[100].mxu1 %v13495_v8  ;;  %v13208_v0 = vpop.f32.mrb[74].mxu0  ;;  %v16180_v20 = vadd.f32 %v13430_v31, %v20687_v3  ;;  %v16149_v54 = vadd.f32 %v13206_v33, %v20690_v34 }
 0xc67   : > { %v16150_v21 = vadd.f32 %v13208_v0, %v20684_v40  ;;  %v13434_v15 = vpop.f32.mrb[74].mxu1  ;;  %v13210_v58 = vpop.f32.mrb[75].mxu0  ;;  %v16181_v9 = vadd.f32 %v13432_v16, %v20693_v63 }
 0xc68   : > { %v16182_v49 = vadd.f32 %v13434_v15, %v20687_v3  ;;  %v16151_v53 = vadd.f32 %v13210_v58, %v20690_v34  ;;  %v13436_v13 = vpop.f32.mrb[75].mxu1 }
 0xc69   : > { %v13497_v50 = vpack.c.bf16 %v16150_v21, %v16148_v24  ;;  %v16183_v5 = vadd.f32 %v13436_v13, %v20693_v63 }
 0xc6a   : > { %v13499_v22 = vpack.c.bf16 %v16182_v49, %v16180_v20  ;;  %v13498_v52 = vpack.c.bf16 %v16151_v53, %v16149_v54 }
 0xc6b   : > { %v13500_v17 = vpack.c.bf16 %v16183_v5, %v16181_v9 }
 0xc6c   : > { %v13214_v29 = vpop.f32.mrb[76].mxu0  ;;  %13826 = vmatprep.mubr.bf16.mxu0 %v13498_v52 }
 0xc6d   : > { %v13440_v56 = vpop.f32.mrb[76].mxu1  ;;  %13923 = vmatprep.mubr.bf16.mxu1 %v13500_v17  ;;  %v13216_v60 = vpop.f32.mrb[77].mxu0  ;;  %13827 = vmatmul.mubr.bf16.gmra.mrb[104].mxu0 %v13497_v50  ;;  %v16152_v36 = vadd.f32 %v13214_v29, %v20684_v40 }
 0xc6e   : > { %v13442_v23 = vpop.f32.mrb[77].mxu1  ;;  %13924 = vmatmul.mubr.bf16.gmra.mrb[104].mxu1 %v13499_v22  ;;  %v13218_v14 = vpop.f32.mrb[78].mxu0  ;;  %v16184_v1 = vadd.f32 %v13440_v56, %v20687_v3  ;;  %v16153_v57 = vadd.f32 %v13216_v60, %v20690_v34 }
 0xc6f   : > { %v16154_v10 = vadd.f32 %v13218_v14, %v20684_v40  ;;  %v13444_v46 = vpop.f32.mrb[78].mxu1  ;;  %v13220_v7 = vpop.f32.mrb[79].mxu0  ;;  %v16185_v59 = vadd.f32 %v13442_v23, %v20693_v63 }
 0xc70   : > { %v16186_v47 = vadd.f32 %v13444_v46, %v20687_v3  ;;  %v16155_v38 = vadd.f32 %v13220_v7, %v20690_v34  ;;  %v13446_v2 = vpop.f32.mrb[79].mxu1 }
 0xc71   : > { %v13501_v62 = vpack.c.bf16 %v16154_v10, %v16152_v36  ;;  %v16187_v37 = vadd.f32 %v13446_v2, %v20693_v63 }
 0xc72   : > { %v13503_v11 = vpack.c.bf16 %v16186_v47, %v16184_v1  ;;  %v13502_v18 = vpack.c.bf16 %v16155_v38, %v16153_v57 }
 0xc73   : > { %v13504_v35 = vpack.c.bf16 %v16187_v37, %v16185_v59 }
 0xc74   : > { %v13224_v51 = vpop.f32.mrb[80].mxu0  ;;  %13834 = vmatprep.mubr.bf16.mxu0 %v13502_v18 }
 0xc75   : > { %v13450_v27 = vpop.f32.mrb[80].mxu1  ;;  %13931 = vmatprep.mubr.bf16.mxu1 %v13504_v35  ;;  %v13226_v4 = vpop.f32.mrb[81].mxu0  ;;  %13835 = vmatmul.mubr.bf16.gmra.mrb[108].mxu0 %v13501_v62  ;;  %v16156_v6 = vadd.f32 %v13224_v51, %v20684_v40 }
 0xc76   : > { %v13452_v41 = vpop.f32.mrb[81].mxu1  ;;  %13932 = vmatmul.mubr.bf16.gmra.mrb[108].mxu1 %v13503_v11  ;;  %v13228_v39 = vpop.f32.mrb[82].mxu0  ;;  %v16188_v48 = vadd.f32 %v13450_v27, %v20687_v3  ;;  %v16157_v30 = vadd.f32 %v13226_v4, %v20690_v34 }
 0xc77   : > { %v16158_v19 = vadd.f32 %v13228_v39, %v20684_v40  ;;  %v13454_v25 = vpop.f32.mrb[82].mxu1  ;;  %v13230_v55 = vpop.f32.mrb[83].mxu0  ;;  %v16189_v61 = vadd.f32 %v13452_v41, %v20693_v63 }
 0xc78   : > { %v16190_v28 = vadd.f32 %v13454_v25, %v20687_v3  ;;  %v16159_v45 = vadd.f32 %v13230_v55, %v20690_v34  ;;  %v13456_v43 = vpop.f32.mrb[83].mxu1 }
 0xc79   : > { %v13505_v32 = vpack.c.bf16 %v16158_v19, %v16156_v6  ;;  %v16191_v26 = vadd.f32 %v13456_v43, %v20693_v63 }
 0xc7a   : > { %v13507_v8 = vpack.c.bf16 %v16190_v28, %v16188_v48  ;;  %v13506_v42 = vpack.c.bf16 %v16159_v45, %v16157_v30 }
 0xc7b   : > { %v13508_v12 = vpack.c.bf16 %v16191_v26, %v16189_v61 }
 0xc7c   : > { %v13234_v44 = vpop.f32.mrb[84].mxu0  ;;  %13842 = vmatprep.mubr.bf16.mxu0 %v13506_v42 }
 0xc7d   : > { %v13460_v31 = vpop.f32.mrb[84].mxu1  ;;  %13939 = vmatprep.mubr.bf16.mxu1 %v13508_v12  ;;  %v13236_v33 = vpop.f32.mrb[85].mxu0  ;;  %13843 = vmatmul.mubr.bf16.gmra.mrb[112].mxu0 %v13505_v32  ;;  %v16160_v24 = vadd.f32 %v13234_v44, %v20684_v40 }
 0xc7e   : > { %v13462_v16 = vpop.f32.mrb[85].mxu1  ;;  %13940 = vmatmul.mubr.bf16.gmra.mrb[112].mxu1 %v13507_v8  ;;  %v13238_v0 = vpop.f32.mrb[86].mxu0  ;;  %v16192_v20 = vadd.f32 %v13460_v31, %v20687_v3  ;;  %v16161_v54 = vadd.f32 %v13236_v33, %v20690_v34  ;;  %v20759_v31 = vld [vmem:[#allocation6 + $0x23] ss:$0 sm:$0xff] }
 0xc7f   : > { %v16162_v21 = vadd.f32 %v13238_v0, %v20684_v40  ;;  %v13464_v15 = vpop.f32.mrb[86].mxu1  ;;  %v13240_v58 = vpop.f32.mrb[87].mxu0  ;;  %v16193_v9 = vadd.f32 %v13462_v16, %v20693_v63 }
 0xc80   : > { %v16194_v49 = vadd.f32 %v13464_v15, %v20687_v3  ;;  %v16163_v53 = vadd.f32 %v13240_v58, %v20690_v34  ;;  %v13466_v13 = vpop.f32.mrb[87].mxu1 }
 0xc81   : > { %v13509_v50 = vpack.c.bf16 %v16162_v21, %v16160_v24  ;;  %v16195_v5 = vadd.f32 %v13466_v13, %v20693_v63 }
 0xc82   : > { %v13511_v22 = vpack.c.bf16 %v16194_v49, %v16192_v20  ;;  %v13510_v52 = vpack.c.bf16 %v16163_v53, %v16161_v54 }
 0xc83   : > { %v13512_v17 = vpack.c.bf16 %v16195_v5, %v16193_v9 }
 0xc84   : > { %v13244_v29 = vpop.f32.mrb[88].mxu0  ;;  %13850 = vmatprep.mubr.bf16.mxu0 %v13510_v52 }
 0xc85   : > { %v13470_v56 = vpop.f32.mrb[88].mxu1  ;;  %13947 = vmatprep.mubr.bf16.mxu1 %v13512_v17  ;;  %v13246_v60 = vpop.f32.mrb[89].mxu0  ;;  %13851 = vmatmul.mubr.bf16.gmra.mrb[116].mxu0 %v13509_v50  ;;  %v16164_v36 = vadd.f32 %v13244_v29, %v20684_v40 }
 0xc86   : > { %v13472_v23 = vpop.f32.mrb[89].mxu1  ;;  %13948 = vmatmul.mubr.bf16.gmra.mrb[116].mxu1 %v13511_v22  ;;  %v13248_v14 = vpop.f32.mrb[90].mxu0  ;;  %v16196_v1 = vadd.f32 %v13470_v56, %v20687_v3  ;;  %v16165_v57 = vadd.f32 %v13246_v60, %v20690_v34 }
 0xc87   : > { %v16166_v10 = vadd.f32 %v13248_v14, %v20684_v40  ;;  %v13474_v46 = vpop.f32.mrb[90].mxu1  ;;  %v13250_v7 = vpop.f32.mrb[91].mxu0  ;;  %v16197_v59 = vadd.f32 %v13472_v23, %v20693_v63 }
 0xc88   : > { %v16198_v47 = vadd.f32 %v13474_v46, %v20687_v3  ;;  %v16167_v38 = vadd.f32 %v13250_v7, %v20690_v34  ;;  %v13476_v2 = vpop.f32.mrb[91].mxu1 }
 0xc89   : > { %v13513_v62 = vpack.c.bf16 %v16166_v10, %v16164_v36  ;;  %v16199_v37 = vadd.f32 %v13476_v2, %v20693_v63 }
 0xc8a   : > { %v13515_v11 = vpack.c.bf16 %v16198_v47, %v16196_v1  ;;  %v13514_v18 = vpack.c.bf16 %v16167_v38, %v16165_v57 }
 0xc8b   : > { %v13516_v35 = vpack.c.bf16 %v16199_v37, %v16197_v59 }
 0xc8c   : > { %v13254_v51 = vpop.f32.mrb[92].mxu0  ;;  %13858 = vmatprep.mubr.bf16.mxu0 %v13514_v18 }
 0xc8d   : > { %v13480_v27 = vpop.f32.mrb[92].mxu1  ;;  %13955 = vmatprep.mubr.bf16.mxu1 %v13516_v35  ;;  %v13256_v4 = vpop.f32.mrb[93].mxu0  ;;  %13859 = vmatmul.mubr.bf16.gmra.mrb[120].mxu0 %v13513_v62  ;;  %v16168_v6 = vadd.f32 %v13254_v51, %v20684_v40 }
 0xc8e   : > { %v13482_v41 = vpop.f32.mrb[93].mxu1  ;;  %13956 = vmatmul.mubr.bf16.gmra.mrb[120].mxu1 %v13515_v11  ;;  %v13258_v39 = vpop.f32.mrb[94].mxu0  ;;  %v16200_v48 = vadd.f32 %v13480_v27, %v20687_v3  ;;  %v16169_v30 = vadd.f32 %v13256_v4, %v20690_v34 }
 0xc8f   : > { %v16170_v19 = vadd.f32 %v13258_v39, %v20684_v40  ;;  %v13484_v25 = vpop.f32.mrb[94].mxu1  ;;  %v13260_v55 = vpop.f32.mrb[95].mxu0  ;;  %v16201_v61 = vadd.f32 %v13482_v41, %v20693_v63 }
 0xc90   : > { %v16202_v28 = vadd.f32 %v13484_v25, %v20687_v3  ;;  %v16171_v45 = vadd.f32 %v13260_v55, %v20690_v34  ;;  %v13486_v43 = vpop.f32.mrb[95].mxu1 }
 0xc91   : > { %v13517_v32 = vpack.c.bf16 %v16170_v19, %v16168_v6  ;;  %v16203_v26 = vadd.f32 %v13486_v43, %v20693_v63 }
 0xc92   : > { %v13519_v8 = vpack.c.bf16 %v16202_v28, %v16200_v48  ;;  %v13518_v42 = vpack.c.bf16 %v16171_v45, %v16169_v30 }
 0xc93   : > { %v13520_v12 = vpack.c.bf16 %v16203_v26, %v16201_v61 }
 0xc94   : > { %13866 = vmatprep.mubr.bf16.mxu0 %v13518_v42 }
 0xc95   : > { %13963 = vmatprep.mubr.bf16.mxu1 %v13520_v12  ;;  %13867 = vmatmul.mubr.bf16.gmra.mrb[124].mxu0 %v13517_v32 }
 0xc96   : > { %13964 = vmatmul.mubr.bf16.gmra.mrb[124].mxu1 %v13519_v8 }
 0xd30   : > { %v15452_v40 = vpop.f32.mrb[96].mxu0 }
 0xd31   : > { %v15516_v44 = vpop.f32.mrb[96].mxu1  ;;  %v15453_v3 = vpop.f32.mrb[97].mxu0 }
 0xd32   : > { %v15454_v34 = vadd.f32 %v15453_v3, %v15452_v40  ;;  %v15517_v33 = vpop.f32.mrb[97].mxu1  ;;  %v15455_v16 = vpop.f32.mrb[98].mxu0 }
 0xd33   : > { %v15518_v0 = vadd.f32 %v15517_v33, %v15516_v44  ;;  %v15519_v24 = vpop.f32.mrb[98].mxu1  ;;  %v15456_v21 = vpop.f32.mrb[99].mxu0 }
 0xd34   : > { %v13813_v63 = vadd.f32 %v15454_v34, %v20759_v31  ;;  %v15457_v15 = vadd.f32 %v15456_v21, %v15455_v16  ;;  %v15520_v58 = vpop.f32.mrb[99].mxu1 }
 0xd35   : > { %v15521_v20 = vadd.f32 %v15520_v58, %v15519_v24 }
 0xd36   : > { %v13910_v54 = vadd.f32 %v15518_v0, %v13813_v63  ;;  %v13816_v49 = vadd.f32 %v15457_v15, %v20759_v31 }
 0xd38   : > { %13972 = vst.msk [vmem:[%s20767_s9] sm:$0xff] %vm415_vm0, %v13910_v54  ;;  %v13913_v53 = vadd.f32 %v15521_v20, %v13816_v49  ;;  %v15458_v13 = vpop.f32.mrb[100].mxu0 }
 0xd39   : > { %v15522_v9 = vpop.f32.mrb[100].mxu1  ;;  %v15459_v50 = vpop.f32.mrb[101].mxu0 }
 0xd3a   : > { %13973 = vst.msk [vmem:[%s20767_s9 + $0x8] sm:$0xff] %vm415_vm0, %v13913_v53  ;;  %v15460_v5 = vadd.f32 %v15459_v50, %v15458_v13  ;;  %v15523_v22 = vpop.f32.mrb[101].mxu1  ;;  %v15461_v52 = vpop.f32.mrb[102].mxu0 }
 0xd3b   : > { %v15524_v17 = vadd.f32 %v15523_v22, %v15522_v9  ;;  %v15525_v29 = vpop.f32.mrb[102].mxu1  ;;  %v15462_v56 = vpop.f32.mrb[103].mxu0 }
 0xd3c   : > { %v13821_v60 = vadd.f32 %v15460_v5, %v20759_v31  ;;  %v15463_v23 = vadd.f32 %v15462_v56, %v15461_v52  ;;  %v15526_v14 = vpop.f32.mrb[103].mxu1 }
 0xd3d   : > { %v15527_v36 = vadd.f32 %v15526_v14, %v15525_v29 }
 0xd3e   : > { %v13918_v10 = vadd.f32 %v15524_v17, %v13821_v60  ;;  %v13824_v46 = vadd.f32 %v15463_v23, %v20759_v31 }
 0xd40   : > { %13974 = vst.msk [vmem:[%s20767_s9 + $0x10] sm:$0xff] %vm415_vm0, %v13918_v10  ;;  %v13921_v7 = vadd.f32 %v15527_v36, %v13824_v46  ;;  %v15464_v1 = vpop.f32.mrb[104].mxu0 }
 0xd41   : > { %v15528_v57 = vpop.f32.mrb[104].mxu1  ;;  %v15465_v47 = vpop.f32.mrb[105].mxu0 }
 0xd42   : > { %13975 = vst.msk [vmem:[%s20767_s9 + $0x18] sm:$0xff] %vm415_vm0, %v13921_v7  ;;  %v15466_v38 = vadd.f32 %v15465_v47, %v15464_v1  ;;  %v15529_v2 = vpop.f32.mrb[105].mxu1  ;;  %v15467_v59 = vpop.f32.mrb[106].mxu0 }
 0xd43   : > { %v15530_v62 = vadd.f32 %v15529_v2, %v15528_v57  ;;  %v15531_v37 = vpop.f32.mrb[106].mxu1  ;;  %v15468_v11 = vpop.f32.mrb[107].mxu0 }
 0xd44   : > { %v13829_v18 = vadd.f32 %v15466_v38, %v20759_v31  ;;  %v15469_v35 = vadd.f32 %v15468_v11, %v15467_v59  ;;  %v15532_v51 = vpop.f32.mrb[107].mxu1 }
 0xd45   : > { %v15533_v27 = vadd.f32 %v15532_v51, %v15531_v37 }
 0xd46   : > { %v13926_v4 = vadd.f32 %v15530_v62, %v13829_v18  ;;  %v13832_v41 = vadd.f32 %v15469_v35, %v20759_v31 }
 0xd48   : > { %13976 = vst.msk [vmem:[%s20767_s9 + $0x20] sm:$0xff] %vm415_vm0, %v13926_v4  ;;  %v13929_v39 = vadd.f32 %v15533_v27, %v13832_v41  ;;  %v15470_v6 = vpop.f32.mrb[108].mxu0 }
 0xd49   : > { %v15534_v19 = vpop.f32.mrb[108].mxu1  ;;  %v15471_v25 = vpop.f32.mrb[109].mxu0 }
 0xd4a   : > { %13977 = vst.msk [vmem:[%s20767_s9 + $0x28] sm:$0xff] %vm415_vm0, %v13929_v39  ;;  %v15472_v55 = vadd.f32 %v15471_v25, %v15470_v6  ;;  %v15535_v48 = vpop.f32.mrb[109].mxu1  ;;  %v15473_v30 = vpop.f32.mrb[110].mxu0 }
 0xd4b   : > { %v15536_v28 = vadd.f32 %v15535_v48, %v15534_v19  ;;  %v15537_v45 = vpop.f32.mrb[110].mxu1  ;;  %v15474_v43 = vpop.f32.mrb[111].mxu0 }
 0xd4c   : > { %v13837_v61 = vadd.f32 %v15472_v55, %v20759_v31  ;;  %v15475_v32 = vadd.f32 %v15474_v43, %v15473_v30  ;;  %v15538_v26 = vpop.f32.mrb[111].mxu1 }
 0xd4d   : > { %v15539_v8 = vadd.f32 %v15538_v26, %v15537_v45 }
 0xd4e   : > { %v13934_v42 = vadd.f32 %v15536_v28, %v13837_v61  ;;  %v13840_v12 = vadd.f32 %v15475_v32, %v20759_v31 }
 0xd50   : > { %13978 = vst.msk [vmem:[%s20767_s9 + $0x30] sm:$0xff] %vm415_vm0, %v13934_v42  ;;  %v13937_v40 = vadd.f32 %v15539_v8, %v13840_v12  ;;  %v15476_v44 = vpop.f32.mrb[112].mxu0 }
 0xd51   : > { %v15540_v3 = vpop.f32.mrb[112].mxu1  ;;  %v15477_v34 = vpop.f32.mrb[113].mxu0 }
 0xd52   : > { %13979 = vst.msk [vmem:[%s20767_s9 + $0x38] sm:$0xff] %vm415_vm0, %v13937_v40  ;;  %v15478_v33 = vadd.f32 %v15477_v34, %v15476_v44  ;;  %v15541_v16 = vpop.f32.mrb[113].mxu1  ;;  %v15479_v0 = vpop.f32.mrb[114].mxu0 }
 0xd53   : > { %v15542_v24 = vadd.f32 %v15541_v16, %v15540_v3  ;;  %v15543_v21 = vpop.f32.mrb[114].mxu1  ;;  %v15480_v63 = vpop.f32.mrb[115].mxu0 }
 0xd54   : > { %v13845_v15 = vadd.f32 %v15478_v33, %v20759_v31  ;;  %v15481_v58 = vadd.f32 %v15480_v63, %v15479_v0  ;;  %v15544_v20 = vpop.f32.mrb[115].mxu1 }
 0xd55   : > { %v15545_v54 = vadd.f32 %v15544_v20, %v15543_v21 }
 0xd56   : > { %v13942_v49 = vadd.f32 %v15542_v24, %v13845_v15  ;;  %v13848_v53 = vadd.f32 %v15481_v58, %v20759_v31 }
 0xd58   : > { %13980 = vst.msk [vmem:[%s20767_s9 + $0x40] sm:$0xff] %vm415_vm0, %v13942_v49  ;;  %v13945_v13 = vadd.f32 %v15545_v54, %v13848_v53  ;;  %v15482_v9 = vpop.f32.mrb[116].mxu0 }
 0xd59   : > { %v15546_v50 = vpop.f32.mrb[116].mxu1  ;;  %v15483_v5 = vpop.f32.mrb[117].mxu0 }
 0xd5a   : > { %13981 = vst.msk [vmem:[%s20767_s9 + $0x48] sm:$0xff] %vm415_vm0, %v13945_v13  ;;  %v15484_v22 = vadd.f32 %v15483_v5, %v15482_v9  ;;  %v15547_v52 = vpop.f32.mrb[117].mxu1  ;;  %v15485_v17 = vpop.f32.mrb[118].mxu0 }
 0xd5b   : > { %v15548_v29 = vadd.f32 %v15547_v52, %v15546_v50  ;;  %v15549_v56 = vpop.f32.mrb[118].mxu1  ;;  %v15486_v60 = vpop.f32.mrb[119].mxu0 }
 0xd5c   : > { %v13853_v23 = vadd.f32 %v15484_v22, %v20759_v31  ;;  %v15487_v14 = vadd.f32 %v15486_v60, %v15485_v17  ;;  %v15550_v36 = vpop.f32.mrb[119].mxu1 }
 0xd5d   : > { %v15551_v10 = vadd.f32 %v15550_v36, %v15549_v56 }
 0xd5e   : > { %v13950_v46 = vadd.f32 %v15548_v29, %v13853_v23  ;;  %v13856_v7 = vadd.f32 %v15487_v14, %v20759_v31 }
 0xd60   : > { %13982 = vst.msk [vmem:[%s20767_s9 + $0x50] sm:$0xff] %vm415_vm0, %v13950_v46  ;;  %v13953_v1 = vadd.f32 %v15551_v10, %v13856_v7  ;;  %v15488_v57 = vpop.f32.mrb[120].mxu0 }
 0xd61   : > { %v15552_v47 = vpop.f32.mrb[120].mxu1  ;;  %v15489_v38 = vpop.f32.mrb[121].mxu0 }
 0xd62   : > { %13983 = vst.msk [vmem:[%s20767_s9 + $0x58] sm:$0xff] %vm415_vm0, %v13953_v1  ;;  %v15490_v2 = vadd.f32 %v15489_v38, %v15488_v57  ;;  %v15553_v59 = vpop.f32.mrb[121].mxu1  ;;  %v15491_v62 = vpop.f32.mrb[122].mxu0 }
 0xd63   : > { %v15554_v37 = vadd.f32 %v15553_v59, %v15552_v47  ;;  %v15555_v11 = vpop.f32.mrb[122].mxu1  ;;  %v15492_v18 = vpop.f32.mrb[123].mxu0 }
 0xd64   : > { %v13861_v35 = vadd.f32 %v15490_v2, %v20759_v31  ;;  %v15493_v51 = vadd.f32 %v15492_v18, %v15491_v62  ;;  %v15556_v27 = vpop.f32.mrb[123].mxu1 }
 0xd65   : > { %v15557_v4 = vadd.f32 %v15556_v27, %v15555_v11 }
 0xd66   : > { %v13958_v41 = vadd.f32 %v15554_v37, %v13861_v35  ;;  %v13864_v39 = vadd.f32 %v15493_v51, %v20759_v31 }
 0xd68   : > { %13984 = vst.msk [vmem:[%s20767_s9 + $0x60] sm:$0xff] %vm415_vm0, %v13958_v41  ;;  %v13961_v6 = vadd.f32 %v15557_v4, %v13864_v39  ;;  %v15494_v19 = vpop.f32.mrb[124].mxu0 }
 0xd69   : > { %v15558_v25 = vpop.f32.mrb[124].mxu1  ;;  %v15495_v55 = vpop.f32.mrb[125].mxu0 }
 0xd6a   : > { %13985 = vst.msk [vmem:[%s20767_s9 + $0x68] sm:$0xff] %vm415_vm0, %v13961_v6  ;;  %v15496_v48 = vadd.f32 %v15495_v55, %v15494_v19  ;;  %v15559_v30 = vpop.f32.mrb[125].mxu1  ;;  %v15497_v28 = vpop.f32.mrb[126].mxu0 }
 0xd6b   : > { %v15560_v45 = vadd.f32 %v15559_v30, %v15558_v25  ;;  %v15561_v43 = vpop.f32.mrb[126].mxu1  ;;  %v15498_v61 = vpop.f32.mrb[127].mxu0 }
 0xd6c   : > { %v13869_v32 = vadd.f32 %v15496_v48, %v20759_v31  ;;  %v15499_v26 = vadd.f32 %v15498_v61, %v15497_v28  ;;  %v15562_v8 = vpop.f32.mrb[127].mxu1 }
 0xd6d   : > { %v15563_v42 = vadd.f32 %v15562_v8, %v15561_v43 }
 0xd6e   : > { %v13966_v12 = vadd.f32 %v15560_v45, %v13869_v32  ;;  %v13872_v40 = vadd.f32 %v15499_v26, %v20759_v31 }
 0xd70   : > { %13986 = vst.msk [vmem:[%s20767_s9 + $0x70] sm:$0xff] %vm415_vm0, %v13966_v12  ;;  %v13969_v44 = vadd.f32 %v15563_v42, %v13872_v40 }
 0xd72   : > { %13987 = vst.msk [vmem:[%s20767_s9 + $0x78] sm:$0xff] %vm415_vm0, %v13969_v44 }
 0xd73 PF: > { %s17_s18 = sadd.s32 1, %s18962_s18  }
 0xd74   : > { %p14_p2 = scmp.ge.s32.totalorder %s17_s18, 4  }
 0xd76   :  { %16 = sbr.rel (!%p14_p2) target bundleno = 2 (0x2), region = 102 }
 0xd7d   :  { %14010 = vsyncpa [#allocation3], 1 }
 0xd7e   :  { %14012 = vsyncpa [#allocation3 + $0x1], 1 }
 0xd7f   :  { %14013 = vsyncpa [#allocation5], 1 }

</bundles_post_ra>
